<compile_context>
chip_gen: v7x
topology: tpu7x:2x2x1
jax: 0.10.0
libtpu: 0.0.40
codegen_flags: <defaults>
</compile_context>

<pallas_src>
import jax
import jax.numpy as jnp
from jax import lax
from jax.experimental import pallas as pl
from jax.experimental.pallas import tpu as pltpu


def _round_up(x, m):
    return (x + m - 1) // m * m


_VMEM_LIMIT = 40 * 1024 * 1024


# ----------------------------------------------------------------------------
# Block 1: Conv2d(1->C, k=2, s=1, p=1)*BNscale + MaxPool(4) + bias + ReLU
#          cin = 1, so the conv is shifted VPU FMAs on 4 column-phase planes.
# ----------------------------------------------------------------------------
def _block1_kernel(x_ref, w_ref, b_ref, o_ref):
    """x_ref : (1, 4, H_pad, Wp+1)  column-phase planes of the padded input:
                                    x_ref[0, o, r, p] = x_pad[r, 4*p + o]
       w_ref : (C, 4)               BN-scaled conv taps, tap t = di*2 + dj
       b_ref : (C, 1)               folded BN/conv bias
       o_ref : (1, Hp, C, Wp)       pooled output, pooled-W in lanes
    """
    hp = o_ref.shape[1]
    cout = o_ref.shape[2]
    wp = o_ref.shape[3]

    # Per-channel constants hoisted once (5 x (C, Wp) ~ 20 vregs total).
    wb = [jnp.broadcast_to(w_ref[:, t:t + 1], (cout, wp)) for t in range(4)]
    bias = jnp.broadcast_to(b_ref[...], (cout, wp))

    def row_body(pr, carry):
        r0 = pr * 4
        acc = None
        for q in range(4):                    # conv rows in the pool window
            for o in range(4):                # conv cols in the pool window
                conv = None
                for di in range(2):
                    row = r0 + q + di
                    for dj in range(2):
                        src = o + dj
                        plane = src % 4       # which column phase
                        shift = src // 4      # carry into the next group
                        v = x_ref[0, plane, pl.ds(row, 1), pl.ds(shift, wp)]
                        term = wb[di * 2 + dj] * v            # (C, Wp)
                        conv = term if conv is None else conv + term
                acc = conv if acc is None else jnp.maximum(acc, conv)
        # bias + ReLU commute exactly with the max-pool above.
        y = jnp.maximum(acc + bias, 0.0)
        o_ref[0, pl.ds(pr, 1)] = y[None].astype(o_ref.dtype)
        return carry

    lax.fori_loop(0, hp, row_body, 0)


def conv_block1(x_plane, w_taps, bias):
    """x_plane: (N, H, W) single-channel input.
       w_taps : (C, 4) BN-scaled conv taps; bias: (C, 1).
       Returns (N, Hp, C, Wp) pooled activations (channel-major layout)."""
    n, h, w_in = x_plane.shape
    cout = w_taps.shape[0]
    hp = (h + 1) // 4
    wp = (w_in + 1) // 4
    h_pad = h + 2
    w_flat = 4 * (wp + 1)
    # Zero pad (conv padding + phase alignment) and split W into 4 phases.
    x_pad = jnp.pad(x_plane, ((0, 0), (1, 1), (1, w_flat - w_in - 1)))
    x_d = x_pad.reshape(n, h_pad, wp + 1, 4).transpose(0, 3, 1, 2)

    return pl.pallas_call(
        _block1_kernel,
        out_shape=jax.ShapeDtypeStruct((n, hp, cout, wp), jnp.float32),
        grid_spec=pltpu.PrefetchScalarGridSpec(
            num_scalar_prefetch=0,
            grid=(n,),
            in_specs=[
                pl.BlockSpec((1, 4, h_pad, wp + 1), lambda i: (i, 0, 0, 0)),
                pl.BlockSpec((cout, 4), lambda i: (0, 0)),
                pl.BlockSpec((cout, 1), lambda i: (0, 0)),
            ],
            out_specs=pl.BlockSpec((1, hp, cout, wp), lambda i: (i, 0, 0, 0)),
        ),
        compiler_params=pltpu.CompilerParams(
            dimension_semantics=("parallel",),
            vmem_limit_bytes=_VMEM_LIMIT),
    )(x_d, w_taps, bias)


# ----------------------------------------------------------------------------
# Block 2: Conv2d(k=2, p=1)*BNscale (4 K=cin MXU matmuls) + MaxPool(4)
#          + bias + ReLU.  NHWC in / NHWC out (alignment-padded pooled width).
# ----------------------------------------------------------------------------
def _conv_pool_kernel(x_ref, wk_ref, b_ref, o_ref):
    """x_ref : (1, H_pad, Wc+1, Cin)   zero-padded NHWC input
       wk_ref: (4, Cin, Cout)          BN-scaled taps, tap t = di*2 + dj
       b_ref : (1, Cout)               folded bias
       o_ref : (1, Hp, Wo, Cout)       Wo = Wc//4 pooled cols (last one may be
                                       alignment padding, dropped by caller)
    """
    hp = o_ref.shape[1]
    wo = o_ref.shape[2]
    cout = o_ref.shape[3]
    cin = x_ref.shape[3]
    wc = wo * 4

    wk = [wk_ref[t] for t in range(4)]
    bias = b_ref[...]

    def row_body(pr, carry):
        r0 = pr * 4
        acc = None
        for di in range(2):
            for dj in range(2):
                slab = x_ref[0, pl.ds(r0 + di, 4), pl.ds(dj, wc), :]
                part = jnp.dot(slab.reshape(4 * wc, cin), wk[di * 2 + dj],
                               preferred_element_type=jnp.float32)
                acc = part if acc is None else acc + part
        p = jnp.max(acc.reshape(4, wc, cout), axis=0)        # pool rows
        p = jnp.max(p.reshape(wo, 4, cout), axis=1)          # pool cols
        y = jnp.maximum(p + bias, 0.0)
        o_ref[0, pl.ds(pr, 1)] = y[None].astype(o_ref.dtype)
        return carry

    lax.fori_loop(0, hp, row_body, 0)


def conv_block2(x_nhwc, wk, bias):
    """x_nhwc: (N, H, W, Cin); wk: (4, Cin, Cout) BN-scaled; bias: (1, Cout).
       Returns (N, Hp, Wp, Cout) pooled NHWC activations."""
    n, h, w_in, cin = x_nhwc.shape
    cout = wk.shape[-1]
    hp = (h + 1) // 4
    wp = (w_in + 1) // 4
    wc = _round_up(w_in + 1, 8)          # conv columns computed per row
    wo = wc // 4
    h_pad = h + 2
    xp = jnp.pad(x_nhwc, ((0, 0), (1, 1), (1, wc - w_in), (0, 0)))

    out = pl.pallas_call(
        _conv_pool_kernel,
        out_shape=jax.ShapeDtypeStruct((n, hp, wo, cout), jnp.float32),
        grid_spec=pltpu.PrefetchScalarGridSpec(
            num_scalar_prefetch=0,
            grid=(n,),
            in_specs=[
                pl.BlockSpec((1, h_pad, wc + 1, cin), lambda i: (i, 0, 0, 0)),
                pl.BlockSpec((4, cin, cout), lambda i: (0, 0, 0)),
                pl.BlockSpec((1, cout), lambda i: (0, 0)),
            ],
            out_specs=pl.BlockSpec((1, hp, wo, cout), lambda i: (i, 0, 0, 0)),
        ),
        compiler_params=pltpu.CompilerParams(
            dimension_semantics=("parallel",),
            vmem_limit_bytes=_VMEM_LIMIT),
    )(xp, wk, bias)
    return out[:, :, :wp, :]             # drop alignment-pad pooled column(s)


# ----------------------------------------------------------------------------
# Block 3 + classifier: conv/pool like block2, then the Linear layer fused in
# via a mask-and-matmul contraction (no in-kernel flatten).
# ----------------------------------------------------------------------------
def _conv_pool_fc_kernel(x_ref, wk_ref, b_ref, wf_ref, d_ref, s_ref, fb_ref,
                         o_ref):
    """x_ref : (1, H_pad, Wc+1, Cin)
       wk_ref: (4, Cin, Cout)        BN-scaled conv taps
       b_ref : (1, Cout)             folded bias
       wf_ref: (Hp, Cout, Wo*Nout)   fc weight, wf[r, c, p*Nout + j]
       d_ref : (Wo, Wo*Nout)         mask selecting p == p' (and p < real Wp)
       s_ref : (Wo*Nout, Nout)       column regroup matrix (k % Nout == j)
       fb_ref: (1, Nout)             fc bias
       o_ref : (1, 1, Nout)          logits
    """
    cin = x_ref.shape[3]
    cout = wk_ref.shape[2]
    hp = wf_ref.shape[0]
    wo = d_ref.shape[0]
    wc = wo * 4

    wk = [wk_ref[t] for t in range(4)]
    bias = b_ref[...]
    t_acc = jnp.zeros((wo, d_ref.shape[1]), jnp.float32)

    for pr in range(hp):                 # hp == 2: tiny static unroll
        r0 = 4 * pr
        acc = None
        for di in range(2):
            for dj in range(2):
                slab = x_ref[0, r0 + di:r0 + di + 4, dj:dj + wc, :]
                part = jnp.dot(slab.reshape(4 * wc, cin), wk[di * 2 + dj],
                               preferred_element_type=jnp.float32)
                acc = part if acc is None else acc + part
        p = jnp.max(acc.reshape(4, wc, cout), axis=0)
        p = jnp.max(p.reshape(wo, 4, cout), axis=1)          # (Wo, Cout)
        p = jnp.maximum(p + bias, 0.0)
        t_acc = t_acc + jnp.dot(p, wf_ref[pr],
                                preferred_element_type=jnp.float32)

    # logits_j = sum_{p < Wp} T[p, p*Nout + j] + fc_b[j]
    u = jnp.sum(t_acc * d_ref[...], axis=0, keepdims=True)   # (1, Wo*Nout)
    logits = jnp.dot(u, s_ref[...], preferred_element_type=jnp.float32)
    o_ref[0] = (logits + fb_ref[...]).astype(o_ref.dtype)


def conv_block3_fc(x_nhwc, wk, bias, wf, fc_b):
    """x_nhwc: (N, H, W, Cin); wk: (4, Cin, Cout); bias: (1, Cout);
       wf: (Hp, Cout, Wp*Nout) pre-permuted fc weight; fc_b: (1, Nout).
       Returns (N, Nout) logits."""
    n, h, w_in, cin = x_nhwc.shape
    cout = wk.shape[-1]
    nout = fc_b.shape[-1]
    hp = (h + 1) // 4
    wp = (w_in + 1) // 4
    wc = _round_up(w_in + 1, 8)
    wo = wc // 4
    h_pad = h + 2
    assert wf.shape == (hp, cout, wp * nout), (wf.shape, hp, cout, wp, nout)

    xp = jnp.pad(x_nhwc, ((0, 0), (1, 1), (1, wc - w_in), (0, 0)))
    wf_pad = jnp.pad(wf, ((0, 0), (0, 0), (0, (wo - wp) * nout)))

    # Constant selection matrices (constant-folded at compile time).
    k = jnp.arange(wo * nout)
    p_idx = jnp.arange(wo)[:, None]
    d_mask = ((k[None, :] // nout == p_idx) & (p_idx < wp)).astype(jnp.float32)
    s_mat = (k[:, None] % nout == jnp.arange(nout)[None, :]).astype(jnp.float32)

    out = pl.pallas_call(
        _conv_pool_fc_kernel,
        out_shape=jax.ShapeDtypeStruct((n, 1, nout), jnp.float32),
        grid_spec=pltpu.PrefetchScalarGridSpec(
            num_scalar_prefetch=0,
            grid=(n,),
            in_specs=[
                pl.BlockSpec((1, h_pad, wc + 1, cin), lambda i: (i, 0, 0, 0)),
                pl.BlockSpec((4, cin, cout), lambda i: (0, 0, 0)),
                pl.BlockSpec((1, cout), lambda i: (0, 0)),
                pl.BlockSpec((hp, cout, wo * nout), lambda i: (0, 0, 0)),
                pl.BlockSpec((wo, wo * nout), lambda i: (0, 0)),
                pl.BlockSpec((wo * nout, nout), lambda i: (0, 0)),
                pl.BlockSpec((1, nout), lambda i: (0, 0)),
            ],
            out_specs=pl.BlockSpec((1, 1, nout), lambda i: (i, 0, 0)),
        ),
        compiler_params=pltpu.CompilerParams(
            dimension_semantics=("parallel",),
            vmem_limit_bytes=_VMEM_LIMIT),
    )(xp, wk, bias, wf_pad, d_mask, s_mat, fc_b)
    return out[:, 0, :]


# ----------------------------------------------------------------------------
# Parameter prep (once, outside the jitted forward): fold BN, permute fc_w.
# ----------------------------------------------------------------------------
def _fold_bn(w, b, gamma, beta, mean, var, eps=1e-5):
    scale = gamma / jnp.sqrt(var + eps)
    cin, cout = w.shape[2], w.shape[3]
    wk = (w.reshape(4, cin, cout) * scale[None, None, :]).astype(jnp.float32)
    bias = (beta + scale * (b - mean)).astype(jnp.float32)
    return wk, bias


def prepare_params(params, eps=1e-5):
    out = {}
    wk1, b1 = _fold_bn(params["block1"]["w"], params["block1"]["b"],
                       params["block1"]["gamma"], params["block1"]["beta"],
                       params["block1"]["mean"], params["block1"]["var"], eps)
    out["block1"] = dict(w=wk1[:, 0, :].T, b=b1[:, None])        # (C,4), (C,1)
    wk2, b2 = _fold_bn(params["block2"]["w"], params["block2"]["b"],
                       params["block2"]["gamma"], params["block2"]["beta"],
                       params["block2"]["mean"], params["block2"]["var"], eps)
    out["block2"] = dict(w=wk2, b=b2[None, :])
    wk3, b3 = _fold_bn(params["block3"]["w"], params["block3"]["b"],
                       params["block3"]["gamma"], params["block3"]["beta"],
                       params["block3"]["mean"], params["block3"]["var"], eps)
    out["block3"] = dict(w=wk3, b=b3[None, :])
    # Classifier: PyTorch flattens NCHW (C, Hp=2, Wp=15); permute to
    # (Hp, C, Wp) and fold Wp into the class axis for the in-kernel FC.
    c3 = wk3.shape[-1]
    hp_t, wp_t = 2, 15                    # fixed by the module's classifier
    nout = params["fc_b"].shape[0]
    wf = params["fc_w"].reshape(c3, hp_t, wp_t, nout)
    wf = jnp.transpose(wf, (1, 0, 2, 3)).reshape(hp_t, c3, wp_t * nout)
    out["fc"] = dict(wf=wf.astype(jnp.float32),
                     b=params["fc_b"].reshape(1, nout).astype(jnp.float32))
    return out


# ----------------------------------------------------------------------------
# Full model
# ----------------------------------------------------------------------------
def init_params(key, input_shape=1, hidden_units=16, output_shape=10):
    ks = jax.random.split(key, 8)

    def conv_params(k, cin, cout):
        k1, k2, k3, k4, k5, k6 = jax.random.split(k, 6)
        fan_in = cin * 4
        return dict(
            w=jax.random.normal(k1, (2, 2, cin, cout), jnp.float32)
              / jnp.sqrt(float(fan_in)),
            b=0.05 * jax.random.normal(k2, (cout,), jnp.float32),
            gamma=1.0 + 0.1 * jax.random.normal(k3, (cout,), jnp.float32),
            beta=0.05 * jax.random.normal(k4, (cout,), jnp.float32),
            mean=0.05 * jax.random.normal(k5, (cout,), jnp.float32),
            var=1.0 + 0.2 * jax.random.uniform(k6, (cout,), jnp.float32),
        )

    feat = hidden_units * 4 * 2 * 15
    return {
        "block1": conv_params(ks[0], input_shape, hidden_units),
        "block2": conv_params(ks[1], hidden_units, hidden_units * 2),
        "block3": conv_params(ks[2], hidden_units * 2, hidden_units * 4),
        "fc_w": jax.random.normal(ks[3], (feat, output_shape), jnp.float32)
                / jnp.sqrt(float(feat)),
        "fc_b": 0.05 * jax.random.normal(ks[4], (output_shape,), jnp.float32),
    }


@jax.jit
def audio_cnn_forward(prepped, x_nchw):
    p1, p2, p3 = prepped["block1"], prepped["block2"], prepped["block3"]
    y1 = conv_block1(x_nchw[:, 0, :, :], p1["w"], p1["b"])   # (N, Hp, C, Wp)
    x2 = jnp.transpose(y1, (0, 1, 3, 2))                     # NHWC for block2
    x3 = conv_block2(x2, p2["w"], p2["b"])                   # (N, 7, 59, 32)
    return conv_block3_fc(x3, p3["w"], p3["b"],
                          prepped["fc"]["wf"], prepped["fc"]["b"])


def reference_forward(params, x_nchw, eps=1e-5):
    """Pure-JAX reference for correctness checking (eval-mode BN)."""
    x = jnp.transpose(x_nchw, (0, 2, 3, 1))
    for name in ("block1", "block2", "block3"):
        bp = params[name]
        y = jax.lax.conv_general_dilated(
            x, bp["w"], window_strides=(1, 1), padding=((1, 1), (1, 1)),
            dimension_numbers=("NHWC", "HWIO", "NHWC"))
        y = y + bp["b"]
        scale = bp["gamma"] / jnp.sqrt(bp["var"] + eps)
        y = (y - bp["mean"]) * scale + bp["beta"]
        y = jnp.maximum(y, 0.0)
        hc, wc = (y.shape[1] // 4) * 4, (y.shape[2] // 4) * 4
        y = y[:, :hc, :wc, :]
        x = jax.lax.reduce_window(y, -jnp.inf, jax.lax.max,
                                  (1, 4, 4, 1), (1, 4, 4, 1), "VALID")
    x = jnp.transpose(x, (0, 3, 1, 2)).reshape(x.shape[0], -1)
    return x @ params["fc_w"] + params["fc_b"]


if __name__ == "__main__":
    key = jax.random.PRNGKey(0)
    pkey, xkey = jax.random.split(key)
    params = init_params(pkey)
    prepped = prepare_params(params)

    # Smallest NCHW input whose forward yields the 2x15 spatial map that the
    # classifier (hidden_units*4 * 2 * 15 = 1920 features) requires.
    x = jax.random.normal(xkey, (2, 1, 107, 939), jnp.float32)

    out = jax.block_until_ready(audio_cnn_forward(prepped, x))
    assert out.shape == (2, 10), out.shape

    ref = reference_forward(params, x)
    if not jnp.allclose(out, ref, rtol=1e-2, atol=1e-3):
        raise AssertionError(
            f"mismatch vs reference: max abs err "
            f"{float(jnp.max(jnp.abs(out - ref)))}")

    print("KERNEL_OK")
</pallas_src>

<mosaic_0001>
module attributes {stable_mosaic.version = 11 : i64} {
  func.func @_block1_kernel(%arg0: i32, %arg1: memref<1x4x109x236xf32, #tpu.memory_space<vmem>>, %arg2: memref<16x4xf32, #tpu.memory_space<vmem>>, %arg3: memref<16x1xf32, #tpu.memory_space<vmem>>, %arg4: memref<1x27x16x235xf32, #tpu.memory_space<vmem>>) attributes {dimension_semantics = [#tpu.dimension_semantics<parallel>], iteration_bounds = array<i64: 2>, scalar_prefetch = 0 : i64, scratch_operands = 0 : i64, tpu.core_type = #tpu.core_type<tc>, window_params = [{transform_indices = @transform_0, window_bounds = array<i64: 1, 4, 109, 236>}, {pipeline_mode = #tpu.pipeline_mode<synchronous>, transform_indices = @transform_1, window_bounds = array<i64: 16, 4>}, {pipeline_mode = #tpu.pipeline_mode<synchronous>, transform_indices = @transform_2, window_bounds = array<i64: 16, 1>}, {transform_indices = @transform_3, window_bounds = array<i64: 1, 27, 16, 235>}]} {
    %c0 = arith.constant 0 : index
    %c0_0 = arith.constant 0 : index
    %0 = vector.load %arg2[%c0, %c0_0] : memref<16x4xf32, #tpu.memory_space<vmem>>, vector<16x1xf32>
    %1 = vector.shape_cast %0 : vector<16x1xf32> to vector<16x1xf32>
    %2 = vector.broadcast %1 : vector<16x1xf32> to vector<16x235xf32>
    %c0_1 = arith.constant 0 : index
    %c1 = arith.constant 1 : index
    %3 = vector.load %arg2[%c0_1, %c1] : memref<16x4xf32, #tpu.memory_space<vmem>>, vector<16x1xf32>
    %4 = vector.shape_cast %3 : vector<16x1xf32> to vector<16x1xf32>
    %5 = vector.broadcast %4 : vector<16x1xf32> to vector<16x235xf32>
    %c0_2 = arith.constant 0 : index
    %c2 = arith.constant 2 : index
    %6 = vector.load %arg2[%c0_2, %c2] : memref<16x4xf32, #tpu.memory_space<vmem>>, vector<16x1xf32>
    %7 = vector.shape_cast %6 : vector<16x1xf32> to vector<16x1xf32>
    %8 = vector.broadcast %7 : vector<16x1xf32> to vector<16x235xf32>
    %c0_3 = arith.constant 0 : index
    %c3 = arith.constant 3 : index
    %9 = vector.load %arg2[%c0_3, %c3] : memref<16x4xf32, #tpu.memory_space<vmem>>, vector<16x1xf32>
    %10 = vector.shape_cast %9 : vector<16x1xf32> to vector<16x1xf32>
    %11 = vector.broadcast %10 : vector<16x1xf32> to vector<16x235xf32>
    %c0_4 = arith.constant 0 : index
    %c0_5 = arith.constant 0 : index
    %12 = vector.load %arg3[%c0_4, %c0_5] : memref<16x1xf32, #tpu.memory_space<vmem>>, vector<16x1xf32>
    %13 = vector.shape_cast %12 : vector<16x1xf32> to vector<16x1xf32>
    %14 = vector.broadcast %13 : vector<16x1xf32> to vector<16x235xf32>
    %c0_i32 = arith.constant 0 : i32
    %c27_i32 = arith.constant 27 : i32
    %15 = arith.addi %c0_i32, %c27_i32 : i32
    %c1_i32 = arith.constant 1 : i32
    scf.for %arg5 = %c0_i32 to %15 step %c1_i32  : i32 {
      %c4_i32 = arith.constant 4 : i32
      %16 = arith.muli %arg5, %c4_i32 : i32
      %c0_i32_7 = arith.constant 0 : i32
      %17 = arith.addi %16, %c0_i32_7 : i32
      %c0_i32_8 = arith.constant 0 : i32
      %18 = arith.addi %17, %c0_i32_8 : i32
      %c0_9 = arith.constant 0 : index
      %c0_10 = arith.constant 0 : index
      %19 = arith.index_cast %18 : i32 to index
      %c0_11 = arith.constant 0 : index
      %20 = vector.load %arg1[%c0_9, %c0_10, %19, %c0_11] : memref<1x4x109x236xf32, #tpu.memory_space<vmem>>, vector<1x1x1x235xf32>
      %21 = vector.shape_cast %20 : vector<1x1x1x235xf32> to vector<1x235xf32>
      %22 = vector.broadcast %21 : vector<1x235xf32> to vector<16x235xf32>
      %23 = arith.mulf %2, %22 : vector<16x235xf32>
      %c0_12 = arith.constant 0 : index
      %c1_13 = arith.constant 1 : index
      %24 = arith.index_cast %18 : i32 to index
      %c0_14 = arith.constant 0 : index
      %25 = vector.load %arg1[%c0_12, %c1_13, %24, %c0_14] : memref<1x4x109x236xf32, #tpu.memory_space<vmem>>, vector<1x1x1x235xf32>
      %26 = vector.shape_cast %25 : vector<1x1x1x235xf32> to vector<1x235xf32>
      %27 = vector.broadcast %26 : vector<1x235xf32> to vector<16x235xf32>
      %28 = arith.mulf %5, %27 : vector<16x235xf32>
      %29 = arith.addf %23, %28 : vector<16x235xf32>
      %c0_i32_15 = arith.constant 0 : i32
      %30 = arith.addi %16, %c0_i32_15 : i32
      %c1_i32_16 = arith.constant 1 : i32
      %31 = arith.addi %30, %c1_i32_16 : i32
      %c0_17 = arith.constant 0 : index
      %c0_18 = arith.constant 0 : index
      %32 = arith.index_cast %31 : i32 to index
      %c0_19 = arith.constant 0 : index
      %33 = vector.load %arg1[%c0_17, %c0_18, %32, %c0_19] : memref<1x4x109x236xf32, #tpu.memory_space<vmem>>, vector<1x1x1x235xf32>
      %34 = vector.shape_cast %33 : vector<1x1x1x235xf32> to vector<1x235xf32>
      %35 = vector.broadcast %34 : vector<1x235xf32> to vector<16x235xf32>
      %36 = arith.mulf %8, %35 : vector<16x235xf32>
      %37 = arith.addf %29, %36 : vector<16x235xf32>
      %c0_20 = arith.constant 0 : index
      %c1_21 = arith.constant 1 : index
      %38 = arith.index_cast %31 : i32 to index
      %c0_22 = arith.constant 0 : index
      %39 = vector.load %arg1[%c0_20, %c1_21, %38, %c0_22] : memref<1x4x109x236xf32, #tpu.memory_space<vmem>>, vector<1x1x1x235xf32>
      %40 = vector.shape_cast %39 : vector<1x1x1x235xf32> to vector<1x235xf32>
      %41 = vector.broadcast %40 : vector<1x235xf32> to vector<16x235xf32>
      %42 = arith.mulf %11, %41 : vector<16x235xf32>
      %43 = arith.addf %37, %42 : vector<16x235xf32>
      %c0_i32_23 = arith.constant 0 : i32
      %44 = arith.addi %16, %c0_i32_23 : i32
      %c0_i32_24 = arith.constant 0 : i32
      %45 = arith.addi %44, %c0_i32_24 : i32
      %c0_25 = arith.constant 0 : index
      %c1_26 = arith.constant 1 : index
      %46 = arith.index_cast %45 : i32 to index
      %c0_27 = arith.constant 0 : index
      %47 = vector.load %arg1[%c0_25, %c1_26, %46, %c0_27] : memref<1x4x109x236xf32, #tpu.memory_space<vmem>>, vector<1x1x1x235xf32>
      %48 = vector.shape_cast %47 : vector<1x1x1x235xf32> to vector<1x235xf32>
      %49 = vector.broadcast %48 : vector<1x235xf32> to vector<16x235xf32>
      %50 = arith.mulf %2, %49 : vector<16x235xf32>
      %c0_28 = arith.constant 0 : index
      %c2_29 = arith.constant 2 : index
      %51 = arith.index_cast %45 : i32 to index
      %c0_30 = arith.constant 0 : index
      %52 = vector.load %arg1[%c0_28, %c2_29, %51, %c0_30] : memref<1x4x109x236xf32, #tpu.memory_space<vmem>>, vector<1x1x1x235xf32>
      %53 = vector.shape_cast %52 : vector<1x1x1x235xf32> to vector<1x235xf32>
      %54 = vector.broadcast %53 : vector<1x235xf32> to vector<16x235xf32>
      %55 = arith.mulf %5, %54 : vector<16x235xf32>
      %56 = arith.addf %50, %55 : vector<16x235xf32>
      %c0_i32_31 = arith.constant 0 : i32
      %57 = arith.addi %16, %c0_i32_31 : i32
      %c1_i32_32 = arith.constant 1 : i32
      %58 = arith.addi %57, %c1_i32_32 : i32
      %c0_33 = arith.constant 0 : index
      %c1_34 = arith.constant 1 : index
      %59 = arith.index_cast %58 : i32 to index
      %c0_35 = arith.constant 0 : index
      %60 = vector.load %arg1[%c0_33, %c1_34, %59, %c0_35] : memref<1x4x109x236xf32, #tpu.memory_space<vmem>>, vector<1x1x1x235xf32>
      %61 = vector.shape_cast %60 : vector<1x1x1x235xf32> to vector<1x235xf32>
      %62 = vector.broadcast %61 : vector<1x235xf32> to vector<16x235xf32>
      %63 = arith.mulf %8, %62 : vector<16x235xf32>
      %64 = arith.addf %56, %63 : vector<16x235xf32>
      %c0_36 = arith.constant 0 : index
      %c2_37 = arith.constant 2 : index
      %65 = arith.index_cast %58 : i32 to index
      %c0_38 = arith.constant 0 : index
      %66 = vector.load %arg1[%c0_36, %c2_37, %65, %c0_38] : memref<1x4x109x236xf32, #tpu.memory_space<vmem>>, vector<1x1x1x235xf32>
      %67 = vector.shape_cast %66 : vector<1x1x1x235xf32> to vector<1x235xf32>
      %68 = vector.broadcast %67 : vector<1x235xf32> to vector<16x235xf32>
      %69 = arith.mulf %11, %68 : vector<16x235xf32>
      %70 = arith.addf %64, %69 : vector<16x235xf32>
      %71 = arith.maximumf %43, %70 : vector<16x235xf32>
      %c0_i32_39 = arith.constant 0 : i32
      %72 = arith.addi %16, %c0_i32_39 : i32
      %c0_i32_40 = arith.constant 0 : i32
      %73 = arith.addi %72, %c0_i32_40 : i32
      %c0_41 = arith.constant 0 : index
      %c2_42 = arith.constant 2 : index
      %74 = arith.index_cast %73 : i32 to index
      %c0_43 = arith.constant 0 : index
      %75 = vector.load %arg1[%c0_41, %c2_42, %74, %c0_43] : memref<1x4x109x236xf32, #tpu.memory_space<vmem>>, vector<1x1x1x235xf32>
      %76 = vector.shape_cast %75 : vector<1x1x1x235xf32> to vector<1x235xf32>
      %77 = vector.broadcast %76 : vector<1x235xf32> to vector<16x235xf32>
      %78 = arith.mulf %2, %77 : vector<16x235xf32>
      %c0_44 = arith.constant 0 : index
      %c3_45 = arith.constant 3 : index
      %79 = arith.index_cast %73 : i32 to index
      %c0_46 = arith.constant 0 : index
      %80 = vector.load %arg1[%c0_44, %c3_45, %79, %c0_46] : memref<1x4x109x236xf32, #tpu.memory_space<vmem>>, vector<1x1x1x235xf32>
      %81 = vector.shape_cast %80 : vector<1x1x1x235xf32> to vector<1x235xf32>
      %82 = vector.broadcast %81 : vector<1x235xf32> to vector<16x235xf32>
      %83 = arith.mulf %5, %82 : vector<16x235xf32>
      %84 = arith.addf %78, %83 : vector<16x235xf32>
      %c0_i32_47 = arith.constant 0 : i32
      %85 = arith.addi %16, %c0_i32_47 : i32
      %c1_i32_48 = arith.constant 1 : i32
      %86 = arith.addi %85, %c1_i32_48 : i32
      %c0_49 = arith.constant 0 : index
      %c2_50 = arith.constant 2 : index
      %87 = arith.index_cast %86 : i32 to index
      %c0_51 = arith.constant 0 : index
      %88 = vector.load %arg1[%c0_49, %c2_50, %87, %c0_51] : memref<1x4x109x236xf32, #tpu.memory_space<vmem>>, vector<1x1x1x235xf32>
      %89 = vector.shape_cast %88 : vector<1x1x1x235xf32> to vector<1x235xf32>
      %90 = vector.broadcast %89 : vector<1x235xf32> to vector<16x235xf32>
      %91 = arith.mulf %8, %90 : vector<16x235xf32>
      %92 = arith.addf %84, %91 : vector<16x235xf32>
      %c0_52 = arith.constant 0 : index
      %c3_53 = arith.constant 3 : index
      %93 = arith.index_cast %86 : i32 to index
      %c0_54 = arith.constant 0 : index
      %94 = vector.load %arg1[%c0_52, %c3_53, %93, %c0_54] : memref<1x4x109x236xf32, #tpu.memory_space<vmem>>, vector<1x1x1x235xf32>
      %95 = vector.shape_cast %94 : vector<1x1x1x235xf32> to vector<1x235xf32>
      %96 = vector.broadcast %95 : vector<1x235xf32> to vector<16x235xf32>
      %97 = arith.mulf %11, %96 : vector<16x235xf32>
      %98 = arith.addf %92, %97 : vector<16x235xf32>
      %99 = arith.maximumf %71, %98 : vector<16x235xf32>
      %c0_i32_55 = arith.constant 0 : i32
      %100 = arith.addi %16, %c0_i32_55 : i32
      %c0_i32_56 = arith.constant 0 : i32
      %101 = arith.addi %100, %c0_i32_56 : i32
      %c0_57 = arith.constant 0 : index
      %c3_58 = arith.constant 3 : index
      %102 = arith.index_cast %101 : i32 to index
      %c0_59 = arith.constant 0 : index
      %103 = vector.load %arg1[%c0_57, %c3_58, %102, %c0_59] : memref<1x4x109x236xf32, #tpu.memory_space<vmem>>, vector<1x1x1x235xf32>
      %104 = vector.shape_cast %103 : vector<1x1x1x235xf32> to vector<1x235xf32>
      %105 = vector.broadcast %104 : vector<1x235xf32> to vector<16x235xf32>
      %106 = arith.mulf %2, %105 : vector<16x235xf32>
      %c0_60 = arith.constant 0 : index
      %c0_61 = arith.constant 0 : index
      %107 = arith.index_cast %101 : i32 to index
      %c1_62 = arith.constant 1 : index
      %108 = vector.load %arg1[%c0_60, %c0_61, %107, %c1_62] : memref<1x4x109x236xf32, #tpu.memory_space<vmem>>, vector<1x1x1x235xf32>
      %109 = vector.shape_cast %108 : vector<1x1x1x235xf32> to vector<1x235xf32>
      %110 = vector.broadcast %109 : vector<1x235xf32> to vector<16x235xf32>
      %111 = arith.mulf %5, %110 : vector<16x235xf32>
      %112 = arith.addf %106, %111 : vector<16x235xf32>
      %c0_i32_63 = arith.constant 0 : i32
      %113 = arith.addi %16, %c0_i32_63 : i32
      %c1_i32_64 = arith.constant 1 : i32
      %114 = arith.addi %113, %c1_i32_64 : i32
      %c0_65 = arith.constant 0 : index
      %c3_66 = arith.constant 3 : index
      %115 = arith.index_cast %114 : i32 to index
      %c0_67 = arith.constant 0 : index
      %116 = vector.load %arg1[%c0_65, %c3_66, %115, %c0_67] : memref<1x4x109x236xf32, #tpu.memory_space<vmem>>, vector<1x1x1x235xf32>
      %117 = vector.shape_cast %116 : vector<1x1x1x235xf32> to vector<1x235xf32>
      %118 = vector.broadcast %117 : vector<1x235xf32> to vector<16x235xf32>
      %119 = arith.mulf %8, %118 : vector<16x235xf32>
      %120 = arith.addf %112, %119 : vector<16x235xf32>
      %c0_68 = arith.constant 0 : index
      %c0_69 = arith.constant 0 : index
      %121 = arith.index_cast %114 : i32 to index
      %c1_70 = arith.constant 1 : index
      %122 = vector.load %arg1[%c0_68, %c0_69, %121, %c1_70] : memref<1x4x109x236xf32, #tpu.memory_space<vmem>>, vector<1x1x1x235xf32>
      %123 = vector.shape_cast %122 : vector<1x1x1x235xf32> to vector<1x235xf32>
      %124 = vector.broadcast %123 : vector<1x235xf32> to vector<16x235xf32>
      %125 = arith.mulf %11, %124 : vector<16x235xf32>
      %126 = arith.addf %120, %125 : vector<16x235xf32>
      %127 = arith.maximumf %99, %126 : vector<16x235xf32>
      %c1_i32_71 = arith.constant 1 : i32
      %128 = arith.addi %16, %c1_i32_71 : i32
      %c0_i32_72 = arith.constant 0 : i32
      %129 = arith.addi %128, %c0_i32_72 : i32
      %c0_73 = arith.constant 0 : index
      %c0_74 = arith.constant 0 : index
      %130 = arith.index_cast %129 : i32 to index
      %c0_75 = arith.constant 0 : index
      %131 = vector.load %arg1[%c0_73, %c0_74, %130, %c0_75] : memref<1x4x109x236xf32, #tpu.memory_space<vmem>>, vector<1x1x1x235xf32>
      %132 = vector.shape_cast %131 : vector<1x1x1x235xf32> to vector<1x235xf32>
      %133 = vector.broadcast %132 : vector<1x235xf32> to vector<16x235xf32>
      %134 = arith.mulf %2, %133 : vector<16x235xf32>
      %c0_76 = arith.constant 0 : index
      %c1_77 = arith.constant 1 : index
      %135 = arith.index_cast %129 : i32 to index
      %c0_78 = arith.constant 0 : index
      %136 = vector.load %arg1[%c0_76, %c1_77, %135, %c0_78] : memref<1x4x109x236xf32, #tpu.memory_space<vmem>>, vector<1x1x1x235xf32>
      %137 = vector.shape_cast %136 : vector<1x1x1x235xf32> to vector<1x235xf32>
      %138 = vector.broadcast %137 : vector<1x235xf32> to vector<16x235xf32>
      %139 = arith.mulf %5, %138 : vector<16x235xf32>
      %140 = arith.addf %134, %139 : vector<16x235xf32>
      %c1_i32_79 = arith.constant 1 : i32
      %141 = arith.addi %16, %c1_i32_79 : i32
      %c1_i32_80 = arith.constant 1 : i32
      %142 = arith.addi %141, %c1_i32_80 : i32
      %c0_81 = arith.constant 0 : index
      %c0_82 = arith.constant 0 : index
      %143 = arith.index_cast %142 : i32 to index
      %c0_83 = arith.constant 0 : index
      %144 = vector.load %arg1[%c0_81, %c0_82, %143, %c0_83] : memref<1x4x109x236xf32, #tpu.memory_space<vmem>>, vector<1x1x1x235xf32>
      %145 = vector.shape_cast %144 : vector<1x1x1x235xf32> to vector<1x235xf32>
      %146 = vector.broadcast %145 : vector<1x235xf32> to vector<16x235xf32>
      %147 = arith.mulf %8, %146 : vector<16x235xf32>
      %148 = arith.addf %140, %147 : vector<16x235xf32>
      %c0_84 = arith.constant 0 : index
      %c1_85 = arith.constant 1 : index
      %149 = arith.index_cast %142 : i32 to index
      %c0_86 = arith.constant 0 : index
      %150 = vector.load %arg1[%c0_84, %c1_85, %149, %c0_86] : memref<1x4x109x236xf32, #tpu.memory_space<vmem>>, vector<1x1x1x235xf32>
      %151 = vector.shape_cast %150 : vector<1x1x1x235xf32> to vector<1x235xf32>
      %152 = vector.broadcast %151 : vector<1x235xf32> to vector<16x235xf32>
      %153 = arith.mulf %11, %152 : vector<16x235xf32>
      %154 = arith.addf %148, %153 : vector<16x235xf32>
      %155 = arith.maximumf %127, %154 : vector<16x235xf32>
      %c1_i32_87 = arith.constant 1 : i32
      %156 = arith.addi %16, %c1_i32_87 : i32
      %c0_i32_88 = arith.constant 0 : i32
      %157 = arith.addi %156, %c0_i32_88 : i32
      %c0_89 = arith.constant 0 : index
      %c1_90 = arith.constant 1 : index
      %158 = arith.index_cast %157 : i32 to index
      %c0_91 = arith.constant 0 : index
      %159 = vector.load %arg1[%c0_89, %c1_90, %158, %c0_91] : memref<1x4x109x236xf32, #tpu.memory_space<vmem>>, vector<1x1x1x235xf32>
      %160 = vector.shape_cast %159 : vector<1x1x1x235xf32> to vector<1x235xf32>
      %161 = vector.broadcast %160 : vector<1x235xf32> to vector<16x235xf32>
      %162 = arith.mulf %2, %161 : vector<16x235xf32>
      %c0_92 = arith.constant 0 : index
      %c2_93 = arith.constant 2 : index
      %163 = arith.index_cast %157 : i32 to index
      %c0_94 = arith.constant 0 : index
      %164 = vector.load %arg1[%c0_92, %c2_93, %163, %c0_94] : memref<1x4x109x236xf32, #tpu.memory_space<vmem>>, vector<1x1x1x235xf32>
      %165 = vector.shape_cast %164 : vector<1x1x1x235xf32> to vector<1x235xf32>
      %166 = vector.broadcast %165 : vector<1x235xf32> to vector<16x235xf32>
      %167 = arith.mulf %5, %166 : vector<16x235xf32>
      %168 = arith.addf %162, %167 : vector<16x235xf32>
      %c1_i32_95 = arith.constant 1 : i32
      %169 = arith.addi %16, %c1_i32_95 : i32
      %c1_i32_96 = arith.constant 1 : i32
      %170 = arith.addi %169, %c1_i32_96 : i32
      %c0_97 = arith.constant 0 : index
      %c1_98 = arith.constant 1 : index
      %171 = arith.index_cast %170 : i32 to index
      %c0_99 = arith.constant 0 : index
      %172 = vector.load %arg1[%c0_97, %c1_98, %171, %c0_99] : memref<1x4x109x236xf32, #tpu.memory_space<vmem>>, vector<1x1x1x235xf32>
      %173 = vector.shape_cast %172 : vector<1x1x1x235xf32> to vector<1x235xf32>
      %174 = vector.broadcast %173 : vector<1x235xf32> to vector<16x235xf32>
      %175 = arith.mulf %8, %174 : vector<16x235xf32>
      %176 = arith.addf %168, %175 : vector<16x235xf32>
      %c0_100 = arith.constant 0 : index
      %c2_101 = arith.constant 2 : index
      %177 = arith.index_cast %170 : i32 to index
      %c0_102 = arith.constant 0 : index
      %178 = vector.load %arg1[%c0_100, %c2_101, %177, %c0_102] : memref<1x4x109x236xf32, #tpu.memory_space<vmem>>, vector<1x1x1x235xf32>
      %179 = vector.shape_cast %178 : vector<1x1x1x235xf32> to vector<1x235xf32>
      %180 = vector.broadcast %179 : vector<1x235xf32> to vector<16x235xf32>
      %181 = arith.mulf %11, %180 : vector<16x235xf32>
      %182 = arith.addf %176, %181 : vector<16x235xf32>
      %183 = arith.maximumf %155, %182 : vector<16x235xf32>
      %c1_i32_103 = arith.constant 1 : i32
      %184 = arith.addi %16, %c1_i32_103 : i32
      %c0_i32_104 = arith.constant 0 : i32
      %185 = arith.addi %184, %c0_i32_104 : i32
      %c0_105 = arith.constant 0 : index
      %c2_106 = arith.constant 2 : index
      %186 = arith.index_cast %185 : i32 to index
      %c0_107 = arith.constant 0 : index
      %187 = vector.load %arg1[%c0_105, %c2_106, %186, %c0_107] : memref<1x4x109x236xf32, #tpu.memory_space<vmem>>, vector<1x1x1x235xf32>
      %188 = vector.shape_cast %187 : vector<1x1x1x235xf32> to vector<1x235xf32>
      %189 = vector.broadcast %188 : vector<1x235xf32> to vector<16x235xf32>
      %190 = arith.mulf %2, %189 : vector<16x235xf32>
      %c0_108 = arith.constant 0 : index
      %c3_109 = arith.constant 3 : index
      %191 = arith.index_cast %185 : i32 to index
      %c0_110 = arith.constant 0 : index
      %192 = vector.load %arg1[%c0_108, %c3_109, %191, %c0_110] : memref<1x4x109x236xf32, #tpu.memory_space<vmem>>, vector<1x1x1x235xf32>
      %193 = vector.shape_cast %192 : vector<1x1x1x235xf32> to vector<1x235xf32>
      %194 = vector.broadcast %193 : vector<1x235xf32> to vector<16x235xf32>
      %195 = arith.mulf %5, %194 : vector<16x235xf32>
      %196 = arith.addf %190, %195 : vector<16x235xf32>
      %c1_i32_111 = arith.constant 1 : i32
      %197 = arith.addi %16, %c1_i32_111 : i32
      %c1_i32_112 = arith.constant 1 : i32
      %198 = arith.addi %197, %c1_i32_112 : i32
      %c0_113 = arith.constant 0 : index
      %c2_114 = arith.constant 2 : index
      %199 = arith.index_cast %198 : i32 to index
      %c0_115 = arith.constant 0 : index
      %200 = vector.load %arg1[%c0_113, %c2_114, %199, %c0_115] : memref<1x4x109x236xf32, #tpu.memory_space<vmem>>, vector<1x1x1x235xf32>
      %201 = vector.shape_cast %200 : vector<1x1x1x235xf32> to vector<1x235xf32>
      %202 = vector.broadcast %201 : vector<1x235xf32> to vector<16x235xf32>
      %203 = arith.mulf %8, %202 : vector<16x235xf32>
      %204 = arith.addf %196, %203 : vector<16x235xf32>
      %c0_116 = arith.constant 0 : index
      %c3_117 = arith.constant 3 : index
      %205 = arith.index_cast %198 : i32 to index
      %c0_118 = arith.constant 0 : index
      %206 = vector.load %arg1[%c0_116, %c3_117, %205, %c0_118] : memref<1x4x109x236xf32, #tpu.memory_space<vmem>>, vector<1x1x1x235xf32>
      %207 = vector.shape_cast %206 : vector<1x1x1x235xf32> to vector<1x235xf32>
      %208 = vector.broadcast %207 : vector<1x235xf32> to vector<16x235xf32>
      %209 = arith.mulf %11, %208 : vector<16x235xf32>
      %210 = arith.addf %204, %209 : vector<16x235xf32>
      %211 = arith.maximumf %183, %210 : vector<16x235xf32>
      %c1_i32_119 = arith.constant 1 : i32
      %212 = arith.addi %16, %c1_i32_119 : i32
      %c0_i32_120 = arith.constant 0 : i32
      %213 = arith.addi %212, %c0_i32_120 : i32
      %c0_121 = arith.constant 0 : index
      %c3_122 = arith.constant 3 : index
      %214 = arith.index_cast %213 : i32 to index
      %c0_123 = arith.constant 0 : index
      %215 = vector.load %arg1[%c0_121, %c3_122, %214, %c0_123] : memref<1x4x109x236xf32, #tpu.memory_space<vmem>>, vector<1x1x1x235xf32>
      %216 = vector.shape_cast %215 : vector<1x1x1x235xf32> to vector<1x235xf32>
      %217 = vector.broadcast %216 : vector<1x235xf32> to vector<16x235xf32>
      %218 = arith.mulf %2, %217 : vector<16x235xf32>
      %c0_124 = arith.constant 0 : index
      %c0_125 = arith.constant 0 : index
      %219 = arith.index_cast %213 : i32 to index
      %c1_126 = arith.constant 1 : index
      %220 = vector.load %arg1[%c0_124, %c0_125, %219, %c1_126] : memref<1x4x109x236xf32, #tpu.memory_space<vmem>>, vector<1x1x1x235xf32>
      %221 = vector.shape_cast %220 : vector<1x1x1x235xf32> to vector<1x235xf32>
      %222 = vector.broadcast %221 : vector<1x235xf32> to vector<16x235xf32>
      %223 = arith.mulf %5, %222 : vector<16x235xf32>
      %224 = arith.addf %218, %223 : vector<16x235xf32>
      %c1_i32_127 = arith.constant 1 : i32
      %225 = arith.addi %16, %c1_i32_127 : i32
      %c1_i32_128 = arith.constant 1 : i32
      %226 = arith.addi %225, %c1_i32_128 : i32
      %c0_129 = arith.constant 0 : index
      %c3_130 = arith.constant 3 : index
      %227 = arith.index_cast %226 : i32 to index
      %c0_131 = arith.constant 0 : index
      %228 = vector.load %arg1[%c0_129, %c3_130, %227, %c0_131] : memref<1x4x109x236xf32, #tpu.memory_space<vmem>>, vector<1x1x1x235xf32>
      %229 = vector.shape_cast %228 : vector<1x1x1x235xf32> to vector<1x235xf32>
      %230 = vector.broadcast %229 : vector<1x235xf32> to vector<16x235xf32>
      %231 = arith.mulf %8, %230 : vector<16x235xf32>
      %232 = arith.addf %224, %231 : vector<16x235xf32>
      %c0_132 = arith.constant 0 : index
      %c0_133 = arith.constant 0 : index
      %233 = arith.index_cast %226 : i32 to index
      %c1_134 = arith.constant 1 : index
      %234 = vector.load %arg1[%c0_132, %c0_133, %233, %c1_134] : memref<1x4x109x236xf32, #tpu.memory_space<vmem>>, vector<1x1x1x235xf32>
      %235 = vector.shape_cast %234 : vector<1x1x1x235xf32> to vector<1x235xf32>
      %236 = vector.broadcast %235 : vector<1x235xf32> to vector<16x235xf32>
      %237 = arith.mulf %11, %236 : vector<16x235xf32>
      %238 = arith.addf %232, %237 : vector<16x235xf32>
      %239 = arith.maximumf %211, %238 : vector<16x235xf32>
      %c2_i32 = arith.constant 2 : i32
      %240 = arith.addi %16, %c2_i32 : i32
      %c0_i32_135 = arith.constant 0 : i32
      %241 = arith.addi %240, %c0_i32_135 : i32
      %c0_136 = arith.constant 0 : index
      %c0_137 = arith.constant 0 : index
      %242 = arith.index_cast %241 : i32 to index
      %c0_138 = arith.constant 0 : index
      %243 = vector.load %arg1[%c0_136, %c0_137, %242, %c0_138] : memref<1x4x109x236xf32, #tpu.memory_space<vmem>>, vector<1x1x1x235xf32>
      %244 = vector.shape_cast %243 : vector<1x1x1x235xf32> to vector<1x235xf32>
      %245 = vector.broadcast %244 : vector<1x235xf32> to vector<16x235xf32>
      %246 = arith.mulf %2, %245 : vector<16x235xf32>
      %c0_139 = arith.constant 0 : index
      %c1_140 = arith.constant 1 : index
      %247 = arith.index_cast %241 : i32 to index
      %c0_141 = arith.constant 0 : index
      %248 = vector.load %arg1[%c0_139, %c1_140, %247, %c0_141] : memref<1x4x109x236xf32, #tpu.memory_space<vmem>>, vector<1x1x1x235xf32>
      %249 = vector.shape_cast %248 : vector<1x1x1x235xf32> to vector<1x235xf32>
      %250 = vector.broadcast %249 : vector<1x235xf32> to vector<16x235xf32>
      %251 = arith.mulf %5, %250 : vector<16x235xf32>
      %252 = arith.addf %246, %251 : vector<16x235xf32>
      %c2_i32_142 = arith.constant 2 : i32
      %253 = arith.addi %16, %c2_i32_142 : i32
      %c1_i32_143 = arith.constant 1 : i32
      %254 = arith.addi %253, %c1_i32_143 : i32
      %c0_144 = arith.constant 0 : index
      %c0_145 = arith.constant 0 : index
      %255 = arith.index_cast %254 : i32 to index
      %c0_146 = arith.constant 0 : index
      %256 = vector.load %arg1[%c0_144, %c0_145, %255, %c0_146] : memref<1x4x109x236xf32, #tpu.memory_space<vmem>>, vector<1x1x1x235xf32>
      %257 = vector.shape_cast %256 : vector<1x1x1x235xf32> to vector<1x235xf32>
      %258 = vector.broadcast %257 : vector<1x235xf32> to vector<16x235xf32>
      %259 = arith.mulf %8, %258 : vector<16x235xf32>
      %260 = arith.addf %252, %259 : vector<16x235xf32>
      %c0_147 = arith.constant 0 : index
      %c1_148 = arith.constant 1 : index
      %261 = arith.index_cast %254 : i32 to index
      %c0_149 = arith.constant 0 : index
      %262 = vector.load %arg1[%c0_147, %c1_148, %261, %c0_149] : memref<1x4x109x236xf32, #tpu.memory_space<vmem>>, vector<1x1x1x235xf32>
      %263 = vector.shape_cast %262 : vector<1x1x1x235xf32> to vector<1x235xf32>
      %264 = vector.broadcast %263 : vector<1x235xf32> to vector<16x235xf32>
      %265 = arith.mulf %11, %264 : vector<16x235xf32>
      %266 = arith.addf %260, %265 : vector<16x235xf32>
      %267 = arith.maximumf %239, %266 : vector<16x235xf32>
      %c2_i32_150 = arith.constant 2 : i32
      %268 = arith.addi %16, %c2_i32_150 : i32
      %c0_i32_151 = arith.constant 0 : i32
      %269 = arith.addi %268, %c0_i32_151 : i32
      %c0_152 = arith.constant 0 : index
      %c1_153 = arith.constant 1 : index
      %270 = arith.index_cast %269 : i32 to index
      %c0_154 = arith.constant 0 : index
      %271 = vector.load %arg1[%c0_152, %c1_153, %270, %c0_154] : memref<1x4x109x236xf32, #tpu.memory_space<vmem>>, vector<1x1x1x235xf32>
      %272 = vector.shape_cast %271 : vector<1x1x1x235xf32> to vector<1x235xf32>
      %273 = vector.broadcast %272 : vector<1x235xf32> to vector<16x235xf32>
      %274 = arith.mulf %2, %273 : vector<16x235xf32>
      %c0_155 = arith.constant 0 : index
      %c2_156 = arith.constant 2 : index
      %275 = arith.index_cast %269 : i32 to index
      %c0_157 = arith.constant 0 : index
      %276 = vector.load %arg1[%c0_155, %c2_156, %275, %c0_157] : memref<1x4x109x236xf32, #tpu.memory_space<vmem>>, vector<1x1x1x235xf32>
      %277 = vector.shape_cast %276 : vector<1x1x1x235xf32> to vector<1x235xf32>
      %278 = vector.broadcast %277 : vector<1x235xf32> to vector<16x235xf32>
      %279 = arith.mulf %5, %278 : vector<16x235xf32>
      %280 = arith.addf %274, %279 : vector<16x235xf32>
      %c2_i32_158 = arith.constant 2 : i32
      %281 = arith.addi %16, %c2_i32_158 : i32
      %c1_i32_159 = arith.constant 1 : i32
      %282 = arith.addi %281, %c1_i32_159 : i32
      %c0_160 = arith.constant 0 : index
      %c1_161 = arith.constant 1 : index
      %283 = arith.index_cast %282 : i32 to index
      %c0_162 = arith.constant 0 : index
      %284 = vector.load %arg1[%c0_160, %c1_161, %283, %c0_162] : memref<1x4x109x236xf32, #tpu.memory_space<vmem>>, vector<1x1x1x235xf32>
      %285 = vector.shape_cast %284 : vector<1x1x1x235xf32> to vector<1x235xf32>
      %286 = vector.broadcast %285 : vector<1x235xf32> to vector<16x235xf32>
      %287 = arith.mulf %8, %286 : vector<16x235xf32>
      %288 = arith.addf %280, %287 : vector<16x235xf32>
      %c0_163 = arith.constant 0 : index
      %c2_164 = arith.constant 2 : index
      %289 = arith.index_cast %282 : i32 to index
      %c0_165 = arith.constant 0 : index
      %290 = vector.load %arg1[%c0_163, %c2_164, %289, %c0_165] : memref<1x4x109x236xf32, #tpu.memory_space<vmem>>, vector<1x1x1x235xf32>
      %291 = vector.shape_cast %290 : vector<1x1x1x235xf32> to vector<1x235xf32>
      %292 = vector.broadcast %291 : vector<1x235xf32> to vector<16x235xf32>
      %293 = arith.mulf %11, %292 : vector<16x235xf32>
      %294 = arith.addf %288, %293 : vector<16x235xf32>
      %295 = arith.maximumf %267, %294 : vector<16x235xf32>
      %c2_i32_166 = arith.constant 2 : i32
      %296 = arith.addi %16, %c2_i32_166 : i32
      %c0_i32_167 = arith.constant 0 : i32
      %297 = arith.addi %296, %c0_i32_167 : i32
      %c0_168 = arith.constant 0 : index
      %c2_169 = arith.constant 2 : index
      %298 = arith.index_cast %297 : i32 to index
      %c0_170 = arith.constant 0 : index
      %299 = vector.load %arg1[%c0_168, %c2_169, %298, %c0_170] : memref<1x4x109x236xf32, #tpu.memory_space<vmem>>, vector<1x1x1x235xf32>
      %300 = vector.shape_cast %299 : vector<1x1x1x235xf32> to vector<1x235xf32>
      %301 = vector.broadcast %300 : vector<1x235xf32> to vector<16x235xf32>
      %302 = arith.mulf %2, %301 : vector<16x235xf32>
      %c0_171 = arith.constant 0 : index
      %c3_172 = arith.constant 3 : index
      %303 = arith.index_cast %297 : i32 to index
      %c0_173 = arith.constant 0 : index
      %304 = vector.load %arg1[%c0_171, %c3_172, %303, %c0_173] : memref<1x4x109x236xf32, #tpu.memory_space<vmem>>, vector<1x1x1x235xf32>
      %305 = vector.shape_cast %304 : vector<1x1x1x235xf32> to vector<1x235xf32>
      %306 = vector.broadcast %305 : vector<1x235xf32> to vector<16x235xf32>
      %307 = arith.mulf %5, %306 : vector<16x235xf32>
      %308 = arith.addf %302, %307 : vector<16x235xf32>
      %c2_i32_174 = arith.constant 2 : i32
      %309 = arith.addi %16, %c2_i32_174 : i32
      %c1_i32_175 = arith.constant 1 : i32
      %310 = arith.addi %309, %c1_i32_175 : i32
      %c0_176 = arith.constant 0 : index
      %c2_177 = arith.constant 2 : index
      %311 = arith.index_cast %310 : i32 to index
      %c0_178 = arith.constant 0 : index
      %312 = vector.load %arg1[%c0_176, %c2_177, %311, %c0_178] : memref<1x4x109x236xf32, #tpu.memory_space<vmem>>, vector<1x1x1x235xf32>
      %313 = vector.shape_cast %312 : vector<1x1x1x235xf32> to vector<1x235xf32>
      %314 = vector.broadcast %313 : vector<1x235xf32> to vector<16x235xf32>
      %315 = arith.mulf %8, %314 : vector<16x235xf32>
      %316 = arith.addf %308, %315 : vector<16x235xf32>
      %c0_179 = arith.constant 0 : index
      %c3_180 = arith.constant 3 : index
      %317 = arith.index_cast %310 : i32 to index
      %c0_181 = arith.constant 0 : index
      %318 = vector.load %arg1[%c0_179, %c3_180, %317, %c0_181] : memref<1x4x109x236xf32, #tpu.memory_space<vmem>>, vector<1x1x1x235xf32>
      %319 = vector.shape_cast %318 : vector<1x1x1x235xf32> to vector<1x235xf32>
      %320 = vector.broadcast %319 : vector<1x235xf32> to vector<16x235xf32>
      %321 = arith.mulf %11, %320 : vector<16x235xf32>
      %322 = arith.addf %316, %321 : vector<16x235xf32>
      %323 = arith.maximumf %295, %322 : vector<16x235xf32>
      %c2_i32_182 = arith.constant 2 : i32
      %324 = arith.addi %16, %c2_i32_182 : i32
      %c0_i32_183 = arith.constant 0 : i32
      %325 = arith.addi %324, %c0_i32_183 : i32
      %c0_184 = arith.constant 0 : index
      %c3_185 = arith.constant 3 : index
      %326 = arith.index_cast %325 : i32 to index
      %c0_186 = arith.constant 0 : index
      %327 = vector.load %arg1[%c0_184, %c3_185, %326, %c0_186] : memref<1x4x109x236xf32, #tpu.memory_space<vmem>>, vector<1x1x1x235xf32>
      %328 = vector.shape_cast %327 : vector<1x1x1x235xf32> to vector<1x235xf32>
      %329 = vector.broadcast %328 : vector<1x235xf32> to vector<16x235xf32>
      %330 = arith.mulf %2, %329 : vector<16x235xf32>
      %c0_187 = arith.constant 0 : index
      %c0_188 = arith.constant 0 : index
      %331 = arith.index_cast %325 : i32 to index
      %c1_189 = arith.constant 1 : index
      %332 = vector.load %arg1[%c0_187, %c0_188, %331, %c1_189] : memref<1x4x109x236xf32, #tpu.memory_space<vmem>>, vector<1x1x1x235xf32>
      %333 = vector.shape_cast %332 : vector<1x1x1x235xf32> to vector<1x235xf32>
      %334 = vector.broadcast %333 : vector<1x235xf32> to vector<16x235xf32>
      %335 = arith.mulf %5, %334 : vector<16x235xf32>
      %336 = arith.addf %330, %335 : vector<16x235xf32>
      %c2_i32_190 = arith.constant 2 : i32
      %337 = arith.addi %16, %c2_i32_190 : i32
      %c1_i32_191 = arith.constant 1 : i32
      %338 = arith.addi %337, %c1_i32_191 : i32
      %c0_192 = arith.constant 0 : index
      %c3_193 = arith.constant 3 : index
      %339 = arith.index_cast %338 : i32 to index
      %c0_194 = arith.constant 0 : index
      %340 = vector.load %arg1[%c0_192, %c3_193, %339, %c0_194] : memref<1x4x109x236xf32, #tpu.memory_space<vmem>>, vector<1x1x1x235xf32>
      %341 = vector.shape_cast %340 : vector<1x1x1x235xf32> to vector<1x235xf32>
      %342 = vector.broadcast %341 : vector<1x235xf32> to vector<16x235xf32>
      %343 = arith.mulf %8, %342 : vector<16x235xf32>
      %344 = arith.addf %336, %343 : vector<16x235xf32>
      %c0_195 = arith.constant 0 : index
      %c0_196 = arith.constant 0 : index
      %345 = arith.index_cast %338 : i32 to index
      %c1_197 = arith.constant 1 : index
      %346 = vector.load %arg1[%c0_195, %c0_196, %345, %c1_197] : memref<1x4x109x236xf32, #tpu.memory_space<vmem>>, vector<1x1x1x235xf32>
      %347 = vector.shape_cast %346 : vector<1x1x1x235xf32> to vector<1x235xf32>
      %348 = vector.broadcast %347 : vector<1x235xf32> to vector<16x235xf32>
      %349 = arith.mulf %11, %348 : vector<16x235xf32>
      %350 = arith.addf %344, %349 : vector<16x235xf32>
      %351 = arith.maximumf %323, %350 : vector<16x235xf32>
      %c3_i32 = arith.constant 3 : i32
      %352 = arith.addi %16, %c3_i32 : i32
      %c0_i32_198 = arith.constant 0 : i32
      %353 = arith.addi %352, %c0_i32_198 : i32
      %c0_199 = arith.constant 0 : index
      %c0_200 = arith.constant 0 : index
      %354 = arith.index_cast %353 : i32 to index
      %c0_201 = arith.constant 0 : index
      %355 = vector.load %arg1[%c0_199, %c0_200, %354, %c0_201] : memref<1x4x109x236xf32, #tpu.memory_space<vmem>>, vector<1x1x1x235xf32>
      %356 = vector.shape_cast %355 : vector<1x1x1x235xf32> to vector<1x235xf32>
      %357 = vector.broadcast %356 : vector<1x235xf32> to vector<16x235xf32>
      %358 = arith.mulf %2, %357 : vector<16x235xf32>
      %c0_202 = arith.constant 0 : index
      %c1_203 = arith.constant 1 : index
      %359 = arith.index_cast %353 : i32 to index
      %c0_204 = arith.constant 0 : index
      %360 = vector.load %arg1[%c0_202, %c1_203, %359, %c0_204] : memref<1x4x109x236xf32, #tpu.memory_space<vmem>>, vector<1x1x1x235xf32>
      %361 = vector.shape_cast %360 : vector<1x1x1x235xf32> to vector<1x235xf32>
      %362 = vector.broadcast %361 : vector<1x235xf32> to vector<16x235xf32>
      %363 = arith.mulf %5, %362 : vector<16x235xf32>
      %364 = arith.addf %358, %363 : vector<16x235xf32>
      %c3_i32_205 = arith.constant 3 : i32
      %365 = arith.addi %16, %c3_i32_205 : i32
      %c1_i32_206 = arith.constant 1 : i32
      %366 = arith.addi %365, %c1_i32_206 : i32
      %c0_207 = arith.constant 0 : index
      %c0_208 = arith.constant 0 : index
      %367 = arith.index_cast %366 : i32 to index
      %c0_209 = arith.constant 0 : index
      %368 = vector.load %arg1[%c0_207, %c0_208, %367, %c0_209] : memref<1x4x109x236xf32, #tpu.memory_space<vmem>>, vector<1x1x1x235xf32>
      %369 = vector.shape_cast %368 : vector<1x1x1x235xf32> to vector<1x235xf32>
      %370 = vector.broadcast %369 : vector<1x235xf32> to vector<16x235xf32>
      %371 = arith.mulf %8, %370 : vector<16x235xf32>
      %372 = arith.addf %364, %371 : vector<16x235xf32>
      %c0_210 = arith.constant 0 : index
      %c1_211 = arith.constant 1 : index
      %373 = arith.index_cast %366 : i32 to index
      %c0_212 = arith.constant 0 : index
      %374 = vector.load %arg1[%c0_210, %c1_211, %373, %c0_212] : memref<1x4x109x236xf32, #tpu.memory_space<vmem>>, vector<1x1x1x235xf32>
      %375 = vector.shape_cast %374 : vector<1x1x1x235xf32> to vector<1x235xf32>
      %376 = vector.broadcast %375 : vector<1x235xf32> to vector<16x235xf32>
      %377 = arith.mulf %11, %376 : vector<16x235xf32>
      %378 = arith.addf %372, %377 : vector<16x235xf32>
      %379 = arith.maximumf %351, %378 : vector<16x235xf32>
      %c3_i32_213 = arith.constant 3 : i32
      %380 = arith.addi %16, %c3_i32_213 : i32
      %c0_i32_214 = arith.constant 0 : i32
      %381 = arith.addi %380, %c0_i32_214 : i32
      %c0_215 = arith.constant 0 : index
      %c1_216 = arith.constant 1 : index
      %382 = arith.index_cast %381 : i32 to index
      %c0_217 = arith.constant 0 : index
      %383 = vector.load %arg1[%c0_215, %c1_216, %382, %c0_217] : memref<1x4x109x236xf32, #tpu.memory_space<vmem>>, vector<1x1x1x235xf32>
      %384 = vector.shape_cast %383 : vector<1x1x1x235xf32> to vector<1x235xf32>
      %385 = vector.broadcast %384 : vector<1x235xf32> to vector<16x235xf32>
      %386 = arith.mulf %2, %385 : vector<16x235xf32>
      %c0_218 = arith.constant 0 : index
      %c2_219 = arith.constant 2 : index
      %387 = arith.index_cast %381 : i32 to index
      %c0_220 = arith.constant 0 : index
      %388 = vector.load %arg1[%c0_218, %c2_219, %387, %c0_220] : memref<1x4x109x236xf32, #tpu.memory_space<vmem>>, vector<1x1x1x235xf32>
      %389 = vector.shape_cast %388 : vector<1x1x1x235xf32> to vector<1x235xf32>
      %390 = vector.broadcast %389 : vector<1x235xf32> to vector<16x235xf32>
      %391 = arith.mulf %5, %390 : vector<16x235xf32>
      %392 = arith.addf %386, %391 : vector<16x235xf32>
      %c3_i32_221 = arith.constant 3 : i32
      %393 = arith.addi %16, %c3_i32_221 : i32
      %c1_i32_222 = arith.constant 1 : i32
      %394 = arith.addi %393, %c1_i32_222 : i32
      %c0_223 = arith.constant 0 : index
      %c1_224 = arith.constant 1 : index
      %395 = arith.index_cast %394 : i32 to index
      %c0_225 = arith.constant 0 : index
      %396 = vector.load %arg1[%c0_223, %c1_224, %395, %c0_225] : memref<1x4x109x236xf32, #tpu.memory_space<vmem>>, vector<1x1x1x235xf32>
      %397 = vector.shape_cast %396 : vector<1x1x1x235xf32> to vector<1x235xf32>
      %398 = vector.broadcast %397 : vector<1x235xf32> to vector<16x235xf32>
      %399 = arith.mulf %8, %398 : vector<16x235xf32>
      %400 = arith.addf %392, %399 : vector<16x235xf32>
      %c0_226 = arith.constant 0 : index
      %c2_227 = arith.constant 2 : index
      %401 = arith.index_cast %394 : i32 to index
      %c0_228 = arith.constant 0 : index
      %402 = vector.load %arg1[%c0_226, %c2_227, %401, %c0_228] : memref<1x4x109x236xf32, #tpu.memory_space<vmem>>, vector<1x1x1x235xf32>
      %403 = vector.shape_cast %402 : vector<1x1x1x235xf32> to vector<1x235xf32>
      %404 = vector.broadcast %403 : vector<1x235xf32> to vector<16x235xf32>
      %405 = arith.mulf %11, %404 : vector<16x235xf32>
      %406 = arith.addf %400, %405 : vector<16x235xf32>
      %407 = arith.maximumf %379, %406 : vector<16x235xf32>
      %c3_i32_229 = arith.constant 3 : i32
      %408 = arith.addi %16, %c3_i32_229 : i32
      %c0_i32_230 = arith.constant 0 : i32
      %409 = arith.addi %408, %c0_i32_230 : i32
      %c0_231 = arith.constant 0 : index
      %c2_232 = arith.constant 2 : index
      %410 = arith.index_cast %409 : i32 to index
      %c0_233 = arith.constant 0 : index
      %411 = vector.load %arg1[%c0_231, %c2_232, %410, %c0_233] : memref<1x4x109x236xf32, #tpu.memory_space<vmem>>, vector<1x1x1x235xf32>
      %412 = vector.shape_cast %411 : vector<1x1x1x235xf32> to vector<1x235xf32>
      %413 = vector.broadcast %412 : vector<1x235xf32> to vector<16x235xf32>
      %414 = arith.mulf %2, %413 : vector<16x235xf32>
      %c0_234 = arith.constant 0 : index
      %c3_235 = arith.constant 3 : index
      %415 = arith.index_cast %409 : i32 to index
      %c0_236 = arith.constant 0 : index
      %416 = vector.load %arg1[%c0_234, %c3_235, %415, %c0_236] : memref<1x4x109x236xf32, #tpu.memory_space<vmem>>, vector<1x1x1x235xf32>
      %417 = vector.shape_cast %416 : vector<1x1x1x235xf32> to vector<1x235xf32>
      %418 = vector.broadcast %417 : vector<1x235xf32> to vector<16x235xf32>
      %419 = arith.mulf %5, %418 : vector<16x235xf32>
      %420 = arith.addf %414, %419 : vector<16x235xf32>
      %c3_i32_237 = arith.constant 3 : i32
      %421 = arith.addi %16, %c3_i32_237 : i32
      %c1_i32_238 = arith.constant 1 : i32
      %422 = arith.addi %421, %c1_i32_238 : i32
      %c0_239 = arith.constant 0 : index
      %c2_240 = arith.constant 2 : index
      %423 = arith.index_cast %422 : i32 to index
      %c0_241 = arith.constant 0 : index
      %424 = vector.load %arg1[%c0_239, %c2_240, %423, %c0_241] : memref<1x4x109x236xf32, #tpu.memory_space<vmem>>, vector<1x1x1x235xf32>
      %425 = vector.shape_cast %424 : vector<1x1x1x235xf32> to vector<1x235xf32>
      %426 = vector.broadcast %425 : vector<1x235xf32> to vector<16x235xf32>
      %427 = arith.mulf %8, %426 : vector<16x235xf32>
      %428 = arith.addf %420, %427 : vector<16x235xf32>
      %c0_242 = arith.constant 0 : index
      %c3_243 = arith.constant 3 : index
      %429 = arith.index_cast %422 : i32 to index
      %c0_244 = arith.constant 0 : index
      %430 = vector.load %arg1[%c0_242, %c3_243, %429, %c0_244] : memref<1x4x109x236xf32, #tpu.memory_space<vmem>>, vector<1x1x1x235xf32>
      %431 = vector.shape_cast %430 : vector<1x1x1x235xf32> to vector<1x235xf32>
      %432 = vector.broadcast %431 : vector<1x235xf32> to vector<16x235xf32>
      %433 = arith.mulf %11, %432 : vector<16x235xf32>
      %434 = arith.addf %428, %433 : vector<16x235xf32>
      %435 = arith.maximumf %407, %434 : vector<16x235xf32>
      %c3_i32_245 = arith.constant 3 : i32
      %436 = arith.addi %16, %c3_i32_245 : i32
      %c0_i32_246 = arith.constant 0 : i32
      %437 = arith.addi %436, %c0_i32_246 : i32
      %c0_247 = arith.constant 0 : index
      %c3_248 = arith.constant 3 : index
      %438 = arith.index_cast %437 : i32 to index
      %c0_249 = arith.constant 0 : index
      %439 = vector.load %arg1[%c0_247, %c3_248, %438, %c0_249] : memref<1x4x109x236xf32, #tpu.memory_space<vmem>>, vector<1x1x1x235xf32>
      %440 = vector.shape_cast %439 : vector<1x1x1x235xf32> to vector<1x235xf32>
      %441 = vector.broadcast %440 : vector<1x235xf32> to vector<16x235xf32>
      %442 = arith.mulf %2, %441 : vector<16x235xf32>
      %c0_250 = arith.constant 0 : index
      %c0_251 = arith.constant 0 : index
      %443 = arith.index_cast %437 : i32 to index
      %c1_252 = arith.constant 1 : index
      %444 = vector.load %arg1[%c0_250, %c0_251, %443, %c1_252] : memref<1x4x109x236xf32, #tpu.memory_space<vmem>>, vector<1x1x1x235xf32>
      %445 = vector.shape_cast %444 : vector<1x1x1x235xf32> to vector<1x235xf32>
      %446 = vector.broadcast %445 : vector<1x235xf32> to vector<16x235xf32>
      %447 = arith.mulf %5, %446 : vector<16x235xf32>
      %448 = arith.addf %442, %447 : vector<16x235xf32>
      %c3_i32_253 = arith.constant 3 : i32
      %449 = arith.addi %16, %c3_i32_253 : i32
      %c1_i32_254 = arith.constant 1 : i32
      %450 = arith.addi %449, %c1_i32_254 : i32
      %c0_255 = arith.constant 0 : index
      %c3_256 = arith.constant 3 : index
      %451 = arith.index_cast %450 : i32 to index
      %c0_257 = arith.constant 0 : index
      %452 = vector.load %arg1[%c0_255, %c3_256, %451, %c0_257] : memref<1x4x109x236xf32, #tpu.memory_space<vmem>>, vector<1x1x1x235xf32>
      %453 = vector.shape_cast %452 : vector<1x1x1x235xf32> to vector<1x235xf32>
      %454 = vector.broadcast %453 : vector<1x235xf32> to vector<16x235xf32>
      %455 = arith.mulf %8, %454 : vector<16x235xf32>
      %456 = arith.addf %448, %455 : vector<16x235xf32>
      %c0_258 = arith.constant 0 : index
      %c0_259 = arith.constant 0 : index
      %457 = arith.index_cast %450 : i32 to index
      %c1_260 = arith.constant 1 : index
      %458 = vector.load %arg1[%c0_258, %c0_259, %457, %c1_260] : memref<1x4x109x236xf32, #tpu.memory_space<vmem>>, vector<1x1x1x235xf32>
      %459 = vector.shape_cast %458 : vector<1x1x1x235xf32> to vector<1x235xf32>
      %460 = vector.broadcast %459 : vector<1x235xf32> to vector<16x235xf32>
      %461 = arith.mulf %11, %460 : vector<16x235xf32>
      %462 = arith.addf %456, %461 : vector<16x235xf32>
      %463 = arith.maximumf %435, %462 : vector<16x235xf32>
      %464 = arith.addf %463, %14 : vector<16x235xf32>
      %cst = arith.constant 0.000000e+00 : f32
      %465 = vector.broadcast %cst : f32 to vector<16x235xf32>
      %466 = arith.maximumf %464, %465 : vector<16x235xf32>
      %467 = vector.shape_cast %466 : vector<16x235xf32> to vector<1x16x235xf32>
      %c0_261 = arith.constant 0 : index
      %468 = arith.index_cast %arg5 : i32 to index
      %c0_262 = arith.constant 0 : index
      %c0_263 = arith.constant 0 : index
      %469 = vector.load %arg4[%c0_261, %468, %c0_262, %c0_263] : memref<1x27x16x235xf32, #tpu.memory_space<vmem>>, vector<1x1x16x235xf32>
      %470 = vector.shape_cast %469 : vector<1x1x16x235xf32> to vector<1x16x235xf32>
      %471 = vector.shape_cast %467 : vector<1x16x235xf32> to vector<1x1x16x235xf32>
      tpu.vector_store %arg4[%c0_261, %468, %c0_262, %c0_263], %471 {strides = array<i32>} : memref<1x27x16x235xf32, #tpu.memory_space<vmem>>, vector<1x1x16x235xf32>,
    }
    %c27_i32_6 = arith.constant 27 : i32
    return
  }
  func.func @transform_0(%arg0: i32) -> (i32, i32, i32, i32) {
    %c0_i32 = arith.constant 0 : i32
    %c0_i32_0 = arith.constant 0 : i32
    %c0_i32_1 = arith.constant 0 : i32
    %c0_i32_2 = arith.constant 0 : i32
    return %arg0, %c0_i32, %c0_i32_0, %c0_i32_1 : i32, i32, i32, i32
  }
  func.func @transform_1(%arg0: i32) -> (i32, i32) {
    %c0_i32 = arith.constant 0 : i32
    %c0_i32_0 = arith.constant 0 : i32
    %c0_i32_1 = arith.constant 0 : i32
    return %c0_i32, %c0_i32_0 : i32, i32
  }
  func.func @transform_2(%arg0: i32) -> (i32, i32) {
    %c0_i32 = arith.constant 0 : i32
    %c0_i32_0 = arith.constant 0 : i32
    %c0_i32_1 = arith.constant 0 : i32
    return %c0_i32, %c0_i32_0 : i32, i32
  }
  func.func @transform_3(%arg0: i32) -> (i32, i32, i32, i32) {
    %c0_i32 = arith.constant 0 : i32
    %c0_i32_0 = arith.constant 0 : i32
    %c0_i32_1 = arith.constant 0 : i32
    %c0_i32_2 = arith.constant 0 : i32
    return %arg0, %c0_i32, %c0_i32_0, %c0_i32_1 : i32, i32, i32, i32
  }
}

module attributes {stable_mosaic.version = 11 : i64} {
  func.func @_conv_pool_kernel(%arg0: i32, %arg1: memref<1x29x241x16xf32, #tpu.memory_space<vmem>>, %arg2: memref<4x16x32xf32, #tpu.memory_space<vmem>>, %arg3: memref<1x32xf32, #tpu.memory_space<vmem>>, %arg4: memref<1x7x60x32xf32, #tpu.memory_space<vmem>>) attributes {dimension_semantics = [#tpu.dimension_semantics<parallel>], iteration_bounds = array<i64: 2>, scalar_prefetch = 0 : i64, scratch_operands = 0 : i64, tpu.core_type = #tpu.core_type<tc>, window_params = [{transform_indices = @transform_0, window_bounds = array<i64: 1, 29, 241, 16>}, {pipeline_mode = #tpu.pipeline_mode<synchronous>, transform_indices = @transform_1, window_bounds = array<i64: 4, 16, 32>}, {pipeline_mode = #tpu.pipeline_mode<synchronous>, transform_indices = @transform_2, window_bounds = array<i64: 1, 32>}, {transform_indices = @transform_3, window_bounds = array<i64: 1, 7, 60, 32>}]} {
    %c0 = arith.constant 0 : index
    %c0_0 = arith.constant 0 : index
    %c0_1 = arith.constant 0 : index
    %0 = vector.load %arg2[%c0, %c0_0, %c0_1] : memref<4x16x32xf32, #tpu.memory_space<vmem>>, vector<1x16x32xf32>
    %1 = vector.shape_cast %0 : vector<1x16x32xf32> to vector<16x32xf32>
    %c1 = arith.constant 1 : index
    %c0_2 = arith.constant 0 : index
    %c0_3 = arith.constant 0 : index
    %2 = vector.load %arg2[%c1, %c0_2, %c0_3] : memref<4x16x32xf32, #tpu.memory_space<vmem>>, vector<1x16x32xf32>
    %3 = vector.shape_cast %2 : vector<1x16x32xf32> to vector<16x32xf32>
    %c2 = arith.constant 2 : index
    %c0_4 = arith.constant 0 : index
    %c0_5 = arith.constant 0 : index
    %4 = vector.load %arg2[%c2, %c0_4, %c0_5] : memref<4x16x32xf32, #tpu.memory_space<vmem>>, vector<1x16x32xf32>
    %5 = vector.shape_cast %4 : vector<1x16x32xf32> to vector<16x32xf32>
    %c3 = arith.constant 3 : index
    %c0_6 = arith.constant 0 : index
    %c0_7 = arith.constant 0 : index
    %6 = vector.load %arg2[%c3, %c0_6, %c0_7] : memref<4x16x32xf32, #tpu.memory_space<vmem>>, vector<1x16x32xf32>
    %7 = vector.shape_cast %6 : vector<1x16x32xf32> to vector<16x32xf32>
    %c0_8 = arith.constant 0 : index
    %c0_9 = arith.constant 0 : index
    %8 = vector.load %arg3[%c0_8, %c0_9] : memref<1x32xf32, #tpu.memory_space<vmem>>, vector<1x32xf32>
    %c0_i32 = arith.constant 0 : i32
    %c7_i32 = arith.constant 7 : i32
    %9 = arith.addi %c0_i32, %c7_i32 : i32
    %c1_i32 = arith.constant 1 : i32
    scf.for %arg5 = %c0_i32 to %9 step %c1_i32  : i32 {
      %c4_i32 = arith.constant 4 : i32
      %10 = arith.muli %arg5, %c4_i32 : i32
      %c0_i32_11 = arith.constant 0 : i32
      %11 = arith.addi %10, %c0_i32_11 : i32
      %c0_12 = arith.constant 0 : index
      %12 = arith.index_cast %11 : i32 to index
      %c0_13 = arith.constant 0 : index
      %c0_14 = arith.constant 0 : index
      %13 = vector.load %arg1[%c0_12, %12, %c0_13, %c0_14] : memref<1x29x241x16xf32, #tpu.memory_space<vmem>>, vector<1x4x240x16xf32>
      %14 = vector.shape_cast %13 : vector<1x4x240x16xf32> to vector<4x240x16xf32>
      %15 = vector.shape_cast %14 : vector<4x240x16xf32> to vector<960x16xf32>
      %cst = arith.constant dense<0.000000e+00> : vector<960x32xf32>
      %16 = tpu.matmul %15, %1, %cst {dimension_numbers = #tpu.dot_dimension_numbers<[1], [0], [0], [1], [0, 0, 1, 1], [], []>} : vector<960x16xf32>, vector<16x32xf32>, vector<960x32xf32> -> vector<960x32xf32>
      %c0_i32_15 = arith.constant 0 : i32
      %17 = arith.addi %10, %c0_i32_15 : i32
      %c0_16 = arith.constant 0 : index
      %18 = arith.index_cast %17 : i32 to index
      %c1_17 = arith.constant 1 : index
      %c0_18 = arith.constant 0 : index
      %19 = vector.load %arg1[%c0_16, %18, %c1_17, %c0_18] : memref<1x29x241x16xf32, #tpu.memory_space<vmem>>, vector<1x4x240x16xf32>
      %20 = vector.shape_cast %19 : vector<1x4x240x16xf32> to vector<4x240x16xf32>
      %21 = vector.shape_cast %20 : vector<4x240x16xf32> to vector<960x16xf32>
      %cst_19 = arith.constant dense<0.000000e+00> : vector<960x32xf32>
      %22 = tpu.matmul %21, %3, %cst_19 {dimension_numbers = #tpu.dot_dimension_numbers<[1], [0], [0], [1], [0, 0, 1, 1], [], []>} : vector<960x16xf32>, vector<16x32xf32>, vector<960x32xf32> -> vector<960x32xf32>
      %23 = arith.addf %16, %22 : vector<960x32xf32>
      %c1_i32_20 = arith.constant 1 : i32
      %24 = arith.addi %10, %c1_i32_20 : i32
      %c0_21 = arith.constant 0 : index
      %25 = arith.index_cast %24 : i32 to index
      %c0_22 = arith.constant 0 : index
      %c0_23 = arith.constant 0 : index
      %26 = vector.load %arg1[%c0_21, %25, %c0_22, %c0_23] : memref<1x29x241x16xf32, #tpu.memory_space<vmem>>, vector<1x4x240x16xf32>
      %27 = vector.shape_cast %26 : vector<1x4x240x16xf32> to vector<4x240x16xf32>
      %28 = vector.shape_cast %27 : vector<4x240x16xf32> to vector<960x16xf32>
      %cst_24 = arith.constant dense<0.000000e+00> : vector<960x32xf32>
      %29 = tpu.matmul %28, %5, %cst_24 {dimension_numbers = #tpu.dot_dimension_numbers<[1], [0], [0], [1], [0, 0, 1, 1], [], []>} : vector<960x16xf32>, vector<16x32xf32>, vector<960x32xf32> -> vector<960x32xf32>
      %30 = arith.addf %23, %29 : vector<960x32xf32>
      %c1_i32_25 = arith.constant 1 : i32
      %31 = arith.addi %10, %c1_i32_25 : i32
      %c0_26 = arith.constant 0 : index
      %32 = arith.index_cast %31 : i32 to index
      %c1_27 = arith.constant 1 : index
      %c0_28 = arith.constant 0 : index
      %33 = vector.load %arg1[%c0_26, %32, %c1_27, %c0_28] : memref<1x29x241x16xf32, #tpu.memory_space<vmem>>, vector<1x4x240x16xf32>
      %34 = vector.shape_cast %33 : vector<1x4x240x16xf32> to vector<4x240x16xf32>
      %35 = vector.shape_cast %34 : vector<4x240x16xf32> to vector<960x16xf32>
      %cst_29 = arith.constant dense<0.000000e+00> : vector<960x32xf32>
      %36 = tpu.matmul %35, %7, %cst_29 {dimension_numbers = #tpu.dot_dimension_numbers<[1], [0], [0], [1], [0, 0, 1, 1], [], []>} : vector<960x16xf32>, vector<16x32xf32>, vector<960x32xf32> -> vector<960x32xf32>
      %37 = arith.addf %30, %36 : vector<960x32xf32>
      %38 = vector.shape_cast %37 : vector<960x32xf32> to vector<4x240x32xf32>
      %cst_30 = arith.constant dense<0xFF800000> : vector<240x32xf32>
      %39 = vector.multi_reduction <maximumf>, %38, %cst_30 [0] : vector<4x240x32xf32> to vector<240x32xf32>
      %40 = vector.shape_cast %39 : vector<240x32xf32> to vector<60x4x32xf32>
      %cst_31 = arith.constant dense<0xFF800000> : vector<60x32xf32>
      %41 = vector.multi_reduction <maximumf>, %40, %cst_31 [1] : vector<60x4x32xf32> to vector<60x32xf32>
      %42 = vector.broadcast %8 : vector<1x32xf32> to vector<60x32xf32>
      %43 = arith.addf %41, %42 : vector<60x32xf32>
      %cst_32 = arith.constant 0.000000e+00 : f32
      %44 = vector.broadcast %cst_32 : f32 to vector<60x32xf32>
      %45 = arith.maximumf %43, %44 : vector<60x32xf32>
      %46 = vector.shape_cast %45 : vector<60x32xf32> to vector<1x60x32xf32>
      %c0_33 = arith.constant 0 : index
      %47 = arith.index_cast %arg5 : i32 to index
      %c0_34 = arith.constant 0 : index
      %c0_35 = arith.constant 0 : index
      %48 = vector.load %arg4[%c0_33, %47, %c0_34, %c0_35] : memref<1x7x60x32xf32, #tpu.memory_space<vmem>>, vector<1x1x60x32xf32>
      %49 = vector.shape_cast %48 : vector<1x1x60x32xf32> to vector<1x60x32xf32>
      %50 = vector.shape_cast %46 : vector<1x60x32xf32> to vector<1x1x60x32xf32>
      tpu.vector_store %arg4[%c0_33, %47, %c0_34, %c0_35], %50 {strides = array<i32>} : memref<1x7x60x32xf32, #tpu.memory_space<vmem>>, vector<1x1x60x32xf32>,
    }
    %c7_i32_10 = arith.constant 7 : i32
    return
  }
  func.func @transform_0(%arg0: i32) -> (i32, i32, i32, i32) {
    %c0_i32 = arith.constant 0 : i32
    %c0_i32_0 = arith.constant 0 : i32
    %c0_i32_1 = arith.constant 0 : i32
    %c0_i32_2 = arith.constant 0 : i32
    return %arg0, %c0_i32, %c0_i32_0, %c0_i32_1 : i32, i32, i32, i32
  }
  func.func @transform_1(%arg0: i32) -> (i32, i32, i32) {
    %c0_i32 = arith.constant 0 : i32
    %c0_i32_0 = arith.constant 0 : i32
    %c0_i32_1 = arith.constant 0 : i32
    %c0_i32_2 = arith.constant 0 : i32
    return %c0_i32, %c0_i32_0, %c0_i32_1 : i32, i32, i32
  }
  func.func @transform_2(%arg0: i32) -> (i32, i32) {
    %c0_i32 = arith.constant 0 : i32
    %c0_i32_0 = arith.constant 0 : i32
    %c0_i32_1 = arith.constant 0 : i32
    return %c0_i32, %c0_i32_0 : i32, i32
  }
  func.func @transform_3(%arg0: i32) -> (i32, i32, i32, i32) {
    %c0_i32 = arith.constant 0 : i32
    %c0_i32_0 = arith.constant 0 : i32
    %c0_i32_1 = arith.constant 0 : i32
    %c0_i32_2 = arith.constant 0 : i32
    return %arg0, %c0_i32, %c0_i32_0, %c0_i32_1 : i32, i32, i32, i32
  }
}

module attributes {stable_mosaic.version = 11 : i64} {
  func.func @_conv_pool_fc_kernel(%arg0: i32, %arg1: memref<1x9x65x32xf32, #tpu.memory_space<vmem>>, %arg2: memref<4x32x64xf32, #tpu.memory_space<vmem>>, %arg3: memref<1x64xf32, #tpu.memory_space<vmem>>, %arg4: memref<2x64x160xf32, #tpu.memory_space<vmem>>, %arg5: memref<16x160xf32, #tpu.memory_space<vmem>>, %arg6: memref<160x10xf32, #tpu.memory_space<vmem>>, %arg7: memref<1x10xf32, #tpu.memory_space<vmem>>, %arg8: memref<1x1x10xf32, #tpu.memory_space<vmem>>) attributes {dimension_semantics = [#tpu.dimension_semantics<parallel>], iteration_bounds = array<i64: 2>, scalar_prefetch = 0 : i64, scratch_operands = 0 : i64, tpu.core_type = #tpu.core_type<tc>, window_params = [{transform_indices = @transform_0, window_bounds = array<i64: 1, 9, 65, 32>}, {pipeline_mode = #tpu.pipeline_mode<synchronous>, transform_indices = @transform_1, window_bounds = array<i64: 4, 32, 64>}, {pipeline_mode = #tpu.pipeline_mode<synchronous>, transform_indices = @transform_2, window_bounds = array<i64: 1, 64>}, {pipeline_mode = #tpu.pipeline_mode<synchronous>, transform_indices = @transform_3, window_bounds = array<i64: 2, 64, 160>}, {pipeline_mode = #tpu.pipeline_mode<synchronous>, transform_indices = @transform_4, window_bounds = array<i64: 16, 160>}, {pipeline_mode = #tpu.pipeline_mode<synchronous>, transform_indices = @transform_5, window_bounds = array<i64: 160, 10>}, {pipeline_mode = #tpu.pipeline_mode<synchronous>, transform_indices = @transform_6, window_bounds = array<i64: 1, 10>}, {transform_indices = @transform_7, window_bounds = array<i64: 1, 1, 10>}]} {
    %c0 = arith.constant 0 : index
    %c0_0 = arith.constant 0 : index
    %c0_1 = arith.constant 0 : index
    %0 = vector.load %arg2[%c0, %c0_0, %c0_1] : memref<4x32x64xf32, #tpu.memory_space<vmem>>, vector<1x32x64xf32>
    %1 = vector.shape_cast %0 : vector<1x32x64xf32> to vector<32x64xf32>
    %c1 = arith.constant 1 : index
    %c0_2 = arith.constant 0 : index
    %c0_3 = arith.constant 0 : index
    %2 = vector.load %arg2[%c1, %c0_2, %c0_3] : memref<4x32x64xf32, #tpu.memory_space<vmem>>, vector<1x32x64xf32>
    %3 = vector.shape_cast %2 : vector<1x32x64xf32> to vector<32x64xf32>
    %c2 = arith.constant 2 : index
    %c0_4 = arith.constant 0 : index
    %c0_5 = arith.constant 0 : index
    %4 = vector.load %arg2[%c2, %c0_4, %c0_5] : memref<4x32x64xf32, #tpu.memory_space<vmem>>, vector<1x32x64xf32>
    %5 = vector.shape_cast %4 : vector<1x32x64xf32> to vector<32x64xf32>
    %c3 = arith.constant 3 : index
    %c0_6 = arith.constant 0 : index
    %c0_7 = arith.constant 0 : index
    %6 = vector.load %arg2[%c3, %c0_6, %c0_7] : memref<4x32x64xf32, #tpu.memory_space<vmem>>, vector<1x32x64xf32>
    %7 = vector.shape_cast %6 : vector<1x32x64xf32> to vector<32x64xf32>
    %c0_8 = arith.constant 0 : index
    %c0_9 = arith.constant 0 : index
    %8 = vector.load %arg3[%c0_8, %c0_9] : memref<1x64xf32, #tpu.memory_space<vmem>>, vector<1x64xf32>
    %cst = arith.constant 0.000000e+00 : f32
    %9 = vector.broadcast %cst : f32 to vector<16x160xf32>
    %c0_10 = arith.constant 0 : index
    %c0_11 = arith.constant 0 : index
    %c0_12 = arith.constant 0 : index
    %c0_13 = arith.constant 0 : index
    %10 = vector.load %arg1[%c0_10, %c0_11, %c0_12, %c0_13] : memref<1x9x65x32xf32, #tpu.memory_space<vmem>>, vector<1x4x64x32xf32>
    %11 = vector.shape_cast %10 : vector<1x4x64x32xf32> to vector<4x64x32xf32>
    %12 = vector.shape_cast %11 : vector<4x64x32xf32> to vector<256x32xf32>
    %cst_14 = arith.constant dense<0.000000e+00> : vector<256x64xf32>
    %13 = tpu.matmul %12, %1, %cst_14 {dimension_numbers = #tpu.dot_dimension_numbers<[1], [0], [0], [1], [0, 0, 1, 1], [], []>} : vector<256x32xf32>, vector<32x64xf32>, vector<256x64xf32> -> vector<256x64xf32>
    %c0_15 = arith.constant 0 : index
    %c0_16 = arith.constant 0 : index
    %c1_17 = arith.constant 1 : index
    %c0_18 = arith.constant 0 : index
    %14 = vector.load %arg1[%c0_15, %c0_16, %c1_17, %c0_18] : memref<1x9x65x32xf32, #tpu.memory_space<vmem>>, vector<1x4x64x32xf32>
    %15 = vector.shape_cast %14 : vector<1x4x64x32xf32> to vector<4x64x32xf32>
    %16 = vector.shape_cast %15 : vector<4x64x32xf32> to vector<256x32xf32>
    %cst_19 = arith.constant dense<0.000000e+00> : vector<256x64xf32>
    %17 = tpu.matmul %16, %3, %cst_19 {dimension_numbers = #tpu.dot_dimension_numbers<[1], [0], [0], [1], [0, 0, 1, 1], [], []>} : vector<256x32xf32>, vector<32x64xf32>, vector<256x64xf32> -> vector<256x64xf32>
    %18 = arith.addf %13, %17 : vector<256x64xf32>
    %c0_20 = arith.constant 0 : index
    %c1_21 = arith.constant 1 : index
    %c0_22 = arith.constant 0 : index
    %c0_23 = arith.constant 0 : index
    %19 = vector.load %arg1[%c0_20, %c1_21, %c0_22, %c0_23] : memref<1x9x65x32xf32, #tpu.memory_space<vmem>>, vector<1x4x64x32xf32>
    %20 = vector.shape_cast %19 : vector<1x4x64x32xf32> to vector<4x64x32xf32>
    %21 = vector.shape_cast %20 : vector<4x64x32xf32> to vector<256x32xf32>
    %cst_24 = arith.constant dense<0.000000e+00> : vector<256x64xf32>
    %22 = tpu.matmul %21, %5, %cst_24 {dimension_numbers = #tpu.dot_dimension_numbers<[1], [0], [0], [1], [0, 0, 1, 1], [], []>} : vector<256x32xf32>, vector<32x64xf32>, vector<256x64xf32> -> vector<256x64xf32>
    %23 = arith.addf %18, %22 : vector<256x64xf32>
    %c0_25 = arith.constant 0 : index
    %c1_26 = arith.constant 1 : index
    %c1_27 = arith.constant 1 : index
    %c0_28 = arith.constant 0 : index
    %24 = vector.load %arg1[%c0_25, %c1_26, %c1_27, %c0_28] : memref<1x9x65x32xf32, #tpu.memory_space<vmem>>, vector<1x4x64x32xf32>
    %25 = vector.shape_cast %24 : vector<1x4x64x32xf32> to vector<4x64x32xf32>
    %26 = vector.shape_cast %25 : vector<4x64x32xf32> to vector<256x32xf32>
    %cst_29 = arith.constant dense<0.000000e+00> : vector<256x64xf32>
    %27 = tpu.matmul %26, %7, %cst_29 {dimension_numbers = #tpu.dot_dimension_numbers<[1], [0], [0], [1], [0, 0, 1, 1], [], []>} : vector<256x32xf32>, vector<32x64xf32>, vector<256x64xf32> -> vector<256x64xf32>
    %28 = arith.addf %23, %27 : vector<256x64xf32>
    %29 = vector.shape_cast %28 : vector<256x64xf32> to vector<4x64x64xf32>
    %cst_30 = arith.constant dense<0xFF800000> : vector<64x64xf32>
    %30 = vector.multi_reduction <maximumf>, %29, %cst_30 [0] : vector<4x64x64xf32> to vector<64x64xf32>
    %31 = vector.shape_cast %30 : vector<64x64xf32> to vector<16x4x64xf32>
    %cst_31 = arith.constant dense<0xFF800000> : vector<16x64xf32>
    %32 = vector.multi_reduction <maximumf>, %31, %cst_31 [1] : vector<16x4x64xf32> to vector<16x64xf32>
    %33 = vector.broadcast %8 : vector<1x64xf32> to vector<16x64xf32>
    %34 = arith.addf %32, %33 : vector<16x64xf32>
    %cst_32 = arith.constant 0.000000e+00 : f32
    %35 = vector.broadcast %cst_32 : f32 to vector<16x64xf32>
    %36 = arith.maximumf %34, %35 : vector<16x64xf32>
    %c0_33 = arith.constant 0 : index
    %c0_34 = arith.constant 0 : index
    %c0_35 = arith.constant 0 : index
    %37 = vector.load %arg4[%c0_33, %c0_34, %c0_35] : memref<2x64x160xf32, #tpu.memory_space<vmem>>, vector<1x64x160xf32>
    %38 = vector.shape_cast %37 : vector<1x64x160xf32> to vector<64x160xf32>
    %cst_36 = arith.constant dense<0.000000e+00> : vector<16x160xf32>
    %39 = tpu.matmul %36, %38, %cst_36 {dimension_numbers = #tpu.dot_dimension_numbers<[1], [0], [0], [1], [0, 0, 1, 1], [], []>} : vector<16x64xf32>, vector<64x160xf32>, vector<16x160xf32> -> vector<16x160xf32>
    %40 = arith.addf %9, %39 : vector<16x160xf32>
    %c0_37 = arith.constant 0 : index
    %c4 = arith.constant 4 : index
    %c0_38 = arith.constant 0 : index
    %c0_39 = arith.constant 0 : index
    %41 = vector.load %arg1[%c0_37, %c4, %c0_38, %c0_39] : memref<1x9x65x32xf32, #tpu.memory_space<vmem>>, vector<1x4x64x32xf32>
    %42 = vector.shape_cast %41 : vector<1x4x64x32xf32> to vector<4x64x32xf32>
    %43 = vector.shape_cast %42 : vector<4x64x32xf32> to vector<256x32xf32>
    %cst_40 = arith.constant dense<0.000000e+00> : vector<256x64xf32>
    %44 = tpu.matmul %43, %1, %cst_40 {dimension_numbers = #tpu.dot_dimension_numbers<[1], [0], [0], [1], [0, 0, 1, 1], [], []>} : vector<256x32xf32>, vector<32x64xf32>, vector<256x64xf32> -> vector<256x64xf32>
    %c0_41 = arith.constant 0 : index
    %c4_42 = arith.constant 4 : index
    %c1_43 = arith.constant 1 : index
    %c0_44 = arith.constant 0 : index
    %45 = vector.load %arg1[%c0_41, %c4_42, %c1_43, %c0_44] : memref<1x9x65x32xf32, #tpu.memory_space<vmem>>, vector<1x4x64x32xf32>
    %46 = vector.shape_cast %45 : vector<1x4x64x32xf32> to vector<4x64x32xf32>
    %47 = vector.shape_cast %46 : vector<4x64x32xf32> to vector<256x32xf32>
    %cst_45 = arith.constant dense<0.000000e+00> : vector<256x64xf32>
    %48 = tpu.matmul %47, %3, %cst_45 {dimension_numbers = #tpu.dot_dimension_numbers<[1], [0], [0], [1], [0, 0, 1, 1], [], []>} : vector<256x32xf32>, vector<32x64xf32>, vector<256x64xf32> -> vector<256x64xf32>
    %49 = arith.addf %44, %48 : vector<256x64xf32>
    %c0_46 = arith.constant 0 : index
    %c5 = arith.constant 5 : index
    %c0_47 = arith.constant 0 : index
    %c0_48 = arith.constant 0 : index
    %50 = vector.load %arg1[%c0_46, %c5, %c0_47, %c0_48] : memref<1x9x65x32xf32, #tpu.memory_space<vmem>>, vector<1x4x64x32xf32>
    %51 = vector.shape_cast %50 : vector<1x4x64x32xf32> to vector<4x64x32xf32>
    %52 = vector.shape_cast %51 : vector<4x64x32xf32> to vector<256x32xf32>
    %cst_49 = arith.constant dense<0.000000e+00> : vector<256x64xf32>
    %53 = tpu.matmul %52, %5, %cst_49 {dimension_numbers = #tpu.dot_dimension_numbers<[1], [0], [0], [1], [0, 0, 1, 1], [], []>} : vector<256x32xf32>, vector<32x64xf32>, vector<256x64xf32> -> vector<256x64xf32>
    %54 = arith.addf %49, %53 : vector<256x64xf32>
    %c0_50 = arith.constant 0 : index
    %c5_51 = arith.constant 5 : index
    %c1_52 = arith.constant 1 : index
    %c0_53 = arith.constant 0 : index
    %55 = vector.load %arg1[%c0_50, %c5_51, %c1_52, %c0_53] : memref<1x9x65x32xf32, #tpu.memory_space<vmem>>, vector<1x4x64x32xf32>
    %56 = vector.shape_cast %55 : vector<1x4x64x32xf32> to vector<4x64x32xf32>
    %57 = vector.shape_cast %56 : vector<4x64x32xf32> to vector<256x32xf32>
    %cst_54 = arith.constant dense<0.000000e+00> : vector<256x64xf32>
    %58 = tpu.matmul %57, %7, %cst_54 {dimension_numbers = #tpu.dot_dimension_numbers<[1], [0], [0], [1], [0, 0, 1, 1], [], []>} : vector<256x32xf32>, vector<32x64xf32>, vector<256x64xf32> -> vector<256x64xf32>
    %59 = arith.addf %54, %58 : vector<256x64xf32>
    %60 = vector.shape_cast %59 : vector<256x64xf32> to vector<4x64x64xf32>
    %cst_55 = arith.constant dense<0xFF800000> : vector<64x64xf32>
    %61 = vector.multi_reduction <maximumf>, %60, %cst_55 [0] : vector<4x64x64xf32> to vector<64x64xf32>
    %62 = vector.shape_cast %61 : vector<64x64xf32> to vector<16x4x64xf32>
    %cst_56 = arith.constant dense<0xFF800000> : vector<16x64xf32>
    %63 = vector.multi_reduction <maximumf>, %62, %cst_56 [1] : vector<16x4x64xf32> to vector<16x64xf32>
    %64 = vector.broadcast %8 : vector<1x64xf32> to vector<16x64xf32>
    %65 = arith.addf %63, %64 : vector<16x64xf32>
    %cst_57 = arith.constant 0.000000e+00 : f32
    %66 = vector.broadcast %cst_57 : f32 to vector<16x64xf32>
    %67 = arith.maximumf %65, %66 : vector<16x64xf32>
    %c1_58 = arith.constant 1 : index
    %c0_59 = arith.constant 0 : index
    %c0_60 = arith.constant 0 : index
    %68 = vector.load %arg4[%c1_58, %c0_59, %c0_60] : memref<2x64x160xf32, #tpu.memory_space<vmem>>, vector<1x64x160xf32>
    %69 = vector.shape_cast %68 : vector<1x64x160xf32> to vector<64x160xf32>
    %cst_61 = arith.constant dense<0.000000e+00> : vector<16x160xf32>
    %70 = tpu.matmul %67, %69, %cst_61 {dimension_numbers = #tpu.dot_dimension_numbers<[1], [0], [0], [1], [0, 0, 1, 1], [], []>} : vector<16x64xf32>, vector<64x160xf32>, vector<16x160xf32> -> vector<16x160xf32>
    %71 = arith.addf %40, %70 : vector<16x160xf32>
    %c0_62 = arith.constant 0 : index
    %c0_63 = arith.constant 0 : index
    %72 = vector.load %arg5[%c0_62, %c0_63] : memref<16x160xf32, #tpu.memory_space<vmem>>, vector<16x160xf32>
    %73 = arith.mulf %71, %72 : vector<16x160xf32>
    %cst_64 = arith.constant dense<0.000000e+00> : vector<160xf32>
    %74 = vector.multi_reduction <add>, %73, %cst_64 [0] : vector<16x160xf32> to vector<160xf32>
    %75 = vector.shape_cast %74 : vector<160xf32> to vector<1x160xf32>
    %c0_65 = arith.constant 0 : index
    %c0_66 = arith.constant 0 : index
    %76 = vector.load %arg6[%c0_65, %c0_66] : memref<160x10xf32, #tpu.memory_space<vmem>>, vector<160x10xf32>
    %cst_67 = arith.constant dense<0.000000e+00> : vector<1x10xf32>
    %77 = tpu.matmul %75, %76, %cst_67 {dimension_numbers = #tpu.dot_dimension_numbers<[1], [0], [0], [1], [0, 0, 1, 1], [], []>} : vector<1x160xf32>, vector<160x10xf32>, vector<1x10xf32> -> vector<1x10xf32>
    %c0_68 = arith.constant 0 : index
    %c0_69 = arith.constant 0 : index
    %78 = vector.load %arg7[%c0_68, %c0_69] : memref<1x10xf32, #tpu.memory_space<vmem>>, vector<1x10xf32>
    %79 = arith.addf %77, %78 : vector<1x10xf32>
    %c0_70 = arith.constant 0 : index
    %c0_71 = arith.constant 0 : index
    %c0_72 = arith.constant 0 : index
    %80 = vector.load %arg8[%c0_70, %c0_71, %c0_72] : memref<1x1x10xf32, #tpu.memory_space<vmem>>, vector<1x1x10xf32>
    %81 = vector.shape_cast %80 : vector<1x1x10xf32> to vector<1x10xf32>
    %82 = vector.shape_cast %79 : vector<1x10xf32> to vector<1x1x10xf32>
    tpu.vector_store %arg8[%c0_70, %c0_71, %c0_72], %82 {strides = array<i32>} : memref<1x1x10xf32, #tpu.memory_space<vmem>>, vector<1x1x10xf32>,
    return
  }
  func.func @transform_0(%arg0: i32) -> (i32, i32, i32, i32) {
    %c0_i32 = arith.constant 0 : i32
    %c0_i32_0 = arith.constant 0 : i32
    %c0_i32_1 = arith.constant 0 : i32
    %c0_i32_2 = arith.constant 0 : i32
    return %arg0, %c0_i32, %c0_i32_0, %c0_i32_1 : i32, i32, i32, i32
  }
  func.func @transform_1(%arg0: i32) -> (i32, i32, i32) {
    %c0_i32 = arith.constant 0 : i32
    %c0_i32_0 = arith.constant 0 : i32
    %c0_i32_1 = arith.constant 0 : i32
    %c0_i32_2 = arith.constant 0 : i32
    return %c0_i32, %c0_i32_0, %c0_i32_1 : i32, i32, i32
  }
  func.func @transform_2(%arg0: i32) -> (i32, i32) {
    %c0_i32 = arith.constant 0 : i32
    %c0_i32_0 = arith.constant 0 : i32
    %c0_i32_1 = arith.constant 0 : i32
    return %c0_i32, %c0_i32_0 : i32, i32
  }
  func.func @transform_3(%arg0: i32) -> (i32, i32, i32) {
    %c0_i32 = arith.constant 0 : i32
    %c0_i32_0 = arith.constant 0 : i32
    %c0_i32_1 = arith.constant 0 : i32
    %c0_i32_2 = arith.constant 0 : i32
    return %c0_i32, %c0_i32_0, %c0_i32_1 : i32, i32, i32
  }
  func.func @transform_4(%arg0: i32) -> (i32, i32) {
    %c0_i32 = arith.constant 0 : i32
    %c0_i32_0 = arith.constant 0 : i32
    %c0_i32_1 = arith.constant 0 : i32
    return %c0_i32, %c0_i32_0 : i32, i32
  }
  func.func @transform_5(%arg0: i32) -> (i32, i32) {
    %c0_i32 = arith.constant 0 : i32
    %c0_i32_0 = arith.constant 0 : i32
    %c0_i32_1 = arith.constant 0 : i32
    return %c0_i32, %c0_i32_0 : i32, i32
  }
  func.func @transform_6(%arg0: i32) -> (i32, i32) {
    %c0_i32 = arith.constant 0 : i32
    %c0_i32_0 = arith.constant 0 : i32
    %c0_i32_1 = arith.constant 0 : i32
    return %c0_i32, %c0_i32_0 : i32, i32
  }
  func.func @transform_7(%arg0: i32) -> (i32, i32, i32) {
    %c0_i32 = arith.constant 0 : i32
    %c0_i32_0 = arith.constant 0 : i32
    %c0_i32_1 = arith.constant 0 : i32
    return %arg0, %c0_i32, %c0_i32_0 : i32, i32, i32
  }
}

</mosaic_0001>

<bundles_post_ra>
// kernel: audio_cnn_forward.3
= control target key start
LH: loop header
LB: loop body
LE: loop exit
PB: predicated region body
PF: predicated region fallthrough
CT: control target
= control target key end

     0   :  { %s1474_s12 = smov 0   ;;  %s2419_s0 = inlined_call_operand.vmem [shape: f32[2,4,109,236], index: 0, kind: input, shape index: {}]   ;;  %s2420_s1 = inlined_call_operand.vmem [shape: f32[16,4], index: 1, kind: input, shape index: {}]   ;;  %s2421_s2 = inlined_call_operand.vmem [shape: f32[16,1], index: 2, kind: input, shape index: {}]   ;;  %s2422_s3 = inlined_call_operand.vmem [shape: f32[2,27,16,235], index: 3, kind: output, shape index: {}]  }
   0x1 LB: > { %s1345_s13 = sadd.s32 4294967295, %s1443_s12   ;;  %p1349_p0 = scmp.ge.s32.totalorder %s1443_s12, 1  ;;  %s1443_s12 = sphi %s1474_s12, %s13_s12  }
   0x2   : > { %p137_p1 = scmp.lt.s32.totalorder %s1443_s12, 3 }
   0x4   : > { %p138_p2 = pnand %p1349_p0, %p137_p1 }
   0x5   : > { %v171_v0 = vld [vmem:[%s2420_s1] sm:$0xff] (!%p138_p2)  ;;  %v1449_v1 = vmov (!%p138_p2), 1   ;;  %v1450_v2 = vmov (!%p138_p2), 0   ;;  %v172_v3 = vld [vmem:[%s2420_s1 + $0x8] sm:$0xff] (!%p138_p2)  ;;  %v1451_v4 = vmov (!%p138_p2), 2   ;;  %v1452_v5 = vmov (!%p138_p2), 3  }
   0x6   : > { %141 = sbr.rel (%p138_p2) target bundleno = 355 (0x163), region = 32  ;;  %1426 = vset.pattern.permute.xlu1 (!%p138_p2), %v1449_v1  ;;  %1425 = vset.pattern.permute.xlu0 (!%p138_p2), %v1450_v2  ;;  %v207_v6 = vld [vmem:[%s2421_s2] sm:$0xff] (!%p138_p2)  ;;  %p161_p3 = scmp.lt.s32.totalorder (!%p138_p2), %s1345_s13, 1  ;;  %v208_v7 = vld [vmem:[%s2421_s2 + $0x8] sm:$0xff] (!%p138_p2) }
   0x7   : > { %184 = vperm.xlu1 (!%p138_p2), %1426, %v171_v0   ;;  %175 = vperm.xlu0 (!%p138_p2), %1425, %v171_v0   ;;  %s1524_s30 = smov (!%p138_p2), 0  }
   0xb   : > { %188 = vperm.xlu1 (!%p138_p2), %1426, %v172_v3   ;;  %180 = vperm.xlu0 (!%p138_p2), %1425, %v172_v3  }
   0xd   : > { %s2490_s13 = smov (!%p161_p3, %s1345_s13), 1 }
   0xe   : > { %s1402_s22 = smul.u32 896, %s2490_s13 }
   0xf   : > { %1428 = vset.pattern.permute.xlu1 %v1451_v4  ;;  %1427 = vset.pattern.permute.xlu0 %v1451_v4  ;;  %s1403_s23 = smul.u32 864, %s2490_s13 }
  0x10   : > { %196 = vperm.xlu1 %1428, %v172_v3   ;;  %192 = vperm.xlu0 %1427, %v171_v0   ;;  %s1497_s26 = scalar_lea.vmem %s2419_s0, %s1402_s22 }
  0x11   : > { %s1502_s29 = scalar_lea.vmem %s2422_s3, %s1403_s23 }
  0x14   : > { %1429 = vset.pattern.permute.xlu1 %v1452_v5  ;;  %1430 = vset.pattern.permute.xlu0 %v1452_v5 }
  0x15   : > { %200 = vperm.xlu1 %1429, %v171_v0   ;;  %204 = vperm.xlu0 %1430, %v172_v3  }
  0x19   : > { %1431 = vset.pattern.permute.xlu1 %v1450_v2  ;;  %1432 = vset.pattern.permute.xlu0 %v1450_v2 }
  0x1a   : > { %211 = vperm.xlu1 %1431, %v207_v6  }
  0x1e   : > { %216 = vperm.xlu1 %1431, %v208_v7  }
  0x86   : > { %v1504_v8 = vpop.permute.xlu1 %184  ;;  %v1506_v9 = vpop.permute.xlu0 %175 }
  0x87   : > { %2435 = vst [vmem:[#allocation2_spill] sm:$0xff] %v1504_v8 }
  0x8a   : > { %v1508_v10 = vpop.permute.xlu1 %188  ;;  %v1510_v11 = vpop.permute.xlu0 %180 }
  0x8b   : > { %2436 = vst [vmem:[#allocation3_spill] sm:$0xff] %v1508_v10 }
  0x8f   : > { %v1512_v12 = vpop.permute.xlu1 %196  ;;  %v1514_v13 = vpop.permute.xlu0 %192 }
  0x94   : > { %v1516_v14 = vpop.permute.xlu1 %200  ;;  %v1518_v15 = vpop.permute.xlu0 %204 }
  0x95   : > { %2437 = vst [vmem:[#allocation4_spill] sm:$0xff] %v1516_v14  ;;  %2438 = vst [vmem:[#allocation5_spill] sm:$0xff] %v1518_v15 }
  0x99   : > { %v1520_v16 = vpop.permute.xlu1 %211 }
  0x9a   : > { %2439 = vst [vmem:[#allocation6_spill] sm:$0xff] %v1520_v16 }
  0x9d   : > { %v1522_v17 = vpop.permute.xlu1 %216 }
  0x9e   : > { %2440 = vst [vmem:[#allocation7_spill] sm:$0xff] %v1522_v17 }
  0x9f LB: >> { %v2441_v15 = vld [vmem:[#allocation5_spill] sm:$0xff]  ;;  %v2442_v14 = vld [vmem:[#allocation4_spill] sm:$0xff]  ;;  %v2443_v10 = vld [vmem:[#allocation3_spill] sm:$0xff]  ;;  %v236_v18 = vlaneseq  ;;  %s1530_s4 = sshll.u32 %s1447_s30, 2  ;;  %s1453_s22 = smov 127   ;;  %vm463_vm0 = vcmask 1039360   ;;  %s1447_s30 = sphi %s1524_s30, %s224_s30  }
  0xa0   : >> { %v2444_v8 = vld [vmem:[#allocation2_spill] sm:$0xff]  ;;  %s226_s5 = sshra.s32 %s1530_s4, 3  ;;  %s229_s6 = sand.u32 7, %s1530_s4  ;;  %vm1204_vm1 = vcmask 875520  }
  0xa1   : >> { %v237_v19 = vshrl.u32 %v236_v18, 7  ;;  %s1396_s7 = sshll.u32 %s226_s5, 4  ;;  %s272_s8 = sadd.s32 1, %s1530_s4 }
  0xa2   : >> { %s232_s9 = sadd.s32 %s1396_s7, %s229_s6  ;;  %s273_s10 = sshra.s32 %s272_s8, 3 }
  0xa3   : >> { %v1534_v20 = vsub.s32 0, %v237_v19  ;;  %v1536_v21 = vsub.s32 1, %v237_v19  ;;  %s233_s11 = scalar_lea.vmem %s1497_s26, %s232_s9  ;;  %s276_s13 = sand.u32 7, %s272_s8 }
  0xa4   : >> { %v234_v22 = vld [vmem:[%s233_s11] ss:$8 sm:$0x3]  ;;  %s1397_s14 = sshll.u32 %s273_s10, 4  ;;  %s524_s15 = sadd.s32 2, %s1530_s4 }
  0xa5   : >> { %2445 = vst [vmem:[#allocation8_spill] sm:$0xff] %v1536_v21  ;;  %v1356_v23 = vld [vmem:[%s233_s11 + $0xe0] ss:$8 sm:$0x3]  ;;  %v1541_v24 = vrot.slane %v234_v22, %v1534_v20  ;;  %v1544_v25 = vrot.slane %v234_v22, %v1536_v21  ;;  %s279_s16 = sadd.s32 %s1397_s14, %s276_s13  ;;  %s525_s17 = sshra.s32 %s524_s15, 3 }
  0xa6   : >> { %v1547_v26 = vrot.slane %v1356_v23, %v1536_v21  ;;  %s1551_s18 = scalar_lea.vmem %s1497_s26, %s279_s16  ;;  %s528_s19 = sand.u32 7, %s524_s15  ;;  %v1362_v29 = vld [vmem:[%s233_s11 + $0x1c0] ss:$8 sm:$0x3]  ;;  %v1581_v41 = vrot.slane %v1356_v23, %v1534_v20 }
  0xa7   : >> { %v449_v27 = vmul.f32 %v1541_v24, %v2443_v10  ;;  %v447_v28 = vmul.f32 %v1541_v24, %v2444_v8  ;;  %v1366_v30 = vld [vmem:[%s233_s11 + $0x2a0] ss:$8 sm:$0x3]  ;;  %v247_v31 = vmul.f32 %v1544_v25, %v1506_v9  ;;  %s1398_s20 = sshll.u32 %s525_s17, 4  ;;  %s751_s21 = sadd.s32 3, %s1530_s4  ;;  %v450_v33 = vmul.f32 %v1544_v25, %v2443_v10 }
  0xa8   : >> { %v265_v32 = vmul.f32 %v1547_v26, %v2444_v8  ;;  %v281_v34 = vld [vmem:[%s1551_s18] ss:$8 sm:$0x3]  ;;  %s531_s23 = sadd.s32 %s1398_s20, %s528_s19  ;;  %s752_s24 = sshra.s32 %s751_s21, 3  ;;  %v448_v36 = vmul.f32 %v1544_v25, %v2444_v8  ;;  %v1584_v42 = vrot.slane %v1362_v29, %v1534_v20  ;;  %v1591_v45 = vrot.slane %v1362_v29, %v1536_v21 }
  0xa9   : >> { %459 = vrot.lane.b32.xlu1 %v449_v27, %s1453_s22  ;;  %v1360_v35 = vld [vmem:[%s1551_s18 + $0xe0] ss:$8 sm:$0x3]  ;;  %455 = vrot.lane.b32.xlu0 %v447_v28, %s1453_s22  ;;  %v1571_v37 = vrot.slane %v281_v34, %v1536_v21  ;;  %v1574_v38 = vrot.slane %v281_v34, %v1534_v20  ;;  %s1578_s25 = scalar_lea.vmem %s1497_s26, %s531_s23  ;;  %s755_s27 = sand.u32 7, %s751_s21  ;;  %v1599_v48 = vrot.slane %v1366_v30, %v1534_v20 }
  0xaa   : >> { %v1364_v39 = vld [vmem:[%s1551_s18 + $0x1c0] ss:$8 sm:$0x3]  ;;  %v269_v40 = vadd.f32 %v265_v32, %v247_v31  ;;  %v1588_v44 = vrot.slane %v1360_v35, %v1536_v21  ;;  %s1399_s28 = sshll.u32 %s752_s24, 4  ;;  %s978_s5 = sadd.s32 4, %s1530_s4  ;;  %v1602_v49 = vrot.slane %v1360_v35, %v1534_v20  ;;  %v1612_v53 = vrot.slane %v1366_v30, %v1536_v21 }
  0xab   : >> { %v1372_v43 = vld [vmem:[%s1578_s25 + $0xe0] ss:$8 sm:$0x3]  ;;  %v483_v47 = vmul.f32 %v1571_v37, %v2442_v14  ;;  %v1605_v50 = vrot.slane %v1364_v39, %v1534_v20  ;;  %s758_s6 = sadd.s32 %s1399_s28, %s755_s27  ;;  %v482_v51 = vmul.f32 %v1574_v38, %v2442_v14  ;;  %s979_s7 = sshra.s32 %s978_s5, 3  ;;  %v1615_v54 = vrot.slane %v1364_v39, %v1536_v21 }
  0xac   : >> { %v1374_v46 = vld [vmem:[%s1578_s25 + $0x1c0] ss:$8 sm:$0x3]  ;;  %s1618_s4 = scalar_lea.vmem %s1497_s26, %s758_s6  ;;  %v485_v55 = vmul.f32 %v1571_v37, %v2441_v15  ;;  %v484_v56 = vmul.f32 %v1574_v38, %v2441_v15  ;;  %s982_s8 = sand.u32 7, %s978_s5  ;;  %v316_v57 = vmul.f32 %v1588_v44, %v2442_v14  ;;  %v1627_v58 = vrot.slane %v1372_v43, %v1534_v20 }
  0xad   : >> { %461 = vrot.lane.b32.xlu1 %v450_v33, %s1453_s22  ;;  %457 = vrot.lane.b32.xlu0 %v448_v36, %s1453_s22  ;;  %v533_v52 = vld [vmem:[%s1578_s25] ss:$8 sm:$0x3]  ;;  %v1630_v59 = vrot.slane %v1372_v43, %v1536_v21  ;;  %v1633_v60 = vrot.slane %v1374_v46, %v1534_v20  ;;  %v294_v62 = vmul.f32 %v1571_v37, %v1514_v13  ;;  %s1400_s9 = sshll.u32 %s979_s7, 4  ;;  %s1401_s13 = sshll.u32 %s1447_s30, 5 }
  0xae   : >> { %v1380_v61 = vld [vmem:[%s1618_s4 + $0xe0] ss:$8 sm:$0x3]  ;;  %v1639_v63 = vrot.slane %v1374_v46, %v1536_v21  ;;  %v1643_v0 = vrot.slane %v533_v52, %v1536_v21  ;;  %v324_v2 = vmul.f32 %v1547_v26, %v1506_v9  ;;  %v342_v3 = vmul.f32 %v1591_v45, %v2444_v8  ;;  %s985_s10 = sadd.s32 %s1400_s9, %s982_s8  ;;  %s1202_s14 = scalar_lea.vmem %s1502_s29, %s1401_s13 }
  0xaf   : >> { %2446 = vst [vmem:[#allocation9_spill] sm:$0xff] %v1633_v60  ;;  %v760_v1 = vld [vmem:[%s1618_s4] ss:$8 sm:$0x3]  ;;  %v676_v4 = vmul.f32 %v1571_v37, %v2444_v8  ;;  %v675_v5 = vmul.f32 %v1574_v38, %v2444_v8  ;;  %v678_v6 = vmul.f32 %v1571_v37, %v2443_v10  ;;  %v1658_v7 = vrot.slane %v533_v52, %v1534_v20  ;;  %s1663_s11 = scalar_lea.vmem %s1497_s26, %s985_s10  ;;  %s224_s30 = sadd.s32 1, %s1447_s30  }
  0xb0   : >> { %2447 = vst [vmem:[#allocation10_spill] sm:$0xff] %v1639_v63  ;;  %v677_v18 = vmul.f32 %v1574_v38, %v2443_v10  ;;  %v350_v19 = vmul.f32 %v1588_v44, %v1514_v13  ;;  %v372_v22 = vmul.f32 %v1615_v54, %v2442_v14  ;;  %v384_v23 = vmul.f32 %v1591_v45, %v1506_v9  ;;  %v987_v33 = vld [vmem:[%s1663_s11] ss:$8 sm:$0x3]  ;;  %p221_p4 = scmp.ge.s32.totalorder %s224_s30, 27  }
  0xb1   : >> { %492 = vrot.lane.b32.xlu1 %v483_v47, %s1453_s22  ;;  %490 = vrot.lane.b32.xlu0 %v482_v51, %s1453_s22  ;;  %v1672_v27 = vrot.slane %v1380_v61, %v1534_v20  ;;  %v1675_v28 = vrot.slane %v760_v1, %v1536_v21  ;;  %v1678_v29 = vrot.slane %v760_v1, %v1534_v20  ;;  %v1368_v46 = vld [vmem:[%s1551_s18 + $0x2a0] ss:$8 sm:$0x3] }
  0xb2   : >> { %v298_v30 = vadd.f32 %v294_v62, %v269_v40  ;;  %v1681_v31 = vrot.slane %v1380_v61, %v1536_v21  ;;  %v710_v32 = vmul.f32 %v1643_v0, %v2442_v14  ;;  %v346_v34 = vadd.f32 %v342_v3, %v324_v2 }
  0xb3   : >> { %2448 = vst [vmem:[#allocation11_spill] sm:$0xff] %v1672_v27  ;;  %v402_v35 = vmul.f32 %v1612_v53, %v2444_v8  ;;  %v709_v36 = vmul.f32 %v1658_v7, %v2442_v14  ;;  %v1694_v39 = vmul.f32 %v1643_v0, %v2441_v15  ;;  %v1698_v40 = vmul.f32 %v1658_v7, %v2441_v15 }
  0xb4   : >> { %2449 = vst [vmem:[#allocation12_spill] sm:$0xff] %v1681_v31  ;;  %v1702_v43 = vmul.f32 %v1643_v0, %v2444_v8  ;;  %v1707_v47 = vmul.f32 %v1658_v7, %v2444_v8  ;;  %v1711_v51 = vmul.f32 %v1643_v0, %v2443_v10  ;;  %v1715_v52 = vmul.f32 %v1658_v7, %v2443_v10 }
  0xb5   : >> { %496 = vrot.lane.b32.xlu1 %v485_v55, %s1453_s22  ;;  %494 = vrot.lane.b32.xlu0 %v484_v56, %s1453_s22  ;;  %v410_v55 = vmul.f32 %v1615_v54, %v1514_v13  ;;  %v1721_v56 = vmul.f32 %v1675_v28, %v2442_v14  ;;  %v1725_v61 = vmul.f32 %v1678_v29, %v2442_v14 }
  0xb6   : >> { %v1728_v62 = vrot.slane %v987_v33, %v1536_v21  ;;  %v1731_v1 = vrot.slane %v987_v33, %v1534_v20  ;;  %v320_v2 = vadd.f32 %v316_v57, %v298_v30  ;;  %v354_v3 = vadd.f32 %v350_v19, %v346_v34 }
  0xb7   : >> { %v406_v17 = vadd.f32 %v402_v35, %v384_v23  ;;  %v1735_v16 = vrot.slane %v1368_v46, %v1536_v21  ;;  %v1740_v27 = vmul.f32 %v1675_v28, %v2441_v15  ;;  %v513_v60 = vmul.f32 %v1571_v37, %v1506_v9 }
  0xb8   : >> { %v517_v33 = vmul.f32 %v1588_v44, %v2444_v8  ;;  %v546_v57 = vmul.f32 %v1643_v0, %v1514_v13  ;;  %v376_v19 = vadd.f32 %v372_v22, %v354_v3  ;;  %v568_v34 = vmul.f32 %v1630_v59, %v2442_v14 }
  0xb9   : >> { %685 = vrot.lane.b32.xlu1 %v676_v4, %s1453_s22  ;;  %683 = vrot.lane.b32.xlu0 %v675_v5, %s1453_s22  ;;  %v1750_v4 = vmul.f32 %v1678_v29, %v2441_v15  ;;  %v414_v23 = vadd.f32 %v410_v55, %v406_v17  ;;  %v432_v5 = vmul.f32 %v1735_v16, %v2442_v14 }
  0xba   : >> { %v521_v30 = vadd.f32 %v517_v33, %v513_v60  ;;  %v264_v35 = vmul.f32 %v1581_v41, %v2444_v8  ;;  %v293_v31 = vmul.f32 %v1574_v38, %v1514_v13  ;;  %v380_v21 = vmax.f32 %v320_v2, %v376_v19 }
  0xbb   : >> { %v436_v63 = vadd.f32 %v432_v5, %v414_v23  ;;  %v323_v17 = vmul.f32 %v1581_v41, %v1506_v9  ;;  %v341_v22 = vmul.f32 %v1584_v42, %v2444_v8  ;;  %v349_v55 = vmul.f32 %v1602_v49, %v1514_v13 }
  0xbc   : >> { %v550_v60 = vadd.f32 %v546_v57, %v521_v30  ;;  %v371_v3 = vmul.f32 %v1605_v50, %v2442_v14  ;;  %v401_v19 = vmul.f32 %v1599_v48, %v2444_v8  ;;  %v409_v23 = vmul.f32 %v1605_v50, %v1514_v13 }
  0xbd   : >> { %689 = vrot.lane.b32.xlu1 %v678_v6, %s1453_s22  ;;  %687 = vrot.lane.b32.xlu0 %v677_v18, %s1453_s22  ;;  %v383_v6 = vmul.f32 %v1584_v42, %v1506_v9  ;;  %v1772_v2 = vmax.f32 %v380_v21, %v436_v63  ;;  %v345_v33 = vadd.f32 %v341_v22, %v323_v17 }
  0xbe   : >> { %v1778_v18 = vadd.f32 %v568_v34, %v550_v60  ;;  %v1781_v57 = vrot.slane %v1368_v46, %v1534_v20  ;;  %v512_v5 = vmul.f32 %v1574_v38, %v1506_v9  ;;  %v516_v30 = vmul.f32 %v1602_v49, %v2444_v8 }
  0xbf   : >> { %2450 = vst [vmem:[#allocation13_spill] sm:$0xff] %v1772_v2  ;;  %v315_v21 = vmul.f32 %v1602_v49, %v2442_v14  ;;  %v353_v63 = vadd.f32 %v349_v55, %v345_v33  ;;  %v405_v17 = vadd.f32 %v401_v19, %v383_v6  ;;  %v545_v34 = vmul.f32 %v1658_v7, %v1514_v13 }
  0xc0   : >> { %2451 = vst [vmem:[#allocation14_spill] sm:$0xff] %v1778_v18  ;;  %v431_v46 = vmul.f32 %v1781_v57, %v2442_v14  ;;  %v520_v22 = vadd.f32 %v516_v30, %v512_v5  ;;  %v567_v60 = vmul.f32 %v1627_v58, %v2442_v14  ;;  %v249_v55 = vmul.f32 %v1544_v25, %v1510_v11 }
  0xc1   : >> { %719 = vrot.lane.b32.xlu1 %v710_v32, %s1453_s22  ;;  %717 = vrot.lane.b32.xlu0 %v709_v36, %s1453_s22  ;;  %v246_v32 = vmul.f32 %v1541_v24, %v1506_v9  ;;  %v375_v18 = vadd.f32 %v371_v3, %v353_v63  ;;  %v413_v2 = vadd.f32 %v409_v23, %v405_v17 }
  0xc2   : >> { %v267_v6 = vmul.f32 %v1547_v26, %v2443_v10  ;;  %v549_v33 = vadd.f32 %v545_v34, %v520_v22  ;;  %v296_v19 = vmul.f32 %v1571_v37, %v1512_v12  ;;  %v318_v5 = vmul.f32 %v1588_v44, %v2441_v15 }
  0xc3   : >> { %v268_v36 = vadd.f32 %v264_v35, %v246_v32  ;;  %v435_v30 = vadd.f32 %v431_v46, %v413_v2  ;;  %v326_v23 = vmul.f32 %v1547_v26, %v1510_v11  ;;  %v344_v25 = vmul.f32 %v1591_v45, %v2443_v10 }
  0xc4   : >> { %v271_v3 = vadd.f32 %v267_v6, %v249_v55  ;;  %v1815_v35 = vadd.f32 %v567_v60, %v549_v33  ;;  %v352_v17 = vmul.f32 %v1588_v44, %v1512_v12  ;;  %v386_v26 = vmul.f32 %v1591_v45, %v1510_v11 }
  0xc5   : >> { %723 = vrot.lane.b32.xlu1 %v1694_v39, %s1453_s22  ;;  %721 = vrot.lane.b32.xlu0 %v1698_v40, %s1453_s22  ;;  %v297_v63 = vadd.f32 %v293_v31, %v268_v36  ;;  %v374_v39 = vmul.f32 %v1615_v54, %v2441_v15  ;;  %v348_v34 = vadd.f32 %v344_v25, %v326_v23 }
  0xc6   : >> { %v300_v2 = vadd.f32 %v296_v19, %v271_v3  ;;  %v404_v46 = vmul.f32 %v1612_v53, %v2443_v10  ;;  %v1827_v40 = vmul.f32 %v1675_v28, %v2444_v8  ;;  %v412_v31 = vmul.f32 %v1615_v54, %v1512_v12 }
  0xc7   : >> { %v319_v22 = vadd.f32 %v315_v21, %v297_v63  ;;  %v434_v60 = vmul.f32 %v1735_v16, %v2441_v15  ;;  %v356_v55 = vadd.f32 %v352_v17, %v348_v34  ;;  %v515_v6 = vmul.f32 %v1571_v37, %v1510_v11 }
  0xc8   : >> { %v322_v32 = vadd.f32 %v318_v5, %v300_v2  ;;  %v408_v45 = vadd.f32 %v404_v46, %v386_v26  ;;  %v1841_v21 = vmul.f32 %v1678_v29, %v2444_v8  ;;  %v519_v36 = vmul.f32 %v1588_v44, %v2443_v10 }
  0xc9   : >> { %912 = vrot.lane.b32.xlu1 %v1702_v43, %s1453_s22  ;;  %910 = vrot.lane.b32.xlu0 %v1707_v47, %s1453_s22  ;;  %v379_v33 = vmax.f32 %v319_v22, %v375_v18  ;;  %v548_v43 = vmul.f32 %v1643_v0, %v1512_v12  ;;  %v1849_v19 = vmul.f32 %v1675_v28, %v2443_v10 }
  0xca   : >> { %v1853_v37 = vmul.f32 %v1678_v29, %v2443_v10  ;;  %v378_v47 = vadd.f32 %v374_v39, %v356_v55  ;;  %v416_v5 = vadd.f32 %v412_v31, %v408_v45  ;;  %v523_v23 = vadd.f32 %v519_v36, %v515_v6 }
  0xcb   : >> { %v1855_v3 = vmax.f32 %v379_v33, %v435_v30  ;;  %v570_v18 = vmul.f32 %v1630_v59, %v2441_v15  ;;  %v325_v25 = vmul.f32 %v1581_v41, %v1510_v11  ;;  %v343_v2 = vmul.f32 %v1584_v42, %v2443_v10 }
  0xcc   : >> { %v382_v63 = vmax.f32 %v322_v32, %v378_v47  ;;  %v438_v17 = vadd.f32 %v434_v60, %v416_v5  ;;  %v351_v39 = vmul.f32 %v1602_v49, %v1512_v12  ;;  %v552_v30 = vadd.f32 %v548_v43, %v523_v23 }
  0xcd   : >> { %916 = vrot.lane.b32.xlu1 %v1711_v51, %s1453_s22  ;;  %914 = vrot.lane.b32.xlu0 %v1715_v52, %s1453_s22  ;;  %v266_v34 = vmul.f32 %v1581_v41, %v2443_v10  ;;  %v385_v26 = vmul.f32 %v1584_v42, %v1510_v11  ;;  %v403_v51 = vmul.f32 %v1599_v48, %v2443_v10 }
  0xce   : >> { %v1875_v46 = vmax.f32 %v382_v63, %v438_v17  ;;  %v347_v22 = vadd.f32 %v343_v2, %v325_v25  ;;  %v373_v31 = vmul.f32 %v1605_v50, %v2441_v15  ;;  %v411_v60 = vmul.f32 %v1605_v50, %v1512_v12  ;;  %v1376_v2 = vld [vmem:[%s1578_s25 + $0x2a0] ss:$8 sm:$0x3] }
  0xcf   : >> { %v1881_v52 = vadd.f32 %v570_v18, %v552_v30  ;;  %v407_v32 = vadd.f32 %v403_v51, %v385_v26  ;;  %v433_v41 = vmul.f32 %v1781_v57, %v2441_v15  ;;  %v514_v42 = vmul.f32 %v1574_v38, %v1510_v11  ;;  %v2452_v30 = vld [vmem:[#allocation10_spill] sm:$0xff] }
  0xd0   : >> { %v1891_v55 = vmul.f32 %v1728_v62, %v2442_v14  ;;  %v355_v45 = vadd.f32 %v351_v39, %v347_v22  ;;  %v518_v6 = vmul.f32 %v1602_v49, %v2443_v10  ;;  %v547_v33 = vmul.f32 %v1658_v7, %v1512_v12 }
  0xd1   : >> { %946 = vrot.lane.b32.xlu1 %v1721_v56, %s1453_s22  ;;  %944 = vrot.lane.b32.xlu0 %v1725_v61, %s1453_s22  ;;  %v1901_v36 = vmul.f32 %v1731_v1, %v2442_v14  ;;  %v295_v56 = vmul.f32 %v1574_v38, %v1512_v12  ;;  %v415_v43 = vadd.f32 %v411_v60, %v407_v32  ;;  %v2453_v32 = vld [vmem:[#allocation8_spill] sm:$0xff] }
  0xd2   : >> { %v248_v47 = vmul.f32 %v1541_v24, %v1510_v11  ;;  %v317_v5 = vmul.f32 %v1602_v49, %v2441_v15  ;;  %v377_v23 = vadd.f32 %v373_v31, %v355_v45  ;;  %v522_v18 = vadd.f32 %v518_v6, %v514_v42 }
  0xd3   : >> { %v569_v25 = vmul.f32 %v1627_v58, %v2441_v15  ;;  %v437_v61 = vadd.f32 %v433_v41, %v415_v43  ;;  %v580_v17 = vmul.f32 %v1588_v44, %v1506_v9  ;;  %v584_v38 = vmul.f32 %v1615_v54, %v2444_v8 }
  0xd4   : >> { %v270_v63 = vadd.f32 %v266_v34, %v248_v47  ;;  %v551_v24 = vadd.f32 %v547_v33, %v522_v18  ;;  %v592_v39 = vmul.f32 %v1630_v59, %v1514_v13  ;;  %v614_v26 = vmul.f32 %v2452_v30, %v2442_v14 }
  0xd5   : >> { %950 = vrot.lane.b32.xlu1 %v1740_v27, %s1453_s22  ;;  %v626_v34 = vmul.f32 %v1615_v54, %v1506_v9  ;;  %948 = vrot.lane.b32.xlu0 %v1750_v4, %s1453_s22  ;;  %v588_v22 = vadd.f32 %v584_v38, %v580_v17  ;;  %v630_v31 = vmul.f32 %v1735_v16, %v2444_v8 }
  0xd6   : >> { %v299_v51 = vadd.f32 %v295_v56, %v270_v63  ;;  %v638_v27 = vmul.f32 %v2452_v30, %v1514_v13  ;;  %v1930_v60 = vadd.f32 %v569_v25, %v551_v24  ;;  %v1933_v41 = vrot.slane %v1376_v2, %v2453_v32  ;;  %v2454_v25 = vld [vmem:[#allocation12_spill] sm:$0xff] }
  0xd7   : >> { %v740_v42 = vmul.f32 %v1643_v0, %v1506_v9  ;;  %v744_v45 = vmul.f32 %v1630_v59, %v2444_v8  ;;  %v596_v6 = vadd.f32 %v592_v39, %v588_v22  ;;  %v634_v33 = vadd.f32 %v630_v31, %v626_v34 }
  0xd8   : >> { %v321_v4 = vadd.f32 %v317_v5, %v299_v51  ;;  %v773_v56 = vmul.f32 %v1675_v28, %v1514_v13  ;;  %v1166_v43 = vmul.f32 %v1728_v62, %v2441_v15  ;;  %v660_v47 = vmul.f32 %v1933_v41, %v2442_v14  ;;  %v2455_v51 = vld [vmem:[#allocation9_spill] sm:$0xff] }
  0xd9   : >> { %1139 = vrot.lane.b32.xlu1 %v1827_v40, %s1453_s22  ;;  %v748_v18 = vadd.f32 %v744_v45, %v740_v42  ;;  %v795_v63 = vmul.f32 %v2454_v25, %v2442_v14  ;;  %1137 = vrot.lane.b32.xlu0 %v1841_v21, %s1453_s22  ;;  %v1951_v17 = vadd.f32 %v614_v26, %v596_v6 }
  0xda   : >> { %v381_v5 = vmax.f32 %v321_v4, %v377_v23  ;;  %v642_v38 = vadd.f32 %v638_v27, %v634_v33  ;;  %v579_v40 = vmul.f32 %v1602_v49, %v1506_v9  ;;  %v583_v39 = vmul.f32 %v1605_v50, %v2444_v8 }
  0xdb   : >> { %v777_v24 = vadd.f32 %v773_v56, %v748_v18  ;;  %v591_v34 = vmul.f32 %v1627_v58, %v1514_v13  ;;  %v613_v22 = vmul.f32 %v2455_v51, %v2442_v14  ;;  %v625_v23 = vmul.f32 %v1605_v50, %v1506_v9  ;;  %v2457_v18 = vld [vmem:[#allocation11_spill] sm:$0xff] }
  0xdc   : >> { %v1961_v31 = vmax.f32 %v381_v5, %v437_v61  ;;  %v1963_v21 = vadd.f32 %v660_v47, %v642_v38  ;;  %v629_v26 = vmul.f32 %v1781_v57, %v2444_v8  ;;  %v587_v42 = vadd.f32 %v583_v39, %v579_v40 }
  0xdd   : >> { %1143 = vrot.lane.b32.xlu1 %v1849_v19, %s1453_s22  ;;  %v1971_v27 = vadd.f32 %v795_v63, %v777_v24  ;;  %v637_v45 = vmul.f32 %v2455_v51, %v1514_v13  ;;  %v1976_v61 = vrot.slane %v1376_v2, %v1534_v20  ;;  %1141 = vrot.lane.b32.xlu0 %v1853_v37, %s1453_s22 }
  0xde   : >> { %v633_v4 = vadd.f32 %v629_v26, %v625_v23  ;;  %v739_v6 = vmul.f32 %v1658_v7, %v1506_v9  ;;  %v743_v33 = vmul.f32 %v1627_v58, %v2444_v8  ;;  %v772_v19 = vmul.f32 %v1678_v29, %v1514_v13 }
  0xdf   : >> { %2456 = vst [vmem:[#allocation10_spill] sm:$0xff] %v1971_v27  ;;  %v1165_v56 = vmul.f32 %v1731_v1, %v2441_v15  ;;  %v595_v47 = vadd.f32 %v591_v34, %v587_v42  ;;  %v659_v2 = vmul.f32 %v1976_v61, %v2442_v14  ;;  %v794_v37 = vmul.f32 %v2457_v18, %v2442_v14 }
  0xe0   : >> { %v641_v63 = vadd.f32 %v637_v45, %v633_v4  ;;  %v747_v5 = vadd.f32 %v743_v33, %v739_v6  ;;  %v582_v38 = vmul.f32 %v1588_v44, %v1510_v11  ;;  %v586_v40 = vmul.f32 %v1615_v54, %v2443_v10 }
  0xe1   : >> { %1173 = vrot.lane.b32.xlu1 %v1891_v55, %s1453_s22  ;;  %v1998_v24 = vadd.f32 %v613_v22, %v595_v47  ;;  %v594_v39 = vmul.f32 %v1630_v59, %v1512_v12  ;;  %v616_v34 = vmul.f32 %v2452_v30, %v2441_v15  ;;  %v628_v23 = vmul.f32 %v1615_v54, %v1510_v11 }
  0xe2   : >> { %1171 = vrot.lane.b32.xlu0 %v1901_v36, %s1453_s22  ;;  %v2008_v44 = vadd.f32 %v659_v2, %v641_v63  ;;  %v776_v26 = vadd.f32 %v772_v19, %v747_v5  ;;  %v590_v42 = vadd.f32 %v586_v40, %v582_v38  ;;  %v632_v55 = vmul.f32 %v1735_v16, %v2443_v10  ;;  %v1382_v19 = vld [vmem:[%s1618_s4 + $0x1c0] ss:$8 sm:$0x3] }
  0xe3   : >> { %v640_v22 = vmul.f32 %v2452_v30, %v1512_v12  ;;  %v662_v45 = vmul.f32 %v1933_v41, %v2441_v15  ;;  %v742_v4 = vmul.f32 %v1643_v0, %v1510_v11  ;;  %v746_v33 = vmul.f32 %v1630_v59, %v2443_v10 }
  0xe4   : >> { %v2018_v54 = vadd.f32 %v794_v37, %v776_v26  ;;  %v598_v6 = vadd.f32 %v594_v39, %v590_v42  ;;  %v636_v36 = vadd.f32 %v632_v55, %v628_v23  ;;  %v775_v47 = vmul.f32 %v1675_v28, %v1512_v12 }
  0xe5   : >> { %1177 = vrot.lane.b32.xlu1 %v1166_v43, %s1453_s22  ;;  %v797_v2 = vmul.f32 %v2454_v25, %v2441_v15  ;;  %v581_v63 = vmul.f32 %v1602_v49, %v1510_v11  ;;  %v585_v0 = vmul.f32 %v1605_v50, %v2443_v10  ;;  %v750_v38 = vadd.f32 %v746_v33, %v742_v4 }
  0xe6   : >> { %2458 = vst [vmem:[#allocation8_spill] sm:$0xff] %v2018_v54  ;;  %1175 = vrot.lane.b32.xlu0 %v1165_v56, %s1453_s22  ;;  %v2033_v37 = vadd.f32 %v616_v34, %v598_v6  ;;  %v644_v5 = vadd.f32 %v640_v22, %v636_v36  ;;  %v593_v43 = vmul.f32 %v1627_v58, %v1512_v12 }
  0xe7   : >> { %v589_v40 = vadd.f32 %v585_v0, %v581_v63  ;;  %v615_v39 = vmul.f32 %v2455_v51, %v2441_v15  ;;  %v627_v23 = vmul.f32 %v1605_v50, %v1510_v11  ;;  %v631_v49 = vmul.f32 %v1781_v57, %v2443_v10 }
  0xe8   : >> { %v2044_v26 = vrot.slane %v1382_v19, %v2453_v32  ;;  %v2046_v56 = vadd.f32 %v662_v45, %v644_v5  ;;  %v779_v34 = vadd.f32 %v775_v47, %v750_v38  ;;  %v639_v42 = vmul.f32 %v2455_v51, %v1512_v12 }
  0xe9   : >> { %v597_v55 = vadd.f32 %v593_v43, %v589_v40  ;;  %v635_v22 = vadd.f32 %v631_v49, %v627_v23  ;;  %v661_v4 = vmul.f32 %v1976_v61, %v2441_v15  ;;  %v741_v50 = vmul.f32 %v1658_v7, %v1510_v11 }
  0xea   : >> { %v2054_v6 = vadd.f32 %v797_v2, %v779_v34  ;;  %v745_v45 = vmul.f32 %v1627_v58, %v2443_v10  ;;  %v774_v36 = vmul.f32 %v1678_v29, %v1512_v12  ;;  %v2063_v63 = vrot.slane %v1382_v19, %v1534_v20  ;;  %v1384_v2 = vld [vmem:[%s1618_s4 + $0x2a0] ss:$8 sm:$0x3] }
  0xeb   : >> { %v2060_v33 = vadd.f32 %v615_v39, %v597_v55  ;;  %v643_v47 = vadd.f32 %v639_v42, %v635_v22  ;;  %v796_v5 = vmul.f32 %v2457_v18, %v2441_v15  ;;  %v807_v7 = vmul.f32 %v1630_v59, %v1506_v9  ;;  %v1388_v39 = vld [vmem:[%s1663_s11 + $0xe0] ss:$8 sm:$0x3] }
  0xec   : >> { %2459 = vst [vmem:[#allocation12_spill] sm:$0xff] %v2054_v6  ;;  %v749_v0 = vadd.f32 %v745_v45, %v741_v50  ;;  %v811_v43 = vmul.f32 %v2452_v30, %v2444_v8  ;;  %v819_v40 = vmul.f32 %v2454_v25, %v1514_v13  ;;  %v841_v19 = vmul.f32 %v2044_v26, %v2442_v14 }
  0xed   : >> { %v2070_v38 = vadd.f32 %v661_v4, %v643_v47  ;;  %v853_v49 = vmul.f32 %v2452_v30, %v1506_v9  ;;  %v857_v34 = vmul.f32 %v1933_v41, %v2444_v8  ;;  %v865_v42 = vmul.f32 %v2044_v26, %v1514_v13 }
  0xee   : >> { %v778_v23 = vadd.f32 %v774_v36, %v749_v0  ;;  %v815_v55 = vadd.f32 %v811_v43, %v807_v7  ;;  %v2086_v22 = vrot.slane %v1384_v2, %v2453_v32  ;;  %v967_v4 = vmul.f32 %v1675_v28, %v1506_v9 }
  0xef   : >> { %v971_v50 = vmul.f32 %v2454_v25, %v2444_v8  ;;  %v861_v36 = vadd.f32 %v857_v34, %v853_v49  ;;  %v1000_v47 = vmul.f32 %v1728_v62, %v1514_v13  ;;  %v2097_v0 = vrot.slane %v1388_v39, %v2453_v32 }
  0xf0   : >> { %v2092_v45 = vadd.f32 %v796_v5, %v778_v23  ;;  %v823_v6 = vadd.f32 %v819_v40, %v815_v55  ;;  %v887_v7 = vmul.f32 %v2086_v22, %v2442_v14  ;;  %v806_v5 = vmul.f32 %v1627_v58, %v1506_v9 }
  0xf1   : >> { %v975_v43 = vadd.f32 %v971_v50, %v967_v4  ;;  %v869_v54 = vadd.f32 %v865_v42, %v861_v36  ;;  %v1022_v27 = vmul.f32 %v2097_v0, %v2442_v14  ;;  %v810_v23 = vmul.f32 %v2455_v51, %v2444_v8 }
  0xf2   : >> { %2460 = vst [vmem:[#allocation9_spill] sm:$0xff] %v2092_v45  ;;  %v2107_v49 = vadd.f32 %v841_v19, %v823_v6  ;;  %v818_v40 = vmul.f32 %v2457_v18, %v1514_v13  ;;  %v840_v55 = vmul.f32 %v2063_v63, %v2442_v14  ;;  %v852_v50 = vmul.f32 %v2455_v51, %v1506_v9 }
  0xf3   : >> { %v1004_v34 = vadd.f32 %v1000_v47, %v975_v43  ;;  %v2113_v4 = vadd.f32 %v887_v7, %v869_v54  ;;  %v814_v42 = vadd.f32 %v810_v23, %v806_v5  ;;  %v856_v36 = vmul.f32 %v1976_v61, %v2444_v8 }
  0xf4   : >> { %2461 = vst [vmem:[#allocation11_spill] sm:$0xff] %v2107_v49  ;;  %v864_v6 = vmul.f32 %v2063_v63, %v1514_v13  ;;  %v2124_v19 = vrot.slane %v1384_v2, %v1534_v20  ;;  %v966_v47 = vmul.f32 %v1678_v29, %v1506_v9  ;;  %v970_v43 = vmul.f32 %v2457_v18, %v2444_v8 }
  0xf5   : >> { %2462 = vst [vmem:[#allocation15_spill] sm:$0xff] %v2113_v4  ;;  %v2119_v45 = vadd.f32 %v1022_v27, %v1004_v34  ;;  %v822_v54 = vadd.f32 %v818_v40, %v814_v42  ;;  %v860_v7 = vadd.f32 %v856_v36, %v852_v50  ;;  %v999_v5 = vmul.f32 %v1731_v1, %v1514_v13 }
  0xf6   : >> { %v886_v27 = vmul.f32 %v2124_v19, %v2442_v14  ;;  %v2135_v23 = vrot.slane %v1388_v39, %v1534_v20  ;;  %v809_v2 = vmul.f32 %v1630_v59, %v1510_v11  ;;  %v974_v40 = vadd.f32 %v970_v43, %v966_v47 }
  0xf7   : >> { %2463 = vst [vmem:[#allocation16_spill] sm:$0xff] %v2119_v45  ;;  %v2139_v34 = vadd.f32 %v840_v55, %v822_v54  ;;  %v868_v45 = vadd.f32 %v864_v6, %v860_v7  ;;  %v813_v42 = vmul.f32 %v2452_v30, %v2443_v10  ;;  %v821_v36 = vmul.f32 %v2454_v25, %v1512_v12 }
  0xf8   : >> { %v1021_v50 = vmul.f32 %v2135_v23, %v2442_v14  ;;  %v843_v39 = vmul.f32 %v2044_v26, %v2441_v15  ;;  %v855_v4 = vmul.f32 %v2452_v30, %v1510_v11  ;;  %v1003_v55 = vadd.f32 %v999_v5, %v974_v40 }
  0xf9   : >> { %2464 = vst [vmem:[#allocation17_spill] sm:$0xff] %v2139_v34  ;;  %v2151_v59 = vadd.f32 %v886_v27, %v868_v45  ;;  %v817_v6 = vadd.f32 %v813_v42, %v809_v2  ;;  %v859_v47 = vmul.f32 %v1933_v41, %v2443_v10  ;;  %v867_v54 = vmul.f32 %v2044_v26, %v1512_v12 }
  0xfa   : >> { %v889_v7 = vmul.f32 %v2086_v22, %v2441_v15  ;;  %v969_v43 = vmul.f32 %v1675_v28, %v1510_v11  ;;  %v2161_v34 = vadd.f32 %v1021_v50, %v1003_v55  ;;  %v973_v45 = vmul.f32 %v2454_v25, %v2443_v10 }
  0xfb   : >> { %v825_v49 = vadd.f32 %v821_v36, %v817_v6  ;;  %v863_v30 = vadd.f32 %v859_v47, %v855_v4  ;;  %v1002_v5 = vmul.f32 %v1728_v62, %v1512_v12  ;;  %v1024_v27 = vmul.f32 %v2097_v0, %v2441_v15 }
  0xfc   : >> { %2465 = vst [vmem:[#allocation18_spill] sm:$0xff] %v2161_v34  ;;  %v808_v2 = vmul.f32 %v1627_v58, %v1510_v11  ;;  %v812_v40 = vmul.f32 %v2455_v51, %v2443_v10  ;;  %v977_v50 = vadd.f32 %v973_v45, %v969_v43  ;;  %v820_v4 = vmul.f32 %v2457_v18, %v1512_v12 }
  0xfd   : >> { %v2173_v28 = vadd.f32 %v843_v39, %v825_v49  ;;  %v871_v42 = vadd.f32 %v867_v54, %v863_v30  ;;  %v842_v62 = vmul.f32 %v2063_v63, %v2441_v15  ;;  %v854_v55 = vmul.f32 %v2455_v51, %v1510_v11 }
  0xfe   : >> { %v816_v36 = vadd.f32 %v812_v40, %v808_v2  ;;  %v858_v58 = vmul.f32 %v1976_v61, %v2443_v10  ;;  %v1006_v49 = vadd.f32 %v1002_v5, %v977_v50  ;;  %v866_v39 = vmul.f32 %v2063_v63, %v1512_v12  ;;  %v1390_v5 = vld [vmem:[%s1663_s11 + $0x1c0] ss:$8 sm:$0x3] }
  0xff   : >> { %v2183_v6 = vadd.f32 %v889_v7, %v871_v42  ;;  %v888_v43 = vmul.f32 %v2124_v19, %v2441_v15  ;;  %v968_v30 = vmul.f32 %v1678_v29, %v1510_v11  ;;  %v972_v51 = vmul.f32 %v2457_v18, %v2443_v10  ;;  %v1392_v42 = vld [vmem:[%s1663_s11 + $0x2a0] ss:$8 sm:$0x3] }
 0x100   : >> { %v824_v47 = vadd.f32 %v820_v4, %v816_v36  ;;  %v862_v54 = vadd.f32 %v858_v58, %v854_v55  ;;  %v2191_v45 = vadd.f32 %v1024_v27, %v1006_v49  ;;  %v1001_v7 = vmul.f32 %v1731_v1, %v1512_v12 }
 0x101   : >> { %v976_v50 = vadd.f32 %v972_v51, %v968_v30  ;;  %v1023_v4 = vmul.f32 %v2135_v23, %v2441_v15  ;;  %v1034_v29 = vmul.f32 %v2454_v25, %v1506_v9  ;;  %v1038_v36 = vmul.f32 %v2044_v26, %v2444_v8 }
 0x102   : >> { %2466 = vst [vmem:[#allocation19_spill] sm:$0xff] %v2191_v45  ;;  %v2198_v2 = vadd.f32 %v842_v62, %v824_v47  ;;  %v870_v40 = vadd.f32 %v866_v39, %v862_v54  ;;  %v1046_v1 = vmul.f32 %v2097_v0, %v1514_v13  ;;  %v1064_v62 = vrot.slane %v1390_v5, %v2453_v32 }
 0x103   : >> { %v1005_v55 = vadd.f32 %v1001_v7, %v976_v50  ;;  %v1080_v58 = vmul.f32 %v2044_v26, %v1506_v9  ;;  %v1084_v49 = vmul.f32 %v2086_v22, %v2444_v8  ;;  %v2217_v39 = vrot.slane %v1392_v42, %v2453_v32 }
 0x104   : >> { %v2205_v27 = vadd.f32 %v888_v43, %v870_v40  ;;  %v1042_v47 = vadd.f32 %v1038_v36, %v1034_v29  ;;  %v1068_v54 = vmul.f32 %v1064_v62, %v2442_v14  ;;  %v1092_v43 = vmul.f32 %v1064_v62, %v1514_v13 }
 0x105   : >> { %v2221_v30 = vadd.f32 %v1023_v4, %v1005_v55  ;;  %v1088_v51 = vadd.f32 %v1084_v49, %v1080_v58  ;;  %v1114_v7 = vmul.f32 %v2217_v39, %v2442_v14  ;;  %v1033_v50 = vmul.f32 %v2457_v18, %v1506_v9 }
 0x106   : >> { %v1050_v40 = vadd.f32 %v1046_v1, %v1042_v47  ;;  %v1037_v45 = vmul.f32 %v2063_v63, %v2444_v8  ;;  %v1045_v32 = vmul.f32 %v2135_v23, %v1514_v13  ;;  %v1060_v36 = vrot.slane %v1390_v5, %v1534_v20 }
 0x107   : >> { %2467 = vst [vmem:[#allocation20_spill] sm:$0xff] %v2221_v30  ;;  %v1096_v29 = vadd.f32 %v1092_v43, %v1088_v51  ;;  %v1079_v4 = vmul.f32 %v2063_v63, %v1506_v9  ;;  %v1083_v55 = vmul.f32 %v2124_v19, %v2444_v8  ;;  %v2239_v49 = vrot.slane %v1392_v42, %v1534_v20 }
 0x108   : >> { %v2236_v58 = vadd.f32 %v1068_v54, %v1050_v40  ;;  %v1041_v1 = vadd.f32 %v1037_v45, %v1033_v50  ;;  %v1036_v47 = vmul.f32 %v2454_v25, %v1510_v11  ;;  %v1067_v43 = vmul.f32 %v1060_v36, %v2442_v14 }
 0x109   : >> { %v2243_v30 = vadd.f32 %v1114_v7, %v1096_v29  ;;  %v1087_v5 = vadd.f32 %v1083_v55, %v1079_v4  ;;  %v1091_v51 = vmul.f32 %v1060_v36, %v1514_v13  ;;  %v1113_v8 = vmul.f32 %v2239_v49, %v2442_v14 }
 0x10a   : >> { %v1049_v34 = vadd.f32 %v1045_v32, %v1041_v1  ;;  %v1040_v45 = vmul.f32 %v2044_v26, %v2443_v10  ;;  %v1048_v20 = vmul.f32 %v2097_v0, %v1512_v12  ;;  %v1070_v25 = vmul.f32 %v1064_v62, %v2441_v15 }
 0x10b   : >> { %v1095_v54 = vadd.f32 %v1091_v51, %v1087_v5  ;;  %v1082_v42 = vmul.f32 %v2044_v26, %v1510_v11  ;;  %v1086_v50 = vmul.f32 %v2086_v22, %v2443_v10  ;;  %v1094_v32 = vmul.f32 %v1064_v62, %v1512_v12 }
 0x10c   : >> { %v2256_v7 = vadd.f32 %v1067_v43, %v1049_v34  ;;  %v1044_v40 = vadd.f32 %v1040_v45, %v1036_v47  ;;  %v1116_v4 = vmul.f32 %v2217_v39, %v2441_v15  ;;  %v1035_v0 = vmul.f32 %v2457_v18, %v1510_v11 }
 0x10d   : >> { %v2261_v29 = vadd.f32 %v1113_v8, %v1095_v54  ;;  %v1090_v1 = vadd.f32 %v1086_v50, %v1082_v42  ;;  %v1039_v26 = vmul.f32 %v2063_v63, %v2443_v10  ;;  %v1047_v34 = vmul.f32 %v2135_v23, %v1512_v12 }
 0x10e   : >> { %v1052_v55 = vadd.f32 %v1048_v20, %v1044_v40  ;;  %v1081_v47 = vmul.f32 %v2063_v63, %v1510_v11  ;;  %v1085_v8 = vmul.f32 %v2124_v19, %v2443_v10  ;;  %v1093_v62 = vmul.f32 %v1060_v36, %v1512_v12 }
 0x10f   : >> { %v1098_v5 = vadd.f32 %v1094_v32, %v1090_v1  ;;  %v1043_v18 = vadd.f32 %v1039_v26, %v1035_v0  ;;  %v1069_v51 = vmul.f32 %v1060_v36, %v2441_v15  ;;  %v1115_v54 = vmul.f32 %v2239_v49, %v2441_v15 }
 0x110   : >> { %v2276_v43 = vadd.f32 %v1070_v25, %v1052_v55  ;;  %v1089_v45 = vadd.f32 %v1085_v8, %v1081_v47  ;;  %v446_v25 = vmul.f32 %v1612_v53, %v1510_v11  ;;  %v445_v36 = vmul.f32 %v1599_v48, %v1510_v11 }
 0x111   : >> { %v2281_v20 = vadd.f32 %v1116_v4, %v1098_v5  ;;  %v1051_v23 = vadd.f32 %v1047_v34, %v1043_v18  ;;  %v444_v32 = vmul.f32 %v1612_v53, %v1506_v9  ;;  %v443_v4 = vmul.f32 %v1599_v48, %v1506_v9 }
 0x112   : >> { %v1097_v42 = vadd.f32 %v1093_v62, %v1089_v45  ;;  %v477_v0 = vmul.f32 %v1735_v16, %v1512_v12  ;;  %v475_v1 = vmul.f32 %v1735_v16, %v1514_v13  ;;  %v476_v26 = vmul.f32 %v1781_v57, %v1512_v12 }
 0x113   : >> { %2468 = vst [vmem:[#allocation21_spill] sm:$0xff] %v2281_v20  ;;  %v2283_v63 = vadd.f32 %v1069_v51, %v1051_v23  ;;  %v474_v53 = vmul.f32 %v1781_v57, %v1514_v13 }
 0x114   : >> { %v2285_v40 = vadd.f32 %v1115_v54, %v1097_v42 }
 0x115   : >> { %2469 = vst [vmem:[#allocation22_spill] sm:$0xff] %v2283_v63 }
 0x116   : >> { %2470 = vst [vmem:[#allocation23_spill] sm:$0xff] %v2285_v40 }
 0x11b   : >> { %v460_v50 = vpop.permute.xlu1 %459  ;;  %v456_v10 = vpop.permute.xlu0 %455 }
 0x11f   : >> { %v462_v55 = vpop.permute.xlu1 %461  ;;  %v458_v8 = vpop.permute.xlu0 %457 }
 0x120   : >> { %v465_v34 = vsel %vm463_vm0, %v460_v50, %v462_v55  ;;  %v473_v47 = vadd.f32 %v462_v55, %v446_v25  ;;  %v464_v48 = vsel %vm463_vm0, %v456_v10, %v458_v8  ;;  %v471_v5 = vadd.f32 %v458_v8, %v444_v32  ;;  %v2471_v25 = vld [vmem:[#allocation13_spill] sm:$0xff]  ;;  %v2472_v32 = vld [vmem:[#allocation14_spill] sm:$0xff] }
 0x121   : >> { %v472_v62 = vadd.f32 %v465_v34, %v445_v36  ;;  %v470_v18 = vadd.f32 %v464_v48, %v443_v4  ;;  %v672_v10 = vmul.f32 %v1735_v16, %v1506_v9 }
 0x122   : >> { %v481_v51 = vadd.f32 %v477_v0, %v473_v47  ;;  %v479_v54 = vadd.f32 %v475_v1, %v471_v5  ;;  %v671_v1 = vmul.f32 %v1781_v57, %v1506_v9  ;;  %v674_v47 = vmul.f32 %v1735_v16, %v1510_v11 }
 0x123   : >> { %v493_v45 = vpop.permute.xlu1 %492  ;;  %v480_v23 = vadd.f32 %v476_v26, %v472_v62  ;;  %v478_v42 = vadd.f32 %v474_v53, %v470_v18  ;;  %v491_v14 = vpop.permute.xlu0 %490  ;;  %v673_v5 = vmul.f32 %v1781_v57, %v1510_v11  ;;  %v703_v57 = vmul.f32 %v1976_v61, %v1512_v12 }
 0x124   : >> { %v505_v15 = vadd.f32 %v493_v45, %v479_v54  ;;  %v498_v40 = vsel %vm463_vm0, %v491_v14, %v493_v45 }
 0x125   : >> { %v504_v50 = vadd.f32 %v498_v40, %v478_v42 }
 0x126   : >> { %v509_v55 = vmax.f32 %v2471_v25, %v505_v15 }
 0x127   : >> { %v497_v63 = vpop.permute.xlu1 %496  ;;  %v508_v20 = vmax.f32 %v1855_v3, %v504_v50  ;;  %v495_v34 = vpop.permute.xlu0 %494  ;;  %v702_v3 = vmul.f32 %v1933_v41, %v1514_v13 }
 0x128   : >> { %v507_v36 = vadd.f32 %v497_v63, %v481_v51  ;;  %v576_v4 = vmax.f32 %v509_v55, %v2472_v32  ;;  %v499_v0 = vsel %vm463_vm0, %v495_v34, %v497_v63  ;;  %v701_v63 = vmul.f32 %v1976_v61, %v1514_v13 }
 0x129   : >> { %v575_v14 = vmax.f32 %v508_v20, %v1815_v35  ;;  %v506_v15 = vadd.f32 %v499_v0, %v480_v23 }
 0x12a   : >> { %v511_v40 = vmax.f32 %v1875_v46, %v507_v36  ;;  %v622_v8 = vmax.f32 %v576_v4, %v1951_v17  ;;  %v704_v17 = vmul.f32 %v1933_v41, %v1512_v12 }
 0x12b   : >> { %v686_v26 = vpop.permute.xlu1 %685  ;;  %v510_v62 = vmax.f32 %v1961_v31, %v506_v15  ;;  %v684_v20 = vpop.permute.xlu0 %683  ;;  %v621_v46 = vmax.f32 %v575_v14, %v1998_v24  ;;  %v2473_v14 = vld [vmem:[#allocation10_spill] sm:$0xff] }
 0x12c   : >> { %v578_v53 = vmax.f32 %v511_v40, %v1881_v52  ;;  %v698_v35 = vadd.f32 %v686_v26, %v672_v10  ;;  %v691_v48 = vsel %vm463_vm0, %v684_v20, %v686_v26  ;;  %v668_v16 = vmax.f32 %v622_v8, %v1963_v21  ;;  %v2474_v8 = vld [vmem:[#allocation8_spill] sm:$0xff] }
 0x12d   : >> { %v577_v18 = vmax.f32 %v510_v62, %v1930_v60  ;;  %v697_v51 = vadd.f32 %v691_v48, %v671_v1  ;;  %v667_v31 = vmax.f32 %v621_v46, %v2008_v44  ;;  %v901_v48 = vmul.f32 %v1933_v41, %v1510_v11 }
 0x12e   : >> { %v706_v52 = vadd.f32 %v702_v3, %v698_v35  ;;  %v624_v54 = vmax.f32 %v578_v53, %v2033_v37  ;;  %v2475_v35 = vld [vmem:[#allocation11_spill] sm:$0xff] }
 0x12f   : >> { %v690_v45 = vpop.permute.xlu1 %689  ;;  %v688_v23 = vpop.permute.xlu0 %687  ;;  %v705_v42 = vadd.f32 %v701_v63, %v697_v51  ;;  %v623_v21 = vmax.f32 %v577_v18, %v2060_v33 }
 0x130   : >> { %v700_v24 = vadd.f32 %v690_v45, %v674_v47  ;;  %v692_v50 = vsel %vm463_vm0, %v688_v23, %v690_v45  ;;  %v670_v25 = vmax.f32 %v624_v54, %v2046_v56  ;;  %v899_v56 = vmul.f32 %v1933_v41, %v1506_v9  ;;  %v2478_v23 = vld [vmem:[#allocation17_spill] sm:$0xff] }
 0x131   : >> { %v699_v60 = vadd.f32 %v692_v50, %v673_v5  ;;  %v669_v36 = vmax.f32 %v623_v21, %v2070_v38  ;;  %v898_v38 = vmul.f32 %v1976_v61, %v1506_v9  ;;  %v929_v47 = vmul.f32 %v2086_v22, %v1514_v13 }
 0x132   : >> { %v708_v55 = vadd.f32 %v704_v17, %v700_v24  ;;  %v928_v5 = vmul.f32 %v2124_v19, %v1514_v13  ;;  %v900_v24 = vmul.f32 %v1976_v61, %v1510_v11  ;;  %v931_v41 = vmul.f32 %v2086_v22, %v1512_v12 }
 0x133   : >> { %v720_v44 = vpop.permute.xlu1 %719  ;;  %v718_v10 = vpop.permute.xlu0 %717  ;;  %v707_v37 = vadd.f32 %v703_v57, %v699_v60  ;;  %v2479_v57 = vld [vmem:[#allocation9_spill] sm:$0xff] }
 0x134   : >> { %v732_v34 = vadd.f32 %v720_v44, %v706_v52  ;;  %v725_v32 = vsel %vm463_vm0, %v718_v10, %v720_v44  ;;  %v930_v44 = vmul.f32 %v2124_v19, %v1512_v12 }
 0x135   : >> { %v731_v0 = vadd.f32 %v725_v32, %v705_v42 }
 0x136   : >> { %v736_v4 = vmax.f32 %v668_v16, %v732_v34  ;;  %v2476_v16 = vld [vmem:[#allocation12_spill] sm:$0xff] }
 0x137   : >> { %v724_v1 = vpop.permute.xlu1 %723  ;;  %v735_v33 = vmax.f32 %v667_v31, %v731_v0  ;;  %v722_v3 = vpop.permute.xlu0 %721  ;;  %v2477_v31 = vld [vmem:[#allocation15_spill] sm:$0xff] }
 0x138   : >> { %v803_v40 = vmax.f32 %v736_v4, %v2473_v14  ;;  %v734_v15 = vadd.f32 %v724_v1, %v708_v55  ;;  %v726_v26 = vsel %vm463_vm0, %v722_v3, %v724_v1 }
 0x139   : >> { %v802_v63 = vmax.f32 %v735_v33, %v2474_v8  ;;  %v733_v62 = vadd.f32 %v726_v26, %v707_v37 }
 0x13a   : >> { %v738_v53 = vmax.f32 %v670_v25, %v734_v15  ;;  %v849_v20 = vmax.f32 %v803_v40, %v2475_v35  ;;  %v2481_v35 = vld [vmem:[#allocation18_spill] sm:$0xff] }
 0x13b   : >> { %v913_v46 = vpop.permute.xlu1 %912  ;;  %v737_v18 = vmax.f32 %v669_v36, %v733_v62  ;;  %v911_v52 = vpop.permute.xlu0 %910  ;;  %v848_v42 = vmax.f32 %v802_v63, %v2478_v23  ;;  %v1126_v63 = vmul.f32 %v2086_v22, %v1506_v9  ;;  %v1156_v62 = vmul.f32 %v2217_v39, %v1514_v13 }
 0x13c   : >> { %v805_v17 = vmax.f32 %v738_v53, %v2476_v16  ;;  %v925_v51 = vadd.f32 %v913_v46, %v899_v56  ;;  %v895_v45 = vmax.f32 %v849_v20, %v2477_v31  ;;  %v918_v54 = vsel %vm463_vm0, %v911_v52, %v913_v46 }
 0x13d   : >> { %v804_v21 = vmax.f32 %v737_v18, %v2479_v57  ;;  %v924_v50 = vadd.f32 %v918_v54, %v898_v38  ;;  %v894_v36 = vmax.f32 %v848_v42, %v2151_v59  ;;  %v2480_v38 = vld [vmem:[#allocation16_spill] sm:$0xff]  ;;  %v1155_v18 = vmul.f32 %v2239_v49, %v1514_v13 }
 0x13e   : >> { %v933_v25 = vadd.f32 %v929_v47, %v925_v51  ;;  %v851_v60 = vmax.f32 %v805_v17, %v2173_v28  ;;  %v1128_v17 = vmul.f32 %v2086_v22, %v1510_v11  ;;  %v2482_v51 = vld [vmem:[#allocation19_spill] sm:$0xff]  ;;  %v1127_v42 = vmul.f32 %v2124_v19, %v1510_v11 }
 0x13f   : >> { %v917_v55 = vpop.permute.xlu1 %916  ;;  %v915_v10 = vpop.permute.xlu0 %914  ;;  %v932_v61 = vadd.f32 %v928_v5, %v924_v50  ;;  %v850_v32 = vmax.f32 %v804_v21, %v2198_v2  ;;  %v1158_v22 = vmul.f32 %v2217_v39, %v1512_v12 }
 0x140   : >> { %v927_v34 = vadd.f32 %v917_v55, %v901_v48  ;;  %v897_v37 = vmax.f32 %v851_v60, %v2183_v6  ;;  %v919_v4 = vsel %vm463_vm0, %v915_v10, %v917_v55  ;;  %v2485_v10 = vld [vmem:[#allocation22_spill] sm:$0xff] }
 0x141   : >> { %v926_v0 = vadd.f32 %v919_v4, %v900_v24  ;;  %v896_v14 = vmax.f32 %v850_v32, %v2205_v27  ;;  %v1125_v27 = vmul.f32 %v2124_v19, %v1506_v9 }
 0x142   : >> { %v935_v1 = vadd.f32 %v931_v41, %v927_v34  ;;  %v2483_v41 = vld [vmem:[#allocation20_spill] sm:$0xff] }
 0x143   : >> { %v947_v28 = vpop.permute.xlu1 %946  ;;  %v945_v33 = vpop.permute.xlu0 %944  ;;  %v934_v59 = vadd.f32 %v930_v44, %v926_v0 }
 0x144   : >> { %v959_v40 = vadd.f32 %v947_v28, %v933_v25  ;;  %v952_v15 = vsel %vm463_vm0, %v945_v33, %v947_v28 }
 0x145   : >> { %v958_v56 = vadd.f32 %v952_v15, %v932_v61 }
 0x146   : >> { %v963_v3 = vmax.f32 %v895_v45, %v959_v40 }
 0x147   : >> { %v951_v26 = vpop.permute.xlu1 %950  ;;  %v962_v6 = vmax.f32 %v894_v36, %v958_v56  ;;  %v949_v2 = vpop.permute.xlu0 %948 }
 0x148   : >> { %v1030_v47 = vmax.f32 %v963_v3, %v2480_v38  ;;  %v961_v8 = vadd.f32 %v951_v26, %v935_v1  ;;  %v953_v53 = vsel %vm463_vm0, %v949_v2, %v951_v26 }
 0x149   : >> { %v1029_v20 = vmax.f32 %v962_v6, %v2481_v35  ;;  %v960_v48 = vadd.f32 %v953_v53, %v934_v59  ;;  %v2487_v59 = vld [vmem:[#allocation6_spill] sm:$0xff]  ;;  %v2488_v53 = vld [vmem:[#allocation7_spill] sm:$0xff] }
 0x14a   : >> { %v965_v46 = vmax.f32 %v897_v37, %v961_v8  ;;  %v1076_v5 = vmax.f32 %v1030_v47, %v2236_v58 }
 0x14b   : >> { %v1140_v16 = vpop.permute.xlu1 %1139  ;;  %v964_v31 = vmax.f32 %v896_v14, %v960_v48  ;;  %v1138_v54 = vpop.permute.xlu0 %1137  ;;  %v1075_v58 = vmax.f32 %v1029_v20, %v2256_v7  ;;  %v2484_v7 = vld [vmem:[#allocation21_spill] sm:$0xff] }
 0x14c   : >> { %v1032_v52 = vmax.f32 %v965_v46, %v2482_v51  ;;  %v1152_v45 = vadd.f32 %v1140_v16, %v1126_v63  ;;  %v1122_v24 = vmax.f32 %v1076_v5, %v2243_v30  ;;  %v1145_v23 = vsel %vm463_vm0, %v1138_v54, %v1140_v16 }
 0x14d   : >> { %v1031_v57 = vmax.f32 %v964_v31, %v2483_v41  ;;  %v1151_v21 = vadd.f32 %v1145_v23, %v1125_v27  ;;  %v1121_v55 = vmax.f32 %v1075_v58, %v2261_v29  ;;  %v1157_v30 = vmul.f32 %v2239_v49, %v1512_v12 }
 0x14e   : >> { %v1160_v50 = vadd.f32 %v1156_v62, %v1152_v45  ;;  %v1078_v25 = vmax.f32 %v1032_v52, %v2276_v43  ;;  %v2486_v43 = vld [vmem:[#allocation23_spill] sm:$0xff] }
 0x14f   : >> { %v1144_v60 = vpop.permute.xlu1 %1143  ;;  %v1142_v19 = vpop.permute.xlu0 %1141  ;;  %v1159_v44 = vadd.f32 %v1155_v18, %v1151_v21  ;;  %v1077_v39 = vmax.f32 %v1031_v57, %v2485_v10 }
 0x150   : >> { %v1154_v36 = vadd.f32 %v1144_v60, %v1128_v17  ;;  %v1124_v34 = vmax.f32 %v1078_v25, %v2484_v7  ;;  %v1146_v61 = vsel %vm463_vm0, %v1142_v19, %v1144_v60 }
 0x151   : >> { %v1153_v37 = vadd.f32 %v1146_v61, %v1127_v42  ;;  %v1123_v4 = vmax.f32 %v1077_v39, %v2486_v43 }
 0x152   : >> { %v1162_v32 = vadd.f32 %v1158_v22, %v1154_v36 }
 0x153   : >> { %v1174_v0 = vpop.permute.xlu1 %1173  ;;  %v1161_v14 = vadd.f32 %v1157_v30, %v1153_v37 }
 0x154   : >> { %v1186_v29 = vadd.f32 %v1174_v0, %v1160_v50  ;;  %v1172_v1 = vpop.permute.xlu0 %1171 }
 0x155   : >> { %v1179_v49 = vsel %vm463_vm0, %v1172_v1, %v1174_v0 }
 0x156   : >> { %v1190_v28 = vmax.f32 %v1122_v24, %v1186_v29  ;;  %v1185_v40 = vadd.f32 %v1179_v49, %v1159_v44 }
 0x157   : >> { %v1178_v33 = vpop.permute.xlu1 %1177 }
 0x158   : >> { %v1194_v15 = vadd.f32 %v1190_v28, %v2487_v59  ;;  %v1189_v3 = vmax.f32 %v1121_v55, %v1185_v40  ;;  %v1188_v56 = vadd.f32 %v1178_v33, %v1162_v32  ;;  %v1176_v26 = vpop.permute.xlu0 %1175 }
 0x159   : >> { %v1180_v38 = vsel %vm463_vm0, %v1176_v26, %v1178_v33 }
 0x15a   : >> { %v1198_v47 = vmax.f32 %v1194_v15, 0.0  ;;  %v1193_v6 = vadd.f32 %v1189_v3, %v2487_v59  ;;  %v1192_v8 = vmax.f32 %v1124_v34, %v1188_v56  ;;  %v1187_v2 = vadd.f32 %v1180_v38, %v1161_v14 }
 0x15c   : >> { %1205 = vst.msk [vmem:[%s1202_s14 + $0x8] sm:$0xff] %vm1204_vm1, %v1198_v47  ;;  %v1197_v63 = vmax.f32 %v1193_v6, 0.0  ;;  %v1196_v27 = vadd.f32 %v1192_v8, %v2488_v53  ;;  %v1191_v62 = vmax.f32 %v1123_v4, %v1187_v2  ;;  %223 = sbr.rel (!%p221_p4) target bundleno = 159 (0x9f), region = 90 }
 0x15e   : >> { %1203 = vst [vmem:[%s1202_s14] sm:$0xff] %v1197_v63  ;;  %v1200_v35 = vmax.f32 %v1196_v27, 0.0  ;;  %v1195_v20 = vadd.f32 %v1191_v62, %v2488_v53 }
 0x160   : >> { %1207 = vst.msk [vmem:[%s1202_s14 + $0x18] sm:$0xff] %vm1204_vm1, %v1200_v35  ;;  %v1199_v46 = vmax.f32 %v1195_v20, 0.0 }
 0x162   : >> { %1206 = vst [vmem:[%s1202_s14 + $0x10] sm:$0xff] %v1199_v46 }
 0x163 PF: > { %s13_s12 = sadd.s32 1, %s1443_s12  }
 0x164   : > { %p10_p5 = scmp.ge.s32.totalorder %s13_s12, 4  }
 0x166   :  { %12 = sbr.rel (!%p10_p5) target bundleno = 1 (0x1), region = 101 }

// kernel: audio_cnn_forward.4
= control target key start
LH: loop header
LB: loop body
LE: loop exit
PB: predicated region body
PF: predicated region fallthrough
CT: control target
= control target key end

     0   :  { %s8516_s12 = smov 0   ;;  %s10756_s0 = inlined_call_operand.vmem [shape: f32[2,29,241,16], index: 0, kind: input, shape index: {}]   ;;  %s10757_s1 = inlined_call_operand.vmem [shape: f32[4,16,32], index: 1, kind: input, shape index: {}]   ;;  %s10758_s2 = inlined_call_operand.vmem [shape: f32[1,32], index: 2, kind: input, shape index: {}]   ;;  %s10759_s3 = inlined_call_operand.vmem [shape: f32[2,7,60,32], index: 3, kind: output, shape index: {}]  }
   0x1 LB: > { %s6121_s13 = sadd.s32 4294967295, %s8490_s12   ;;  %p6125_p0 = scmp.ge.s32.totalorder %s8490_s12, 1  ;;  %s8490_s12 = sphi %s8516_s12, %s13_s12  }
   0x2   : > { %p137_p1 = scmp.lt.s32.totalorder %s8490_s12, 3 }
   0x4   : > { %p138_p2 = pnand %p6125_p0, %p137_p1 }
   0x5   : > { %p161_p3 = scmp.lt.s32.totalorder (!%p138_p2), %s6121_s13, 1  ;;  %v8527_v0 = vld [vmem:[%s10757_s1] sm:$0xff] (!%p138_p2)  ;;  %v8532_v1 = vld [vmem:[%s10757_s1 + $0x8] sm:$0xff] (!%p138_p2)  ;;  %v8537_v2 = vld [vmem:[%s10757_s1 + $0x10] sm:$0xff] (!%p138_p2)  ;;  %s8579_s15 = smov (!%p138_p2), 0  }
   0x6   : > { %141 = sbr.rel (%p138_p2) target bundleno = 862 (0x35e), region = 32  ;;  %10803 = vst [vmem:[#allocation2_spill] sm:$0xff] (!%p138_p2), %v8527_v0  ;;  %10804 = vst [vmem:[#allocation3_spill] sm:$0xff] (!%p138_p2), %v8532_v1  ;;  %v8542_v3 = vld [vmem:[%s10757_s1 + $0x18] sm:$0xff] (!%p138_p2)  ;;  %v8547_v4 = vld [vmem:[%s10757_s1 + $0x20] sm:$0xff] (!%p138_p2) }
   0x7   : > { %10805 = vst [vmem:[#allocation4_spill] sm:$0xff] (!%p138_p2), %v8537_v2  ;;  %10806 = vst [vmem:[#allocation5_spill] sm:$0xff] (!%p138_p2), %v8542_v3  ;;  %v8552_v5 = vld [vmem:[%s10757_s1 + $0x28] sm:$0xff] (!%p138_p2)  ;;  %v8557_v6 = vld [vmem:[%s10757_s1 + $0x30] sm:$0xff] (!%p138_p2) }
   0x8   : > { %10807 = vst [vmem:[#allocation6_spill] sm:$0xff] (!%p138_p2), %v8547_v4  ;;  %10808 = vst [vmem:[#allocation7_spill] sm:$0xff] (!%p138_p2), %v8552_v5  ;;  %v8562_v7 = vld [vmem:[%s10757_s1 + $0x38] sm:$0xff] (!%p138_p2)  ;;  %v8567_v8 = vld [vmem:[%s10758_s2] ss:$0 sm:$0xff] (!%p138_p2) }
   0x9   : > { %10809 = vst [vmem:[#allocation8_spill] sm:$0xff] (!%p138_p2), %v8557_v6  ;;  %10810 = vst [vmem:[#allocation9_spill] sm:$0xff] (!%p138_p2), %v8562_v7 }
   0xa   : > { %10811 = vst [vmem:[#allocation10_spill] sm:$0xff] (!%p138_p2), %v8567_v8 }
   0xd   : > { %s10976_s13 = smov (!%p161_p3, %s6121_s13), 1 }
   0xe   : > { %s8462_s5 = smul.u32 7192, %s10976_s13 }
   0xf   : > { %s8463_s6 = smul.u32 448, %s10976_s13 }
  0x10   : > { %s8572_s9 = scalar_lea.vmem %s10756_s0, %s8462_s5 }
  0x11   : > { %s8577_s14 = scalar_lea.vmem %s10759_s3, %s8463_s6 }
  0x12 LB: >> { %v10812_v2 = vld [vmem:[#allocation4_spill] sm:$0xff]  ;;  %v10813_v3 = vld [vmem:[#allocation5_spill] sm:$0xff]  ;;  %v10814_v4 = vld [vmem:[#allocation6_spill] sm:$0xff]  ;;  %s6135_s13 = smul.u32 992, %s8494_s15  ;;  %vm432_vm0 = vcmask 130048   ;;  %vm5016_vm1 = vcmask 261120   ;;  %s8494_s15 = sphi %s8579_s15, %s188_s15  }
  0x13   : >> { %v8086_v9 = vpack.c.bf16 %v10813_v3, %v10812_v2  ;;  %v10815_v5 = vld [vmem:[#allocation7_spill] sm:$0xff]  ;;  %v10816_v0 = vld [vmem:[#allocation2_spill] sm:$0xff]  ;;  %v10818_v6 = vld [vmem:[#allocation8_spill] sm:$0xff]  ;;  %vm5317_vm2 = vcmask 257024   ;;  %vm5925_vm3 = vcmask 1041409   ;;  %vm5928_vm4 = vcmask 1042434  }
  0x14   : >> { %v8094_v10 = vpack.c.bf16 %v10815_v5, %v10814_v4  ;;  %v10817_v1 = vld [vmem:[#allocation3_spill] sm:$0xff]  ;;  %v10819_v7 = vld [vmem:[#allocation9_spill] sm:$0xff]  ;;  %s8594_s16 = scalar_lea.vmem %s8572_s9, %s6135_s13  ;;  %vm5931_vm5 = vcmask 1043459   ;;  %vm5934_vm6 = vcmask 1044484   ;;  %vm5937_vm7 = vcmask 1045509   ;;  %s6859_s17 = sshll.u32 %s8494_s15, 6 }
  0x15   : >> { %v8090_v11 = vpack.c.bf16 %v10817_v1, %v10816_v0  ;;  %v8098_v12 = vpack.c.bf16 %v10819_v7, %v10818_v6  ;;  %8087 = vmatprep.subr.bf16.mxu1 %v8086_v9  ;;  %v312_v13 = vld [vmem:[%s8594_s16 + $0x1] sm:$0xff]  ;;  %v6378_v14 = vld [vmem:[%s8594_s16 + $0xf8] sm:$0xff]  ;;  %v313_v15 = vld [vmem:[%s8594_s16 + $0x9] sm:$0xff]  ;;  %vm5940_vm8 = vcmask 1046534   ;;  %vm5943_vm9 = vcmask 1047559   ;;  %s10440_s18 = scalar_lea.vmem %s8577_s14, %s6859_s17  ;;  %s188_s15 = sadd.s32 1, %s8494_s15  }
  0x16   : >> { %8095 = vmatprep.subr.bf16.mxu0 %v8094_v10  ;;  %8089 = vmatpush3.bf16.msra.mxu1 %v8086_v9  ;;  %v6379_v16 = vld [vmem:[%s8594_s16 + $0x100] sm:$0xff]  ;;  %v314_v17 = vld [vmem:[%s8594_s16 + $0x11] sm:$0xff]  ;;  %v6380_v18 = vld [vmem:[%s8594_s16 + $0x108] sm:$0xff]  ;;  %p185_p4 = scmp.ge.s32.totalorder %s188_s15, 7  }
  0x17   : >> { %8097 = vmatpush3.bf16.msra.mxu0 %v8094_v10  ;;  %8091 = vmatprep.subr.bf16.mxu1 %v8090_v11  ;;  %v315_v19 = vld [vmem:[%s8594_s16 + $0x19] sm:$0xff]  ;;  %v6381_v20 = vld [vmem:[%s8594_s16 + $0x110] sm:$0xff]  ;;  %v316_v21 = vld [vmem:[%s8594_s16 + $0x21] sm:$0xff] }
  0x18   : >> { %8099 = vmatprep.subr.bf16.mxu0 %v8098_v12  ;;  %7354 = vmatprep.mubr.msk.f32.mxu1 %vm432_vm0, %v312_v13  ;;  %v6382_v22 = vld [vmem:[%s8594_s16 + $0x118] sm:$0xff]  ;;  %v317_v23 = vld [vmem:[%s8594_s16 + $0x29] sm:$0xff]  ;;  %v6383_v24 = vld [vmem:[%s8594_s16 + $0x120] sm:$0xff] }
  0x19   : >> { %7722 = vmatprep.mubr.msk.f32.mxu0 %vm432_vm0, %v6378_v14  ;;  %7355 = vmatmul.mubr.msk.f32.vlgmr.msra.gmra.mrb[0].mxu1 %vm432_vm0, %v313_v15  ;;  %v318_v25 = vld [vmem:[%s8594_s16 + $0x31] sm:$0xff]  ;;  %v6384_v26 = vld [vmem:[%s8594_s16 + $0x128] sm:$0xff]  ;;  %v319_v27 = vld [vmem:[%s8594_s16 + $0x39] sm:$0xff] }
  0x1a   : >> { %7723 = vmatmul.mubr.msk.f32.vlgmr.msra.gmra.mrb[0].mxu0 %vm432_vm0, %v6379_v16  ;;  %8093 = vmatpush3.bf16.msra.mxu1 %v8090_v11  ;;  %v6385_v28 = vld [vmem:[%s8594_s16 + $0x130] sm:$0xff]  ;;  %v320_v29 = vld [vmem:[%s8594_s16 + $0x41] sm:$0xff]  ;;  %v6386_v30 = vld [vmem:[%s8594_s16 + $0x138] sm:$0xff] }
  0x1b   : >> { %8101 = vmatpush3.bf16.msra.mxu0 %v8098_v12  ;;  %7357 = vmatprep.mubr.msk.f32.mxu1 %vm432_vm0, %v314_v17  ;;  %v321_v31 = vld [vmem:[%s8594_s16 + $0x49] sm:$0xff]  ;;  %v6387_v32 = vld [vmem:[%s8594_s16 + $0x140] sm:$0xff]  ;;  %v322_v33 = vld [vmem:[%s8594_s16 + $0x51] sm:$0xff] }
  0x1c   : >> { %7725 = vmatprep.mubr.msk.f32.mxu0 %vm432_vm0, %v6380_v18  ;;  %v6388_v34 = vld [vmem:[%s8594_s16 + $0x148] sm:$0xff]  ;;  %v323_v35 = vld [vmem:[%s8594_s16 + $0x59] sm:$0xff]  ;;  %v6389_v36 = vld [vmem:[%s8594_s16 + $0x150] sm:$0xff] }
  0x1d   : >> { %7358 = vmatmul.mubr.msk.f32.gmra.mrb[2].mxu1 %vm432_vm0, %v315_v19  ;;  %v324_v37 = vld [vmem:[%s8594_s16 + $0x61] sm:$0xff]  ;;  %v6390_v38 = vld [vmem:[%s8594_s16 + $0x158] sm:$0xff]  ;;  %v325_v39 = vld [vmem:[%s8594_s16 + $0x69] sm:$0xff] }
  0x1e   : >> { %7726 = vmatmul.mubr.msk.f32.gmra.mrb[2].mxu0 %vm432_vm0, %v6381_v20  ;;  %7360 = vmatprep.mubr.msk.f32.mxu1 %vm432_vm0, %v316_v21  ;;  %v6391_v40 = vld [vmem:[%s8594_s16 + $0x160] sm:$0xff]  ;;  %v326_v41 = vld [vmem:[%s8594_s16 + $0x71] sm:$0xff]  ;;  %v6392_v42 = vld [vmem:[%s8594_s16 + $0x168] sm:$0xff] }
  0x1f   : >> { %7728 = vmatprep.mubr.msk.f32.mxu0 %vm432_vm0, %v6382_v22  ;;  %v327_v43 = vld [vmem:[%s8594_s16 + $0x79] sm:$0xff]  ;;  %v6393_v44 = vld [vmem:[%s8594_s16 + $0x170] sm:$0xff]  ;;  %v328_v45 = vld [vmem:[%s8594_s16 + $0x81] sm:$0xff] }
  0x20   : >> { %v6394_v46 = vld [vmem:[%s8594_s16 + $0x178] sm:$0xff]  ;;  %v329_v47 = vld [vmem:[%s8594_s16 + $0x89] sm:$0xff]  ;;  %v6395_v48 = vld [vmem:[%s8594_s16 + $0x180] sm:$0xff] }
  0x21   : >> { %7361 = vmatmul.mubr.msk.f32.gmra.mrb[4].mxu1 %vm432_vm0, %v317_v23  ;;  %v330_v49 = vld [vmem:[%s8594_s16 + $0x91] sm:$0xff]  ;;  %v6396_v50 = vld [vmem:[%s8594_s16 + $0x188] sm:$0xff]  ;;  %v331_v51 = vld [vmem:[%s8594_s16 + $0x99] sm:$0xff] }
  0x22   : >> { %7729 = vmatmul.mubr.msk.f32.gmra.mrb[4].mxu0 %vm432_vm0, %v6383_v24  ;;  %7363 = vmatprep.mubr.msk.f32.mxu1 %vm432_vm0, %v318_v25  ;;  %v6397_v52 = vld [vmem:[%s8594_s16 + $0x190] sm:$0xff]  ;;  %v332_v53 = vld [vmem:[%s8594_s16 + $0xa1] sm:$0xff]  ;;  %v6398_v54 = vld [vmem:[%s8594_s16 + $0x198] sm:$0xff] }
  0x23   : >> { %7731 = vmatprep.mubr.msk.f32.mxu0 %vm432_vm0, %v6384_v26  ;;  %v333_v55 = vld [vmem:[%s8594_s16 + $0xa9] sm:$0xff]  ;;  %v6399_v56 = vld [vmem:[%s8594_s16 + $0x1a0] sm:$0xff]  ;;  %v334_v57 = vld [vmem:[%s8594_s16 + $0xb1] sm:$0xff] }
  0x24   : >> { %v6400_v58 = vld [vmem:[%s8594_s16 + $0x1a8] sm:$0xff]  ;;  %v335_v59 = vld [vmem:[%s8594_s16 + $0xb9] sm:$0xff]  ;;  %v6401_v60 = vld [vmem:[%s8594_s16 + $0x1b0] sm:$0xff] }
  0x25   : >> { %7364 = vmatmul.mubr.msk.f32.gmra.mrb[6].mxu1 %vm432_vm0, %v319_v27  ;;  %v336_v61 = vld [vmem:[%s8594_s16 + $0xc1] sm:$0xff]  ;;  %v6402_v62 = vld [vmem:[%s8594_s16 + $0x1b8] sm:$0xff]  ;;  %v337_v63 = vld [vmem:[%s8594_s16 + $0xc9] sm:$0xff] }
  0x26   : >> { %7732 = vmatmul.mubr.msk.f32.gmra.mrb[6].mxu0 %vm432_vm0, %v6385_v28  ;;  %7366 = vmatprep.mubr.msk.f32.mxu1 %vm432_vm0, %v320_v29  ;;  %v6403_v9 = vld [vmem:[%s8594_s16 + $0x1c0] sm:$0xff]  ;;  %v338_v10 = vld [vmem:[%s8594_s16 + $0xd1] sm:$0xff]  ;;  %v6404_v11 = vld [vmem:[%s8594_s16 + $0x1c8] sm:$0xff] }
  0x27   : >> { %7734 = vmatprep.mubr.msk.f32.mxu0 %vm432_vm0, %v6386_v30  ;;  %v339_v12 = vld [vmem:[%s8594_s16 + $0xd9] sm:$0xff]  ;;  %v6405_v13 = vld [vmem:[%s8594_s16 + $0x1d0] sm:$0xff]  ;;  %v340_v14 = vld [vmem:[%s8594_s16 + $0xe1] sm:$0xff] }
  0x28   : >> { %v6406_v15 = vld [vmem:[%s8594_s16 + $0x1d8] sm:$0xff]  ;;  %v341_v16 = vld [vmem:[%s8594_s16 + $0xe9] sm:$0xff]  ;;  %v6407_v17 = vld [vmem:[%s8594_s16 + $0x1e0] sm:$0xff] }
  0x29   : >> { %7367 = vmatmul.mubr.msk.f32.gmra.mrb[8].mxu1 %vm432_vm0, %v321_v31  ;;  %v8715_v18 = vld [vmem:[%s8594_s16 + $0xf9] sm:$0xff]  ;;  %v6408_v19 = vld [vmem:[%s8594_s16 + $0x1f0] sm:$0xff]  ;;  %v8724_v20 = vld [vmem:[%s8594_s16 + $0x101] sm:$0xff] }
  0x2a   : >> { %7735 = vmatmul.mubr.msk.f32.gmra.mrb[8].mxu0 %vm432_vm0, %v6387_v32  ;;  %7369 = vmatprep.mubr.msk.f32.mxu1 %vm432_vm0, %v322_v33  ;;  %v6409_v21 = vld [vmem:[%s8594_s16 + $0x1f8] sm:$0xff]  ;;  %v8728_v22 = vld [vmem:[%s8594_s16 + $0x109] sm:$0xff]  ;;  %v6410_v23 = vld [vmem:[%s8594_s16 + $0x200] sm:$0xff] }
  0x2b   : >> { %7737 = vmatprep.mubr.msk.f32.mxu0 %vm432_vm0, %v6388_v34  ;;  %v8738_v24 = vld [vmem:[%s8594_s16 + $0x111] sm:$0xff]  ;;  %v6411_v25 = vld [vmem:[%s8594_s16 + $0x208] sm:$0xff]  ;;  %v8742_v26 = vld [vmem:[%s8594_s16 + $0x119] sm:$0xff] }
  0x2c   : >> { %v6412_v27 = vld [vmem:[%s8594_s16 + $0x210] sm:$0xff]  ;;  %v8752_v28 = vld [vmem:[%s8594_s16 + $0x121] sm:$0xff]  ;;  %v6413_v29 = vld [vmem:[%s8594_s16 + $0x218] sm:$0xff] }
  0x2d   : >> { %7370 = vmatmul.mubr.msk.f32.gmra.mrb[10].mxu1 %vm432_vm0, %v323_v35  ;;  %v8756_v30 = vld [vmem:[%s8594_s16 + $0x129] sm:$0xff]  ;;  %v6414_v31 = vld [vmem:[%s8594_s16 + $0x220] sm:$0xff]  ;;  %v8766_v32 = vld [vmem:[%s8594_s16 + $0x131] sm:$0xff] }
  0x2e   : >> { %7738 = vmatmul.mubr.msk.f32.gmra.mrb[10].mxu0 %vm432_vm0, %v6389_v36  ;;  %7372 = vmatprep.mubr.msk.f32.mxu1 %vm432_vm0, %v324_v37  ;;  %v6415_v33 = vld [vmem:[%s8594_s16 + $0x228] sm:$0xff]  ;;  %v8770_v34 = vld [vmem:[%s8594_s16 + $0x139] sm:$0xff]  ;;  %v6416_v35 = vld [vmem:[%s8594_s16 + $0x230] sm:$0xff] }
  0x2f   : >> { %7740 = vmatprep.mubr.msk.f32.mxu0 %vm432_vm0, %v6390_v38  ;;  %v8780_v36 = vld [vmem:[%s8594_s16 + $0x141] sm:$0xff]  ;;  %v6417_v37 = vld [vmem:[%s8594_s16 + $0x238] sm:$0xff]  ;;  %v8784_v38 = vld [vmem:[%s8594_s16 + $0x149] sm:$0xff] }
  0x30   : >> { %v9078_v0 = vld [vmem:[%s8594_s16 + $0x2a1] sm:$0xff]  ;;  %v6460_v1 = vld [vmem:[%s8594_s16 + $0x398] sm:$0xff]  ;;  %v9134_v8 = vld [vmem:[%s8594_s16 + $0x2e9] sm:$0xff] }
  0x31   : >> { %7373 = vmatmul.mubr.msk.f32.gmra.mrb[12].mxu1 %vm432_vm0, %v325_v39  ;;  %v6418_v39 = vld [vmem:[%s8594_s16 + $0x240] sm:$0xff]  ;;  %v9092_v2 = vld [vmem:[%s8594_s16 + $0x2b1] sm:$0xff]  ;;  %v6462_v3 = vld [vmem:[%s8594_s16 + $0x3a8] sm:$0xff]  ;;  %10824 = vst [vmem:[#allocation15_spill] sm:$0xff] %v9134_v8 }
  0x32   : >> { %7741 = vmatmul.mubr.msk.f32.gmra.mrb[12].mxu0 %vm432_vm0, %v6391_v40  ;;  %7375 = vmatprep.mubr.msk.f32.mxu1 %vm432_vm0, %v326_v41  ;;  %v8794_v40 = vld [vmem:[%s8594_s16 + $0x151] sm:$0xff]  ;;  %v6419_v41 = vld [vmem:[%s8594_s16 + $0x248] sm:$0xff] }
  0x33   : >> { %7743 = vmatprep.mubr.msk.f32.mxu0 %vm432_vm0, %v6392_v42  ;;  %v8798_v42 = vld [vmem:[%s8594_s16 + $0x159] sm:$0xff]  ;;  %v9106_v4 = vld [vmem:[%s8594_s16 + $0x2c1] sm:$0xff]  ;;  %v9120_v6 = vld [vmem:[%s8594_s16 + $0x2d1] sm:$0xff] }
  0x34   : >> { %10820 = vst [vmem:[#allocation11_spill] sm:$0xff] %v9106_v4  ;;  %v6464_v5 = vld [vmem:[%s8594_s16 + $0x3b8] sm:$0xff]  ;;  %10822 = vst [vmem:[#allocation13_spill] sm:$0xff] %v9120_v6  ;;  %v6466_v7 = vld [vmem:[%s8594_s16 + $0x3c8] sm:$0xff] }
  0x35   : >> { %7376 = vmatmul.mubr.msk.f32.gmra.mrb[14].mxu1 %vm432_vm0, %v327_v43  ;;  %v6420_v43 = vld [vmem:[%s8594_s16 + $0x250] sm:$0xff] }
  0x36   : >> { %7744 = vmatmul.mubr.msk.f32.gmra.mrb[14].mxu0 %vm432_vm0, %v6393_v44  ;;  %7378 = vmatprep.mubr.msk.f32.mxu1 %vm432_vm0, %v328_v45  ;;  %v8808_v44 = vld [vmem:[%s8594_s16 + $0x161] sm:$0xff]  ;;  %v6421_v45 = vld [vmem:[%s8594_s16 + $0x258] sm:$0xff] }
  0x37   : >> { %7746 = vmatprep.mubr.msk.f32.mxu0 %vm432_vm0, %v6394_v46  ;;  %v8812_v46 = vld [vmem:[%s8594_s16 + $0x169] sm:$0xff] }
  0x39   : >> { %7379 = vmatmul.mubr.msk.f32.gmra.mrb[16].mxu1 %vm432_vm0, %v329_v47  ;;  %v6422_v47 = vld [vmem:[%s8594_s16 + $0x260] sm:$0xff] }
  0x3a   : >> { %7747 = vmatmul.mubr.msk.f32.gmra.mrb[16].mxu0 %vm432_vm0, %v6395_v48  ;;  %7381 = vmatprep.mubr.msk.f32.mxu1 %vm432_vm0, %v330_v49  ;;  %v8822_v48 = vld [vmem:[%s8594_s16 + $0x171] sm:$0xff]  ;;  %v6423_v49 = vld [vmem:[%s8594_s16 + $0x268] sm:$0xff] }
  0x3b   : >> { %7749 = vmatprep.mubr.msk.f32.mxu0 %vm432_vm0, %v6396_v50  ;;  %v8826_v50 = vld [vmem:[%s8594_s16 + $0x179] sm:$0xff] }
  0x3d   : >> { %7382 = vmatmul.mubr.msk.f32.gmra.mrb[18].mxu1 %vm432_vm0, %v331_v51  ;;  %v6424_v51 = vld [vmem:[%s8594_s16 + $0x270] sm:$0xff] }
  0x3e   : >> { %7750 = vmatmul.mubr.msk.f32.gmra.mrb[18].mxu0 %vm432_vm0, %v6397_v52  ;;  %7384 = vmatprep.mubr.msk.f32.mxu1 %vm432_vm0, %v332_v53  ;;  %v8836_v52 = vld [vmem:[%s8594_s16 + $0x181] sm:$0xff]  ;;  %v6425_v53 = vld [vmem:[%s8594_s16 + $0x278] sm:$0xff] }
  0x3f   : >> { %7752 = vmatprep.mubr.msk.f32.mxu0 %vm432_vm0, %v6398_v54  ;;  %v8840_v54 = vld [vmem:[%s8594_s16 + $0x189] sm:$0xff] }
  0x41   : >> { %7385 = vmatmul.mubr.msk.f32.gmra.mrb[20].mxu1 %vm432_vm0, %v333_v55  ;;  %v6426_v55 = vld [vmem:[%s8594_s16 + $0x280] sm:$0xff] }
  0x42   : >> { %7753 = vmatmul.mubr.msk.f32.gmra.mrb[20].mxu0 %vm432_vm0, %v6399_v56  ;;  %7387 = vmatprep.mubr.msk.f32.mxu1 %vm432_vm0, %v334_v57  ;;  %v8850_v56 = vld [vmem:[%s8594_s16 + $0x191] sm:$0xff]  ;;  %v6427_v57 = vld [vmem:[%s8594_s16 + $0x288] sm:$0xff] }
  0x43   : >> { %7755 = vmatprep.mubr.msk.f32.mxu0 %vm432_vm0, %v6400_v58  ;;  %v8854_v58 = vld [vmem:[%s8594_s16 + $0x199] sm:$0xff] }
  0x45   : >> { %7388 = vmatmul.mubr.msk.f32.gmra.mrb[22].mxu1 %vm432_vm0, %v335_v59  ;;  %v6428_v59 = vld [vmem:[%s8594_s16 + $0x290] sm:$0xff] }
  0x46   : >> { %7756 = vmatmul.mubr.msk.f32.gmra.mrb[22].mxu0 %vm432_vm0, %v6401_v60  ;;  %7390 = vmatprep.mubr.msk.f32.mxu1 %vm432_vm0, %v336_v61  ;;  %v8864_v60 = vld [vmem:[%s8594_s16 + $0x1a1] sm:$0xff]  ;;  %v6429_v61 = vld [vmem:[%s8594_s16 + $0x298] sm:$0xff] }
  0x47   : >> { %7758 = vmatprep.mubr.msk.f32.mxu0 %vm432_vm0, %v6402_v62  ;;  %v8868_v62 = vld [vmem:[%s8594_s16 + $0x1a9] sm:$0xff] }
  0x49   : >> { %7391 = vmatmul.mubr.msk.f32.gmra.mrb[24].mxu1 %vm432_vm0, %v337_v63  ;;  %v6430_v63 = vld [vmem:[%s8594_s16 + $0x2a0] sm:$0xff] }
  0x4a   : >> { %7759 = vmatmul.mubr.msk.f32.gmra.mrb[24].mxu0 %vm432_vm0, %v6403_v9  ;;  %7393 = vmatprep.mubr.msk.f32.mxu1 %vm432_vm0, %v338_v10  ;;  %v8878_v9 = vld [vmem:[%s8594_s16 + $0x1b1] sm:$0xff]  ;;  %v6431_v10 = vld [vmem:[%s8594_s16 + $0x2a8] sm:$0xff] }
  0x4b   : >> { %7761 = vmatprep.mubr.msk.f32.mxu0 %vm432_vm0, %v6404_v11  ;;  %v8882_v11 = vld [vmem:[%s8594_s16 + $0x1b9] sm:$0xff] }
  0x4d   : >> { %7394 = vmatmul.mubr.msk.f32.gmra.mrb[26].mxu1 %vm432_vm0, %v339_v12  ;;  %v6432_v12 = vld [vmem:[%s8594_s16 + $0x2b0] sm:$0xff] }
  0x4e   : >> { %7762 = vmatmul.mubr.msk.f32.gmra.mrb[26].mxu0 %vm432_vm0, %v6405_v13  ;;  %7396 = vmatprep.mubr.msk.f32.mxu1 %vm432_vm0, %v340_v14  ;;  %v8892_v13 = vld [vmem:[%s8594_s16 + $0x1c1] sm:$0xff]  ;;  %v6433_v14 = vld [vmem:[%s8594_s16 + $0x2b8] sm:$0xff] }
  0x4f   : >> { %7764 = vmatprep.mubr.msk.f32.mxu0 %vm432_vm0, %v6406_v15  ;;  %v8896_v15 = vld [vmem:[%s8594_s16 + $0x1c9] sm:$0xff] }
  0x51   : >> { %7397 = vmatmul.mubr.msk.f32.gmra.mrb[28].mxu1 %vm432_vm0, %v341_v16  ;;  %v6434_v16 = vld [vmem:[%s8594_s16 + $0x2c0] sm:$0xff] }
  0x52   : >> { %7765 = vmatmul.mubr.msk.f32.gmra.mrb[28].mxu0 %vm432_vm0, %v6407_v17  ;;  %7399 = vmatprep.mubr.msk.f32.mxu1 %vm432_vm0, %v8715_v18  ;;  %v8906_v17 = vld [vmem:[%s8594_s16 + $0x1d1] sm:$0xff] }
  0x53   : >> { %7767 = vmatprep.mubr.msk.f32.mxu0 %vm432_vm0, %v6408_v19  ;;  %v6435_v19 = vld [vmem:[%s8594_s16 + $0x2c8] sm:$0xff] }
  0x55   : >> { %7400 = vmatmul.mubr.msk.f32.gmra.mrb[30].mxu1 %vm432_vm0, %v8724_v20 }
  0x56   : >> { %7768 = vmatmul.mubr.msk.f32.gmra.mrb[30].mxu0 %vm432_vm0, %v6409_v21  ;;  %7402 = vmatprep.mubr.msk.f32.mxu1 %vm432_vm0, %v8728_v22  ;;  %v8910_v21 = vld [vmem:[%s8594_s16 + $0x1d9] sm:$0xff] }
  0x57   : >> { %7770 = vmatprep.mubr.msk.f32.mxu0 %vm432_vm0, %v6410_v23  ;;  %v6436_v23 = vld [vmem:[%s8594_s16 + $0x2d0] sm:$0xff] }
  0x59   : >> { %7403 = vmatmul.mubr.msk.f32.gmra.mrb[32].mxu1 %vm432_vm0, %v8738_v24 }
  0x5a   : >> { %7771 = vmatmul.mubr.msk.f32.gmra.mrb[32].mxu0 %vm432_vm0, %v6411_v25  ;;  %7405 = vmatprep.mubr.msk.f32.mxu1 %vm432_vm0, %v8742_v26  ;;  %v8920_v25 = vld [vmem:[%s8594_s16 + $0x1e1] sm:$0xff] }
  0x5b   : >> { %7773 = vmatprep.mubr.msk.f32.mxu0 %vm432_vm0, %v6412_v27  ;;  %v6437_v27 = vld [vmem:[%s8594_s16 + $0x2d8] sm:$0xff] }
  0x5d   : >> { %7406 = vmatmul.mubr.msk.f32.gmra.mrb[34].mxu1 %vm432_vm0, %v8752_v28 }
  0x5e   : >> { %7774 = vmatmul.mubr.msk.f32.gmra.mrb[34].mxu0 %vm432_vm0, %v6413_v29  ;;  %7408 = vmatprep.mubr.msk.f32.mxu1 %vm432_vm0, %v8756_v30  ;;  %v8924_v29 = vld [vmem:[%s8594_s16 + $0x1f1] sm:$0xff] }
  0x5f   : >> { %7776 = vmatprep.mubr.msk.f32.mxu0 %vm432_vm0, %v6414_v31  ;;  %v6438_v31 = vld [vmem:[%s8594_s16 + $0x2e8] sm:$0xff] }
  0x61   : >> { %7409 = vmatmul.mubr.msk.f32.gmra.mrb[36].mxu1 %vm432_vm0, %v8766_v32 }
  0x62   : >> { %7777 = vmatmul.mubr.msk.f32.gmra.mrb[36].mxu0 %vm432_vm0, %v6415_v33  ;;  %7411 = vmatprep.mubr.msk.f32.mxu1 %vm432_vm0, %v8770_v34  ;;  %v8934_v33 = vld [vmem:[%s8594_s16 + $0x1f9] sm:$0xff] }
  0x63   : >> { %7779 = vmatprep.mubr.msk.f32.mxu0 %vm432_vm0, %v6416_v35  ;;  %v6439_v35 = vld [vmem:[%s8594_s16 + $0x2f0] sm:$0xff] }
  0x65   : >> { %7412 = vmatmul.mubr.msk.f32.gmra.mrb[38].mxu1 %vm432_vm0, %v8780_v36 }
  0x66   : >> { %7780 = vmatmul.mubr.msk.f32.gmra.mrb[38].mxu0 %vm432_vm0, %v6417_v37  ;;  %7414 = vmatprep.mubr.msk.f32.mxu1 %vm432_vm0, %v8784_v38  ;;  %v8938_v37 = vld [vmem:[%s8594_s16 + $0x201] sm:$0xff] }
  0x67   : >> { %7782 = vmatprep.mubr.msk.f32.mxu0 %vm432_vm0, %v6418_v39  ;;  %v6440_v39 = vld [vmem:[%s8594_s16 + $0x2f8] sm:$0xff] }
  0x69   : >> { %7415 = vmatmul.mubr.msk.f32.gmra.mrb[40].mxu1 %vm432_vm0, %v8794_v40 }
  0x6a   : >> { %7783 = vmatmul.mubr.msk.f32.gmra.mrb[40].mxu0 %vm432_vm0, %v6419_v41  ;;  %7417 = vmatprep.mubr.msk.f32.mxu1 %vm432_vm0, %v8798_v42  ;;  %v8948_v41 = vld [vmem:[%s8594_s16 + $0x209] sm:$0xff] }
  0x6b   : >> { %7785 = vmatprep.mubr.msk.f32.mxu0 %vm432_vm0, %v6420_v43  ;;  %v6441_v43 = vld [vmem:[%s8594_s16 + $0x300] sm:$0xff] }
  0x6d   : >> { %7418 = vmatmul.mubr.msk.f32.gmra.mrb[42].mxu1 %vm432_vm0, %v8808_v44 }
  0x6e   : >> { %7786 = vmatmul.mubr.msk.f32.gmra.mrb[42].mxu0 %vm432_vm0, %v6421_v45  ;;  %7420 = vmatprep.mubr.msk.f32.mxu1 %vm432_vm0, %v8812_v46  ;;  %v8952_v45 = vld [vmem:[%s8594_s16 + $0x211] sm:$0xff] }
  0x6f   : >> { %7788 = vmatprep.mubr.msk.f32.mxu0 %vm432_vm0, %v6422_v47  ;;  %v6442_v47 = vld [vmem:[%s8594_s16 + $0x308] sm:$0xff] }
  0x71   : >> { %7421 = vmatmul.mubr.msk.f32.gmra.mrb[44].mxu1 %vm432_vm0, %v8822_v48 }
  0x72   : >> { %7789 = vmatmul.mubr.msk.f32.gmra.mrb[44].mxu0 %vm432_vm0, %v6423_v49  ;;  %7423 = vmatprep.mubr.msk.f32.mxu1 %vm432_vm0, %v8826_v50  ;;  %v8962_v49 = vld [vmem:[%s8594_s16 + $0x219] sm:$0xff] }
  0x73   : >> { %7791 = vmatprep.mubr.msk.f32.mxu0 %vm432_vm0, %v6424_v51  ;;  %v6443_v51 = vld [vmem:[%s8594_s16 + $0x310] sm:$0xff] }
  0x75   : >> { %7424 = vmatmul.mubr.msk.f32.gmra.mrb[46].mxu1 %vm432_vm0, %v8836_v52 }
  0x76   : >> { %7792 = vmatmul.mubr.msk.f32.gmra.mrb[46].mxu0 %vm432_vm0, %v6425_v53  ;;  %7426 = vmatprep.mubr.msk.f32.mxu1 %vm432_vm0, %v8840_v54  ;;  %v8966_v53 = vld [vmem:[%s8594_s16 + $0x221] sm:$0xff] }
  0x77   : >> { %7794 = vmatprep.mubr.msk.f32.mxu0 %vm432_vm0, %v6426_v55  ;;  %v6444_v55 = vld [vmem:[%s8594_s16 + $0x318] sm:$0xff] }
  0x79   : >> { %7427 = vmatmul.mubr.msk.f32.gmra.mrb[48].mxu1 %vm432_vm0, %v8850_v56 }
  0x7a   : >> { %7795 = vmatmul.mubr.msk.f32.gmra.mrb[48].mxu0 %vm432_vm0, %v6427_v57  ;;  %7429 = vmatprep.mubr.msk.f32.mxu1 %vm432_vm0, %v8854_v58  ;;  %v8976_v57 = vld [vmem:[%s8594_s16 + $0x229] sm:$0xff] }
  0x7b   : >> { %7797 = vmatprep.mubr.msk.f32.mxu0 %vm432_vm0, %v6428_v59  ;;  %v6445_v59 = vld [vmem:[%s8594_s16 + $0x320] sm:$0xff] }
  0x7d   : >> { %7430 = vmatmul.mubr.msk.f32.gmra.mrb[50].mxu1 %vm432_vm0, %v8864_v60 }
  0x7e   : >> { %7798 = vmatmul.mubr.msk.f32.gmra.mrb[50].mxu0 %vm432_vm0, %v6429_v61  ;;  %7432 = vmatprep.mubr.msk.f32.mxu1 %vm432_vm0, %v8868_v62  ;;  %v8980_v61 = vld [vmem:[%s8594_s16 + $0x231] sm:$0xff] }
  0x7f   : >> { %7800 = vmatprep.mubr.msk.f32.mxu0 %vm432_vm0, %v6430_v63  ;;  %v6446_v63 = vld [vmem:[%s8594_s16 + $0x328] sm:$0xff] }
  0x81   : >> { %7433 = vmatmul.mubr.msk.f32.gmra.mrb[52].mxu1 %vm432_vm0, %v8878_v9 }
  0x82   : >> { %7801 = vmatmul.mubr.msk.f32.gmra.mrb[52].mxu0 %vm432_vm0, %v6431_v10  ;;  %7435 = vmatprep.mubr.msk.f32.mxu1 %vm432_vm0, %v8882_v11  ;;  %v8990_v10 = vld [vmem:[%s8594_s16 + $0x239] sm:$0xff] }
  0x83   : >> { %7803 = vmatprep.mubr.msk.f32.mxu0 %vm432_vm0, %v6432_v12  ;;  %v6447_v12 = vld [vmem:[%s8594_s16 + $0x330] sm:$0xff] }
  0x85   : >> { %7436 = vmatmul.mubr.msk.f32.gmra.mrb[54].mxu1 %vm432_vm0, %v8892_v13 }
  0x86   : >> { %7804 = vmatmul.mubr.msk.f32.gmra.mrb[54].mxu0 %vm432_vm0, %v6433_v14  ;;  %7438 = vmatprep.mubr.msk.f32.mxu1 %vm432_vm0, %v8896_v15  ;;  %v8994_v14 = vld [vmem:[%s8594_s16 + $0x241] sm:$0xff] }
  0x87   : >> { %7806 = vmatprep.mubr.msk.f32.mxu0 %vm432_vm0, %v6434_v16  ;;  %v6448_v16 = vld [vmem:[%s8594_s16 + $0x338] sm:$0xff] }
  0x89   : >> { %7439 = vmatmul.mubr.msk.f32.gmra.mrb[56].mxu1 %vm432_vm0, %v8906_v17 }
  0x8a   : >> { %7807 = vmatmul.mubr.msk.f32.gmra.mrb[56].mxu0 %vm432_vm0, %v6435_v19  ;;  %7441 = vmatprep.mubr.msk.f32.mxu1 %vm432_vm0, %v8910_v21  ;;  %v9004_v19 = vld [vmem:[%s8594_s16 + $0x249] sm:$0xff] }
  0x8b   : >> { %7809 = vmatprep.mubr.msk.f32.mxu0 %vm432_vm0, %v6436_v23  ;;  %v6449_v23 = vld [vmem:[%s8594_s16 + $0x340] sm:$0xff] }
  0x8d   : >> { %7442 = vmatmul.mubr.msk.f32.gmra.mrb[58].mxu1 %vm432_vm0, %v8920_v25 }
  0x8e   : >> { %7810 = vmatmul.mubr.msk.f32.gmra.mrb[58].mxu0 %vm432_vm0, %v6437_v27  ;;  %7444 = vmatprep.mubr.msk.f32.mxu1 %vm432_vm0, %v8924_v29  ;;  %v9008_v27 = vld [vmem:[%s8594_s16 + $0x251] sm:$0xff] }
  0x8f   : >> { %7812 = vmatprep.mubr.msk.f32.mxu0 %vm432_vm0, %v6438_v31  ;;  %v6450_v31 = vld [vmem:[%s8594_s16 + $0x348] sm:$0xff] }
  0x91   : >> { %7445 = vmatmul.mubr.msk.f32.gmra.mrb[60].mxu1 %vm432_vm0, %v8934_v33 }
  0x92   : >> { %7813 = vmatmul.mubr.msk.f32.gmra.mrb[60].mxu0 %vm432_vm0, %v6439_v35  ;;  %7447 = vmatprep.mubr.msk.f32.mxu1 %vm432_vm0, %v8938_v37  ;;  %v9018_v35 = vld [vmem:[%s8594_s16 + $0x259] sm:$0xff] }
  0x93   : >> { %7815 = vmatprep.mubr.msk.f32.mxu0 %vm432_vm0, %v6440_v39  ;;  %v6451_v39 = vld [vmem:[%s8594_s16 + $0x350] sm:$0xff] }
  0x95   : >> { %7448 = vmatmul.mubr.msk.f32.gmra.mrb[62].mxu1 %vm432_vm0, %v8948_v41 }
  0x96   : >> { %7816 = vmatmul.mubr.msk.f32.gmra.mrb[62].mxu0 %vm432_vm0, %v6441_v43  ;;  %7450 = vmatprep.mubr.msk.f32.mxu1 %vm432_vm0, %v8952_v45  ;;  %v9022_v43 = vld [vmem:[%s8594_s16 + $0x261] sm:$0xff] }
  0x97   : >> { %7818 = vmatprep.mubr.msk.f32.mxu0 %vm432_vm0, %v6442_v47  ;;  %v6452_v47 = vld [vmem:[%s8594_s16 + $0x358] sm:$0xff] }
  0x99   : >> { %7451 = vmatmul.mubr.msk.f32.gmra.mrb[64].mxu1 %vm432_vm0, %v8962_v49 }
  0x9a   : >> { %7819 = vmatmul.mubr.msk.f32.gmra.mrb[64].mxu0 %vm432_vm0, %v6443_v51  ;;  %7453 = vmatprep.mubr.msk.f32.mxu1 %vm432_vm0, %v8966_v53  ;;  %v9032_v51 = vld [vmem:[%s8594_s16 + $0x269] sm:$0xff] }
  0x9b   : >> { %7821 = vmatprep.mubr.msk.f32.mxu0 %vm432_vm0, %v6444_v55  ;;  %v6453_v55 = vld [vmem:[%s8594_s16 + $0x360] sm:$0xff] }
  0x9d   : >> { %7454 = vmatmul.mubr.msk.f32.gmra.mrb[66].mxu1 %vm432_vm0, %v8976_v57 }
  0x9e   : >> { %7822 = vmatmul.mubr.msk.f32.gmra.mrb[66].mxu0 %vm432_vm0, %v6445_v59  ;;  %7456 = vmatprep.mubr.msk.f32.mxu1 %vm432_vm0, %v8980_v61  ;;  %v9036_v59 = vld [vmem:[%s8594_s16 + $0x271] sm:$0xff] }
  0x9f   : >> { %7824 = vmatprep.mubr.msk.f32.mxu0 %vm432_vm0, %v6446_v63  ;;  %v6454_v63 = vld [vmem:[%s8594_s16 + $0x368] sm:$0xff] }
  0xa1   : >> { %7457 = vmatmul.mubr.msk.f32.gmra.mrb[68].mxu1 %vm432_vm0, %v8990_v10 }
  0xa2   : >> { %7825 = vmatmul.mubr.msk.f32.gmra.mrb[68].mxu0 %vm432_vm0, %v6447_v12  ;;  %7459 = vmatprep.mubr.msk.f32.mxu1 %vm432_vm0, %v8994_v14  ;;  %v9046_v12 = vld [vmem:[%s8594_s16 + $0x279] sm:$0xff] }
  0xa3   : >> { %7827 = vmatprep.mubr.msk.f32.mxu0 %vm432_vm0, %v6448_v16  ;;  %v6455_v16 = vld [vmem:[%s8594_s16 + $0x370] sm:$0xff] }
  0xa5   : >> { %7460 = vmatmul.mubr.msk.f32.gmra.mrb[70].mxu1 %vm432_vm0, %v9004_v19 }
  0xa6   : >> { %7828 = vmatmul.mubr.msk.f32.gmra.mrb[70].mxu0 %vm432_vm0, %v6449_v23  ;;  %7462 = vmatprep.mubr.msk.f32.mxu1 %vm432_vm0, %v9008_v27  ;;  %v9050_v23 = vld [vmem:[%s8594_s16 + $0x281] sm:$0xff] }
  0xa7   : >> { %7830 = vmatprep.mubr.msk.f32.mxu0 %vm432_vm0, %v6450_v31  ;;  %v6456_v31 = vld [vmem:[%s8594_s16 + $0x378] sm:$0xff] }
  0xa9   : >> { %7463 = vmatmul.mubr.msk.f32.gmra.mrb[72].mxu1 %vm432_vm0, %v9018_v35 }
  0xaa   : >> { %7831 = vmatmul.mubr.msk.f32.gmra.mrb[72].mxu0 %vm432_vm0, %v6451_v39  ;;  %7465 = vmatprep.mubr.msk.f32.mxu1 %vm432_vm0, %v9022_v43  ;;  %v9060_v39 = vld [vmem:[%s8594_s16 + $0x289] sm:$0xff] }
  0xab   : >> { %7833 = vmatprep.mubr.msk.f32.mxu0 %vm432_vm0, %v6452_v47  ;;  %v6457_v47 = vld [vmem:[%s8594_s16 + $0x380] sm:$0xff] }
  0xad   : >> { %7466 = vmatmul.mubr.msk.f32.gmra.mrb[74].mxu1 %vm432_vm0, %v9032_v51 }
  0xae   : >> { %7834 = vmatmul.mubr.msk.f32.gmra.mrb[74].mxu0 %vm432_vm0, %v6453_v55  ;;  %7468 = vmatprep.mubr.msk.f32.mxu1 %vm432_vm0, %v9036_v59  ;;  %v9064_v55 = vld [vmem:[%s8594_s16 + $0x291] sm:$0xff] }
  0xaf   : >> { %7836 = vmatprep.mubr.msk.f32.mxu0 %vm432_vm0, %v6454_v63  ;;  %v6458_v63 = vld [vmem:[%s8594_s16 + $0x388] sm:$0xff] }
  0xb1   : >> { %7469 = vmatmul.mubr.msk.f32.gmra.mrb[76].mxu1 %vm432_vm0, %v9046_v12 }
  0xb2   : >> { %7837 = vmatmul.mubr.msk.f32.gmra.mrb[76].mxu0 %vm432_vm0, %v6455_v16  ;;  %7471 = vmatprep.mubr.msk.f32.mxu1 %vm432_vm0, %v9050_v23  ;;  %v9074_v16 = vld [vmem:[%s8594_s16 + $0x299] sm:$0xff] }
  0xb3   : >> { %7839 = vmatprep.mubr.msk.f32.mxu0 %vm432_vm0, %v6456_v31  ;;  %v6459_v31 = vld [vmem:[%s8594_s16 + $0x390] sm:$0xff] }
  0xb5   : >> { %7472 = vmatmul.mubr.msk.f32.gmra.mrb[78].mxu1 %vm432_vm0, %v9060_v39 }
  0xb6   : >> { %7840 = vmatmul.mubr.msk.f32.gmra.mrb[78].mxu0 %vm432_vm0, %v6457_v47  ;;  %7474 = vmatprep.mubr.msk.f32.mxu1 %vm432_vm0, %v9064_v55  ;;  %v9088_v47 = vld [vmem:[%s8594_s16 + $0x2a9] sm:$0xff] }
  0xb7   : >> { %7842 = vmatprep.mubr.msk.f32.mxu0 %vm432_vm0, %v6458_v63  ;;  %v6461_v63 = vld [vmem:[%s8594_s16 + $0x3a0] sm:$0xff] }
  0xb9   : >> { %7475 = vmatmul.mubr.msk.f32.gmra.mrb[80].mxu1 %vm432_vm0, %v9074_v16 }
  0xba   : >> { %7843 = vmatmul.mubr.msk.f32.gmra.mrb[80].mxu0 %vm432_vm0, %v6459_v31  ;;  %7477 = vmatprep.mubr.msk.f32.mxu1 %vm432_vm0, %v9078_v0  ;;  %v6463_v31 = vld [vmem:[%s8594_s16 + $0x3b0] sm:$0xff] }
  0xbb   : >> { %7845 = vmatprep.mubr.msk.f32.mxu0 %vm432_vm0, %v6460_v1  ;;  %v9102_v1 = vld [vmem:[%s8594_s16 + $0x2b9] sm:$0xff] }
  0xbd   : >> { %7478 = vmatmul.mubr.msk.f32.gmra.mrb[82].mxu1 %vm432_vm0, %v9088_v47 }
  0xbe   : >> { %7846 = vmatmul.mubr.msk.f32.gmra.mrb[82].mxu0 %vm432_vm0, %v6461_v63  ;;  %7480 = vmatprep.mubr.msk.f32.mxu1 %vm432_vm0, %v9092_v2  ;;  %v6465_v63 = vld [vmem:[%s8594_s16 + $0x3c0] sm:$0xff] }
  0xbf   : >> { %7848 = vmatprep.mubr.msk.f32.mxu0 %vm432_vm0, %v6462_v3  ;;  %v9116_v3 = vld [vmem:[%s8594_s16 + $0x2c9] sm:$0xff] }
  0xc0   : >> { %10821 = vst [vmem:[#allocation12_spill] sm:$0xff] %v9116_v3 }
  0xc1   : >> { %7481 = vmatmul.mubr.msk.f32.gmra.mrb[84].mxu1 %vm432_vm0, %v9102_v1 }
  0xc2   : >> { %7849 = vmatmul.mubr.msk.f32.gmra.mrb[84].mxu0 %vm432_vm0, %v6463_v31  ;;  %7483 = vmatprep.mubr.msk.f32.mxu1 %vm432_vm0, %v9106_v4  ;;  %v6467_v31 = vld [vmem:[%s8594_s16 + $0x3d0] sm:$0xff]  ;;  %v6468_v4 = vld [vmem:[%s8594_s16 + $0x3e0] sm:$0xff] }
  0xc3   : >> { %7851 = vmatprep.mubr.msk.f32.mxu0 %vm432_vm0, %v6464_v5  ;;  %v9130_v5 = vld [vmem:[%s8594_s16 + $0x2d9] sm:$0xff] }
  0xc4   : >> { %10823 = vst [vmem:[#allocation14_spill] sm:$0xff] %v9130_v5 }
  0xc5   : >> { %7484 = vmatmul.mubr.msk.f32.gmra.mrb[86].mxu1 %vm432_vm0, %v9116_v3  ;;  %v6470_v3 = vld [vmem:[%s8594_s16 + $0x3f0] sm:$0xff] }
  0xc6   : >> { %7852 = vmatmul.mubr.msk.f32.gmra.mrb[86].mxu0 %vm432_vm0, %v6465_v63  ;;  %7486 = vmatprep.mubr.msk.f32.mxu1 %vm432_vm0, %v9120_v6  ;;  %v6469_v63 = vld [vmem:[%s8594_s16 + $0x3e8] sm:$0xff]  ;;  %v9148_v6 = vld [vmem:[%s8594_s16 + $0x2f9] sm:$0xff] }
  0xc7   : >> { %7854 = vmatprep.mubr.msk.f32.mxu0 %vm432_vm0, %v6466_v7  ;;  %v9144_v7 = vld [vmem:[%s8594_s16 + $0x2f1] sm:$0xff]  ;;  %10826 = vst [vmem:[#allocation17_spill] sm:$0xff] %v9148_v6 }
  0xc8   : >> { %10825 = vst [vmem:[#allocation16_spill] sm:$0xff] %v9144_v7 }
  0xc9   : >> { %7487 = vmatmul.mubr.msk.f32.gmra.mrb[88].mxu1 %vm432_vm0, %v9130_v5  ;;  %v6472_v5 = vld [vmem:[%s8594_s16 + $0x400] sm:$0xff] }
  0xca   : >> { %7855 = vmatmul.mubr.msk.f32.gmra.mrb[88].mxu0 %vm432_vm0, %v6467_v31  ;;  %7489 = vmatprep.mubr.msk.f32.mxu1 %vm432_vm0, %v9134_v8  ;;  %v6471_v31 = vld [vmem:[%s8594_s16 + $0x3f8] sm:$0xff]  ;;  %v9162_v8 = vld [vmem:[%s8594_s16 + $0x309] sm:$0xff] }
  0xcb   : >> { %7857 = vmatprep.mubr.msk.f32.mxu0 %vm432_vm0, %v6468_v4  ;;  %v9158_v4 = vld [vmem:[%s8594_s16 + $0x301] sm:$0xff]  ;;  %10828 = vst [vmem:[#allocation19_spill] sm:$0xff] %v9162_v8 }
  0xcc   : >> { %10827 = vst [vmem:[#allocation18_spill] sm:$0xff] %v9158_v4 }
  0xcd   : >> { %7490 = vmatmul.mubr.msk.f32.gmra.mrb[90].mxu1 %vm432_vm0, %v9144_v7  ;;  %v6474_v7 = vld [vmem:[%s8594_s16 + $0x410] sm:$0xff] }
  0xce   : >> { %7858 = vmatmul.mubr.msk.f32.gmra.mrb[90].mxu0 %vm432_vm0, %v6469_v63  ;;  %7492 = vmatprep.mubr.msk.f32.mxu1 %vm432_vm0, %v9148_v6  ;;  %v6473_v63 = vld [vmem:[%s8594_s16 + $0x408] sm:$0xff]  ;;  %v9176_v6 = vld [vmem:[%s8594_s16 + $0x319] sm:$0xff] }
  0xcf   : >> { %7860 = vmatprep.mubr.msk.f32.mxu0 %vm432_vm0, %v6470_v3  ;;  %v9172_v3 = vld [vmem:[%s8594_s16 + $0x311] sm:$0xff]  ;;  %10830 = vst [vmem:[#allocation21_spill] sm:$0xff] %v9176_v6 }
  0xd0   : >> { %10829 = vst [vmem:[#allocation20_spill] sm:$0xff] %v9172_v3 }
  0xd1   : >> { %7493 = vmatmul.mubr.msk.f32.gmra.mrb[92].mxu1 %vm432_vm0, %v9158_v4  ;;  %v6476_v4 = vld [vmem:[%s8594_s16 + $0x420] sm:$0xff] }
  0xd2   : >> { %7861 = vmatmul.mubr.msk.f32.gmra.mrb[92].mxu0 %vm432_vm0, %v6471_v31  ;;  %7495 = vmatprep.mubr.msk.f32.mxu1 %vm432_vm0, %v9162_v8  ;;  %v6475_v31 = vld [vmem:[%s8594_s16 + $0x418] sm:$0xff]  ;;  %v9190_v8 = vld [vmem:[%s8594_s16 + $0x329] sm:$0xff] }
  0xd3   : >> { %7863 = vmatprep.mubr.msk.f32.mxu0 %vm432_vm0, %v6472_v5  ;;  %v9186_v5 = vld [vmem:[%s8594_s16 + $0x321] sm:$0xff]  ;;  %10832 = vst [vmem:[#allocation23_spill] sm:$0xff] %v9190_v8 }
  0xd4   : >> { %10831 = vst [vmem:[#allocation22_spill] sm:$0xff] %v9186_v5 }
  0xd5   : >> { %7496 = vmatmul.mubr.msk.f32.gmra.mrb[94].mxu1 %vm432_vm0, %v9172_v3  ;;  %v6478_v3 = vld [vmem:[%s8594_s16 + $0x430] sm:$0xff] }
  0xd6   : >> { %7864 = vmatmul.mubr.msk.f32.gmra.mrb[94].mxu0 %vm432_vm0, %v6473_v63  ;;  %7498 = vmatprep.mubr.msk.f32.mxu1 %vm432_vm0, %v9176_v6  ;;  %v6477_v63 = vld [vmem:[%s8594_s16 + $0x428] sm:$0xff]  ;;  %v9204_v6 = vld [vmem:[%s8594_s16 + $0x339] sm:$0xff] }
  0xd7   : >> { %7866 = vmatprep.mubr.msk.f32.mxu0 %vm432_vm0, %v6474_v7  ;;  %v9200_v7 = vld [vmem:[%s8594_s16 + $0x331] sm:$0xff]  ;;  %10834 = vst [vmem:[#allocation25_spill] sm:$0xff] %v9204_v6 }
  0xd8   : >> { %10833 = vst [vmem:[#allocation24_spill] sm:$0xff] %v9200_v7 }
  0xd9   : >> { %7499 = vmatmul.mubr.msk.f32.gmra.mrb[96].mxu1 %vm432_vm0, %v9186_v5  ;;  %v6480_v5 = vld [vmem:[%s8594_s16 + $0x440] sm:$0xff] }
  0xda   : >> { %7867 = vmatmul.mubr.msk.f32.gmra.mrb[96].mxu0 %vm432_vm0, %v6475_v31  ;;  %7501 = vmatprep.mubr.msk.f32.mxu1 %vm432_vm0, %v9190_v8  ;;  %v6479_v31 = vld [vmem:[%s8594_s16 + $0x438] sm:$0xff]  ;;  %v9218_v8 = vld [vmem:[%s8594_s16 + $0x349] sm:$0xff] }
  0xdb   : >> { %7869 = vmatprep.mubr.msk.f32.mxu0 %vm432_vm0, %v6476_v4  ;;  %v9214_v4 = vld [vmem:[%s8594_s16 + $0x341] sm:$0xff]  ;;  %10836 = vst [vmem:[#allocation27_spill] sm:$0xff] %v9218_v8 }
  0xdc   : >> { %10835 = vst [vmem:[#allocation26_spill] sm:$0xff] %v9214_v4 }
  0xdd   : >> { %7502 = vmatmul.mubr.msk.f32.gmra.mrb[98].mxu1 %vm432_vm0, %v9200_v7  ;;  %v6482_v7 = vld [vmem:[%s8594_s16 + $0x450] sm:$0xff] }
  0xde   : >> { %7870 = vmatmul.mubr.msk.f32.gmra.mrb[98].mxu0 %vm432_vm0, %v6477_v63  ;;  %7504 = vmatprep.mubr.msk.f32.mxu1 %vm432_vm0, %v9204_v6  ;;  %v6481_v63 = vld [vmem:[%s8594_s16 + $0x448] sm:$0xff]  ;;  %v9232_v6 = vld [vmem:[%s8594_s16 + $0x359] sm:$0xff] }
  0xdf   : >> { %7872 = vmatprep.mubr.msk.f32.mxu0 %vm432_vm0, %v6478_v3  ;;  %v9228_v3 = vld [vmem:[%s8594_s16 + $0x351] sm:$0xff]  ;;  %10838 = vst [vmem:[#allocation29_spill] sm:$0xff] %v9232_v6 }
  0xe0   : >> { %10837 = vst [vmem:[#allocation28_spill] sm:$0xff] %v9228_v3 }
  0xe1   : >> { %7505 = vmatmul.mubr.msk.f32.gmra.mrb[100].mxu1 %vm432_vm0, %v9214_v4  ;;  %v6484_v4 = vld [vmem:[%s8594_s16 + $0x460] sm:$0xff] }
  0xe2   : >> { %7873 = vmatmul.mubr.msk.f32.gmra.mrb[100].mxu0 %vm432_vm0, %v6479_v31  ;;  %7507 = vmatprep.mubr.msk.f32.mxu1 %vm432_vm0, %v9218_v8  ;;  %v6483_v31 = vld [vmem:[%s8594_s16 + $0x458] sm:$0xff]  ;;  %v9246_v8 = vld [vmem:[%s8594_s16 + $0x369] sm:$0xff] }
  0xe3   : >> { %7875 = vmatprep.mubr.msk.f32.mxu0 %vm432_vm0, %v6480_v5  ;;  %v9242_v5 = vld [vmem:[%s8594_s16 + $0x361] sm:$0xff]  ;;  %10840 = vst [vmem:[#allocation31_spill] sm:$0xff] %v9246_v8 }
  0xe4   : >> { %10839 = vst [vmem:[#allocation30_spill] sm:$0xff] %v9242_v5 }
  0xe5   : >> { %7508 = vmatmul.mubr.msk.f32.gmra.mrb[102].mxu1 %vm432_vm0, %v9228_v3  ;;  %v6486_v3 = vld [vmem:[%s8594_s16 + $0x470] sm:$0xff] }
  0xe6   : >> { %7876 = vmatmul.mubr.msk.f32.gmra.mrb[102].mxu0 %vm432_vm0, %v6481_v63  ;;  %7510 = vmatprep.mubr.msk.f32.mxu1 %vm432_vm0, %v9232_v6  ;;  %v6485_v63 = vld [vmem:[%s8594_s16 + $0x468] sm:$0xff]  ;;  %v9260_v6 = vld [vmem:[%s8594_s16 + $0x379] sm:$0xff] }
  0xe7   : >> { %7878 = vmatprep.mubr.msk.f32.mxu0 %vm432_vm0, %v6482_v7  ;;  %v9256_v7 = vld [vmem:[%s8594_s16 + $0x371] sm:$0xff]  ;;  %10842 = vst [vmem:[#allocation33_spill] sm:$0xff] %v9260_v6 }
  0xe8   : >> { %10841 = vst [vmem:[#allocation32_spill] sm:$0xff] %v9256_v7 }
  0xe9   : >> { %7511 = vmatmul.mubr.msk.f32.gmra.mrb[104].mxu1 %vm432_vm0, %v9242_v5  ;;  %v6488_v5 = vld [vmem:[%s8594_s16 + $0x480] sm:$0xff] }
  0xea   : >> { %7879 = vmatmul.mubr.msk.f32.gmra.mrb[104].mxu0 %vm432_vm0, %v6483_v31  ;;  %7513 = vmatprep.mubr.msk.f32.mxu1 %vm432_vm0, %v9246_v8  ;;  %v6487_v31 = vld [vmem:[%s8594_s16 + $0x478] sm:$0xff]  ;;  %v9274_v8 = vld [vmem:[%s8594_s16 + $0x389] sm:$0xff] }
  0xeb   : >> { %7881 = vmatprep.mubr.msk.f32.mxu0 %vm432_vm0, %v6484_v4  ;;  %v9270_v4 = vld [vmem:[%s8594_s16 + $0x381] sm:$0xff]  ;;  %10844 = vst [vmem:[#allocation35_spill] sm:$0xff] %v9274_v8 }
  0xec   : >> { %10843 = vst [vmem:[#allocation34_spill] sm:$0xff] %v9270_v4 }
  0xed   : >> { %7514 = vmatmul.mubr.msk.f32.gmra.mrb[106].mxu1 %vm432_vm0, %v9256_v7  ;;  %v6490_v7 = vld [vmem:[%s8594_s16 + $0x490] sm:$0xff] }
  0xee   : >> { %7882 = vmatmul.mubr.msk.f32.gmra.mrb[106].mxu0 %vm432_vm0, %v6485_v63  ;;  %7516 = vmatprep.mubr.msk.f32.mxu1 %vm432_vm0, %v9260_v6  ;;  %v6489_v63 = vld [vmem:[%s8594_s16 + $0x488] sm:$0xff]  ;;  %v9288_v6 = vld [vmem:[%s8594_s16 + $0x399] sm:$0xff] }
  0xef   : >> { %7884 = vmatprep.mubr.msk.f32.mxu0 %vm432_vm0, %v6486_v3  ;;  %v9284_v3 = vld [vmem:[%s8594_s16 + $0x391] sm:$0xff]  ;;  %10846 = vst [vmem:[#allocation37_spill] sm:$0xff] %v9288_v6 }
  0xf0   : >> { %10845 = vst [vmem:[#allocation36_spill] sm:$0xff] %v9284_v3 }
  0xf1   : >> { %7517 = vmatmul.mubr.msk.f32.gmra.mrb[108].mxu1 %vm432_vm0, %v9270_v4  ;;  %v6492_v4 = vld [vmem:[%s8594_s16 + $0x4a0] sm:$0xff] }
  0xf2   : >> { %7885 = vmatmul.mubr.msk.f32.gmra.mrb[108].mxu0 %vm432_vm0, %v6487_v31  ;;  %7519 = vmatprep.mubr.msk.f32.mxu1 %vm432_vm0, %v9274_v8  ;;  %v6491_v31 = vld [vmem:[%s8594_s16 + $0x498] sm:$0xff]  ;;  %v9302_v8 = vld [vmem:[%s8594_s16 + $0x3a9] sm:$0xff] }
  0xf3   : >> { %7887 = vmatprep.mubr.msk.f32.mxu0 %vm432_vm0, %v6488_v5  ;;  %v9298_v5 = vld [vmem:[%s8594_s16 + $0x3a1] sm:$0xff]  ;;  %10848 = vst [vmem:[#allocation39_spill] sm:$0xff] %v9302_v8 }
  0xf4   : >> { %10847 = vst [vmem:[#allocation38_spill] sm:$0xff] %v9298_v5 }
  0xf5   : >> { %7520 = vmatmul.mubr.msk.f32.gmra.mrb[110].mxu1 %vm432_vm0, %v9284_v3  ;;  %v6494_v3 = vld [vmem:[%s8594_s16 + $0x4b0] sm:$0xff] }
  0xf6   : >> { %7888 = vmatmul.mubr.msk.f32.gmra.mrb[110].mxu0 %vm432_vm0, %v6489_v63  ;;  %7522 = vmatprep.mubr.msk.f32.mxu1 %vm432_vm0, %v9288_v6  ;;  %v6493_v63 = vld [vmem:[%s8594_s16 + $0x4a8] sm:$0xff]  ;;  %v9316_v6 = vld [vmem:[%s8594_s16 + $0x3b9] sm:$0xff] }
  0xf7   : >> { %7890 = vmatprep.mubr.msk.f32.mxu0 %vm432_vm0, %v6490_v7  ;;  %v9312_v7 = vld [vmem:[%s8594_s16 + $0x3b1] sm:$0xff]  ;;  %10849 = vst [vmem:[#allocation40_spill] sm:$0xff] %v9316_v6 }
  0xf9   : >> { %7523 = vmatmul.mubr.msk.f32.gmra.mrb[112].mxu1 %vm432_vm0, %v9298_v5  ;;  %v6496_v5 = vld [vmem:[%s8594_s16 + $0x4c0] sm:$0xff] }
  0xfa   : >> { %7891 = vmatmul.mubr.msk.f32.gmra.mrb[112].mxu0 %vm432_vm0, %v6491_v31  ;;  %7525 = vmatprep.mubr.msk.f32.mxu1 %vm432_vm0, %v9302_v8  ;;  %v6495_v31 = vld [vmem:[%s8594_s16 + $0x4b8] sm:$0xff]  ;;  %v9330_v8 = vld [vmem:[%s8594_s16 + $0x3c9] sm:$0xff] }
  0xfb   : >> { %7893 = vmatprep.mubr.msk.f32.mxu0 %vm432_vm0, %v6492_v4  ;;  %v9326_v4 = vld [vmem:[%s8594_s16 + $0x3c1] sm:$0xff]  ;;  %10850 = vst [vmem:[#allocation41_spill] sm:$0xff] %v9330_v8 }
  0xfd   : >> { %7526 = vmatmul.mubr.msk.f32.gmra.mrb[114].mxu1 %vm432_vm0, %v9312_v7 }
  0xfe   : >> { %7894 = vmatmul.mubr.msk.f32.gmra.mrb[114].mxu0 %vm432_vm0, %v6493_v63  ;;  %7528 = vmatprep.mubr.msk.f32.mxu1 %vm432_vm0, %v9316_v6  ;;  %v6497_v63 = vld [vmem:[%s8594_s16 + $0x4c8] sm:$0xff]  ;;  %v192_v6 = vld [vmem:[%s8594_s16] sm:$0xff] }
  0xff   : >> { %7896 = vmatprep.mubr.msk.f32.mxu0 %vm432_vm0, %v6494_v3  ;;  %v9340_v3 = vld [vmem:[%s8594_s16 + $0x3d1] sm:$0xff] }
 0x101   : >> { %7529 = vmatmul.mubr.msk.f32.gmra.mrb[116].mxu1 %vm432_vm0, %v9326_v4 }
 0x102   : >> { %7897 = vmatmul.mubr.msk.f32.gmra.mrb[116].mxu0 %vm432_vm0, %v6495_v31  ;;  %7531 = vmatprep.mubr.msk.f32.mxu1 %vm432_vm0, %v9330_v8  ;;  %v193_v31 = vld [vmem:[%s8594_s16 + $0x8] sm:$0xff]  ;;  %v194_v8 = vld [vmem:[%s8594_s16 + $0x10] sm:$0xff] }
 0x103   : >> { %7899 = vmatprep.mubr.msk.f32.mxu0 %vm432_vm0, %v6496_v5  ;;  %v195_v5 = vld [vmem:[%s8594_s16 + $0x18] sm:$0xff] }
 0x105   : >> { %7532 = vmatmul.mubr.msk.f32.gmra.mrb[118].mxu1 %vm432_vm0, %v9340_v3 }
 0x106   : >> { %7900 = vmatmul.mubr.msk.f32.gmra.mrb[118].mxu0 %vm432_vm0, %v6497_v63  ;;  %7538 = vmatprep.mubr.msk.f32.mxu1 %vm432_vm0, %v192_v6  ;;  %v196_v63 = vld [vmem:[%s8594_s16 + $0x20] sm:$0xff]  ;;  %v197_v6 = vld [vmem:[%s8594_s16 + $0x28] sm:$0xff] }
 0x107   : >> { %7906 = vmatprep.mubr.msk.f32.mxu0 %vm432_vm0, %v8715_v18  ;;  %v198_v18 = vld [vmem:[%s8594_s16 + $0x30] sm:$0xff] }
 0x109   : >> { %7539 = vmatmul.mubr.msk.f32.vlgmr.msra.gmra.mrb[0].mxu1 %vm432_vm0, %v193_v31  ;;  %v252_v31 = vld [vmem:[%s8594_s16 + $0x1f0] sm:$0xff] }
 0x10a   : >> { %7907 = vmatmul.mubr.msk.f32.vlgmr.msra.gmra.mrb[0].mxu0 %vm432_vm0, %v8724_v20  ;;  %7541 = vmatprep.mubr.msk.f32.mxu1 %vm432_vm0, %v194_v8  ;;  %v199_v8 = vld [vmem:[%s8594_s16 + $0x38] sm:$0xff]  ;;  %v200_v20 = vld [vmem:[%s8594_s16 + $0x40] sm:$0xff] }
 0x10b   : >> { %7909 = vmatprep.mubr.msk.f32.mxu0 %vm432_vm0, %v8728_v22  ;;  %v201_v22 = vld [vmem:[%s8594_s16 + $0x48] sm:$0xff] }
 0x10d   : >> { %7542 = vmatmul.mubr.msk.f32.gmra.mrb[2].mxu1 %vm432_vm0, %v195_v5  ;;  %v10854_v5 = vld [vmem:[#allocation14_spill] sm:$0xff] }
 0x10e   : >> { %7910 = vmatmul.mubr.msk.f32.gmra.mrb[2].mxu0 %vm432_vm0, %v8738_v24  ;;  %7544 = vmatprep.mubr.msk.f32.mxu1 %vm432_vm0, %v196_v63  ;;  %v202_v24 = vld [vmem:[%s8594_s16 + $0x50] sm:$0xff]  ;;  %v10855_v63 = vld [vmem:[#allocation15_spill] sm:$0xff] }
 0x10f   : >> { %7912 = vmatprep.mubr.msk.f32.mxu0 %vm432_vm0, %v8742_v26  ;;  %v203_v26 = vld [vmem:[%s8594_s16 + $0x58] sm:$0xff] }
 0x111   : >> { %7545 = vmatmul.mubr.msk.f32.gmra.mrb[4].mxu1 %vm432_vm0, %v197_v6  ;;  %v253_v6 = vld [vmem:[%s8594_s16 + $0x1f8] sm:$0xff] }
 0x112   : >> { %7913 = vmatmul.mubr.msk.f32.gmra.mrb[4].mxu0 %vm432_vm0, %v8752_v28  ;;  %7547 = vmatprep.mubr.msk.f32.mxu1 %vm432_vm0, %v198_v18  ;;  %v204_v28 = vld [vmem:[%s8594_s16 + $0x60] sm:$0xff] }
 0x113   : >> { %7915 = vmatprep.mubr.msk.f32.mxu0 %vm432_vm0, %v8756_v30  ;;  %v205_v30 = vld [vmem:[%s8594_s16 + $0x68] sm:$0xff]  ;;  %v254_v18 = vld [vmem:[%s8594_s16 + $0x200] sm:$0xff] }
 0x115   : >> { %7548 = vmatmul.mubr.msk.f32.gmra.mrb[6].mxu1 %vm432_vm0, %v199_v8  ;;  %v10856_v8 = vld [vmem:[#allocation16_spill] sm:$0xff] }
 0x116   : >> { %7916 = vmatmul.mubr.msk.f32.gmra.mrb[6].mxu0 %vm432_vm0, %v8766_v32  ;;  %7550 = vmatprep.mubr.msk.f32.mxu1 %vm432_vm0, %v200_v20  ;;  %v206_v32 = vld [vmem:[%s8594_s16 + $0x70] sm:$0xff]  ;;  %v10857_v20 = vld [vmem:[#allocation17_spill] sm:$0xff] }
 0x117   : >> { %7918 = vmatprep.mubr.msk.f32.mxu0 %vm432_vm0, %v8770_v34  ;;  %v207_v34 = vld [vmem:[%s8594_s16 + $0x78] sm:$0xff] }
 0x119   : >> { %7551 = vmatmul.mubr.msk.f32.gmra.mrb[8].mxu1 %vm432_vm0, %v201_v22  ;;  %v255_v22 = vld [vmem:[%s8594_s16 + $0x208] sm:$0xff] }
 0x11a   : >> { %7919 = vmatmul.mubr.msk.f32.gmra.mrb[8].mxu0 %vm432_vm0, %v8780_v36  ;;  %7553 = vmatprep.mubr.msk.f32.mxu1 %vm432_vm0, %v202_v24  ;;  %v208_v36 = vld [vmem:[%s8594_s16 + $0x80] sm:$0xff]  ;;  %v256_v24 = vld [vmem:[%s8594_s16 + $0x210] sm:$0xff] }
 0x11b   : >> { %7921 = vmatprep.mubr.msk.f32.mxu0 %vm432_vm0, %v8784_v38  ;;  %v209_v38 = vld [vmem:[%s8594_s16 + $0x88] sm:$0xff] }
 0x11d   : >> { %7554 = vmatmul.mubr.msk.f32.gmra.mrb[10].mxu1 %vm432_vm0, %v203_v26  ;;  %v10858_v26 = vld [vmem:[#allocation18_spill] sm:$0xff] }
 0x11e   : >> { %7922 = vmatmul.mubr.msk.f32.gmra.mrb[10].mxu0 %vm432_vm0, %v8794_v40  ;;  %7556 = vmatprep.mubr.msk.f32.mxu1 %vm432_vm0, %v204_v28  ;;  %v210_v40 = vld [vmem:[%s8594_s16 + $0x90] sm:$0xff]  ;;  %v10859_v28 = vld [vmem:[#allocation19_spill] sm:$0xff] }
 0x11f   : >> { %7924 = vmatprep.mubr.msk.f32.mxu0 %vm432_vm0, %v8798_v42  ;;  %v211_v42 = vld [vmem:[%s8594_s16 + $0x98] sm:$0xff] }
 0x121   : >> { %7557 = vmatmul.mubr.msk.f32.gmra.mrb[12].mxu1 %vm432_vm0, %v205_v30  ;;  %v257_v30 = vld [vmem:[%s8594_s16 + $0x218] sm:$0xff] }
 0x122   : >> { %7925 = vmatmul.mubr.msk.f32.gmra.mrb[12].mxu0 %vm432_vm0, %v8808_v44  ;;  %7559 = vmatprep.mubr.msk.f32.mxu1 %vm432_vm0, %v206_v32  ;;  %v212_v44 = vld [vmem:[%s8594_s16 + $0xa0] sm:$0xff] }
 0x123   : >> { %7927 = vmatprep.mubr.msk.f32.mxu0 %vm432_vm0, %v8812_v46  ;;  %v213_v46 = vld [vmem:[%s8594_s16 + $0xa8] sm:$0xff]  ;;  %v258_v32 = vld [vmem:[%s8594_s16 + $0x220] sm:$0xff] }
 0x125   : >> { %7560 = vmatmul.mubr.msk.f32.gmra.mrb[14].mxu1 %vm432_vm0, %v207_v34  ;;  %v10860_v34 = vld [vmem:[#allocation20_spill] sm:$0xff] }
 0x126   : >> { %7928 = vmatmul.mubr.msk.f32.gmra.mrb[14].mxu0 %vm432_vm0, %v8822_v48  ;;  %7562 = vmatprep.mubr.msk.f32.mxu1 %vm432_vm0, %v208_v36  ;;  %v214_v48 = vld [vmem:[%s8594_s16 + $0xb0] sm:$0xff]  ;;  %v10861_v36 = vld [vmem:[#allocation21_spill] sm:$0xff] }
 0x127   : >> { %7930 = vmatprep.mubr.msk.f32.mxu0 %vm432_vm0, %v8826_v50  ;;  %v215_v50 = vld [vmem:[%s8594_s16 + $0xb8] sm:$0xff] }
 0x129   : >> { %7563 = vmatmul.mubr.msk.f32.gmra.mrb[16].mxu1 %vm432_vm0, %v209_v38  ;;  %v259_v38 = vld [vmem:[%s8594_s16 + $0x228] sm:$0xff] }
 0x12a   : >> { %7931 = vmatmul.mubr.msk.f32.gmra.mrb[16].mxu0 %vm432_vm0, %v8836_v52  ;;  %7565 = vmatprep.mubr.msk.f32.mxu1 %vm432_vm0, %v210_v40  ;;  %v216_v52 = vld [vmem:[%s8594_s16 + $0xc0] sm:$0xff]  ;;  %v260_v40 = vld [vmem:[%s8594_s16 + $0x230] sm:$0xff] }
 0x12b   : >> { %7933 = vmatprep.mubr.msk.f32.mxu0 %vm432_vm0, %v8840_v54  ;;  %v217_v54 = vld [vmem:[%s8594_s16 + $0xc8] sm:$0xff] }
 0x12d   : >> { %7566 = vmatmul.mubr.msk.f32.gmra.mrb[18].mxu1 %vm432_vm0, %v211_v42  ;;  %v10862_v42 = vld [vmem:[#allocation22_spill] sm:$0xff] }
 0x12e   : >> { %7934 = vmatmul.mubr.msk.f32.gmra.mrb[18].mxu0 %vm432_vm0, %v8850_v56  ;;  %7568 = vmatprep.mubr.msk.f32.mxu1 %vm432_vm0, %v212_v44  ;;  %v218_v56 = vld [vmem:[%s8594_s16 + $0xd0] sm:$0xff]  ;;  %v10863_v44 = vld [vmem:[#allocation23_spill] sm:$0xff] }
 0x12f   : >> { %7936 = vmatprep.mubr.msk.f32.mxu0 %vm432_vm0, %v8854_v58  ;;  %v219_v58 = vld [vmem:[%s8594_s16 + $0xd8] sm:$0xff] }
 0x131   : >> { %7569 = vmatmul.mubr.msk.f32.gmra.mrb[20].mxu1 %vm432_vm0, %v213_v46  ;;  %v261_v46 = vld [vmem:[%s8594_s16 + $0x238] sm:$0xff] }
 0x132   : >> { %7937 = vmatmul.mubr.msk.f32.gmra.mrb[20].mxu0 %vm432_vm0, %v8864_v60  ;;  %7571 = vmatprep.mubr.msk.f32.mxu1 %vm432_vm0, %v214_v48  ;;  %v220_v60 = vld [vmem:[%s8594_s16 + $0xe0] sm:$0xff] }
 0x133   : >> { %7939 = vmatprep.mubr.msk.f32.mxu0 %vm432_vm0, %v8868_v62  ;;  %v221_v62 = vld [vmem:[%s8594_s16 + $0xe8] sm:$0xff]  ;;  %v262_v48 = vld [vmem:[%s8594_s16 + $0x240] sm:$0xff] }
 0x135   : >> { %7572 = vmatmul.mubr.msk.f32.gmra.mrb[22].mxu1 %vm432_vm0, %v215_v50  ;;  %v10864_v50 = vld [vmem:[#allocation24_spill] sm:$0xff] }
 0x136   : >> { %7940 = vmatmul.mubr.msk.f32.gmra.mrb[22].mxu0 %vm432_vm0, %v8878_v9  ;;  %7574 = vmatprep.mubr.msk.f32.mxu1 %vm432_vm0, %v216_v52  ;;  %v222_v9 = vld [vmem:[%s8594_s16 + $0xf8] sm:$0xff] }
 0x137   : >> { %7942 = vmatprep.mubr.msk.f32.mxu0 %vm432_vm0, %v8882_v11  ;;  %v223_v11 = vld [vmem:[%s8594_s16 + $0x100] sm:$0xff]  ;;  %v10865_v52 = vld [vmem:[#allocation25_spill] sm:$0xff] }
 0x139   : >> { %7575 = vmatmul.mubr.msk.f32.gmra.mrb[24].mxu1 %vm432_vm0, %v217_v54  ;;  %v263_v54 = vld [vmem:[%s8594_s16 + $0x248] sm:$0xff] }
 0x13a   : >> { %7943 = vmatmul.mubr.msk.f32.gmra.mrb[24].mxu0 %vm432_vm0, %v8892_v13  ;;  %7577 = vmatprep.mubr.msk.f32.mxu1 %vm432_vm0, %v218_v56  ;;  %v224_v13 = vld [vmem:[%s8594_s16 + $0x108] sm:$0xff]  ;;  %v264_v56 = vld [vmem:[%s8594_s16 + $0x250] sm:$0xff] }
 0x13b   : >> { %7945 = vmatprep.mubr.msk.f32.mxu0 %vm432_vm0, %v8896_v15  ;;  %v225_v15 = vld [vmem:[%s8594_s16 + $0x110] sm:$0xff] }
 0x13d   : >> { %7578 = vmatmul.mubr.msk.f32.gmra.mrb[26].mxu1 %vm432_vm0, %v219_v58  ;;  %v10866_v58 = vld [vmem:[#allocation26_spill] sm:$0xff] }
 0x13e   : >> { %7946 = vmatmul.mubr.msk.f32.gmra.mrb[26].mxu0 %vm432_vm0, %v8906_v17  ;;  %7580 = vmatprep.mubr.msk.f32.mxu1 %vm432_vm0, %v220_v60  ;;  %v226_v17 = vld [vmem:[%s8594_s16 + $0x118] sm:$0xff]  ;;  %v10867_v60 = vld [vmem:[#allocation27_spill] sm:$0xff] }
 0x13f   : >> { %7948 = vmatprep.mubr.msk.f32.mxu0 %vm432_vm0, %v8910_v21  ;;  %v227_v21 = vld [vmem:[%s8594_s16 + $0x120] sm:$0xff] }
 0x141   : >> { %7581 = vmatmul.mubr.msk.f32.gmra.mrb[28].mxu1 %vm432_vm0, %v221_v62  ;;  %v265_v62 = vld [vmem:[%s8594_s16 + $0x258] sm:$0xff] }
 0x142   : >> { %7949 = vmatmul.mubr.msk.f32.gmra.mrb[28].mxu0 %vm432_vm0, %v8920_v25  ;;  %7583 = vmatprep.mubr.msk.f32.mxu1 %vm432_vm0, %v222_v9  ;;  %v228_v25 = vld [vmem:[%s8594_s16 + $0x128] sm:$0xff]  ;;  %v266_v9 = vld [vmem:[%s8594_s16 + $0x260] sm:$0xff] }
 0x143   : >> { %7951 = vmatprep.mubr.msk.f32.mxu0 %vm432_vm0, %v8924_v29  ;;  %v229_v29 = vld [vmem:[%s8594_s16 + $0x130] sm:$0xff] }
 0x145   : >> { %7584 = vmatmul.mubr.msk.f32.gmra.mrb[30].mxu1 %vm432_vm0, %v223_v11  ;;  %v10868_v11 = vld [vmem:[#allocation28_spill] sm:$0xff] }
 0x146   : >> { %7952 = vmatmul.mubr.msk.f32.gmra.mrb[30].mxu0 %vm432_vm0, %v8934_v33  ;;  %7586 = vmatprep.mubr.msk.f32.mxu1 %vm432_vm0, %v224_v13  ;;  %v230_v33 = vld [vmem:[%s8594_s16 + $0x138] sm:$0xff] }
 0x147   : >> { %7954 = vmatprep.mubr.msk.f32.mxu0 %vm432_vm0, %v8938_v37  ;;  %v231_v37 = vld [vmem:[%s8594_s16 + $0x140] sm:$0xff]  ;;  %v10869_v13 = vld [vmem:[#allocation29_spill] sm:$0xff] }
 0x149   : >> { %7587 = vmatmul.mubr.msk.f32.gmra.mrb[32].mxu1 %vm432_vm0, %v225_v15  ;;  %v267_v15 = vld [vmem:[%s8594_s16 + $0x268] sm:$0xff] }
 0x14a   : >> { %7955 = vmatmul.mubr.msk.f32.gmra.mrb[32].mxu0 %vm432_vm0, %v8948_v41  ;;  %7589 = vmatprep.mubr.msk.f32.mxu1 %vm432_vm0, %v226_v17  ;;  %v232_v41 = vld [vmem:[%s8594_s16 + $0x148] sm:$0xff]  ;;  %v268_v17 = vld [vmem:[%s8594_s16 + $0x270] sm:$0xff] }
 0x14b   : >> { %7957 = vmatprep.mubr.msk.f32.mxu0 %vm432_vm0, %v8952_v45  ;;  %v233_v45 = vld [vmem:[%s8594_s16 + $0x150] sm:$0xff] }
 0x14d   : >> { %7590 = vmatmul.mubr.msk.f32.gmra.mrb[34].mxu1 %vm432_vm0, %v227_v21  ;;  %v10870_v21 = vld [vmem:[#allocation30_spill] sm:$0xff] }
 0x14e   : >> { %7958 = vmatmul.mubr.msk.f32.gmra.mrb[34].mxu0 %vm432_vm0, %v8962_v49  ;;  %7592 = vmatprep.mubr.msk.f32.mxu1 %vm432_vm0, %v228_v25  ;;  %v234_v49 = vld [vmem:[%s8594_s16 + $0x158] sm:$0xff]  ;;  %v10871_v25 = vld [vmem:[#allocation31_spill] sm:$0xff] }
 0x14f   : >> { %7960 = vmatprep.mubr.msk.f32.mxu0 %vm432_vm0, %v8966_v53  ;;  %v235_v53 = vld [vmem:[%s8594_s16 + $0x160] sm:$0xff] }
 0x151   : >> { %7593 = vmatmul.mubr.msk.f32.gmra.mrb[36].mxu1 %vm432_vm0, %v229_v29  ;;  %v269_v29 = vld [vmem:[%s8594_s16 + $0x278] sm:$0xff] }
 0x152   : >> { %7961 = vmatmul.mubr.msk.f32.gmra.mrb[36].mxu0 %vm432_vm0, %v8976_v57  ;;  %7595 = vmatprep.mubr.msk.f32.mxu1 %vm432_vm0, %v230_v33  ;;  %v236_v57 = vld [vmem:[%s8594_s16 + $0x168] sm:$0xff]  ;;  %v270_v33 = vld [vmem:[%s8594_s16 + $0x280] sm:$0xff] }
 0x153   : >> { %7963 = vmatprep.mubr.msk.f32.mxu0 %vm432_vm0, %v8980_v61  ;;  %v237_v61 = vld [vmem:[%s8594_s16 + $0x170] sm:$0xff] }
 0x155   : >> { %7596 = vmatmul.mubr.msk.f32.gmra.mrb[38].mxu1 %vm432_vm0, %v231_v37  ;;  %v10872_v37 = vld [vmem:[#allocation32_spill] sm:$0xff] }
 0x156   : >> { %7964 = vmatmul.mubr.msk.f32.gmra.mrb[38].mxu0 %vm432_vm0, %v8990_v10  ;;  %7598 = vmatprep.mubr.msk.f32.mxu1 %vm432_vm0, %v232_v41  ;;  %v238_v10 = vld [vmem:[%s8594_s16 + $0x178] sm:$0xff] }
 0x157   : >> { %7966 = vmatprep.mubr.msk.f32.mxu0 %vm432_vm0, %v8994_v14  ;;  %v239_v14 = vld [vmem:[%s8594_s16 + $0x180] sm:$0xff]  ;;  %v10873_v41 = vld [vmem:[#allocation33_spill] sm:$0xff] }
 0x159   : >> { %7599 = vmatmul.mubr.msk.f32.gmra.mrb[40].mxu1 %vm432_vm0, %v233_v45  ;;  %v271_v45 = vld [vmem:[%s8594_s16 + $0x288] sm:$0xff] }
 0x15a   : >> { %7967 = vmatmul.mubr.msk.f32.gmra.mrb[40].mxu0 %vm432_vm0, %v9004_v19  ;;  %7601 = vmatprep.mubr.msk.f32.mxu1 %vm432_vm0, %v234_v49  ;;  %v240_v19 = vld [vmem:[%s8594_s16 + $0x188] sm:$0xff]  ;;  %v272_v49 = vld [vmem:[%s8594_s16 + $0x290] sm:$0xff] }
 0x15b   : >> { %7969 = vmatprep.mubr.msk.f32.mxu0 %vm432_vm0, %v9008_v27  ;;  %v241_v27 = vld [vmem:[%s8594_s16 + $0x190] sm:$0xff] }
 0x15d   : >> { %7602 = vmatmul.mubr.msk.f32.gmra.mrb[42].mxu1 %vm432_vm0, %v235_v53  ;;  %v10874_v53 = vld [vmem:[#allocation34_spill] sm:$0xff] }
 0x15e   : >> { %7970 = vmatmul.mubr.msk.f32.gmra.mrb[42].mxu0 %vm432_vm0, %v9018_v35  ;;  %7604 = vmatprep.mubr.msk.f32.mxu1 %vm432_vm0, %v236_v57  ;;  %v242_v35 = vld [vmem:[%s8594_s16 + $0x198] sm:$0xff]  ;;  %v10875_v57 = vld [vmem:[#allocation35_spill] sm:$0xff] }
 0x15f   : >> { %7972 = vmatprep.mubr.msk.f32.mxu0 %vm432_vm0, %v9022_v43  ;;  %v243_v43 = vld [vmem:[%s8594_s16 + $0x1a0] sm:$0xff] }
 0x161   : >> { %7605 = vmatmul.mubr.msk.f32.gmra.mrb[44].mxu1 %vm432_vm0, %v237_v61  ;;  %v273_v61 = vld [vmem:[%s8594_s16 + $0x298] sm:$0xff] }
 0x162   : >> { %7973 = vmatmul.mubr.msk.f32.gmra.mrb[44].mxu0 %vm432_vm0, %v9032_v51  ;;  %7607 = vmatprep.mubr.msk.f32.mxu1 %vm432_vm0, %v238_v10  ;;  %v244_v51 = vld [vmem:[%s8594_s16 + $0x1a8] sm:$0xff]  ;;  %v274_v10 = vld [vmem:[%s8594_s16 + $0x2a0] sm:$0xff] }
 0x163   : >> { %7975 = vmatprep.mubr.msk.f32.mxu0 %vm432_vm0, %v9036_v59  ;;  %v245_v59 = vld [vmem:[%s8594_s16 + $0x1b0] sm:$0xff] }
 0x165   : >> { %7608 = vmatmul.mubr.msk.f32.gmra.mrb[46].mxu1 %vm432_vm0, %v239_v14  ;;  %v10876_v14 = vld [vmem:[#allocation36_spill] sm:$0xff] }
 0x166   : >> { %7976 = vmatmul.mubr.msk.f32.gmra.mrb[46].mxu0 %vm432_vm0, %v9046_v12  ;;  %7610 = vmatprep.mubr.msk.f32.mxu1 %vm432_vm0, %v240_v19  ;;  %v246_v12 = vld [vmem:[%s8594_s16 + $0x1b8] sm:$0xff] }
 0x167   : >> { %7978 = vmatprep.mubr.msk.f32.mxu0 %vm432_vm0, %v9050_v23  ;;  %v247_v23 = vld [vmem:[%s8594_s16 + $0x1c0] sm:$0xff]  ;;  %v10877_v19 = vld [vmem:[#allocation37_spill] sm:$0xff] }
 0x169   : >> { %7611 = vmatmul.mubr.msk.f32.gmra.mrb[48].mxu1 %vm432_vm0, %v241_v27  ;;  %v275_v27 = vld [vmem:[%s8594_s16 + $0x2a8] sm:$0xff] }
 0x16a   : >> { %7979 = vmatmul.mubr.msk.f32.gmra.mrb[48].mxu0 %vm432_vm0, %v9060_v39  ;;  %7613 = vmatprep.mubr.msk.f32.mxu1 %vm432_vm0, %v242_v35  ;;  %v248_v39 = vld [vmem:[%s8594_s16 + $0x1c8] sm:$0xff]  ;;  %v276_v35 = vld [vmem:[%s8594_s16 + $0x2b0] sm:$0xff] }
 0x16b   : >> { %7981 = vmatprep.mubr.msk.f32.mxu0 %vm432_vm0, %v9064_v55  ;;  %v249_v55 = vld [vmem:[%s8594_s16 + $0x1d0] sm:$0xff] }
 0x16d   : >> { %7614 = vmatmul.mubr.msk.f32.gmra.mrb[50].mxu1 %vm432_vm0, %v243_v43  ;;  %v10878_v43 = vld [vmem:[#allocation38_spill] sm:$0xff] }
 0x16e   : >> { %7982 = vmatmul.mubr.msk.f32.gmra.mrb[50].mxu0 %vm432_vm0, %v9074_v16  ;;  %7616 = vmatprep.mubr.msk.f32.mxu1 %vm432_vm0, %v244_v51  ;;  %v250_v16 = vld [vmem:[%s8594_s16 + $0x1d8] sm:$0xff]  ;;  %v10879_v51 = vld [vmem:[#allocation39_spill] sm:$0xff] }
 0x16f   : >> { %7984 = vmatprep.mubr.msk.f32.mxu0 %vm432_vm0, %v9078_v0  ;;  %v10851_v0 = vld [vmem:[#allocation11_spill] sm:$0xff] }
 0x171   : >> { %7617 = vmatmul.mubr.msk.f32.gmra.mrb[52].mxu1 %vm432_vm0, %v245_v59  ;;  %v277_v59 = vld [vmem:[%s8594_s16 + $0x2b8] sm:$0xff] }
 0x172   : >> { %7985 = vmatmul.mubr.msk.f32.gmra.mrb[52].mxu0 %vm432_vm0, %v9088_v47  ;;  %7619 = vmatprep.mubr.msk.f32.mxu1 %vm432_vm0, %v246_v12  ;;  %v10852_v47 = vld [vmem:[#allocation12_spill] sm:$0xff]  ;;  %v278_v12 = vld [vmem:[%s8594_s16 + $0x2c0] sm:$0xff] }
 0x173   : >> { %7987 = vmatprep.mubr.msk.f32.mxu0 %vm432_vm0, %v9092_v2  ;;  %v10853_v2 = vld [vmem:[#allocation13_spill] sm:$0xff] }
 0x175   : >> { %7620 = vmatmul.mubr.msk.f32.gmra.mrb[54].mxu1 %vm432_vm0, %v247_v23  ;;  %v10880_v23 = vld [vmem:[#allocation40_spill] sm:$0xff] }
 0x176   : >> { %7988 = vmatmul.mubr.msk.f32.gmra.mrb[54].mxu0 %vm432_vm0, %v9102_v1  ;;  %7622 = vmatprep.mubr.msk.f32.mxu1 %vm432_vm0, %v248_v39  ;;  %v251_v1 = vld [vmem:[%s8594_s16 + $0x1e0] sm:$0xff]  ;;  %v279_v39 = vld [vmem:[%s8594_s16 + $0x2c8] sm:$0xff] }
 0x177   : >> { %7990 = vmatprep.mubr.msk.f32.mxu0 %vm432_vm0, %v10851_v0  ;;  %v280_v0 = vld [vmem:[%s8594_s16 + $0x2d0] sm:$0xff] }
 0x179   : >> { %7623 = vmatmul.mubr.msk.f32.gmra.mrb[56].mxu1 %vm432_vm0, %v249_v55  ;;  %v10881_v55 = vld [vmem:[#allocation41_spill] sm:$0xff] }
 0x17a   : >> { %7991 = vmatmul.mubr.msk.f32.gmra.mrb[56].mxu0 %vm432_vm0, %v10852_v47  ;;  %7625 = vmatprep.mubr.msk.f32.mxu1 %vm432_vm0, %v250_v16  ;;  %v282_v16 = vld [vmem:[%s8594_s16 + $0x2e8] sm:$0xff] }
 0x17b   : >> { %7993 = vmatprep.mubr.msk.f32.mxu0 %vm432_vm0, %v10853_v2  ;;  %v6708_v47 = vld [vmem:[%s8594_s16 + $0x3e1] sm:$0xff]  ;;  %v6709_v2 = vld [vmem:[%s8594_s16 + $0x3e9] sm:$0xff] }
 0x17d   : >> { %7626 = vmatmul.mubr.msk.f32.gmra.mrb[58].mxu1 %vm432_vm0, %v251_v1  ;;  %v284_v1 = vld [vmem:[%s8594_s16 + $0x2f8] sm:$0xff] }
 0x17e   : >> { %7994 = vmatmul.mubr.msk.f32.gmra.mrb[58].mxu0 %vm432_vm0, %v10854_v5  ;;  %7628 = vmatprep.mubr.msk.f32.mxu1 %vm432_vm0, %v252_v31  ;;  %v6710_v31 = vld [vmem:[%s8594_s16 + $0x3f1] sm:$0xff]  ;;  %v6711_v5 = vld [vmem:[%s8594_s16 + $0x3f9] sm:$0xff] }
 0x17f   : >> { %7996 = vmatprep.mubr.msk.f32.mxu0 %vm432_vm0, %v10855_v63  ;;  %v286_v63 = vld [vmem:[%s8594_s16 + $0x308] sm:$0xff] }
 0x181   : >> { %7629 = vmatmul.mubr.msk.f32.gmra.mrb[60].mxu1 %vm432_vm0, %v253_v6  ;;  %v6712_v6 = vld [vmem:[%s8594_s16 + $0x401] sm:$0xff] }
 0x182   : >> { %7997 = vmatmul.mubr.msk.f32.gmra.mrb[60].mxu0 %vm432_vm0, %v10856_v8  ;;  %7631 = vmatprep.mubr.msk.f32.mxu1 %vm432_vm0, %v254_v18  ;;  %v287_v18 = vld [vmem:[%s8594_s16 + $0x310] sm:$0xff] }
 0x183   : >> { %7999 = vmatprep.mubr.msk.f32.mxu0 %vm432_vm0, %v10857_v20  ;;  %v6713_v8 = vld [vmem:[%s8594_s16 + $0x409] sm:$0xff]  ;;  %v288_v20 = vld [vmem:[%s8594_s16 + $0x318] sm:$0xff] }
 0x185   : >> { %7632 = vmatmul.mubr.msk.f32.gmra.mrb[62].mxu1 %vm432_vm0, %v255_v22  ;;  %v6714_v22 = vld [vmem:[%s8594_s16 + $0x411] sm:$0xff] }
 0x186   : >> { %8000 = vmatmul.mubr.msk.f32.gmra.mrb[62].mxu0 %vm432_vm0, %v10858_v26  ;;  %7634 = vmatprep.mubr.msk.f32.mxu1 %vm432_vm0, %v256_v24  ;;  %v289_v24 = vld [vmem:[%s8594_s16 + $0x320] sm:$0xff] }
 0x187   : >> { %8002 = vmatprep.mubr.msk.f32.mxu0 %vm432_vm0, %v10859_v28  ;;  %v6715_v26 = vld [vmem:[%s8594_s16 + $0x419] sm:$0xff]  ;;  %v290_v28 = vld [vmem:[%s8594_s16 + $0x328] sm:$0xff] }
 0x189   : >> { %7635 = vmatmul.mubr.msk.f32.gmra.mrb[64].mxu1 %vm432_vm0, %v257_v30  ;;  %v6716_v30 = vld [vmem:[%s8594_s16 + $0x421] sm:$0xff] }
 0x18a   : >> { %8003 = vmatmul.mubr.msk.f32.gmra.mrb[64].mxu0 %vm432_vm0, %v10860_v34  ;;  %7637 = vmatprep.mubr.msk.f32.mxu1 %vm432_vm0, %v258_v32  ;;  %v291_v32 = vld [vmem:[%s8594_s16 + $0x330] sm:$0xff] }
 0x18b   : >> { %8005 = vmatprep.mubr.msk.f32.mxu0 %vm432_vm0, %v10861_v36  ;;  %v6717_v34 = vld [vmem:[%s8594_s16 + $0x429] sm:$0xff]  ;;  %v292_v36 = vld [vmem:[%s8594_s16 + $0x338] sm:$0xff] }
 0x18d   : >> { %7638 = vmatmul.mubr.msk.f32.gmra.mrb[66].mxu1 %vm432_vm0, %v259_v38  ;;  %v6718_v38 = vld [vmem:[%s8594_s16 + $0x431] sm:$0xff] }
 0x18e   : >> { %8006 = vmatmul.mubr.msk.f32.gmra.mrb[66].mxu0 %vm432_vm0, %v10862_v42  ;;  %7640 = vmatprep.mubr.msk.f32.mxu1 %vm432_vm0, %v260_v40  ;;  %v293_v40 = vld [vmem:[%s8594_s16 + $0x340] sm:$0xff] }
 0x18f   : >> { %8008 = vmatprep.mubr.msk.f32.mxu0 %vm432_vm0, %v10863_v44  ;;  %v6719_v42 = vld [vmem:[%s8594_s16 + $0x439] sm:$0xff]  ;;  %v294_v44 = vld [vmem:[%s8594_s16 + $0x348] sm:$0xff] }
 0x191   : >> { %7641 = vmatmul.mubr.msk.f32.gmra.mrb[68].mxu1 %vm432_vm0, %v261_v46  ;;  %v6720_v46 = vld [vmem:[%s8594_s16 + $0x441] sm:$0xff] }
 0x192   : >> { %8009 = vmatmul.mubr.msk.f32.gmra.mrb[68].mxu0 %vm432_vm0, %v10864_v50  ;;  %7643 = vmatprep.mubr.msk.f32.mxu1 %vm432_vm0, %v262_v48  ;;  %v295_v48 = vld [vmem:[%s8594_s16 + $0x350] sm:$0xff] }
 0x193   : >> { %8011 = vmatprep.mubr.msk.f32.mxu0 %vm432_vm0, %v10865_v52  ;;  %v6721_v50 = vld [vmem:[%s8594_s16 + $0x449] sm:$0xff]  ;;  %v296_v52 = vld [vmem:[%s8594_s16 + $0x358] sm:$0xff] }
 0x195   : >> { %7644 = vmatmul.mubr.msk.f32.gmra.mrb[70].mxu1 %vm432_vm0, %v263_v54  ;;  %v6722_v54 = vld [vmem:[%s8594_s16 + $0x451] sm:$0xff] }
 0x196   : >> { %8012 = vmatmul.mubr.msk.f32.gmra.mrb[70].mxu0 %vm432_vm0, %v10866_v58  ;;  %7646 = vmatprep.mubr.msk.f32.mxu1 %vm432_vm0, %v264_v56  ;;  %v297_v56 = vld [vmem:[%s8594_s16 + $0x360] sm:$0xff] }
 0x197   : >> { %8014 = vmatprep.mubr.msk.f32.mxu0 %vm432_vm0, %v10867_v60  ;;  %v6723_v58 = vld [vmem:[%s8594_s16 + $0x459] sm:$0xff]  ;;  %v298_v60 = vld [vmem:[%s8594_s16 + $0x368] sm:$0xff] }
 0x199   : >> { %7647 = vmatmul.mubr.msk.f32.gmra.mrb[72].mxu1 %vm432_vm0, %v265_v62  ;;  %v6724_v62 = vld [vmem:[%s8594_s16 + $0x461] sm:$0xff] }
 0x19a   : >> { %8015 = vmatmul.mubr.msk.f32.gmra.mrb[72].mxu0 %vm432_vm0, %v10868_v11  ;;  %7649 = vmatprep.mubr.msk.f32.mxu1 %vm432_vm0, %v266_v9  ;;  %v299_v9 = vld [vmem:[%s8594_s16 + $0x370] sm:$0xff] }
 0x19b   : >> { %8017 = vmatprep.mubr.msk.f32.mxu0 %vm432_vm0, %v10869_v13  ;;  %v6725_v11 = vld [vmem:[%s8594_s16 + $0x469] sm:$0xff]  ;;  %v300_v13 = vld [vmem:[%s8594_s16 + $0x378] sm:$0xff] }
 0x19d   : >> { %7650 = vmatmul.mubr.msk.f32.gmra.mrb[74].mxu1 %vm432_vm0, %v267_v15  ;;  %v6726_v15 = vld [vmem:[%s8594_s16 + $0x471] sm:$0xff] }
 0x19e   : >> { %8018 = vmatmul.mubr.msk.f32.gmra.mrb[74].mxu0 %vm432_vm0, %v10870_v21  ;;  %7652 = vmatprep.mubr.msk.f32.mxu1 %vm432_vm0, %v268_v17 }
 0x19f   : >> { %8020 = vmatprep.mubr.msk.f32.mxu0 %vm432_vm0, %v10871_v25 }
 0x1a1   : >> { %7653 = vmatmul.mubr.msk.f32.gmra.mrb[76].mxu1 %vm432_vm0, %v269_v29 }
 0x1a2   : >> { %8021 = vmatmul.mubr.msk.f32.gmra.mrb[76].mxu0 %vm432_vm0, %v10872_v37  ;;  %7655 = vmatprep.mubr.msk.f32.mxu1 %vm432_vm0, %v270_v33 }
 0x1a3   : >> { %8023 = vmatprep.mubr.msk.f32.mxu0 %vm432_vm0, %v10873_v41  ;;  %v301_v41 = vld [vmem:[%s8594_s16 + $0x380] sm:$0xff] }
 0x1a5   : >> { %7656 = vmatmul.mubr.msk.f32.gmra.mrb[78].mxu1 %vm432_vm0, %v271_v45  ;;  %v6727_v45 = vld [vmem:[%s8594_s16 + $0x479] sm:$0xff] }
 0x1a6   : >> { %8024 = vmatmul.mubr.msk.f32.gmra.mrb[78].mxu0 %vm432_vm0, %v10874_v53  ;;  %7658 = vmatprep.mubr.msk.f32.mxu1 %vm432_vm0, %v272_v49  ;;  %v302_v49 = vld [vmem:[%s8594_s16 + $0x388] sm:$0xff] }
 0x1a7   : >> { %8026 = vmatprep.mubr.msk.f32.mxu0 %vm432_vm0, %v10875_v57  ;;  %v6728_v53 = vld [vmem:[%s8594_s16 + $0x481] sm:$0xff] }
 0x1a9   : >> { %7659 = vmatmul.mubr.msk.f32.gmra.mrb[80].mxu1 %vm432_vm0, %v273_v61 }
 0x1aa   : >> { %8027 = vmatmul.mubr.msk.f32.gmra.mrb[80].mxu0 %vm432_vm0, %v10876_v14  ;;  %7661 = vmatprep.mubr.msk.f32.mxu1 %vm432_vm0, %v274_v10 }
 0x1ab   : >> { %8029 = vmatprep.mubr.msk.f32.mxu0 %vm432_vm0, %v10877_v19 }
 0x1ad   : >> { %7662 = vmatmul.mubr.msk.f32.gmra.mrb[82].mxu1 %vm432_vm0, %v275_v27 }
 0x1ae   : >> { %8030 = vmatmul.mubr.msk.f32.gmra.mrb[82].mxu0 %vm432_vm0, %v10878_v43  ;;  %7664 = vmatprep.mubr.msk.f32.mxu1 %vm432_vm0, %v276_v35  ;;  %v303_v35 = vld [vmem:[%s8594_s16 + $0x390] sm:$0xff] }
 0x1af   : >> { %8032 = vmatprep.mubr.msk.f32.mxu0 %vm432_vm0, %v10879_v51  ;;  %v6729_v43 = vld [vmem:[%s8594_s16 + $0x489] sm:$0xff]  ;;  %v304_v51 = vld [vmem:[%s8594_s16 + $0x398] sm:$0xff] }
 0x1b1   : >> { %7665 = vmatmul.mubr.msk.f32.gmra.mrb[84].mxu1 %vm432_vm0, %v277_v59  ;;  %v6730_v59 = vld [vmem:[%s8594_s16 + $0x491] sm:$0xff] }
 0x1b2   : >> { %8033 = vmatmul.mubr.msk.f32.gmra.mrb[84].mxu0 %vm432_vm0, %v9312_v7  ;;  %7667 = vmatprep.mubr.msk.f32.mxu1 %vm432_vm0, %v278_v12  ;;  %v281_v7 = vld [vmem:[%s8594_s16 + $0x2d8] sm:$0xff] }
 0x1b3   : >> { %8035 = vmatprep.mubr.msk.f32.mxu0 %vm432_vm0, %v10880_v23 }
 0x1b5   : >> { %7668 = vmatmul.mubr.msk.f32.gmra.mrb[86].mxu1 %vm432_vm0, %v279_v39 }
 0x1b6   : >> { %8036 = vmatmul.mubr.msk.f32.gmra.mrb[86].mxu0 %vm432_vm0, %v9326_v4  ;;  %7670 = vmatprep.mubr.msk.f32.mxu1 %vm432_vm0, %v280_v0  ;;  %v283_v4 = vld [vmem:[%s8594_s16 + $0x2f0] sm:$0xff] }
 0x1b7   : >> { %8038 = vmatprep.mubr.msk.f32.mxu0 %vm432_vm0, %v10881_v55 }
 0x1b9   : >> { %7671 = vmatmul.mubr.msk.f32.gmra.mrb[88].mxu1 %vm432_vm0, %v281_v7 }
 0x1ba   : >> { %8039 = vmatmul.mubr.msk.f32.gmra.mrb[88].mxu0 %vm432_vm0, %v9340_v3  ;;  %7673 = vmatprep.mubr.msk.f32.mxu1 %vm432_vm0, %v282_v16  ;;  %v285_v3 = vld [vmem:[%s8594_s16 + $0x300] sm:$0xff] }
 0x1bb   : >> { %8041 = vmatprep.mubr.msk.f32.mxu0 %vm432_vm0, %v6708_v47  ;;  %v305_v16 = vld [vmem:[%s8594_s16 + $0x3a0] sm:$0xff] }
 0x1bc   : >> { %v6731_v47 = vld [vmem:[%s8594_s16 + $0x499] sm:$0xff] }
 0x1bd   : >> { %7674 = vmatmul.mubr.msk.f32.gmra.mrb[90].mxu1 %vm432_vm0, %v283_v4  ;;  %v306_v4 = vld [vmem:[%s8594_s16 + $0x3a8] sm:$0xff] }
 0x1be   : >> { %8042 = vmatmul.mubr.msk.f32.gmra.mrb[90].mxu0 %vm432_vm0, %v6709_v2  ;;  %7676 = vmatprep.mubr.msk.f32.mxu1 %vm432_vm0, %v284_v1  ;;  %v6732_v2 = vld [vmem:[%s8594_s16 + $0x4a1] sm:$0xff] }
 0x1bf   : >> { %8044 = vmatprep.mubr.msk.f32.mxu0 %vm432_vm0, %v6710_v31 }
 0x1c1   : >> { %7677 = vmatmul.mubr.msk.f32.gmra.mrb[92].mxu1 %vm432_vm0, %v285_v3 }
 0x1c2   : >> { %8045 = vmatmul.mubr.msk.f32.gmra.mrb[92].mxu0 %vm432_vm0, %v6711_v5  ;;  %7679 = vmatprep.mubr.msk.f32.mxu1 %vm432_vm0, %v286_v63 }
 0x1c3   : >> { %8047 = vmatprep.mubr.msk.f32.mxu0 %vm432_vm0, %v6712_v6 }
 0x1c5   : >> { %7680 = vmatmul.mubr.msk.f32.gmra.mrb[94].mxu1 %vm432_vm0, %v287_v18  ;;  %v307_v18 = vld [vmem:[%s8594_s16 + $0x3b0] sm:$0xff] }
 0x1c6   : >> { %8048 = vmatmul.mubr.msk.f32.gmra.mrb[94].mxu0 %vm432_vm0, %v6713_v8  ;;  %7682 = vmatprep.mubr.msk.f32.mxu1 %vm432_vm0, %v288_v20  ;;  %v6733_v8 = vld [vmem:[%s8594_s16 + $0x4a9] sm:$0xff]  ;;  %v308_v20 = vld [vmem:[%s8594_s16 + $0x3b8] sm:$0xff] }
 0x1c7   : >> { %8050 = vmatprep.mubr.msk.f32.mxu0 %vm432_vm0, %v6714_v22  ;;  %v6734_v22 = vld [vmem:[%s8594_s16 + $0x4b1] sm:$0xff] }
 0x1c9   : >> { %7683 = vmatmul.mubr.msk.f32.gmra.mrb[96].mxu1 %vm432_vm0, %v289_v24 }
 0x1ca   : >> { %8051 = vmatmul.mubr.msk.f32.gmra.mrb[96].mxu0 %vm432_vm0, %v6715_v26  ;;  %7685 = vmatprep.mubr.msk.f32.mxu1 %vm432_vm0, %v290_v28 }
 0x1cb   : >> { %8053 = vmatprep.mubr.msk.f32.mxu0 %vm432_vm0, %v6716_v30 }
 0x1cd   : >> { %7686 = vmatmul.mubr.msk.f32.gmra.mrb[98].mxu1 %vm432_vm0, %v291_v32 }
 0x1ce   : >> { %8054 = vmatmul.mubr.msk.f32.gmra.mrb[98].mxu0 %vm432_vm0, %v6717_v34  ;;  %7688 = vmatprep.mubr.msk.f32.mxu1 %vm432_vm0, %v292_v36  ;;  %v309_v36 = vld [vmem:[%s8594_s16 + $0x3c0] sm:$0xff] }
 0x1cf   : >> { %8056 = vmatprep.mubr.msk.f32.mxu0 %vm432_vm0, %v6718_v38  ;;  %v6735_v38 = vld [vmem:[%s8594_s16 + $0x4b9] sm:$0xff] }
 0x1d1   : >> { %7689 = vmatmul.mubr.msk.f32.gmra.mrb[100].mxu1 %vm432_vm0, %v293_v40  ;;  %v310_v40 = vld [vmem:[%s8594_s16 + $0x3c8] sm:$0xff] }
 0x1d2   : >> { %8057 = vmatmul.mubr.msk.f32.gmra.mrb[100].mxu0 %vm432_vm0, %v6719_v42  ;;  %7691 = vmatprep.mubr.msk.f32.mxu1 %vm432_vm0, %v294_v44  ;;  %v6736_v42 = vld [vmem:[%s8594_s16 + $0x4c1] sm:$0xff] }
 0x1d3   : >> { %8059 = vmatprep.mubr.msk.f32.mxu0 %vm432_vm0, %v6720_v46 }
 0x1d5   : >> { %7692 = vmatmul.mubr.msk.f32.gmra.mrb[102].mxu1 %vm432_vm0, %v295_v48 }
 0x1d6   : >> { %8060 = vmatmul.mubr.msk.f32.gmra.mrb[102].mxu0 %vm432_vm0, %v6721_v50  ;;  %7694 = vmatprep.mubr.msk.f32.mxu1 %vm432_vm0, %v296_v52 }
 0x1d7   : >> { %8062 = vmatprep.mubr.msk.f32.mxu0 %vm432_vm0, %v6722_v54 }
 0x1d9   : >> { %7695 = vmatmul.mubr.msk.f32.gmra.mrb[104].mxu1 %vm432_vm0, %v297_v56  ;;  %v311_v56 = vld [vmem:[%s8594_s16 + $0x3d0] sm:$0xff] }
 0x1da   : >> { %8063 = vmatmul.mubr.msk.f32.gmra.mrb[104].mxu0 %vm432_vm0, %v6723_v58  ;;  %7697 = vmatprep.mubr.msk.f32.mxu1 %vm432_vm0, %v298_v60  ;;  %v6737_v58 = vld [vmem:[%s8594_s16 + $0x4c9] sm:$0xff] }
 0x1db   : >> { %8065 = vmatprep.mubr.msk.f32.mxu0 %vm432_vm0, %v6724_v62 }
 0x1dc   : >> { %v7540_v17 = vpop.f32.mrb[0].mxu1 }
 0x1dd   : >> { %v7908_v21 = vpop.f32.mrb[0].mxu0  ;;  %v1884_v29 = vpop.f32.mrb[1].mxu1  ;;  %7698 = vmatmul.mubr.msk.f32.gmra.mrb[106].mxu1 %vm432_vm0, %v299_v9 }
 0x1de   : >> { %v9778_v25 = vadd.f32 %v7908_v21, %v7540_v17  ;;  %v4297_v33 = vpop.f32.mrb[1].mxu0  ;;  %8066 = vmatmul.mubr.msk.f32.gmra.mrb[106].mxu0 %vm432_vm0, %v6725_v11  ;;  %7700 = vmatprep.mubr.msk.f32.mxu1 %vm432_vm0, %v300_v13 }
 0x1df   : >> { %v9782_v37 = vadd.f32 %v4297_v33, %v1884_v29  ;;  %8068 = vmatprep.mubr.msk.f32.mxu0 %vm432_vm0, %v6726_v15 }
 0x1e0   : >> { %v7543_v57 = vpop.f32.mrb[2].mxu1 }
 0x1e1   : >> { %v7911_v61 = vpop.f32.mrb[2].mxu0  ;;  %v1894_v14 = vpop.f32.mrb[3].mxu1  ;;  %7701 = vmatmul.mubr.msk.f32.gmra.mrb[108].mxu1 %vm432_vm0, %v301_v41 }
 0x1e2   : >> { %v9790_v10 = vadd.f32 %v7911_v61, %v7543_v57  ;;  %v4307_v19 = vpop.f32.mrb[3].mxu0  ;;  %8069 = vmatmul.mubr.msk.f32.gmra.mrb[108].mxu0 %vm432_vm0, %v6727_v45  ;;  %7703 = vmatprep.mubr.msk.f32.mxu1 %vm432_vm0, %v302_v49 }
 0x1e3   : >> { %v9794_v27 = vadd.f32 %v4307_v19, %v1894_v14  ;;  %8071 = vmatprep.mubr.msk.f32.mxu0 %vm432_vm0, %v6728_v53 }
 0x1e4   : >> { %v7546_v12 = vpop.f32.mrb[4].mxu1 }
 0x1e5   : >> { %v7914_v23 = vpop.f32.mrb[4].mxu0  ;;  %v1904_v0 = vpop.f32.mrb[5].mxu1  ;;  %7704 = vmatmul.mubr.msk.f32.gmra.mrb[110].mxu1 %vm432_vm0, %v303_v35 }
 0x1e6   : >> { %v9802_v39 = vadd.f32 %v7914_v23, %v7546_v12  ;;  %v4317_v55 = vpop.f32.mrb[5].mxu0  ;;  %8072 = vmatmul.mubr.msk.f32.gmra.mrb[110].mxu0 %vm432_vm0, %v6729_v43  ;;  %7706 = vmatprep.mubr.msk.f32.mxu1 %vm432_vm0, %v304_v51 }
 0x1e7   : >> { %v9806_v7 = vadd.f32 %v4317_v55, %v1904_v0  ;;  %8074 = vmatprep.mubr.msk.f32.mxu0 %vm432_vm0, %v6730_v59 }
 0x1e8   : >> { %v7549_v1 = vpop.f32.mrb[6].mxu1 }
 0x1e9   : >> { %v7917_v31 = vpop.f32.mrb[6].mxu0  ;;  %v1914_v5 = vpop.f32.mrb[7].mxu1  ;;  %7707 = vmatmul.mubr.msk.f32.gmra.mrb[112].mxu1 %vm432_vm0, %v305_v16 }
 0x1ea   : >> { %v9814_v3 = vadd.f32 %v7917_v31, %v7549_v1  ;;  %v4327_v63 = vpop.f32.mrb[7].mxu0  ;;  %8075 = vmatmul.mubr.msk.f32.gmra.mrb[112].mxu0 %vm432_vm0, %v6731_v47  ;;  %7709 = vmatprep.mubr.msk.f32.mxu1 %vm432_vm0, %v306_v4 }
 0x1eb   : >> { %v9818_v6 = vadd.f32 %v4327_v63, %v1914_v5  ;;  %8077 = vmatprep.mubr.msk.f32.mxu0 %vm432_vm0, %v6732_v2 }
 0x1ec   : >> { %v7552_v24 = vpop.f32.mrb[8].mxu1 }
 0x1ed   : >> { %v7920_v26 = vpop.f32.mrb[8].mxu0  ;;  %v1924_v30 = vpop.f32.mrb[9].mxu1  ;;  %7710 = vmatmul.mubr.msk.f32.gmra.mrb[114].mxu1 %vm432_vm0, %v307_v18 }
 0x1ee   : >> { %v9826_v28 = vadd.f32 %v7920_v26, %v7552_v24  ;;  %v4337_v32 = vpop.f32.mrb[9].mxu0  ;;  %8078 = vmatmul.mubr.msk.f32.gmra.mrb[114].mxu0 %vm432_vm0, %v6733_v8  ;;  %7712 = vmatprep.mubr.msk.f32.mxu1 %vm432_vm0, %v308_v20 }
 0x1ef   : >> { %v9830_v34 = vadd.f32 %v4337_v32, %v1924_v30  ;;  %8080 = vmatprep.mubr.msk.f32.mxu0 %vm432_vm0, %v6734_v22 }
 0x1f0   : >> { %v7555_v44 = vpop.f32.mrb[10].mxu1 }
 0x1f1   : >> { %v7923_v46 = vpop.f32.mrb[10].mxu0  ;;  %v1934_v50 = vpop.f32.mrb[11].mxu1  ;;  %7713 = vmatmul.mubr.msk.f32.gmra.mrb[116].mxu1 %vm432_vm0, %v309_v36 }
 0x1f2   : >> { %v9838_v48 = vadd.f32 %v7923_v46, %v7555_v44  ;;  %v4347_v52 = vpop.f32.mrb[11].mxu0  ;;  %8081 = vmatmul.mubr.msk.f32.gmra.mrb[116].mxu0 %vm432_vm0, %v6735_v38  ;;  %7715 = vmatprep.mubr.msk.f32.mxu1 %vm432_vm0, %v310_v40 }
 0x1f3   : >> { %v9842_v54 = vadd.f32 %v4347_v52, %v1934_v50  ;;  %8083 = vmatprep.mubr.msk.f32.mxu0 %vm432_vm0, %v6736_v42 }
 0x1f4   : >> { %v7558_v60 = vpop.f32.mrb[12].mxu1 }
 0x1f5   : >> { %v7926_v62 = vpop.f32.mrb[12].mxu0  ;;  %v1944_v11 = vpop.f32.mrb[13].mxu1  ;;  %7716 = vmatmul.mubr.msk.f32.gmra.mrb[118].mxu1 %vm432_vm0, %v311_v56 }
 0x1f6   : >> { %v9848_v9 = vadd.f32 %v7926_v62, %v7558_v60  ;;  %v4357_v13 = vpop.f32.mrb[13].mxu0  ;;  %8084 = vmatmul.mubr.msk.f32.gmra.mrb[118].mxu0 %vm432_vm0, %v6737_v58 }
 0x1f7   : >> { %v9852_v15 = vadd.f32 %v4357_v13, %v1944_v11 }
 0x1f8   : >> { %v7561_v17 = vpop.f32.mrb[14].mxu1 }
 0x1f9   : >> { %v7929_v21 = vpop.f32.mrb[14].mxu0  ;;  %v1954_v33 = vpop.f32.mrb[15].mxu1 }
 0x1fa   : >> { %v9854_v29 = vadd.f32 %v7929_v21, %v7561_v17  ;;  %v4367_v41 = vpop.f32.mrb[15].mxu0 }
 0x1fb   : >> { %v9856_v45 = vadd.f32 %v4367_v41, %v1954_v33 }
 0x1fc   : >> { %v7564_v49 = vpop.f32.mrb[16].mxu1 }
 0x1fd   : >> { %v7932_v53 = vpop.f32.mrb[16].mxu0  ;;  %v1964_v61 = vpop.f32.mrb[17].mxu1 }
 0x1fe   : >> { %v9858_v57 = vadd.f32 %v7932_v53, %v7564_v49  ;;  %v4377_v14 = vpop.f32.mrb[17].mxu0  ;;  %v9888_v49 = vsel %vm5016_vm1, %v9778_v25, -inf }
 0x1ff   : >> { %v9860_v19 = vadd.f32 %v4377_v14, %v1964_v61  ;;  %v9895_v61 = vsel %vm5016_vm1, %v9782_v37, -inf }
 0x200   : >> { %v7567_v35 = vpop.f32.mrb[18].mxu1 }
 0x201   : >> { %v7935_v43 = vpop.f32.mrb[18].mxu0  ;;  %v1974_v59 = vpop.f32.mrb[19].mxu1 }
 0x202   : >> { %v9862_v51 = vadd.f32 %v7935_v43, %v7567_v35  ;;  %v4387_v12 = vpop.f32.mrb[19].mxu0 }
 0x203   : >> { %v9864_v23 = vadd.f32 %v4387_v12, %v1974_v59 }
 0x204   : >> { %v7570_v0 = vpop.f32.mrb[20].mxu1 }
 0x205   : >> { %v7938_v55 = vpop.f32.mrb[20].mxu0  ;;  %v1984_v47 = vpop.f32.mrb[21].mxu1 }
 0x206   : >> { %v9866_v16 = vadd.f32 %v7938_v55, %v7570_v0  ;;  %v4397_v4 = vpop.f32.mrb[21].mxu0 }
 0x207   : >> { %v9868_v2 = vadd.f32 %v4397_v4, %v1984_v47  ;;  %v9906_v4 = vsel %vm5016_vm1, %v9790_v10, -inf }
 0x208   : >> { %v7573_v1 = vpop.f32.mrb[22].mxu1 }
 0x209   : >> { %v7941_v31 = vpop.f32.mrb[22].mxu0  ;;  %v1994_v63 = vpop.f32.mrb[23].mxu1 }
 0x20a   : >> { %v9870_v5 = vadd.f32 %v7941_v31, %v7573_v1  ;;  %v4407_v18 = vpop.f32.mrb[23].mxu0  ;;  %v9913_v1 = vsel %vm5016_vm1, %v9794_v27, -inf }
 0x20b   : >> { %v9872_v8 = vadd.f32 %v4407_v18, %v1994_v63 }
 0x20c   : >> { %v7576_v20 = vpop.f32.mrb[24].mxu1  ;;  %v10086_v12 = vsel %vm5016_vm1, %v9870_v5, -inf }
 0x20d   : >> { %v7944_v22 = vpop.f32.mrb[24].mxu0  ;;  %v2004_v26 = vpop.f32.mrb[25].mxu1 }
 0x20e   : >> { %v9874_v24 = vadd.f32 %v7944_v22, %v7576_v20  ;;  %v4417_v30 = vpop.f32.mrb[25].mxu0  ;;  %v10068_v22 = vsel %vm5016_vm1, %v9866_v16, -inf }
 0x20f   : >> { %v9876_v32 = vadd.f32 %v4417_v30, %v2004_v26 }
 0x210   : >> { %v7579_v36 = vpop.f32.mrb[26].mxu1 }
 0x211   : >> { %v7947_v38 = vpop.f32.mrb[26].mxu0  ;;  %v2014_v42 = vpop.f32.mrb[27].mxu1 }
 0x212   : >> { %v9878_v40 = vadd.f32 %v7947_v38, %v7579_v36  ;;  %v4427_v44 = vpop.f32.mrb[27].mxu0  ;;  %v9924_v38 = vsel %vm5016_vm1, %v9802_v39, -inf }
 0x213   : >> { %v9880_v46 = vadd.f32 %v4427_v44, %v2014_v42  ;;  %v9931_v42 = vsel %vm5016_vm1, %v9806_v7, -inf }
 0x214   : >> { %v7582_v50 = vpop.f32.mrb[28].mxu1 }
 0x215   : >> { %v7950_v52 = vpop.f32.mrb[28].mxu0  ;;  %v2024_v58 = vpop.f32.mrb[29].mxu1 }
 0x216   : >> { %v9882_v56 = vadd.f32 %v7950_v52, %v7582_v50  ;;  %v4437_v60 = vpop.f32.mrb[29].mxu0 }
 0x217   : >> { %v9884_v62 = vadd.f32 %v4437_v60, %v2024_v58  ;;  %v10050_v60 = vsel %vm5016_vm1, %v9862_v51, -inf }
 0x218   : >> { %v7585_v11 = vpop.f32.mrb[30].mxu1 }
 0x219   : >> { %v7953_v13 = vpop.f32.mrb[30].mxu0  ;;  %v2034_v21 = vpop.f32.mrb[31].mxu1 }
 0x21a   : >> { %v8132_v17 = vadd.f32 %v7953_v13, %v7585_v11  ;;  %v4447_v33 = vpop.f32.mrb[31].mxu0 }
 0x21b   : >> { %v8133_v41 = vadd.f32 %v4447_v33, %v2034_v21  ;;  %v9942_v21 = vsel %vm5016_vm1, %v9814_v3, -inf  ;;  %v9949_v33 = vsel %vm5016_vm1, %v9818_v6, -inf }
 0x21c   : >> { %v9891_v53 = vsel %vm5016_vm1, %v8132_v17, -inf  ;;  %v7588_v43 = vpop.f32.mrb[32].mxu1 }
 0x21d   : >> { %v9900_v35 = vsel %vm5016_vm1, %v8133_v41, -inf  ;;  %v7956_v59 = vpop.f32.mrb[32].mxu0  ;;  %v2044_v0 = vpop.f32.mrb[33].mxu1 }
 0x21e   : >> { %v8134_v25 = vadd.f32 %v7956_v59, %v7588_v43  ;;  %v4457_v55 = vpop.f32.mrb[33].mxu0 }
 0x21f   : >> { %v8135_v47 = vadd.f32 %v4457_v55, %v2044_v0  ;;  %v10032_v0 = vsel %vm5016_vm1, %v9858_v57, -inf }
 0x220   : >> { %v9909_v37 = vsel %vm5016_vm1, %v8134_v25, -inf  ;;  %v7591_v18 = vpop.f32.mrb[34].mxu1 }
 0x221   : >> { %v9918_v63 = vsel %vm5016_vm1, %v8135_v47, -inf  ;;  %v7959_v20 = vpop.f32.mrb[34].mxu0  ;;  %v2054_v26 = vpop.f32.mrb[35].mxu1 }
 0x222   : >> { %v8136_v10 = vadd.f32 %v7959_v20, %v7591_v18  ;;  %v4467_v30 = vpop.f32.mrb[35].mxu0  ;;  %v9960_v20 = vsel %vm5016_vm1, %v9826_v28, -inf }
 0x223   : >> { %v8137_v36 = vadd.f32 %v4467_v30, %v2054_v26 }
 0x224   : >> { %v9927_v27 = vsel %vm5016_vm1, %v8136_v10, -inf  ;;  %v7594_v52 = vpop.f32.mrb[36].mxu1  ;;  %v9967_v10 = vsel %vm5016_vm1, %v9830_v34, -inf }
 0x225   : >> { %v9936_v50 = vsel %vm5016_vm1, %v8137_v36, -inf  ;;  %v7962_v58 = vpop.f32.mrb[36].mxu0  ;;  %v2064_v11 = vpop.f32.mrb[37].mxu1 }
 0x226   : >> { %v8138_v39 = vadd.f32 %v7962_v58, %v7594_v52  ;;  %v4477_v13 = vpop.f32.mrb[37].mxu0  ;;  %v10014_v58 = vsel %vm5016_vm1, %v9854_v29, -inf }
 0x227   : >> { %v8139_v17 = vadd.f32 %v4477_v13, %v2064_v11 }
 0x228   : >> { %v9945_v7 = vsel %vm5016_vm1, %v8138_v39, -inf  ;;  %v7597_v59 = vpop.f32.mrb[38].mxu1 }
 0x229   : >> { %v9954_v43 = vsel %vm5016_vm1, %v8139_v17, -inf  ;;  %v7965_v25 = vpop.f32.mrb[38].mxu0  ;;  %v2074_v55 = vpop.f32.mrb[39].mxu1  ;;  %v9978_v17 = vsel %vm5016_vm1, %v9838_v48, -inf }
 0x22a   : >> { %v8140_v3 = vadd.f32 %v7965_v25, %v7597_v59  ;;  %v4487_v47 = vpop.f32.mrb[39].mxu0  ;;  %v9985_v59 = vsel %vm5016_vm1, %v9842_v54, -inf }
 0x22b   : >> { %v8141_v18 = vadd.f32 %v4487_v47, %v2074_v55 }
 0x22c   : >> { %v9963_v6 = vsel %vm5016_vm1, %v8140_v3, -inf  ;;  %v7600_v36 = vpop.f32.mrb[40].mxu1 }
 0x22d   : >> { %v9972_v30 = vsel %vm5016_vm1, %v8141_v18, -inf  ;;  %v7968_v52 = vpop.f32.mrb[40].mxu0  ;;  %v2084_v39 = vpop.f32.mrb[41].mxu1 }
 0x22e   : >> { %v8142_v28 = vadd.f32 %v7968_v52, %v7600_v36  ;;  %v4497_v11 = vpop.f32.mrb[41].mxu0 }
 0x22f   : >> { %v8143_v13 = vadd.f32 %v4497_v11, %v2084_v39  ;;  %v9996_v39 = vsel %vm5016_vm1, %v9848_v9, -inf  ;;  %v10003_v11 = vsel %vm5016_vm1, %v9852_v15, -inf }
 0x230   : >> { %v9981_v34 = vsel %vm5016_vm1, %v8142_v28, -inf  ;;  %v7603_v55 = vpop.f32.mrb[42].mxu1 }
 0x231   : >> { %v9990_v3 = vsel %vm5016_vm1, %v8143_v13, -inf  ;;  %v7971_v47 = vpop.f32.mrb[42].mxu0  ;;  %v2094_v36 = vpop.f32.mrb[43].mxu1 }
 0x232   : >> { %v8144_v48 = vadd.f32 %v7971_v47, %v7603_v55  ;;  %v4507_v52 = vpop.f32.mrb[43].mxu0 }
 0x233   : >> { %v8145_v28 = vadd.f32 %v4507_v52, %v2094_v36 }
 0x234   : >> { %v9999_v54 = vsel %vm5016_vm1, %v8144_v48, -inf  ;;  %v7606_v55 = vpop.f32.mrb[44].mxu1 }
 0x235   : >> { %v10008_v18 = vsel %vm5016_vm1, %v8145_v28, -inf  ;;  %v7974_v47 = vpop.f32.mrb[44].mxu0  ;;  %v2104_v52 = vpop.f32.mrb[45].mxu1  ;;  %v10021_v28 = vsel %vm5016_vm1, %v9856_v45, -inf }
 0x236   : >> { %v8146_v9 = vadd.f32 %v7974_v47, %v7606_v55  ;;  %v4517_v25 = vpop.f32.mrb[45].mxu0 }
 0x237   : >> { %v8147_v48 = vadd.f32 %v4517_v25, %v2104_v52 }
 0x238   : >> { %v10017_v15 = vsel %vm5016_vm1, %v8146_v9, -inf  ;;  %v7609_v55 = vpop.f32.mrb[46].mxu1 }
 0x239   : >> { %v10026_v36 = vsel %vm5016_vm1, %v8147_v48, -inf  ;;  %v7977_v47 = vpop.f32.mrb[46].mxu0  ;;  %v2114_v52 = vpop.f32.mrb[47].mxu1  ;;  %v10039_v48 = vsel %vm5016_vm1, %v9860_v19, -inf }
 0x23a   : >> { %v8148_v29 = vadd.f32 %v7977_v47, %v7609_v55  ;;  %v4527_v26 = vpop.f32.mrb[47].mxu0 }
 0x23b   : >> { %v8149_v9 = vadd.f32 %v4527_v26, %v2114_v52 }
 0x23c   : >> { %v10035_v45 = vsel %vm5016_vm1, %v8148_v29, -inf  ;;  %v7612_v55 = vpop.f32.mrb[48].mxu1 }
 0x23d   : >> { %v10044_v25 = vsel %vm5016_vm1, %v8149_v9, -inf  ;;  %v7980_v47 = vpop.f32.mrb[48].mxu0  ;;  %v2124_v52 = vpop.f32.mrb[49].mxu1  ;;  %v10057_v9 = vsel %vm5016_vm1, %v9864_v23, -inf }
 0x23e   : >> { %v8150_v57 = vadd.f32 %v7980_v47, %v7612_v55  ;;  %v4537_v41 = vpop.f32.mrb[49].mxu0 }
 0x23f   : >> { %v8151_v29 = vadd.f32 %v4537_v41, %v2124_v52 }
 0x240   : >> { %v10053_v19 = vsel %vm5016_vm1, %v8150_v57, -inf  ;;  %v7615_v55 = vpop.f32.mrb[50].mxu1 }
 0x241   : >> { %v10062_v26 = vsel %vm5016_vm1, %v8151_v29, -inf  ;;  %v7983_v47 = vpop.f32.mrb[50].mxu0  ;;  %v2134_v52 = vpop.f32.mrb[51].mxu1  ;;  %v10075_v29 = vsel %vm5016_vm1, %v9868_v2, -inf }
 0x242   : >> { %v8152_v51 = vadd.f32 %v7983_v47, %v7615_v55  ;;  %v4547_v44 = vpop.f32.mrb[51].mxu0 }
 0x243   : >> { %v8153_v57 = vadd.f32 %v4547_v44, %v2134_v52 }
 0x244   : >> { %v10071_v23 = vsel %vm5016_vm1, %v8152_v51, -inf  ;;  %v7618_v55 = vpop.f32.mrb[52].mxu1 }
 0x245   : >> { %v10080_v41 = vsel %vm5016_vm1, %v8153_v57, -inf  ;;  %v7986_v47 = vpop.f32.mrb[52].mxu0  ;;  %v2144_v52 = vpop.f32.mrb[53].mxu1  ;;  %v10093_v57 = vsel %vm5016_vm1, %v9872_v8, -inf }
 0x246   : >> { %10882 = vst [vmem:[#allocation11_spill] sm:$0xff] %v10080_v41  ;;  %v8154_v16 = vadd.f32 %v7986_v47, %v7618_v55  ;;  %v4557_v31 = vpop.f32.mrb[53].mxu0  ;;  %10883 = vst [vmem:[#allocation12_spill] sm:$0xff] %v10093_v57  ;;  %v10104_v41 = vsel %vm5016_vm1, %v9874_v24, -inf  ;;  %v10122_v57 = vsel %vm5016_vm1, %v9878_v40, -inf }
 0x247   : >> { %v8155_v51 = vadd.f32 %v4557_v31, %v2144_v52  ;;  %10887 = vst [vmem:[#allocation16_spill] sm:$0xff] %v10122_v57 }
 0x248   : >> { %v10089_v2 = vsel %vm5016_vm1, %v8154_v16, -inf  ;;  %v7621_v55 = vpop.f32.mrb[54].mxu1 }
 0x249   : >> { %v10098_v44 = vsel %vm5016_vm1, %v8155_v51, -inf  ;;  %v7989_v47 = vpop.f32.mrb[54].mxu0  ;;  %v2154_v52 = vpop.f32.mrb[55].mxu1  ;;  %v10111_v51 = vsel %vm5016_vm1, %v9876_v32, -inf }
 0x24a   : >> { %10884 = vst [vmem:[#allocation13_spill] sm:$0xff] %v10098_v44  ;;  %v8156_v5 = vadd.f32 %v7989_v47, %v7621_v55  ;;  %v4567_v14 = vpop.f32.mrb[55].mxu0  ;;  %10885 = vst [vmem:[#allocation14_spill] sm:$0xff] %v10111_v51  ;;  %v10140_v51 = vsel %vm5016_vm1, %v9882_v56, -inf }
 0x24b   : >> { %v8157_v16 = vadd.f32 %v4567_v14, %v2154_v52  ;;  %10891 = vst [vmem:[#allocation20_spill] sm:$0xff] %v10140_v51  ;;  %v10894_v51 = vmax.f32 %v9895_v61, %v9900_v35  ;;  %v10896_v61 = vmax.f32 %v9913_v1, %v9918_v63  ;;  %v10898_v1 = vmax.f32 %v9931_v42, %v9936_v50 }
 0x24c   : >> { %v10107_v8 = vsel %vm5016_vm1, %v8156_v5, -inf  ;;  %v7624_v55 = vpop.f32.mrb[56].mxu1  ;;  %v10900_v42 = vmax.f32 %v9949_v33, %v9954_v43  ;;  %v10902_v33 = vmax.f32 %v9967_v10, %v9972_v30  ;;  %v10904_v10 = vmax.f32 %v9985_v59, %v9990_v3 }
 0x24d   : >> { %v10116_v31 = vsel %vm5016_vm1, %v8157_v16, -inf  ;;  %v7992_v47 = vpop.f32.mrb[56].mxu0  ;;  %v2164_v52 = vpop.f32.mrb[57].mxu1  ;;  %v10129_v16 = vsel %vm5016_vm1, %v9880_v46, -inf  ;;  %v10906_v59 = vmax.f32 %v10003_v11, %v10008_v18  ;;  %v10908_v18 = vmax.f32 %v10021_v28, %v10026_v36 }
 0x24e   : >> { %10886 = vst [vmem:[#allocation15_spill] sm:$0xff] %v10116_v31  ;;  %v8158_v24 = vadd.f32 %v7992_v47, %v7624_v55  ;;  %v4577_v44 = vpop.f32.mrb[57].mxu0  ;;  %10889 = vst [vmem:[#allocation18_spill] sm:$0xff] %v10129_v16  ;;  %v10910_v36 = vmax.f32 %v10039_v48, %v10044_v25  ;;  %v10912_v25 = vmax.f32 %v10057_v9, %v10062_v26 }
 0x24f   : >> { %v8159_v5 = vadd.f32 %v4577_v44, %v2164_v52 }
 0x250   : >> { %v10125_v32 = vsel %vm5016_vm1, %v8158_v24, -inf  ;;  %v7627_v55 = vpop.f32.mrb[58].mxu1 }
 0x251   : >> { %10888 = vst [vmem:[#allocation17_spill] sm:$0xff] %v10125_v32  ;;  %v10134_v14 = vsel %vm5016_vm1, %v8159_v5, -inf  ;;  %v7995_v47 = vpop.f32.mrb[58].mxu0  ;;  %v2174_v52 = vpop.f32.mrb[59].mxu1  ;;  %v10147_v5 = vsel %vm5016_vm1, %v9884_v62, -inf  ;;  %v10893_v62 = vmax.f32 %v9888_v49, %v9891_v53  ;;  %v10895_v49 = vmax.f32 %v9906_v4, %v9909_v37 }
 0x252   : >> { %10890 = vst [vmem:[#allocation19_spill] sm:$0xff] %v10134_v14  ;;  %v8160_v40 = vadd.f32 %v7995_v47, %v7627_v55  ;;  %v4587_v31 = vpop.f32.mrb[59].mxu0  ;;  %v10897_v4 = vmax.f32 %v9924_v38, %v9927_v27  ;;  %v10899_v38 = vmax.f32 %v9942_v21, %v9945_v7  ;;  %v10901_v21 = vmax.f32 %v9960_v20, %v9963_v6 }
 0x253   : >> { %v8161_v24 = vadd.f32 %v4587_v31, %v2174_v52  ;;  %v10903_v20 = vmax.f32 %v9978_v17, %v9981_v34  ;;  %v10905_v17 = vmax.f32 %v9996_v39, %v9999_v54  ;;  %v10907_v39 = vmax.f32 %v10014_v58, %v10017_v15 }
 0x254   : >> { %v10143_v46 = vsel %vm5016_vm1, %v8160_v40, -inf  ;;  %v7630_v55 = vpop.f32.mrb[60].mxu1  ;;  %v10909_v58 = vmax.f32 %v10032_v0, %v10035_v45  ;;  %v10911_v0 = vmax.f32 %v10050_v60, %v10053_v19  ;;  %v10914_v60 = vmax.f32 %v10068_v22, %v10071_v23 }
 0x255   : >> { %10892 = vst [vmem:[#allocation21_spill] sm:$0xff] %v10143_v46  ;;  %v10152_v44 = vsel %vm5016_vm1, %v8161_v24, -inf  ;;  %v7998_v47 = vpop.f32.mrb[60].mxu0  ;;  %v2184_v52 = vpop.f32.mrb[61].mxu1  ;;  %v10919_v22 = vmax.f32 %v10086_v12, %v10089_v2  ;;  %v10925_v12 = vmax.f32 %v10104_v41, %v10107_v8 }
 0x256   : >> { %v8162_v56 = vadd.f32 %v7998_v47, %v7630_v55  ;;  %v4597_v14 = vpop.f32.mrb[61].mxu0 }
 0x257   : >> { %v8163_v40 = vadd.f32 %v4597_v14, %v2184_v52 }
 0x258   : >> { %v5027_v16 = vsel %vm5016_vm1, %v8162_v56, -inf  ;;  %v7633_v24 = vpop.f32.mrb[62].mxu1 }
 0x259   : >> { %v10160_v32 = vmax.f32 %v10893_v62, %v5027_v16  ;;  %v5020_v13 = vsel %vm5016_vm1, %v8163_v40, -inf  ;;  %v8001_v46 = vpop.f32.mrb[62].mxu0  ;;  %v2194_v47 = vpop.f32.mrb[63].mxu1 }
 0x25a   : >> { %v10166_v57 = vmax.f32 %v10894_v51, %v5020_v13  ;;  %v8164_v55 = vadd.f32 %v8001_v46, %v7633_v24  ;;  %v4607_v31 = vpop.f32.mrb[63].mxu0 }
 0x25b   : >> { %v8165_v14 = vadd.f32 %v4607_v31, %v2194_v47 }
 0x25c   : >> { %v5041_v56 = vsel %vm5016_vm1, %v8164_v55, -inf  ;;  %v7636_v52 = vpop.f32.mrb[64].mxu1 }
 0x25d   : >> { %v10172_v53 = vmax.f32 %v10895_v49, %v5041_v56  ;;  %v5034_v16 = vsel %vm5016_vm1, %v8165_v14, -inf  ;;  %v8004_v40 = vpop.f32.mrb[64].mxu0  ;;  %v2204_v51 = vpop.f32.mrb[65].mxu1 }
 0x25e   : >> { %v10178_v35 = vmax.f32 %v10896_v61, %v5034_v16  ;;  %v8166_v13 = vadd.f32 %v8004_v40, %v7636_v52  ;;  %v4617_v46 = vpop.f32.mrb[65].mxu0 }
 0x25f   : >> { %v8167_v31 = vadd.f32 %v4617_v46, %v2204_v51 }
 0x260   : >> { %v5055_v62 = vsel %vm5016_vm1, %v8166_v13, -inf  ;;  %v7639_v55 = vpop.f32.mrb[66].mxu1 }
 0x261   : >> { %v10184_v37 = vmax.f32 %v10897_v4, %v5055_v62  ;;  %v5048_v24 = vsel %vm5016_vm1, %v8167_v31, -inf  ;;  %v8007_v47 = vpop.f32.mrb[66].mxu0  ;;  %v2214_v56 = vpop.f32.mrb[67].mxu1 }
 0x262   : >> { %v10190_v63 = vmax.f32 %v10898_v1, %v5048_v24  ;;  %v8168_v14 = vadd.f32 %v8007_v47, %v7639_v55  ;;  %v4627_v49 = vpop.f32.mrb[67].mxu0 }
 0x263   : >> { %v8169_v16 = vadd.f32 %v4627_v49, %v2214_v56 }
 0x264   : >> { %v5069_v52 = vsel %vm5016_vm1, %v8168_v14, -inf  ;;  %v7642_v61 = vpop.f32.mrb[68].mxu1 }
 0x265   : >> { %v10196_v27 = vmax.f32 %v10899_v38, %v5069_v52  ;;  %v5062_v40 = vsel %vm5016_vm1, %v8169_v16, -inf  ;;  %v8010_v13 = vpop.f32.mrb[68].mxu0  ;;  %v2224_v46 = vpop.f32.mrb[69].mxu1 }
 0x266   : >> { %v10202_v50 = vmax.f32 %v10900_v42, %v5062_v40  ;;  %v8170_v51 = vadd.f32 %v8010_v13, %v7642_v61  ;;  %v4637_v31 = vpop.f32.mrb[69].mxu0 }
 0x267   : >> { %v8171_v62 = vadd.f32 %v4637_v31, %v2224_v46 }
 0x268   : >> { %v5083_v4 = vsel %vm5016_vm1, %v8170_v51, -inf  ;;  %v7645_v55 = vpop.f32.mrb[70].mxu1 }
 0x269   : >> { %v10208_v7 = vmax.f32 %v10901_v21, %v5083_v4  ;;  %v5076_v24 = vsel %vm5016_vm1, %v8171_v62, -inf  ;;  %v8013_v47 = vpop.f32.mrb[70].mxu0  ;;  %v2234_v14 = vpop.f32.mrb[71].mxu1 }
 0x26a   : >> { %v10214_v43 = vmax.f32 %v10902_v33, %v5076_v24  ;;  %v8172_v1 = vadd.f32 %v8013_v47, %v7645_v55  ;;  %v4647_v56 = vpop.f32.mrb[71].mxu0 }
 0x26b   : >> { %v8173_v49 = vadd.f32 %v4647_v56, %v2234_v14 }
 0x26c   : >> { %v5097_v16 = vsel %vm5016_vm1, %v8172_v1, -inf  ;;  %v7648_v38 = vpop.f32.mrb[72].mxu1 }
 0x26d   : >> { %v10220_v6 = vmax.f32 %v10903_v20, %v5097_v16  ;;  %v5090_v52 = vsel %vm5016_vm1, %v8173_v49, -inf  ;;  %v8016_v40 = vpop.f32.mrb[72].mxu0  ;;  %v2244_v13 = vpop.f32.mrb[73].mxu1 }
 0x26e   : >> { %v10226_v30 = vmax.f32 %v10904_v10, %v5090_v52  ;;  %v8174_v61 = vadd.f32 %v8016_v40, %v7648_v38  ;;  %v4657_v42 = vpop.f32.mrb[73].mxu0 }
 0x26f   : >> { %v8175_v51 = vadd.f32 %v4657_v42, %v2244_v13 }
 0x270   : >> { %v5111_v46 = vsel %vm5016_vm1, %v8174_v61, -inf  ;;  %v7651_v62 = vpop.f32.mrb[74].mxu1 }
 0x271   : >> { %v10232_v34 = vmax.f32 %v10905_v17, %v5111_v46  ;;  %v5104_v31 = vsel %vm5016_vm1, %v8175_v51, -inf  ;;  %v8019_v4 = vpop.f32.mrb[74].mxu0  ;;  %v2254_v24 = vpop.f32.mrb[75].mxu1 }
 0x272   : >> { %v10238_v3 = vmax.f32 %v10906_v59, %v5104_v31  ;;  %v8176_v21 = vadd.f32 %v8019_v4, %v7651_v62  ;;  %v4667_v55 = vpop.f32.mrb[75].mxu0 }
 0x273   : >> { %v8177_v47 = vadd.f32 %v4667_v55, %v2254_v24 }
 0x274   : >> { %v5125_v33 = vsel %vm5016_vm1, %v8176_v21, -inf  ;;  %v7654_v14 = vpop.f32.mrb[76].mxu1 }
 0x275   : >> { %v10244_v54 = vmax.f32 %v10907_v39, %v5125_v33  ;;  %v5118_v1 = vsel %vm5016_vm1, %v8177_v47, -inf  ;;  %v8022_v56 = vpop.f32.mrb[76].mxu0  ;;  %v2264_v16 = vpop.f32.mrb[77].mxu1 }
 0x276   : >> { %v10250_v11 = vmax.f32 %v10908_v18, %v5118_v1  ;;  %v8178_v49 = vadd.f32 %v8022_v56, %v7654_v14  ;;  %v4677_v20 = vpop.f32.mrb[77].mxu0  ;;  %v10916_v14 = vld [vmem:[#allocation11_spill] sm:$0xff] }
 0x277   : >> { %v8179_v52 = vadd.f32 %v4677_v20, %v2264_v16  ;;  %v10917_v26 = vmax.f32 %v10075_v29, %v10916_v14 }
 0x278   : >> { %v5139_v38 = vsel %vm5016_vm1, %v8178_v49, -inf  ;;  %v7657_v10 = vpop.f32.mrb[78].mxu1 }
 0x279   : >> { %v10256_v15 = vmax.f32 %v10909_v58, %v5139_v38  ;;  %v5132_v40 = vsel %vm5016_vm1, %v8179_v52, -inf  ;;  %v8025_v61 = vpop.f32.mrb[78].mxu0  ;;  %v2274_v42 = vpop.f32.mrb[79].mxu1 }
 0x27a   : >> { %v10262_v28 = vmax.f32 %v10910_v36, %v5132_v40  ;;  %v8180_v13 = vadd.f32 %v8025_v61, %v7657_v10  ;;  %v4687_v51 = vpop.f32.mrb[79].mxu0  ;;  %v10921_v40 = vld [vmem:[#allocation12_spill] sm:$0xff]  ;;  %v10922_v10 = vld [vmem:[#allocation13_spill] sm:$0xff] }
 0x27b   : >> { %v8181_v46 = vadd.f32 %v4687_v51, %v2274_v42  ;;  %v10923_v29 = vmax.f32 %v10921_v40, %v10922_v10  ;;  %v10939_v40 = vld [vmem:[#allocation20_spill] sm:$0xff]  ;;  %v10940_v10 = vld [vmem:[#allocation21_spill] sm:$0xff] }
 0x27c   : >> { %v5153_v17 = vsel %vm5016_vm1, %v8180_v13, -inf  ;;  %v7660_v62 = vpop.f32.mrb[80].mxu1 }
 0x27d   : >> { %v10268_v45 = vmax.f32 %v10911_v0, %v5153_v17  ;;  %v5146_v31 = vsel %vm5016_vm1, %v8181_v46, -inf  ;;  %v8028_v4 = vpop.f32.mrb[80].mxu0  ;;  %v2284_v21 = vpop.f32.mrb[81].mxu1 }
 0x27e   : >> { %v10274_v48 = vmax.f32 %v10912_v25, %v5146_v31  ;;  %v8182_v59 = vadd.f32 %v8028_v4, %v7660_v62  ;;  %v4697_v24 = vpop.f32.mrb[81].mxu0  ;;  %v10927_v62 = vld [vmem:[#allocation14_spill] sm:$0xff]  ;;  %v10928_v4 = vld [vmem:[#allocation15_spill] sm:$0xff] }
 0x27f   : >> { %v8183_v55 = vadd.f32 %v4697_v24, %v2284_v21  ;;  %v10929_v25 = vmax.f32 %v10927_v62, %v10928_v4 }
 0x280   : >> { %10913 = vst [vmem:[#allocation22_spill] sm:$0xff] %v10274_v48  ;;  %v5167_v47 = vsel %vm5016_vm1, %v8182_v59, -inf  ;;  %v7663_v39 = vpop.f32.mrb[82].mxu1 }
 0x281   : >> { %v10280_v19 = vmax.f32 %v10914_v60, %v5167_v47  ;;  %v5160_v33 = vsel %vm5016_vm1, %v8183_v55, -inf  ;;  %v8031_v1 = vpop.f32.mrb[82].mxu0  ;;  %v2294_v18 = vpop.f32.mrb[83].mxu1 }
 0x282   : >> { %v10286_v9 = vmax.f32 %v10917_v26, %v5160_v33  ;;  %v8184_v56 = vadd.f32 %v8031_v1, %v7663_v39  ;;  %v4707_v49 = vpop.f32.mrb[83].mxu0  ;;  %v10931_v33 = vld [vmem:[#allocation16_spill] sm:$0xff]  ;;  %v10932_v39 = vld [vmem:[#allocation17_spill] sm:$0xff] }
 0x283   : >> { %10915 = vst [vmem:[#allocation23_spill] sm:$0xff] %v10280_v19  ;;  %v8185_v16 = vadd.f32 %v4707_v49, %v2294_v18  ;;  %v10933_v41 = vmax.f32 %v10931_v33, %v10932_v39  ;;  %v10936_v18 = vld [vmem:[#allocation19_spill] sm:$0xff] }
 0x284   : >> { %10918 = vst [vmem:[#allocation24_spill] sm:$0xff] %v10286_v9  ;;  %v5181_v20 = vsel %vm5016_vm1, %v8184_v56, -inf  ;;  %v7666_v38 = vpop.f32.mrb[84].mxu1  ;;  %v10935_v56 = vld [vmem:[#allocation18_spill] sm:$0xff] }
 0x285   : >> { %v10292_v23 = vmax.f32 %v10919_v22, %v5181_v20  ;;  %v5174_v52 = vsel %vm5016_vm1, %v8185_v16, -inf  ;;  %v8034_v58 = vpop.f32.mrb[84].mxu0  ;;  %v2304_v13 = vpop.f32.mrb[85].mxu1  ;;  %v10937_v49 = vmax.f32 %v10935_v56, %v10936_v18 }
 0x286   : >> { %v10298_v61 = vmax.f32 %v10923_v29, %v5174_v52  ;;  %v8186_v36 = vadd.f32 %v8034_v58, %v7666_v38  ;;  %v4717_v42 = vpop.f32.mrb[85].mxu0  ;;  %v10941_v29 = vmax.f32 %v10939_v40, %v10940_v10 }
 0x287   : >> { %10920 = vst [vmem:[#allocation25_spill] sm:$0xff] %v10292_v23  ;;  %v8187_v51 = vadd.f32 %v4717_v42, %v2304_v13 }
 0x288   : >> { %10924 = vst [vmem:[#allocation26_spill] sm:$0xff] %v10298_v61  ;;  %v5195_v46 = vsel %vm5016_vm1, %v8186_v36, -inf  ;;  %v7669_v0 = vpop.f32.mrb[86].mxu1 }
 0x289   : >> { %v10304_v2 = vmax.f32 %v10925_v12, %v5195_v46  ;;  %v5188_v17 = vsel %vm5016_vm1, %v8187_v51, -inf  ;;  %v8037_v31 = vpop.f32.mrb[86].mxu0  ;;  %v2314_v24 = vpop.f32.mrb[87].mxu1  ;;  %v10943_v46 = vmax.f32 %v10147_v5, %v10152_v44 }
 0x28a   : >> { %v10310_v59 = vmax.f32 %v10929_v25, %v5188_v17  ;;  %v8188_v21 = vadd.f32 %v8037_v31, %v7669_v0  ;;  %v4727_v55 = vpop.f32.mrb[87].mxu0 }
 0x28b   : >> { %10926 = vst [vmem:[#allocation27_spill] sm:$0xff] %v10304_v2  ;;  %v8189_v47 = vadd.f32 %v4727_v55, %v2314_v24 }
 0x28c   : >> { %10930 = vst [vmem:[#allocation28_spill] sm:$0xff] %v10310_v59  ;;  %v5209_v60 = vsel %vm5016_vm1, %v8188_v21, -inf  ;;  %v7672_v14 = vpop.f32.mrb[88].mxu1 }
 0x28d   : >> { %v10316_v8 = vmax.f32 %v10933_v41, %v5209_v60  ;;  %v5202_v1 = vsel %vm5016_vm1, %v8189_v47, -inf  ;;  %v8040_v26 = vpop.f32.mrb[88].mxu0  ;;  %v2324_v22 = vpop.f32.mrb[89].mxu1 }
 0x28e   : >> { %v10322_v16 = vmax.f32 %v10937_v49, %v5202_v1  ;;  %v8190_v20 = vadd.f32 %v8040_v26, %v7672_v14  ;;  %v4737_v52 = vpop.f32.mrb[89].mxu0 }
 0x28f   : >> { %10934 = vst [vmem:[#allocation29_spill] sm:$0xff] %v10316_v8  ;;  %v8191_v38 = vadd.f32 %v4737_v52, %v2324_v22 }
 0x290   : >> { %10938 = vst [vmem:[#allocation30_spill] sm:$0xff] %v10322_v16  ;;  %v5223_v58 = vsel %vm5016_vm1, %v8190_v20, -inf  ;;  %v7675_v42 = vpop.f32.mrb[90].mxu1 }
 0x291   : >> { %v10328_v36 = vmax.f32 %v10941_v29, %v5223_v58  ;;  %v5216_v13 = vsel %vm5016_vm1, %v8191_v38, -inf  ;;  %v8043_v51 = vpop.f32.mrb[90].mxu0  ;;  %v2334_v0 = vpop.f32.mrb[91].mxu1 }
 0x292   : >> { %v10334_v12 = vmax.f32 %v10943_v46, %v5216_v13  ;;  %v8192_v17 = vadd.f32 %v8043_v51, %v7675_v42  ;;  %v4747_v31 = vpop.f32.mrb[91].mxu0 }
 0x293   : >> { %10942 = vst [vmem:[#allocation31_spill] sm:$0xff] %v10328_v36  ;;  %v8193_v62 = vadd.f32 %v4747_v31, %v2334_v0 }
 0x294   : >> { %10944 = vst [vmem:[#allocation32_spill] sm:$0xff] %v10334_v12  ;;  %v5029_v4 = vsel %vm5016_vm1, %v8192_v17, -inf  ;;  %v7678_v24 = vpop.f32.mrb[92].mxu1 }
 0x295   : >> { %v5030_v25 = vmax.f32 %v10160_v32, %v5029_v4  ;;  %v5022_v21 = vsel %vm5016_vm1, %v8193_v62, -inf  ;;  %v8046_v55 = vpop.f32.mrb[92].mxu0  ;;  %v2344_v33 = vpop.f32.mrb[93].mxu1 }
 0x296   : >> { %v5023_v47 = vmax.f32 %v10166_v57, %v5022_v21  ;;  %v8194_v60 = vadd.f32 %v8046_v55, %v7678_v24  ;;  %v4757_v44 = vpop.f32.mrb[93].mxu0 }
 0x297   : >> { %v5258_v5 = vcombine.high %v5030_v25, %v5030_v25  ;;  %v5332_v39 = vsel %vm5317_vm2, %v5030_v25, -inf  ;;  %v8195_v41 = vadd.f32 %v4757_v44, %v2344_v33 }
 0x298   : >> { %v5333_v1 = vrot.slane %v5332_v39, 4  ;;  %v5257_v14 = vcombine.high %v5023_v47, %v5023_v47  ;;  %v5318_v26 = vsel %vm5317_vm2, %v5023_v47, -inf  ;;  %v5043_v56 = vsel %vm5016_vm1, %v8194_v60, -inf  ;;  %v10346_v20 = vpop.f32.mrb[94].mxu1 }
 0x299   : >> { %v5339_v32 = vsel %vm5317_vm2, %v5258_v5, -inf  ;;  %v5319_v18 = vrot.slane %v5318_v26, 4  ;;  %v5044_v49 = vmax.f32 %v10172_v53, %v5043_v56  ;;  %v5036_v57 = vsel %vm5016_vm1, %v8195_v41, -inf  ;;  %v10348_v22 = vpop.f32.mrb[94].mxu0  ;;  %v10352_v10 = vpop.f32.mrb[95].mxu1 }
 0x29a   : >> { %v5334_v52 = vmax.f32 %v5332_v39, %v5333_v1  ;;  %v5340_v38 = vrot.slane %v5339_v32, 4  ;;  %v5325_v58 = vsel %vm5317_vm2, %v5257_v14, -inf  ;;  %v5037_v40 = vmax.f32 %v10178_v35, %v5036_v57  ;;  %v10354_v29 = vpop.f32.mrb[95].mxu0 }
 0x29b   : >> { %v5320_v13 = vmax.f32 %v5318_v26, %v5319_v18  ;;  %v5326_v42 = vrot.slane %v5325_v58, 4  ;;  %v5260_v51 = vcombine.high %v5044_v49, %v5044_v49  ;;  %v5360_v53 = vsel %vm5317_vm2, %v5044_v49, -inf }
 0x29c   : >> { %v5335_v46 = vrot.slane %v5334_v52, 2  ;;  %v5341_v17 = vmax.f32 %v5339_v32, %v5340_v38  ;;  %v5361_v0 = vrot.slane %v5360_v53, 4  ;;  %v5259_v31 = vcombine.high %v5037_v40, %v5037_v40  ;;  %v10359_v35 = vpop.f32.mrb[96].mxu1 }
 0x29d   : >> { %v5321_v62 = vrot.slane %v5320_v13, 2  ;;  %v5327_v4 = vmax.f32 %v5325_v58, %v5326_v42  ;;  %v5367_v25 = vsel %vm5317_vm2, %v5260_v51, -inf  ;;  %v5346_v21 = vsel %vm5317_vm2, %v5037_v40, -inf  ;;  %v10361_v24 = vpop.f32.mrb[96].mxu0  ;;  %v10363_v44 = vpop.f32.mrb[97].mxu1 }
 0x29e   : >> { %v5336_v55 = vmax.f32 %v5334_v52, %v5335_v46  ;;  %v5342_v47 = vrot.slane %v5341_v17, 2  ;;  %v5362_v60 = vmax.f32 %v5360_v53, %v5361_v0  ;;  %v5368_v33 = vrot.slane %v5367_v25, 4  ;;  %v10365_v5 = vpop.f32.mrb[97].mxu0 }
 0x29f   : >> { %v5322_v39 = vmax.f32 %v5320_v13, %v5321_v62  ;;  %v5328_v41 = vrot.slane %v5327_v4, 2  ;;  %v5347_v1 = vrot.slane %v5346_v21, 4  ;;  %v5353_v14 = vsel %vm5317_vm2, %v5259_v31, -inf }
 0x2a0   : >> { %v5337_v26 = vrot.slane %v5336_v55, 1  ;;  %v5343_v56 = vmax.f32 %v5341_v17, %v5342_v47  ;;  %v5363_v32 = vrot.slane %v5362_v60, 2  ;;  %v5369_v18 = vmax.f32 %v5367_v25, %v5368_v33  ;;  %v10368_v58 = vpop.f32.mrb[98].mxu1 }
 0x2a1   : >> { %v5323_v49 = vrot.slane %v5322_v39, 1  ;;  %v5329_v57 = vmax.f32 %v5327_v4, %v5328_v41  ;;  %v5348_v38 = vmax.f32 %v5346_v21, %v5347_v1  ;;  %v5354_v52 = vrot.slane %v5353_v14, 4  ;;  %v10370_v40 = vpop.f32.mrb[98].mxu0  ;;  %v10372_v46 = vpop.f32.mrb[99].mxu1  ;;  %v10945_v21 = vld [vmem:[#allocation10_spill] sm:$0xff] }
 0x2a2   : >> { %v5338_v42 = vmax.f32 %v5336_v55, %v5337_v26  ;;  %v5344_v51 = vrot.slane %v5343_v56, 1  ;;  %v5364_v13 = vmax.f32 %v5362_v60, %v5363_v32  ;;  %v5370_v53 = vrot.slane %v5369_v18, 2  ;;  %v10374_v0 = vpop.f32.mrb[99].mxu0 }
 0x2a3   : >> { %v5324_v17 = vmax.f32 %v5322_v39, %v5323_v49  ;;  %v5330_v31 = vrot.slane %v5329_v57, 1  ;;  %v5349_v62 = vrot.slane %v5348_v38, 2  ;;  %v5355_v4 = vmax.f32 %v5353_v14, %v5354_v52 }
 0x2a4   : >> { %v5345_v25 = vmax.f32 %v5343_v56, %v5344_v51  ;;  %v5746_v47 = vadd.f32 %v10945_v21, %v5338_v42  ;;  %v5365_v33 = vrot.slane %v5364_v13, 1  ;;  %v5371_v41 = vmax.f32 %v5369_v18, %v5370_v53  ;;  %v10378_v32 = vpop.f32.mrb[100].mxu1 }
 0x2a5   : >> { %v5331_v55 = vmax.f32 %v5329_v57, %v5330_v31  ;;  %v5744_v1 = vadd.f32 %v10945_v21, %v5324_v17  ;;  %v5350_v60 = vmax.f32 %v5348_v38, %v5349_v62  ;;  %v5356_v26 = vrot.slane %v5355_v4, 2  ;;  %v10380_v12 = vpop.f32.mrb[100].mxu0  ;;  %v10383_v56 = vpop.f32.mrb[101].mxu1 }
 0x2a6   : >> { %v5747_v39 = vadd.f32 %v10945_v21, %v5345_v25  ;;  %v5806_v49 = vmax.f32 %v5746_v47, 0.0  ;;  %v5366_v36 = vmax.f32 %v5364_v13, %v5365_v33  ;;  %v5372_v14 = vrot.slane %v5371_v41, 1  ;;  %v10385_v52 = vpop.f32.mrb[101].mxu0 }
 0x2a7   : >> { %v5745_v18 = vadd.f32 %v10945_v21, %v5331_v55  ;;  %v5804_v57 = vmax.f32 %v5744_v1, 0.0  ;;  %v5351_v42 = vrot.slane %v5350_v60, 1  ;;  %v5357_v38 = vmax.f32 %v5355_v4, %v5356_v26 }
 0x2a8   : >> { %v5807_v51 = vmax.f32 %v5747_v39, 0.0  ;;  %v5927_v53 = vrot.slane %v5806_v49, 6  ;;  %v5373_v17 = vmax.f32 %v5371_v41, %v5372_v14  ;;  %v5750_v31 = vadd.f32 %v10945_v21, %v5366_v36  ;;  %v10391_v33 = vpop.f32.mrb[102].mxu1 }
 0x2a9   : >> { %v5805_v62 = vmax.f32 %v5745_v18, 0.0  ;;  %v5352_v25 = vmax.f32 %v5350_v60, %v5351_v42  ;;  %v5358_v13 = vrot.slane %v5357_v38, 1  ;;  %v8196_v47 = vadd.f32 %v10348_v22, %v10346_v20  ;;  %v10393_v16 = vpop.f32.mrb[102].mxu0  ;;  %v10398_v41 = vpop.f32.mrb[103].mxu1 }
 0x2aa   : >> { %v5930_v55 = vrot.slane %v5807_v51, 5  ;;  %v5751_v4 = vadd.f32 %v10945_v21, %v5373_v17  ;;  %v5810_v1 = vmax.f32 %v5750_v31, 0.0  ;;  %v8197_v36 = vadd.f32 %v10354_v29, %v10352_v10  ;;  %v10400_v60 = vpop.f32.mrb[103].mxu0 }
 0x2ab   : >> { %v5924_v26 = vrot.slane %v5805_v62, 7  ;;  %v5359_v39 = vmax.f32 %v5357_v38, %v5358_v13  ;;  %v5748_v20 = vadd.f32 %v10945_v21, %v5352_v25  ;;  %v5057_v22 = vsel %vm5016_vm1, %v8196_v47, -inf }
 0x2ac   : >> { %v5811_v49 = vmax.f32 %v5751_v4, 0.0  ;;  %v5939_v14 = vrot.slane %v5810_v1, 2  ;;  %v5058_v18 = vmax.f32 %v10184_v37, %v5057_v22  ;;  %v5050_v42 = vsel %vm5016_vm1, %v8197_v36, -inf  ;;  %v10409_v31 = vpop.f32.mrb[104].mxu1 }
 0x2ad   : >> { %v5926_v51 = vsel %vm5925_vm3, %v5924_v26, %v5804_v57  ;;  %v5749_v10 = vadd.f32 %v10945_v21, %v5359_v39  ;;  %v5808_v29 = vmax.f32 %v5748_v20, 0.0  ;;  %v5051_v17 = vmax.f32 %v10190_v63, %v5050_v42  ;;  %v10411_v38 = vpop.f32.mrb[104].mxu0  ;;  %v10415_v47 = vpop.f32.mrb[105].mxu1 }
 0x2ae   : >> { %v5929_v62 = vsel %vm5928_vm4, %v5927_v53, %v5926_v51  ;;  %v5942_v25 = vrot.slane %v5811_v49, 1  ;;  %v5262_v13 = vcombine.high %v5058_v18, %v5058_v18  ;;  %v5388_v37 = vsel %vm5317_vm2, %v5058_v18, -inf  ;;  %v10417_v4 = vpop.f32.mrb[105].mxu0 }
 0x2af   : >> { %v5809_v57 = vmax.f32 %v5749_v10, 0.0  ;;  %v5932_v1 = vsel %vm5931_vm5, %v5930_v55, %v5929_v62  ;;  %v5933_v36 = vrot.slane %v5808_v29, 4  ;;  %v5389_v26 = vrot.slane %v5388_v37, 4 }
 0x2b0   : >> { %v5395_v63 = vsel %vm5317_vm2, %v5262_v13, -inf  ;;  %v5261_v39 = vcombine.high %v5051_v17, %v5051_v17  ;;  %v5374_v53 = vsel %vm5317_vm2, %v5051_v17, -inf  ;;  %v8198_v20 = vadd.f32 %v10361_v24, %v10359_v35  ;;  %v10426_v51 = vpop.f32.mrb[106].mxu1 }
 0x2b1   : >> { %v5935_v22 = vsel %vm5934_vm6, %v5933_v36, %v5932_v1  ;;  %v5936_v49 = vrot.slane %v5809_v57, 3  ;;  %v5390_v18 = vmax.f32 %v5388_v37, %v5389_v26  ;;  %v5396_v42 = vrot.slane %v5395_v63, 4  ;;  %v10428_v55 = vpop.f32.mrb[106].mxu0  ;;  %v10434_v13 = vpop.f32.mrb[107].mxu1 }
 0x2b2   : >> { %v5375_v10 = vrot.slane %v5374_v53, 4  ;;  %v5381_v29 = vsel %vm5317_vm2, %v5261_v39, -inf  ;;  %v5071_v62 = vsel %vm5016_vm1, %v8198_v20, -inf  ;;  %v8199_v17 = vadd.f32 %v10365_v5, %v10363_v44  ;;  %v10436_v35 = vpop.f32.mrb[107].mxu0 }
 0x2b3   : >> { %v5938_v24 = vsel %vm5937_vm7, %v5936_v49, %v5935_v22  ;;  %v5391_v37 = vrot.slane %v5390_v18, 2  ;;  %v5397_v57 = vmax.f32 %v5395_v63, %v5396_v42  ;;  %v5382_v1 = vrot.slane %v5381_v29, 4 }
 0x2b4   : >> { %v5941_v36 = vsel %vm5940_vm8, %v5939_v14, %v5938_v24  ;;  %v5376_v26 = vmax.f32 %v5374_v53, %v5375_v10  ;;  %v5072_v39 = vmax.f32 %v10196_v27, %v5071_v62  ;;  %v5064_v20 = vsel %vm5016_vm1, %v8199_v17, -inf  ;;  %v10446_v2 = vpop.f32.mrb[108].mxu1 }
 0x2b5   : >> { %v5944_v44 = vsel %vm5943_vm9, %v5942_v25, %v5941_v36  ;;  %v5392_v5 = vmax.f32 %v5390_v18, %v5391_v37  ;;  %v5398_v8 = vrot.slane %v5397_v57, 2  ;;  %v5383_v59 = vmax.f32 %v5381_v29, %v5382_v1  ;;  %v10448_v22 = vpop.f32.mrb[108].mxu0  ;;  %v10454_v27 = vpop.f32.mrb[109].mxu1 }
 0x2b6   : >> { %6045 = vst.msk [vmem:[%s10440_s18] sm:$0xff] %vm5016_vm1, %v5944_v44  ;;  %v5377_v63 = vrot.slane %v5376_v26, 2  ;;  %v5264_v49 = vcombine.high %v5072_v39, %v5072_v39  ;;  %v5416_v14 = vsel %vm5317_vm2, %v5072_v39, -inf  ;;  %v5065_v53 = vmax.f32 %v10202_v50, %v5064_v20  ;;  %v10456_v42 = vpop.f32.mrb[109].mxu0 }
 0x2b7   : >> { %v5393_v25 = vrot.slane %v5392_v5, 1  ;;  %v5399_v18 = vmax.f32 %v5397_v57, %v5398_v8  ;;  %v5384_v10 = vrot.slane %v5383_v59, 2  ;;  %v5417_v29 = vrot.slane %v5416_v14, 4 }
 0x2b8   : >> { %v5378_v62 = vmax.f32 %v5376_v26, %v5377_v63  ;;  %v5423_v17 = vsel %vm5317_vm2, %v5264_v49, -inf  ;;  %v5263_v24 = vcombine.high %v5065_v53, %v5065_v53  ;;  %v5402_v37 = vsel %vm5317_vm2, %v5065_v53, -inf  ;;  %v10460_v61 = vpop.f32.mrb[110].mxu1 }
 0x2b9   : >> { %v5394_v1 = vmax.f32 %v5392_v5, %v5393_v25  ;;  %v5400_v36 = vrot.slane %v5399_v18, 1  ;;  %v5385_v44 = vmax.f32 %v5383_v59, %v5384_v10  ;;  %v5418_v39 = vmax.f32 %v5416_v14, %v5417_v29  ;;  %10946 = vst [vmem:[#allocation33_spill] sm:$0xff] %v10460_v61  ;;  %v10462_v50 = vpop.f32.mrb[110].mxu0  ;;  %v10465_v57 = vpop.f32.mrb[111].mxu1 }
 0x2ba   : >> { %10947 = vst [vmem:[#allocation34_spill] sm:$0xff] %v10462_v50  ;;  %v5379_v20 = vrot.slane %v5378_v62, 1  ;;  %v5424_v23 = vrot.slane %v5423_v17, 4  ;;  %v5403_v9 = vrot.slane %v5402_v37, 4  ;;  %v5409_v8 = vsel %vm5317_vm2, %v5263_v24, -inf  ;;  %10948 = vst [vmem:[#allocation35_spill] sm:$0xff] %v10465_v57 }
 0x2bb   : >> { %v10467_v26 = vpop.f32.mrb[111].mxu0  ;;  %v5401_v63 = vmax.f32 %v5399_v18, %v5400_v36  ;;  %v5754_v49 = vadd.f32 %v10945_v21, %v5394_v1  ;;  %v5386_v5 = vrot.slane %v5385_v44, 1  ;;  %v5419_v53 = vrot.slane %v5418_v39, 2 }
 0x2bc   : >> { %10949 = vst [vmem:[#allocation36_spill] sm:$0xff] %v10467_v26  ;;  %v5380_v59 = vmax.f32 %v5378_v62, %v5379_v20  ;;  %v5425_v14 = vmax.f32 %v5423_v17, %v5424_v23  ;;  %v5404_v25 = vmax.f32 %v5402_v37, %v5403_v9  ;;  %v5410_v10 = vrot.slane %v5409_v8, 4  ;;  %v10471_v48 = vpop.f32.mrb[112].mxu1 }
 0x2bd   : >> { %v5755_v29 = vadd.f32 %v10945_v21, %v5401_v63  ;;  %v5814_v19 = vmax.f32 %v5754_v49, 0.0  ;;  %v5387_v50 = vmax.f32 %v5385_v44, %v5386_v5  ;;  %v5420_v61 = vmax.f32 %v5418_v39, %v5419_v53  ;;  %v10473_v24 = vpop.f32.mrb[112].mxu0  ;;  %v10476_v57 = vpop.f32.mrb[113].mxu1 }
 0x2be   : >> { %v5752_v26 = vadd.f32 %v10945_v21, %v5380_v59  ;;  %v5426_v18 = vrot.slane %v5425_v14, 2  ;;  %v5405_v36 = vrot.slane %v5404_v25, 2  ;;  %v5411_v1 = vmax.f32 %v5409_v8, %v5410_v10  ;;  %v10478_v62 = vpop.f32.mrb[113].mxu0 }
 0x2bf   : >> { %10950 = vst [vmem:[#allocation37_spill] sm:$0xff] %v10478_v62  ;;  %v5815_v9 = vmax.f32 %v5755_v29, 0.0  ;;  %v5947_v23 = vrot.slane %v5814_v19, 6  ;;  %v5753_v17 = vadd.f32 %v10945_v21, %v5387_v50  ;;  %v5421_v37 = vrot.slane %v5420_v61, 1 }
 0x2c0   : >> { %v5812_v44 = vmax.f32 %v5752_v26, 0.0  ;;  %v5427_v39 = vmax.f32 %v5425_v14, %v5426_v18  ;;  %v5406_v20 = vmax.f32 %v5404_v25, %v5405_v36  ;;  %v5412_v63 = vrot.slane %v5411_v1, 2  ;;  %v10483_v8 = vpop.f32.mrb[114].mxu1 }
 0x2c1   : >> { %v5949_v49 = vrot.slane %v5815_v9, 5  ;;  %v5813_v5 = vmax.f32 %v5753_v17, 0.0  ;;  %v5422_v53 = vmax.f32 %v5420_v61, %v5421_v37  ;;  %v8200_v59 = vadd.f32 %v10370_v40, %v10368_v58  ;;  %v10485_v10 = vpop.f32.mrb[114].mxu0  ;;  %v10489_v26 = vpop.f32.mrb[115].mxu1 }
 0x2c2   : >> { %v5428_v62 = vrot.slane %v5427_v39, 1  ;;  %v5407_v29 = vrot.slane %v5406_v20, 1  ;;  %v5413_v19 = vmax.f32 %v5411_v1, %v5412_v63  ;;  %v8201_v50 = vadd.f32 %v10374_v0, %v10372_v46  ;;  %v10491_v14 = vpop.f32.mrb[115].mxu0 }
 0x2c3   : >> { %v5945_v25 = vrot.slane %v5813_v5, 7  ;;  %v5758_v61 = vadd.f32 %v10945_v21, %v5422_v53  ;;  %v5085_v18 = vsel %vm5016_vm1, %v8200_v59, -inf  ;;  %v8202_v58 = vadd.f32 %v10380_v12, %v10378_v32 }
 0x2c4   : >> { %v5429_v40 = vmax.f32 %v5427_v39, %v5428_v62  ;;  %v5408_v36 = vmax.f32 %v5406_v20, %v5407_v29  ;;  %v5414_v9 = vrot.slane %v5413_v19, 1  ;;  %v5086_v1 = vmax.f32 %v10208_v7, %v5085_v18  ;;  %v10501_v63 = vpop.f32.mrb[116].mxu1 }
 0x2c5   : >> { %v5946_v17 = vsel %vm5925_vm3, %v5945_v25, %v5812_v44  ;;  %v5818_v46 = vmax.f32 %v5758_v61, 0.0  ;;  %v5078_v0 = vsel %vm5016_vm1, %v8201_v50, -inf  ;;  %v5099_v37 = vsel %vm5016_vm1, %v8202_v58, -inf  ;;  %v10503_v5 = vpop.f32.mrb[116].mxu0  ;;  %v10508_v39 = vpop.f32.mrb[117].mxu1 }
 0x2c6   : >> { %v5948_v53 = vsel %vm5928_vm4, %v5947_v23, %v5946_v17  ;;  %v5759_v12 = vadd.f32 %v10945_v21, %v5429_v40  ;;  %v5415_v32 = vmax.f32 %v5413_v19, %v5414_v9  ;;  %v5756_v62 = vadd.f32 %v10945_v21, %v5408_v36  ;;  %v10510_v7 = vpop.f32.mrb[117].mxu0 }
 0x2c7   : >> { %v5955_v44 = vrot.slane %v5818_v46, 2  ;;  %v5950_v20 = vsel %vm5931_vm5, %v5949_v49, %v5948_v53  ;;  %v5266_v59 = vcombine.high %v5086_v1, %v5086_v1  ;;  %v5444_v29 = vsel %vm5317_vm2, %v5086_v1, -inf }
 0x2c8   : >> { %v5819_v50 = vmax.f32 %v5759_v12, 0.0  ;;  %v5757_v25 = vadd.f32 %v10945_v21, %v5415_v32  ;;  %v5816_v61 = vmax.f32 %v5756_v62, 0.0  ;;  %v5445_v23 = vrot.slane %v5444_v29, 4  ;;  %v10520_v36 = vpop.f32.mrb[118].mxu1 }
 0x2c9   : >> { %v5451_v18 = vsel %vm5317_vm2, %v5266_v59, -inf  ;;  %v5079_v19 = vmax.f32 %v10214_v43, %v5078_v0  ;;  %v5100_v58 = vmax.f32 %v10220_v6, %v5099_v37  ;;  %v8203_v40 = vadd.f32 %v10385_v52, %v10383_v56  ;;  %10951 = vst [vmem:[#allocation38_spill] sm:$0xff] %v10520_v36  ;;  %v10522_v49 = vpop.f32.mrb[118].mxu0  ;;  %v10524_v53 = vpop.f32.mrb[119].mxu1 }
 0x2ca   : >> { %10952 = vst [vmem:[#allocation39_spill] sm:$0xff] %v10522_v49  ;;  %v5957_v9 = vrot.slane %v5819_v50, 1  ;;  %v5817_v1 = vmax.f32 %v5757_v25, 0.0  ;;  %v5951_v17 = vrot.slane %v5816_v61, 4  ;;  %v5446_v46 = vmax.f32 %v5444_v29, %v5445_v23  ;;  %10953 = vst [vmem:[#allocation40_spill] sm:$0xff] %v10524_v53  ;;  %v10526_v12 = vpop.f32.mrb[119].mxu0 }
 0x2cb   : >> { %10954 = vst [vmem:[#allocation41_spill] sm:$0xff] %v10526_v12  ;;  %v5452_v32 = vrot.slane %v5451_v18, 4  ;;  %v5265_v62 = vcombine.high %v5079_v19, %v5079_v19  ;;  %v5430_v43 = vsel %vm5317_vm2, %v5079_v19, -inf  ;;  %v5268_v6 = vcombine.high %v5100_v58, %v5100_v58 }
 0x2cc   : >> { %v5952_v0 = vsel %vm5934_vm6, %v5951_v17, %v5950_v20  ;;  %v5953_v56 = vrot.slane %v5817_v1, 3  ;;  %v5447_v52 = vrot.slane %v5446_v46, 2  ;;  %v5431_v37 = vrot.slane %v5430_v43, 4 }
 0x2cd   : >> { %v5453_v59 = vmax.f32 %v5451_v18, %v5452_v32  ;;  %v5437_v50 = vsel %vm5317_vm2, %v5265_v62, -inf  ;;  %v5472_v29 = vsel %vm5317_vm2, %v5100_v58, -inf  ;;  %v5479_v25 = vsel %vm5317_vm2, %v5268_v6, -inf }
 0x2ce   : >> { %v5954_v61 = vsel %vm5937_vm7, %v5953_v56, %v5952_v0  ;;  %v5448_v23 = vmax.f32 %v5446_v46, %v5447_v52  ;;  %v5432_v12 = vmax.f32 %v5430_v43, %v5431_v37  ;;  %v5438_v53 = vrot.slane %v5437_v50, 4 }
 0x2cf   : >> { %v5956_v19 = vsel %vm5940_vm8, %v5955_v44, %v5954_v61  ;;  %v5454_v49 = vrot.slane %v5453_v59, 2  ;;  %v5473_v20 = vrot.slane %v5472_v29, 4  ;;  %v5480_v1 = vrot.slane %v5479_v25, 4 }
 0x2d0   : >> { %v5958_v17 = vsel %vm5943_vm9, %v5957_v9, %v5956_v19  ;;  %v5449_v18 = vrot.slane %v5448_v23, 1  ;;  %v5433_v32 = vrot.slane %v5432_v12, 2  ;;  %v5439_v36 = vmax.f32 %v5437_v50, %v5438_v53 }
 0x2d1   : >> { %6046 = vst.msk [vmem:[%s10440_s18 + $0x8] sm:$0xff] %vm5016_vm1, %v5958_v17  ;;  %v5455_v58 = vmax.f32 %v5453_v59, %v5454_v49  ;;  %v5474_v62 = vmax.f32 %v5472_v29, %v5473_v20  ;;  %v5481_v6 = vmax.f32 %v5479_v25, %v5480_v1  ;;  %v5092_v0 = vsel %vm5016_vm1, %v8203_v40, -inf }
 0x2d2   : >> { %v5450_v46 = vmax.f32 %v5448_v23, %v5449_v18  ;;  %v5434_v43 = vmax.f32 %v5432_v12, %v5433_v32  ;;  %v5440_v56 = vrot.slane %v5439_v36, 2  ;;  %v5093_v44 = vmax.f32 %v10226_v30, %v5092_v0 }
 0x2d3   : >> { %v5456_v52 = vrot.slane %v5455_v58, 1  ;;  %v5475_v37 = vrot.slane %v5474_v62, 2  ;;  %v5482_v61 = vrot.slane %v5481_v6, 2  ;;  %v8204_v9 = vadd.f32 %v10393_v16, %v10391_v33 }
 0x2d4   : >> { %v5762_v53 = vadd.f32 %v10945_v21, %v5450_v46  ;;  %v5435_v50 = vrot.slane %v5434_v43, 1  ;;  %v5441_v19 = vmax.f32 %v5439_v36, %v5440_v56  ;;  %v5267_v49 = vcombine.high %v5093_v44, %v5093_v44 }
 0x2d5   : >> { %v5457_v59 = vmax.f32 %v5455_v58, %v5456_v52  ;;  %v5476_v29 = vmax.f32 %v5474_v62, %v5475_v37  ;;  %v5483_v25 = vmax.f32 %v5481_v6, %v5482_v61  ;;  %v5458_v40 = vsel %vm5317_vm2, %v5093_v44, -inf }
 0x2d6   : >> { %v5822_v12 = vmax.f32 %v5762_v53, 0.0  ;;  %v5436_v23 = vmax.f32 %v5434_v43, %v5435_v50  ;;  %v5442_v20 = vrot.slane %v5441_v19, 1  ;;  %v5459_v30 = vrot.slane %v5458_v40, 4 }
 0x2d7   : >> { %v5763_v1 = vadd.f32 %v10945_v21, %v5457_v59  ;;  %v5477_v17 = vrot.slane %v5476_v29, 1  ;;  %v5484_v18 = vrot.slane %v5483_v25, 1  ;;  %v5465_v16 = vsel %vm5317_vm2, %v5267_v49, -inf }
 0x2d8   : >> { %v5961_v33 = vrot.slane %v5822_v12, 6  ;;  %v5443_v32 = vmax.f32 %v5441_v19, %v5442_v20  ;;  %v5760_v36 = vadd.f32 %v10945_v21, %v5436_v23  ;;  %v5460_v0 = vmax.f32 %v5458_v40, %v5459_v30 }
 0x2d9   : >> { %v5823_v58 = vmax.f32 %v5763_v1, 0.0  ;;  %v5478_v62 = vmax.f32 %v5476_v29, %v5477_v17  ;;  %v5485_v6 = vmax.f32 %v5483_v25, %v5484_v18  ;;  %v5466_v46 = vrot.slane %v5465_v16, 4 }
 0x2da   : >> { %v5761_v56 = vadd.f32 %v10945_v21, %v5443_v32  ;;  %v5820_v43 = vmax.f32 %v5760_v36, 0.0  ;;  %v5461_v44 = vrot.slane %v5460_v0, 2  ;;  %v5113_v52 = vsel %vm5016_vm1, %v8204_v9, -inf }
 0x2db   : >> { %v5963_v37 = vrot.slane %v5823_v58, 5  ;;  %v5766_v61 = vadd.f32 %v10945_v21, %v5478_v62  ;;  %v5767_v53 = vadd.f32 %v10945_v21, %v5485_v6  ;;  %v5467_v50 = vmax.f32 %v5465_v16, %v5466_v46 }
 0x2dc   : >> { %v5821_v19 = vmax.f32 %v5761_v56, 0.0  ;;  %v5462_v49 = vmax.f32 %v5460_v0, %v5461_v44  ;;  %v5114_v59 = vmax.f32 %v10232_v34, %v5113_v52  ;;  %v8205_v29 = vadd.f32 %v10400_v60, %v10398_v41 }
 0x2dd   : >> { %v5826_v25 = vmax.f32 %v5766_v61, 0.0  ;;  %v5827_v40 = vmax.f32 %v5767_v53, 0.0  ;;  %v5468_v12 = vrot.slane %v5467_v50, 2  ;;  %v8206_v23 = vadd.f32 %v10411_v38, %v10409_v31 }
 0x2de   : >> { %v5959_v9 = vrot.slane %v5821_v19, 7  ;;  %v5463_v20 = vrot.slane %v5462_v49, 1  ;;  %v5270_v30 = vcombine.high %v5114_v59, %v5114_v59  ;;  %v5500_v1 = vsel %vm5317_vm2, %v5114_v59, -inf }
 0x2df   : >> { %v5969_v17 = vrot.slane %v5826_v25, 2  ;;  %v5971_v18 = vrot.slane %v5827_v40, 1  ;;  %v5469_v16 = vmax.f32 %v5467_v50, %v5468_v12  ;;  %v5501_v32 = vrot.slane %v5500_v1, 4 }
 0x2e0   : >> { %v5960_v34 = vsel %vm5925_vm3, %v5959_v9, %v5820_v43  ;;  %v5464_v36 = vmax.f32 %v5462_v49, %v5463_v20  ;;  %v5507_v41 = vsel %vm5317_vm2, %v5270_v30, -inf  ;;  %v5106_v60 = vsel %vm5016_vm1, %v8205_v29, -inf }
 0x2e1   : >> { %v5962_v0 = vsel %vm5928_vm4, %v5961_v33, %v5960_v34  ;;  %v5470_v58 = vrot.slane %v5469_v16, 1  ;;  %v5502_v31 = vmax.f32 %v5500_v1, %v5501_v32  ;;  %v5508_v38 = vrot.slane %v5507_v41, 4 }
 0x2e2   : >> { %v5764_v62 = vadd.f32 %v10945_v21, %v5464_v36  ;;  %v5964_v6 = vsel %vm5931_vm5, %v5963_v37, %v5962_v0  ;;  %v5107_v46 = vmax.f32 %v10238_v3, %v5106_v60  ;;  %v5127_v56 = vsel %vm5016_vm1, %v8206_v23, -inf }
 0x2e3   : >> { %v5471_v44 = vmax.f32 %v5469_v16, %v5470_v58  ;;  %v5503_v43 = vrot.slane %v5502_v31, 2  ;;  %v5509_v52 = vmax.f32 %v5507_v41, %v5508_v38  ;;  %v5128_v61 = vmax.f32 %v10244_v54, %v5127_v56 }
 0x2e4   : >> { %v5824_v53 = vmax.f32 %v5764_v62, 0.0  ;;  %v5269_v50 = vcombine.high %v5107_v46, %v5107_v46  ;;  %v5486_v33 = vsel %vm5317_vm2, %v5107_v46, -inf  ;;  %v8207_v19 = vadd.f32 %v10417_v4, %v10415_v47 }
 0x2e5   : >> { %v5765_v49 = vadd.f32 %v10945_v21, %v5471_v44  ;;  %v5504_v59 = vmax.f32 %v5502_v31, %v5503_v43  ;;  %v5510_v37 = vrot.slane %v5509_v52, 2  ;;  %v5487_v29 = vrot.slane %v5486_v33, 4 }
 0x2e6   : >> { %v5965_v3 = vrot.slane %v5824_v53, 4  ;;  %v5493_v25 = vsel %vm5317_vm2, %v5269_v50, -inf  ;;  %v5272_v40 = vcombine.high %v5128_v61, %v5128_v61  ;;  %v5528_v12 = vsel %vm5317_vm2, %v5128_v61, -inf }
 0x2e7   : >> { %v5825_v23 = vmax.f32 %v5765_v49, 0.0  ;;  %v5505_v54 = vrot.slane %v5504_v59, 1  ;;  %v5511_v9 = vmax.f32 %v5509_v52, %v5510_v37  ;;  %v5488_v20 = vmax.f32 %v5486_v33, %v5487_v29 }
 0x2e8   : >> { %v5966_v30 = vsel %vm5934_vm6, %v5965_v3, %v5964_v6  ;;  %v5494_v1 = vrot.slane %v5493_v25, 4  ;;  %v5529_v16 = vrot.slane %v5528_v12, 4  ;;  %v5535_v47 = vsel %vm5317_vm2, %v5272_v40, -inf }
 0x2e9   : >> { %v5967_v4 = vrot.slane %v5825_v23, 3  ;;  %v5506_v32 = vmax.f32 %v5504_v59, %v5505_v54  ;;  %v5512_v34 = vrot.slane %v5511_v9, 1  ;;  %v5489_v36 = vrot.slane %v5488_v20, 2 }
 0x2ea   : >> { %v5495_v41 = vmax.f32 %v5493_v25, %v5494_v1  ;;  %v5530_v60 = vmax.f32 %v5528_v12, %v5529_v16  ;;  %v5536_v0 = vrot.slane %v5535_v47, 4  ;;  %v5120_v58 = vsel %vm5016_vm1, %v8207_v19, -inf }
 0x2eb   : >> { %v5968_v31 = vsel %vm5937_vm7, %v5967_v4, %v5966_v30  ;;  %v5513_v38 = vmax.f32 %v5511_v9, %v5512_v34  ;;  %v5770_v62 = vadd.f32 %v10945_v21, %v5506_v32  ;;  %v5490_v6 = vmax.f32 %v5488_v20, %v5489_v36 }
 0x2ec   : >> { %v5970_v46 = vsel %vm5940_vm8, %v5969_v17, %v5968_v31  ;;  %v5496_v56 = vrot.slane %v5495_v41, 2  ;;  %v5531_v44 = vrot.slane %v5530_v60, 2  ;;  %v5537_v43 = vmax.f32 %v5535_v47, %v5536_v0 }
 0x2ed   : >> { %v5972_v52 = vsel %vm5943_vm9, %v5971_v18, %v5970_v46  ;;  %v5771_v61 = vadd.f32 %v10945_v21, %v5513_v38  ;;  %v5830_v53 = vmax.f32 %v5770_v62, 0.0  ;;  %v5491_v50 = vrot.slane %v5490_v6, 1 }
 0x2ee   : >> { %6047 = vst.msk [vmem:[%s10440_s18 + $0x10] sm:$0xff] %vm5016_vm1, %v5972_v52  ;;  %v5497_v33 = vmax.f32 %v5495_v41, %v5496_v56  ;;  %v5532_v19 = vmax.f32 %v5530_v60, %v5531_v44  ;;  %v5538_v49 = vrot.slane %v5537_v43, 2  ;;  %v5121_v59 = vmax.f32 %v10250_v11, %v5120_v58 }
 0x2ef   : >> { %v5831_v37 = vmax.f32 %v5771_v61, 0.0  ;;  %v5975_v29 = vrot.slane %v5830_v53, 6  ;;  %v5492_v3 = vmax.f32 %v5490_v6, %v5491_v50  ;;  %v8208_v17 = vadd.f32 %v10428_v55, %v10426_v51 }
 0x2f0   : >> { %v5498_v25 = vrot.slane %v5497_v33, 1  ;;  %v5533_v40 = vrot.slane %v5532_v19, 1  ;;  %v5539_v18 = vmax.f32 %v5537_v43, %v5538_v49  ;;  %v5271_v12 = vcombine.high %v5121_v59, %v5121_v59 }
 0x2f1   : >> { %v5977_v23 = vrot.slane %v5831_v37, 5  ;;  %v5768_v54 = vadd.f32 %v10945_v21, %v5492_v3  ;;  %v5514_v9 = vsel %vm5317_vm2, %v5121_v59, -inf  ;;  %v5141_v20 = vsel %vm5016_vm1, %v8208_v17, -inf }
 0x2f2   : >> { %v5499_v30 = vmax.f32 %v5497_v33, %v5498_v25  ;;  %v5534_v1 = vmax.f32 %v5532_v19, %v5533_v40  ;;  %v5540_v11 = vrot.slane %v5539_v18, 1  ;;  %v5515_v16 = vrot.slane %v5514_v9, 4 }
 0x2f3   : >> { %v5828_v47 = vmax.f32 %v5768_v54, 0.0  ;;  %v5521_v4 = vsel %vm5317_vm2, %v5271_v12, -inf  ;;  %v5142_v51 = vmax.f32 %v10256_v15, %v5141_v20  ;;  %v8209_v55 = vadd.f32 %v10436_v35, %v10434_v13 }
 0x2f4   : >> { %v5769_v32 = vadd.f32 %v10945_v21, %v5499_v30  ;;  %v5541_v34 = vmax.f32 %v5539_v18, %v5540_v11  ;;  %v5774_v36 = vadd.f32 %v10945_v21, %v5534_v1  ;;  %v5516_v41 = vmax.f32 %v5514_v9, %v5515_v16 }
 0x2f5   : >> { %v5522_v60 = vrot.slane %v5521_v4, 4  ;;  %v5274_v0 = vcombine.high %v5142_v51, %v5142_v51  ;;  %v5556_v58 = vsel %vm5317_vm2, %v5142_v51, -inf  ;;  %v5134_v31 = vsel %vm5016_vm1, %v8209_v55, -inf }
 0x2f6   : >> { %v5829_v38 = vmax.f32 %v5769_v32, 0.0  ;;  %v5775_v62 = vadd.f32 %v10945_v21, %v5541_v34  ;;  %v5834_v6 = vmax.f32 %v5774_v36, 0.0  ;;  %v5517_v15 = vrot.slane %v5516_v41, 2 }
 0x2f7   : >> { %v5523_v46 = vmax.f32 %v5521_v4, %v5522_v60  ;;  %v5557_v56 = vrot.slane %v5556_v58, 4  ;;  %v5563_v13 = vsel %vm5317_vm2, %v5274_v0, -inf  ;;  %v5135_v35 = vmax.f32 %v10262_v28, %v5134_v31 }
 0x2f8   : >> { %v5973_v44 = vrot.slane %v5829_v38, 7  ;;  %v5835_v43 = vmax.f32 %v5775_v62, 0.0  ;;  %v10599_v52 = vrot.slane %v5834_v6, 2  ;;  %v5518_v61 = vmax.f32 %v5516_v41, %v5517_v15 }
 0x2f9   : >> { %v5524_v53 = vrot.slane %v5523_v46, 2  ;;  %v5558_v50 = vmax.f32 %v5556_v58, %v5557_v56  ;;  %v5564_v33 = vrot.slane %v5563_v13, 4  ;;  %v5273_v19 = vcombine.high %v5135_v35, %v5135_v35 }
 0x2fa   : >> { %v5974_v49 = vsel %vm5925_vm3, %v5973_v44, %v5828_v47  ;;  %v5985_v59 = vrot.slane %v5835_v43, 1  ;;  %v5519_v37 = vrot.slane %v5518_v61, 1  ;;  %v5542_v3 = vsel %vm5317_vm2, %v5135_v35, -inf }
 0x2fb   : >> { %v5976_v17 = vsel %vm5928_vm4, %v5975_v29, %v5974_v49  ;;  %v5525_v25 = vmax.f32 %v5523_v46, %v5524_v53  ;;  %v5559_v40 = vrot.slane %v5558_v50, 2  ;;  %v5565_v28 = vmax.f32 %v5563_v13, %v5564_v33 }
 0x2fc   : >> { %v5520_v18 = vmax.f32 %v5518_v61, %v5519_v37  ;;  %v5978_v12 = vsel %vm5931_vm5, %v5977_v23, %v5976_v17  ;;  %v5543_v54 = vrot.slane %v5542_v3, 4  ;;  %v5549_v9 = vsel %vm5317_vm2, %v5273_v19, -inf }
 0x2fd   : >> { %v5526_v20 = vrot.slane %v5525_v25, 1  ;;  %v5560_v30 = vmax.f32 %v5558_v50, %v5559_v40  ;;  %v5566_v1 = vrot.slane %v5565_v28, 2  ;;  %v5550_v11 = vrot.slane %v5549_v9, 4 }
 0x2fe   : >> { %v5772_v16 = vadd.f32 %v10945_v21, %v5520_v18  ;;  %v5544_v47 = vmax.f32 %v5542_v3, %v5543_v54  ;;  %v8210_v4 = vadd.f32 %v10448_v22, %v10446_v2  ;;  %v8211_v29 = vadd.f32 %v10456_v42, %v10454_v27  ;;  %v10955_v27 = vld [vmem:[#allocation22_spill] sm:$0xff] }
 0x2ff   : >> { %v5527_v51 = vmax.f32 %v5525_v25, %v5526_v20  ;;  %v5561_v55 = vrot.slane %v5560_v30, 1  ;;  %v5567_v32 = vmax.f32 %v5565_v28, %v5566_v1  ;;  %v5551_v23 = vmax.f32 %v5549_v9, %v5550_v11 }
 0x300   : >> { %v5832_v34 = vmax.f32 %v5772_v16, 0.0  ;;  %v5545_v36 = vrot.slane %v5544_v47, 2  ;;  %v5155_v41 = vsel %vm5016_vm1, %v8210_v4, -inf  ;;  %v5148_v60 = vsel %vm5016_vm1, %v8211_v29, -inf }
 0x301   : >> { %v5773_v0 = vadd.f32 %v10945_v21, %v5527_v51  ;;  %v5562_v58 = vmax.f32 %v5560_v30, %v5561_v55  ;;  %v5568_v31 = vrot.slane %v5567_v32, 1  ;;  %v5552_v38 = vrot.slane %v5551_v23, 2  ;;  %v10956_v51 = vld [vmem:[#allocation33_spill] sm:$0xff]  ;;  %v10957_v55 = vld [vmem:[#allocation34_spill] sm:$0xff] }
 0x302   : >> { %v5979_v62 = vrot.slane %v5832_v34, 4  ;;  %v5546_v2 = vmax.f32 %v5544_v47, %v5545_v36  ;;  %v5156_v22 = vmax.f32 %v10268_v45, %v5155_v41  ;;  %v5149_v42 = vmax.f32 %v10955_v27, %v5148_v60  ;;  %v10959_v34 = vld [vmem:[#allocation36_spill] sm:$0xff] }
 0x303   : >> { %v5833_v6 = vmax.f32 %v5773_v0, 0.0  ;;  %v5569_v15 = vmax.f32 %v5567_v32, %v5568_v31  ;;  %v5778_v46 = vadd.f32 %v10945_v21, %v5562_v58  ;;  %v5553_v56 = vmax.f32 %v5551_v23, %v5552_v38  ;;  %v10958_v23 = vld [vmem:[#allocation35_spill] sm:$0xff] }
 0x304   : >> { %v5980_v13 = vsel %vm5934_vm6, %v5979_v62, %v5978_v12  ;;  %v5547_v35 = vrot.slane %v5546_v2, 1  ;;  %v5276_v44 = vcombine.high %v5156_v22, %v5156_v22  ;;  %v5584_v43 = vsel %vm5317_vm2, %v5156_v22, -inf }
 0x305   : >> { %v5981_v61 = vrot.slane %v5833_v6, 3  ;;  %v5779_v53 = vadd.f32 %v10945_v21, %v5569_v15  ;;  %v5838_v50 = vmax.f32 %v5778_v46, 0.0  ;;  %v5554_v33 = vrot.slane %v5553_v56, 1  ;;  %v10960_v15 = vld [vmem:[#allocation23_spill] sm:$0xff] }
 0x306   : >> { %v5548_v19 = vmax.f32 %v5546_v2, %v5547_v35  ;;  %v5585_v45 = vrot.slane %v5584_v43, 4  ;;  %v5591_v49 = vsel %vm5317_vm2, %v5276_v44, -inf  ;;  %v5275_v37 = vcombine.high %v5149_v42, %v5149_v42 }
 0x307   : >> { %v5982_v3 = vsel %vm5937_vm7, %v5981_v61, %v5980_v13  ;;  %v5839_v17 = vmax.f32 %v5779_v53, 0.0  ;;  %v5989_v25 = vrot.slane %v5838_v50, 6  ;;  %v5555_v40 = vmax.f32 %v5553_v56, %v5554_v33  ;;  %v10961_v56 = vld [vmem:[#allocation24_spill] sm:$0xff] }
 0x308   : >> { %v5984_v28 = vsel %vm5940_vm8, %v10599_v52, %v5982_v3  ;;  %v5776_v18 = vadd.f32 %v10945_v21, %v5548_v19  ;;  %v5586_v12 = vmax.f32 %v5584_v43, %v5585_v45  ;;  %v5592_v54 = vrot.slane %v5591_v49, 4 }
 0x309   : >> { %v5986_v9 = vsel %vm5943_vm9, %v5985_v59, %v5984_v28  ;;  %v5991_v20 = vrot.slane %v5839_v17, 5  ;;  %v5777_v30 = vadd.f32 %v10945_v21, %v5555_v40  ;;  %v5570_v1 = vsel %vm5317_vm2, %v5149_v42, -inf }
 0x30a   : >> { %6048 = vst.msk [vmem:[%s10440_s18 + $0x18] sm:$0xff] %vm5016_vm1, %v5986_v9  ;;  %v5836_v11 = vmax.f32 %v5776_v18, 0.0  ;;  %v5587_v16 = vrot.slane %v5586_v12, 2  ;;  %v5593_v47 = vmax.f32 %v5591_v49, %v5592_v54  ;;  %v5571_v4 = vrot.slane %v5570_v1, 4 }
 0x30b   : >> { %v5837_v29 = vmax.f32 %v5777_v30, 0.0  ;;  %v5577_v52 = vsel %vm5317_vm2, %v5275_v37, -inf  ;;  %v8212_v32 = vadd.f32 %v10957_v55, %v10956_v51  ;;  %v8213_v59 = vadd.f32 %v10959_v34, %v10958_v23 }
 0x30c   : >> { %v5588_v36 = vmax.f32 %v5586_v12, %v5587_v16  ;;  %v5594_v41 = vrot.slane %v5593_v47, 2  ;;  %v5572_v60 = vmax.f32 %v5570_v1, %v5571_v4  ;;  %v5578_v0 = vrot.slane %v5577_v52, 4 }
 0x30d   : >> { %v5987_v58 = vrot.slane %v5837_v29, 7  ;;  %v5169_v31 = vsel %vm5016_vm1, %v8212_v32, -inf  ;;  %v5162_v38 = vsel %vm5016_vm1, %v8213_v59, -inf  ;;  %v8214_v62 = vadd.f32 %v10473_v24, %v10471_v48  ;;  %v10962_v59 = vld [vmem:[#allocation25_spill] sm:$0xff] }
 0x30e   : >> { %v5589_v2 = vrot.slane %v5588_v36, 1  ;;  %v5595_v22 = vmax.f32 %v5593_v47, %v5594_v41  ;;  %v5573_v27 = vrot.slane %v5572_v60, 2  ;;  %v5579_v42 = vmax.f32 %v5577_v52, %v5578_v0 }
 0x30f   : >> { %v5988_v6 = vsel %vm5925_vm3, %v5987_v58, %v5836_v11  ;;  %v5170_v46 = vmax.f32 %v10960_v15, %v5169_v31  ;;  %v5163_v13 = vmax.f32 %v10961_v56, %v5162_v38  ;;  %v5183_v35 = vsel %vm5016_vm1, %v8214_v62, -inf }
 0x310   : >> { %v5990_v44 = vsel %vm5928_vm4, %v5989_v25, %v5988_v6  ;;  %v5590_v43 = vmax.f32 %v5588_v36, %v5589_v2  ;;  %v5596_v61 = vrot.slane %v5595_v22, 1  ;;  %v5574_v53 = vmax.f32 %v5572_v60, %v5573_v27 }
 0x311   : >> { %v5580_v50 = vrot.slane %v5579_v42, 2  ;;  %v5992_v48 = vsel %vm5931_vm5, %v5991_v20, %v5990_v44  ;;  %v5278_v24 = vcombine.high %v5170_v46, %v5170_v46  ;;  %v5612_v33 = vsel %vm5317_vm2, %v5170_v46, -inf }
 0x312   : >> { %v5597_v19 = vmax.f32 %v5595_v22, %v5596_v61  ;;  %v5782_v45 = vadd.f32 %v10945_v21, %v5590_v43  ;;  %v5575_v49 = vrot.slane %v5574_v53, 1  ;;  %v5613_v37 = vrot.slane %v5612_v33, 4 }
 0x313   : >> { %v5581_v3 = vmax.f32 %v5579_v42, %v5580_v50  ;;  %v5619_v17 = vsel %vm5317_vm2, %v5278_v24, -inf  ;;  %v5277_v40 = vcombine.high %v5163_v13, %v5163_v13  ;;  %v5598_v25 = vsel %vm5317_vm2, %v5163_v13, -inf }
 0x314   : >> { %v5783_v28 = vadd.f32 %v10945_v21, %v5597_v19  ;;  %v5842_v18 = vmax.f32 %v5782_v45, 0.0  ;;  %v5576_v12 = vmax.f32 %v5574_v53, %v5575_v49  ;;  %v5614_v54 = vmax.f32 %v5612_v33, %v5613_v37  ;;  %v10963_v33 = vld [vmem:[#allocation37_spill] sm:$0xff] }
 0x315   : >> { %v5582_v9 = vrot.slane %v5581_v3, 1  ;;  %v5620_v20 = vrot.slane %v5619_v17, 4  ;;  %v5599_v30 = vrot.slane %v5598_v25, 4  ;;  %v5605_v1 = vsel %vm5317_vm2, %v5277_v40, -inf }
 0x316   : >> { %v5843_v11 = vmax.f32 %v5783_v28, 0.0  ;;  %v5997_v16 = vrot.slane %v5842_v18, 2  ;;  %v5780_v47 = vadd.f32 %v10945_v21, %v5576_v12  ;;  %v5615_v4 = vrot.slane %v5614_v54, 2 }
 0x317   : >> { %v5583_v29 = vmax.f32 %v5581_v3, %v5582_v9  ;;  %v5621_v52 = vmax.f32 %v5619_v17, %v5620_v20  ;;  %v5600_v51 = vmax.f32 %v5598_v25, %v5599_v30  ;;  %v5606_v55 = vrot.slane %v5605_v1, 4 }
 0x318   : >> { %v5999_v32 = vrot.slane %v5843_v11, 1  ;;  %v5840_v23 = vmax.f32 %v5780_v47, 0.0  ;;  %v5616_v34 = vmax.f32 %v5614_v54, %v5615_v4  ;;  %v5184_v36 = vmax.f32 %v10962_v59, %v5183_v35  ;;  %v10964_v47 = vld [vmem:[#allocation26_spill] sm:$0xff] }
 0x319   : >> { %v5781_v41 = vadd.f32 %v10945_v21, %v5583_v29  ;;  %v5622_v60 = vrot.slane %v5621_v52, 2  ;;  %v5601_v0 = vrot.slane %v5600_v51, 2  ;;  %v5607_v58 = vmax.f32 %v5605_v1, %v5606_v55 }
 0x31a   : >> { %v5993_v31 = vrot.slane %v5840_v23, 4  ;;  %v5617_v38 = vrot.slane %v5616_v34, 1  ;;  %v5280_v62 = vcombine.high %v5184_v36, %v5184_v36  ;;  %v5640_v2 = vsel %vm5317_vm2, %v5184_v36, -inf }
 0x31b   : >> { %v5841_v22 = vmax.f32 %v5781_v41, 0.0  ;;  %v5623_v27 = vmax.f32 %v5621_v52, %v5622_v60  ;;  %v5602_v42 = vmax.f32 %v5600_v51, %v5601_v0  ;;  %v5608_v6 = vrot.slane %v5607_v58, 2 }
 0x31c   : >> { %v5994_v15 = vsel %vm5934_vm6, %v5993_v31, %v5992_v48  ;;  %v5618_v46 = vmax.f32 %v5616_v34, %v5617_v38  ;;  %v5641_v56 = vrot.slane %v5640_v2, 4  ;;  %v5647_v13 = vsel %vm5317_vm2, %v5280_v62, -inf  ;;  %v10965_v38 = vld [vmem:[#allocation27_spill] sm:$0xff] }
 0x31d   : >> { %v5995_v35 = vrot.slane %v5841_v22, 3  ;;  %v5624_v44 = vrot.slane %v5623_v27, 1  ;;  %v5603_v43 = vrot.slane %v5602_v42, 1  ;;  %v5609_v61 = vmax.f32 %v5607_v58, %v5608_v6  ;;  %v10966_v6 = vld [vmem:[#allocation28_spill] sm:$0xff] }
 0x31e   : >> { %v5786_v53 = vadd.f32 %v10945_v21, %v5618_v46  ;;  %v5642_v50 = vmax.f32 %v5640_v2, %v5641_v56  ;;  %v5648_v24 = vrot.slane %v5647_v13, 4  ;;  %v8215_v19 = vadd.f32 %v10963_v33, %v10476_v57 }
 0x31f   : >> { %v5996_v45 = vsel %vm5937_vm7, %v5995_v35, %v5994_v15  ;;  %v5625_v49 = vmax.f32 %v5623_v27, %v5624_v44  ;;  %v5604_v48 = vmax.f32 %v5602_v42, %v5603_v43  ;;  %v5610_v37 = vrot.slane %v5609_v61, 1 }
 0x320   : >> { %v5998_v3 = vsel %vm5940_vm8, %v5997_v16, %v5996_v45  ;;  %v5846_v17 = vmax.f32 %v5786_v53, 0.0  ;;  %v5643_v40 = vrot.slane %v5642_v50, 2  ;;  %v5649_v25 = vmax.f32 %v5647_v13, %v5648_v24 }
 0x321   : >> { %v6000_v28 = vsel %vm5943_vm9, %v5999_v32, %v5998_v3  ;;  %v5787_v18 = vadd.f32 %v10945_v21, %v5625_v49  ;;  %v5611_v12 = vmax.f32 %v5609_v61, %v5610_v37  ;;  %v5784_v54 = vadd.f32 %v10945_v21, %v5604_v48 }
 0x322   : >> { %6049 = vst.msk [vmem:[%s10440_s18 + $0x20] sm:$0xff] %vm5016_vm1, %v6000_v28  ;;  %v6003_v57 = vrot.slane %v5846_v17, 6  ;;  %v5644_v9 = vmax.f32 %v5642_v50, %v5643_v40  ;;  %v5650_v20 = vrot.slane %v5649_v25, 2  ;;  %v5176_v30 = vsel %vm5016_vm1, %v8215_v19, -inf }
 0x323   : >> { %v5847_v1 = vmax.f32 %v5787_v18, 0.0  ;;  %v5785_v11 = vadd.f32 %v10945_v21, %v5611_v12  ;;  %v5844_v16 = vmax.f32 %v5784_v54, 0.0  ;;  %v5177_v4 = vmax.f32 %v10964_v47, %v5176_v30 }
 0x324   : >> { %v5645_v29 = vrot.slane %v5644_v9, 1  ;;  %v5651_v52 = vmax.f32 %v5649_v25, %v5650_v20  ;;  %v8216_v51 = vadd.f32 %v10485_v10, %v10483_v8  ;;  %v8217_v55 = vadd.f32 %v10491_v14, %v10489_v26 }
 0x325   : >> { %v6005_v32 = vrot.slane %v5847_v1, 5  ;;  %v5845_v23 = vmax.f32 %v5785_v11, 0.0  ;;  %v5279_v34 = vcombine.high %v5177_v4, %v5177_v4  ;;  %v5626_v59 = vsel %vm5317_vm2, %v5177_v4, -inf }
 0x326   : >> { %v5646_v36 = vmax.f32 %v5644_v9, %v5645_v29  ;;  %v5652_v41 = vrot.slane %v5651_v52, 1  ;;  %v5627_v60 = vrot.slane %v5626_v59, 4  ;;  %v5197_v0 = vsel %vm5016_vm1, %v8216_v51, -inf }
 0x327   : >> { %v6001_v58 = vrot.slane %v5845_v23, 7  ;;  %v5633_v31 = vsel %vm5317_vm2, %v5279_v34, -inf  ;;  %v5198_v62 = vmax.f32 %v10965_v38, %v5197_v0  ;;  %v5190_v8 = vsel %vm5016_vm1, %v8217_v55, -inf  ;;  %v10967_v55 = vld [vmem:[#allocation29_spill] sm:$0xff] }
 0x328   : >> { %v5653_v10 = vmax.f32 %v5651_v52, %v5652_v41  ;;  %v10680_v26 = vadd.f32 %v10945_v21, %v5646_v36  ;;  %v5628_v14 = vmax.f32 %v5626_v59, %v5627_v60  ;;  %v5634_v2 = vrot.slane %v5633_v31, 4 }
 0x329   : >> { %v6002_v22 = vsel %vm5925_vm3, %v6001_v58, %v5844_v16  ;;  %v5282_v27 = vcombine.high %v5198_v62, %v5198_v62  ;;  %v5668_v42 = vsel %vm5317_vm2, %v5198_v62, -inf  ;;  %v5191_v15 = vmax.f32 %v10966_v6, %v5190_v8 }
 0x32a   : >> { %v6004_v46 = vsel %vm5928_vm4, %v6003_v57, %v6002_v22  ;;  %v5791_v56 = vadd.f32 %v10945_v21, %v5653_v10  ;;  %v5629_v13 = vrot.slane %v5628_v14, 2  ;;  %v5635_v35 = vmax.f32 %v5633_v31, %v5634_v2 }
 0x32b   : >> { %v6006_v44 = vsel %vm5931_vm5, %v6005_v32, %v6004_v46  ;;  %v5669_v43 = vrot.slane %v5668_v42, 4  ;;  %v5675_v61 = vsel %vm5317_vm2, %v5282_v27, -inf  ;;  %v5850_v53 = vmax.f32 %v10680_v26, 0.0 }
 0x32c   : >> { %v5630_v50 = vmax.f32 %v5628_v14, %v5629_v13  ;;  %v5676_v24 = vrot.slane %v5675_v61, 4  ;;  %v5636_v33 = vrot.slane %v5635_v35, 2  ;;  %v5281_v45 = vcombine.high %v5191_v15, %v5191_v15 }
 0x32d   : >> { %v5670_v19 = vmax.f32 %v5668_v42, %v5669_v43  ;;  %v5654_v49 = vsel %vm5317_vm2, %v5191_v15, -inf  ;;  %v5851_v48 = vmax.f32 %v5791_v56, 0.0  ;;  %v8218_v18 = vadd.f32 %v10503_v5, %v10501_v63 }
 0x32e   : >> { %v5631_v37 = vrot.slane %v5630_v50, 1  ;;  %v5677_v3 = vmax.f32 %v5675_v61, %v5676_v24  ;;  %v5655_v17 = vrot.slane %v5654_v49, 4  ;;  %v5637_v40 = vmax.f32 %v5635_v35, %v5636_v33  ;;  %v10968_v35 = vld [vmem:[#allocation30_spill] sm:$0xff] }
 0x32f   : >> { %v5671_v25 = vrot.slane %v5670_v19, 2  ;;  %v5661_v28 = vsel %vm5317_vm2, %v5281_v45, -inf  ;;  %v5211_v1 = vsel %vm5016_vm1, %v8218_v18, -inf  ;;  %v8219_v11 = vadd.f32 %v10510_v7, %v10508_v39 }
 0x330   : >> { %v5632_v12 = vmax.f32 %v5630_v50, %v5631_v37  ;;  %v5678_v54 = vrot.slane %v5677_v3, 2  ;;  %v5656_v57 = vmax.f32 %v5654_v49, %v5655_v17  ;;  %v5662_v9 = vrot.slane %v5661_v28, 4 }
 0x331   : >> { %v5638_v20 = vrot.slane %v5637_v40, 1  ;;  %v5672_v30 = vmax.f32 %v5670_v19, %v5671_v25  ;;  %v5212_v63 = vmax.f32 %v10967_v55, %v5211_v1  ;;  %v5204_v5 = vsel %vm5016_vm1, %v8219_v11, -inf  ;;  %v10969_v25 = vld [vmem:[#allocation38_spill] sm:$0xff]  ;;  %v10973_v55 = vld [vmem:[#allocation31_spill] sm:$0xff] }
 0x332   : >> { %v5788_v16 = vadd.f32 %v10945_v21, %v5632_v12  ;;  %v5679_v47 = vmax.f32 %v5677_v3, %v5678_v54  ;;  %v5657_v4 = vrot.slane %v5656_v57, 2  ;;  %v5663_v29 = vmax.f32 %v5661_v28, %v5662_v9  ;;  %v10970_v28 = vld [vmem:[#allocation39_spill] sm:$0xff]  ;;  %v10971_v12 = vld [vmem:[#allocation40_spill] sm:$0xff]  ;;  %v10972_v54 = vld [vmem:[#allocation41_spill] sm:$0xff] }
 0x333   : >> { %v5639_v52 = vmax.f32 %v5637_v40, %v5638_v20  ;;  %v5673_v51 = vrot.slane %v5672_v30, 1  ;;  %v5284_v60 = vcombine.high %v5212_v63, %v5212_v63  ;;  %v5696_v39 = vsel %vm5317_vm2, %v5212_v63, -inf }
 0x334   : >> { %v5848_v32 = vmax.f32 %v5788_v16, 0.0  ;;  %v5680_v23 = vrot.slane %v5679_v47, 1  ;;  %v5658_v34 = vmax.f32 %v5656_v57, %v5657_v4  ;;  %v5664_v59 = vrot.slane %v5663_v29, 2 }
 0x335   : >> { %v5789_v36 = vadd.f32 %v10945_v21, %v5639_v52  ;;  %v5674_v41 = vmax.f32 %v5672_v30, %v5673_v51  ;;  %v5697_v8 = vrot.slane %v5696_v39, 4  ;;  %v5703_v10 = vsel %vm5317_vm2, %v5284_v60, -inf }
 0x336   : >> { %v6007_v7 = vrot.slane %v5848_v32, 4  ;;  %v5681_v0 = vmax.f32 %v5679_v47, %v5680_v23  ;;  %v5659_v58 = vrot.slane %v5658_v34, 1  ;;  %v5665_v31 = vmax.f32 %v5663_v29, %v5664_v59 }
 0x337   : >> { %v5849_v38 = vmax.f32 %v5789_v36, 0.0  ;;  %v5794_v62 = vadd.f32 %v10945_v21, %v5674_v41  ;;  %v6011_v27 = vrot.slane %v5850_v53, 2  ;;  %v5698_v6 = vmax.f32 %v5696_v39, %v5697_v8 }
 0x338   : >> { %v6008_v26 = vsel %vm5934_vm6, %v6007_v7, %v6006_v44  ;;  %v5795_v14 = vadd.f32 %v10945_v21, %v5681_v0  ;;  %v5660_v2 = vmax.f32 %v5658_v34, %v5659_v58  ;;  %v5666_v22 = vrot.slane %v5665_v31, 1  ;;  %v10974_v34 = vld [vmem:[#allocation32_spill] sm:$0xff] }
 0x339   : >> { %v6009_v42 = vrot.slane %v5849_v38, 3  ;;  %v5704_v15 = vrot.slane %v5703_v10, 4  ;;  %v6013_v46 = vrot.slane %v5851_v48, 1  ;;  %v5205_v43 = vmax.f32 %v10968_v35, %v5204_v5 }
 0x33a   : >> { %v5667_v56 = vmax.f32 %v5665_v31, %v5666_v22  ;;  %v5792_v13 = vadd.f32 %v10945_v21, %v5660_v2  ;;  %v5854_v50 = vmax.f32 %v5794_v62, 0.0  ;;  %v5699_v24 = vrot.slane %v5698_v6, 2 }
 0x33b   : >> { %v6010_v61 = vsel %vm5937_vm7, %v6009_v42, %v6008_v26  ;;  %v5705_v44 = vmax.f32 %v5703_v10, %v5704_v15  ;;  %v5855_v19 = vmax.f32 %v5795_v14, 0.0  ;;  %v5283_v3 = vcombine.high %v5205_v43, %v5205_v43 }
 0x33c   : >> { %v6012_v33 = vsel %vm5940_vm8, %v6011_v27, %v6010_v61  ;;  %v5793_v53 = vadd.f32 %v10945_v21, %v5667_v56  ;;  %v5852_v45 = vmax.f32 %v5792_v13, 0.0  ;;  %v5700_v48 = vmax.f32 %v5698_v6, %v5699_v24 }
 0x33d   : >> { %v6014_v49 = vsel %vm5943_vm9, %v6013_v46, %v6012_v33  ;;  %v5706_v37 = vrot.slane %v5705_v44, 2  ;;  %v5682_v40 = vsel %vm5317_vm2, %v5205_v43, -inf  ;;  %v8220_v18 = vadd.f32 %v10970_v28, %v10969_v25 }
 0x33e   : >> { %6050 = vst.msk [vmem:[%s10440_s18 + $0x28] sm:$0xff] %vm5016_vm1, %v6014_v49  ;;  %v5853_v17 = vmax.f32 %v5793_v53, 0.0  ;;  %v8221_v57 = vadd.f32 %v10972_v54, %v10971_v12  ;;  %v5701_v9 = vrot.slane %v5700_v48, 1  ;;  %v5683_v30 = vrot.slane %v5682_v40, 4 }
 0x33f   : >> { %v5707_v20 = vmax.f32 %v5705_v44, %v5706_v37  ;;  %v5689_v1 = vsel %vm5317_vm2, %v5283_v3, -inf  ;;  %v5225_v47 = vsel %vm5016_vm1, %v8220_v18, -inf  ;;  %v6017_v29 = vrot.slane %v5854_v50, 6 }
 0x340   : >> { %v6015_v11 = vrot.slane %v5853_v17, 7  ;;  %v5690_v16 = vrot.slane %v5689_v1, 4  ;;  %v5218_v4 = vsel %vm5016_vm1, %v8221_v57, -inf  ;;  %v5684_v51 = vmax.f32 %v5682_v40, %v5683_v30 }
 0x341   : >> { %v5708_v52 = vrot.slane %v5707_v20, 1  ;;  %v5226_v63 = vmax.f32 %v10973_v55, %v5225_v47  ;;  %v6019_v5 = vrot.slane %v5855_v19, 5  ;;  %v5219_v59 = vmax.f32 %v10974_v34, %v5218_v4 }
 0x342   : >> { %v6016_v32 = vsel %vm5925_vm3, %v6015_v11, %v5852_v45  ;;  %v5691_v23 = vmax.f32 %v5689_v1, %v5690_v16  ;;  %v5702_v41 = vmax.f32 %v5700_v48, %v5701_v9  ;;  %v5685_v60 = vrot.slane %v5684_v51, 2 }
 0x343   : >> { %v6018_v36 = vsel %vm5928_vm4, %v6017_v29, %v6016_v32  ;;  %v5286_v0 = vcombine.high %v5226_v63, %v5226_v63  ;;  %v5724_v58 = vsel %vm5317_vm2, %v5226_v63, -inf  ;;  %v5709_v31 = vmax.f32 %v5707_v20, %v5708_v52 }
 0x344   : >> { %v5692_v39 = vrot.slane %v5691_v23, 2  ;;  %v6020_v7 = vsel %vm5931_vm5, %v6019_v5, %v6018_v36  ;;  %v5686_v38 = vmax.f32 %v5684_v51, %v5685_v60  ;;  %v5725_v62 = vrot.slane %v5724_v58, 4 }
 0x345   : >> { %v5731_v10 = vsel %vm5317_vm2, %v5286_v0, -inf  ;;  %v5285_v26 = vcombine.high %v5219_v59, %v5219_v59  ;;  %v5710_v14 = vsel %vm5317_vm2, %v5219_v59, -inf  ;;  %v5798_v2 = vadd.f32 %v10945_v21, %v5702_v41 }
 0x346   : >> { %v5693_v8 = vmax.f32 %v5691_v23, %v5692_v39  ;;  %v5687_v22 = vrot.slane %v5686_v38, 1  ;;  %v5726_v27 = vmax.f32 %v5724_v58, %v5725_v62  ;;  %v5732_v6 = vrot.slane %v5731_v10, 4 }
 0x347   : >> { %v5711_v15 = vrot.slane %v5710_v14, 4  ;;  %v5717_v46 = vsel %vm5317_vm2, %v5285_v26, -inf  ;;  %v5799_v56 = vadd.f32 %v10945_v21, %v5709_v31  ;;  %v5858_v53 = vmax.f32 %v5798_v2, 0.0 }
 0x348   : >> { %v5694_v42 = vrot.slane %v5693_v8, 1  ;;  %v5688_v13 = vmax.f32 %v5686_v38, %v5687_v22  ;;  %v5727_v35 = vrot.slane %v5726_v27, 2  ;;  %v5718_v43 = vrot.slane %v5717_v46, 4 }
 0x349   : >> { %v5733_v50 = vmax.f32 %v5731_v10, %v5732_v6  ;;  %v5712_v24 = vmax.f32 %v5710_v14, %v5711_v15  ;;  %v5859_v37 = vmax.f32 %v5799_v56, 0.0  ;;  %v6025_v1 = vrot.slane %v5858_v53, 2 }
 0x34a   : >> { %v5695_v61 = vmax.f32 %v5693_v8, %v5694_v42  ;;  %v5796_v44 = vadd.f32 %v10945_v21, %v5688_v13  ;;  %v5728_v33 = vmax.f32 %v5726_v27, %v5727_v35  ;;  %v5719_v19 = vmax.f32 %v5717_v46, %v5718_v43 }
 0x34b   : >> { %v5734_v49 = vrot.slane %v5733_v50, 2  ;;  %v5713_v48 = vrot.slane %v5712_v24, 2  ;;  %v6027_v11 = vrot.slane %v5859_v37, 1 }
 0x34c   : >> { %v5797_v45 = vadd.f32 %v10945_v21, %v5695_v61  ;;  %v5856_v3 = vmax.f32 %v5796_v44, 0.0  ;;  %v5729_v17 = vrot.slane %v5728_v33, 1  ;;  %v5720_v40 = vrot.slane %v5719_v19, 2 }
 0x34d   : >> { %v5735_v28 = vmax.f32 %v5733_v50, %v5734_v49  ;;  %v5714_v18 = vmax.f32 %v5712_v24, %v5713_v48 }
 0x34e   : >> { %v5857_v25 = vmax.f32 %v5797_v45, 0.0  ;;  %v6021_v12 = vrot.slane %v5856_v3, 4  ;;  %v5730_v54 = vmax.f32 %v5728_v33, %v5729_v17  ;;  %v5721_v57 = vmax.f32 %v5719_v19, %v5720_v40 }
 0x34f   : >> { %v5736_v20 = vrot.slane %v5735_v28, 1  ;;  %v5715_v30 = vrot.slane %v5714_v18, 1 }
 0x350   : >> { %v6023_v9 = vrot.slane %v5857_v25, 3  ;;  %v6022_v16 = vsel %vm5934_vm6, %v6021_v12, %v6020_v7  ;;  %v5722_v47 = vrot.slane %v5721_v57, 1  ;;  %v5802_v52 = vadd.f32 %v10945_v21, %v5730_v54 }
 0x351   : >> { %v5737_v29 = vmax.f32 %v5735_v28, %v5736_v20  ;;  %v5716_v51 = vmax.f32 %v5714_v18, %v5715_v30 }
 0x352   : >> { %v6024_v4 = vsel %vm5937_vm7, %v6023_v9, %v6022_v16  ;;  %v5723_v63 = vmax.f32 %v5721_v57, %v5722_v47  ;;  %v5862_v59 = vmax.f32 %v5802_v52, 0.0 }
 0x353   : >> { %v6026_v55 = vsel %vm5940_vm8, %v6025_v1, %v6024_v4  ;;  %v5803_v32 = vadd.f32 %v10945_v21, %v5737_v29  ;;  %v5800_v23 = vadd.f32 %v10945_v21, %v5716_v51 }
 0x354   : >> { %v6028_v5 = vsel %vm5943_vm9, %v6027_v11, %v6026_v55  ;;  %v5801_v34 = vadd.f32 %v10945_v21, %v5723_v63  ;;  %v6031_v7 = vrot.slane %v5862_v59, 6 }
 0x355   : >> { %6051 = vst.msk [vmem:[%s10440_s18 + $0x30] sm:$0xff] %vm5016_vm1, %v6028_v5  ;;  %v5863_v36 = vmax.f32 %v5803_v32, 0.0  ;;  %v5860_v60 = vmax.f32 %v5800_v23, 0.0 }
 0x356   : >> { %v5861_v41 = vmax.f32 %v5801_v34, 0.0 }
 0x357   : >> { %v6033_v0 = vrot.slane %v5863_v36, 5  ;;  %187 = sbr.rel (!%p185_p4) target bundleno = 18 (0x12), region = 75 }
 0x358   : >> { %v6029_v39 = vrot.slane %v5861_v41, 7 }
 0x35a   : >> { %v6030_v58 = vsel %vm5925_vm3, %v6029_v39, %v5860_v60 }
 0x35b   : >> { %v6032_v31 = vsel %vm5928_vm4, %v6031_v7, %v6030_v58 }
 0x35c   : >> { %v6034_v38 = vsel %vm5931_vm5, %v6033_v0, %v6032_v31 }
 0x35d   : >> { %6052 = vst.msk [vmem:[%s10440_s18 + $0x38] sm:$0xf] %vm5317_vm2, %v6034_v38 }
 0x35e PF: > { %s13_s12 = sadd.s32 1, %s8490_s12  }
 0x35f   : > { %p10_p5 = scmp.ge.s32.totalorder %s13_s12, 4  }
 0x361   :  { %12 = sbr.rel (!%p10_p5) target bundleno = 1 (0x1), region = 86 }

// kernel: audio_cnn_forward.5
= control target key start
LH: loop header
LB: loop body
LE: loop exit
PB: predicated region body
PF: predicated region fallthrough
CT: control target
= control target key end

     0   :  { %12 = vsyncpa [#allocation3], 0  ;;  %s7572_s0 = inlined_call_operand.vmem [shape: f32[2,9,65,32], index: 0, kind: input, shape index: {}]   ;;  %s7573_s1 = inlined_call_operand.vmem [shape: f32[4,32,64], index: 1, kind: input, shape index: {}]   ;;  %s7574_s2 = inlined_call_operand.vmem [shape: f32[1,64], index: 2, kind: input, shape index: {}]   ;;  %s7575_s3 = inlined_call_operand.vmem [shape: f32[2,64,160], index: 3, kind: input, shape index: {}]   ;;  %s7576_s4 = inlined_call_operand.vmem [shape: f32[16,160], index: 4, kind: input, shape index: {}]   ;;  %s7577_s5 = inlined_call_operand.vmem [shape: f32[160,10], index: 5, kind: input, shape index: {}]   ;;  %s7578_s6 = inlined_call_operand.vmem [shape: f32[1,10], index: 6, kind: input, shape index: {}]   ;;  %s7579_s7 = inlined_call_operand.hbm [shape: f32[2,1,10], index: 7, kind: output, shape index: {}]  }
   0x1   :  { %14 = vsyncpa [#allocation3 + $0x1], 0  ;;  %s5887_s24 = smov 0   ;;  %s5889_s25 = smov 0  }
   0x2   :  { %s5891_s26 = smov 0   ;;  %s5893_s27 = smov 0  }
   0x3 LB: > { %s5908_s28 = sadd.s32 4294967295, %s5842_s27   ;;  %s4186_s29 = sadd.s32 4294967294, %s5842_s27   ;;  %s5842_s27 = sphi %s5893_s27, %s7753_s27   ;;  %s5838_s26 = sphi %s5891_s26, %s7752_s26   ;;  %s5834_s25 = sphi %s5889_s25, %s7751_s25   ;;  %s5830_s24 = sphi %s5887_s24, %s7750_s24  }
   0x4   : > { %s5912_s30 = sadd.s32 1, %s5842_s27   ;;  %s179_s8 = sadd.s32 1, %s5838_s26 }
   0x5   : > { %s176_s9 = ssub.s32 %s5842_s27, %s5912_s30  ;;  %p189_p0 = scmp.ne.s32.totalorder %s5838_s26, %s5834_s25 }
   0x6   : > { %p177_p1 = scmp.eq.s32.totalorder %s176_s9, 0  ;;  %p190_p2 = scmp.eq.s32.totalorder %s5908_s28, 1 }
   0x7   : > { %p195_p3 = scmp.ne.s32.totalorder %s5834_s25, %s5830_s24  ;;  %p196_p4 = scmp.eq.s32.totalorder %s4186_s29, 1 }
   0x8   : > { %s5923_s10 = scalar_select %p177_p1, %s5838_s26, %s179_s8  }
   0x9   : > { %p5925_p5 = por %p190_p2, %p189_p0  ;;  %p5929_p6 = por %p196_p4, %p195_p3 }
   0xa   : > { %p4189_p7 = scmp.ge.s32.totalorder %s5842_s27, 1  ;;  %p240_p8 = scmp.lt.s32.totalorder %s5842_s27, 3 }
   0xc   : > { %p241_p9 = pnand %p4189_p7, %p240_p8 }
   0xe   : > { %244 = sbr.rel (%p241_p9) target bundleno = 1053 (0x41d), region = 48 }
  0x15   : > { %v4191_v0 = vld [vmem:[%s7573_s1 + $0x20] sm:$0xff]  ;;  %v4192_v1 = vld [vmem:[%s7573_s1 + $0x28] sm:$0xff]  ;;  %v4193_v2 = vld [vmem:[%s7573_s1 + $0x30] sm:$0xff]  ;;  %p271_p10 = scmp.lt.s32.totalorder %s5908_s28, 1  ;;  %vm360_vm0 = vcmask 261120   ;;  %vm1774_vm1 = vcmask 523264  }
  0x16   : > { %v5412_v3 = vpack.c.bf16 %v4192_v1, %v4191_v0  ;;  %v4194_v4 = vld [vmem:[%s7573_s1 + $0x38] sm:$0xff]  ;;  %v276_v6 = vld [vmem:[%s7573_s1] sm:$0xff]  ;;  %v277_v7 = vld [vmem:[%s7573_s1 + $0x8] sm:$0xff]  ;;  %vm1855_vm2 = vcmask 519168   ;;  %vm3758_vm3 = vcmask 1041409   ;;  %vm3761_vm4 = vcmask 1042434  }
  0x17   : > { %v5416_v5 = vpack.c.bf16 %v4194_v4, %v4193_v2  ;;  %s272_s21 = scalar_select %p271_p10, %s5908_s28, 1  ;;  %v5420_v8 = vpack.c.bf16 %v277_v7, %v276_v6  ;;  %v278_v15 = vld [vmem:[%s7573_s1 + $0x10] sm:$0xff]  ;;  %v279_v16 = vld [vmem:[%s7573_s1 + $0x18] sm:$0xff]  ;;  %v4195_v26 = vld [vmem:[%s7573_s1 + $0x40] sm:$0xff]  ;;  %vm3764_vm5 = vcmask 1043459   ;;  %vm3767_vm6 = vcmask 1044484  }
  0x18   : > { %5413 = vmatprep.subr.bf16.mxu0 %v5412_v3  ;;  %5538 = vmatprep.subr.bf16.mxu1 %v5412_v3  ;;  %v5424_v21 = vpack.c.bf16 %v279_v16, %v278_v15  ;;  %v4196_v27 = vld [vmem:[%s7573_s1 + $0x48] sm:$0xff]  ;;  %vm3770_vm7 = vcmask 1045509   ;;  %vm3773_vm8 = vcmask 1046534   ;;  %vm3776_vm9 = vcmask 1047559   ;;  %s269_s8 = sand.u32 1, %s5834_s25   ;;  %s4673_s14 = sshll.u32 %s5908_s28, 4 }
  0x19   : > { %5415 = vmatpush3.bf16.msra.mxu0 %v5412_v3  ;;  %5540 = vmatpush3.bf16.msra.mxu1 %v5412_v3  ;;  %s5738_s9 = smul.u32 648, %s272_s21  ;;  %v6031_v32 = vpack.c.bf16 %v4196_v27, %v4195_v26  ;;  %s270_s16 = scalar_lea.vmem [#allocation2], %s269_s8  ;;  %vm4116_vm10 = vcmask 73728  }
  0x1a   : > { %5417 = vmatprep.subr.bf16.mxu0 %v5416_v5  ;;  %5539 = vmatprep.subr.bf16.mxu1 %v5416_v5  ;;  %s4131_s17 = sshll.u32 %s270_s16, 4  ;;  %s7530_s19 = scalar_lea.hbm %s7579_s7, %s4673_s14  ;;  %s7532_s17 = int_to_ptr.vmem [resolvable:$true] %s4131_s17 }
  0x1b   : > { %s5958_s15 = scalar_lea.vmem %s7572_s0, %s5738_s9  ;;  %s4119_s20 = scalar_lea.sflag [#allocation3], %s269_s8 }
  0x1c   : > { %v328_v9 = vld [vmem:[%s5958_s15 + $0x1] sm:$0xff]  ;;  %v5962_v10 = vld [vmem:[%s5958_s15 + $0xf9] sm:$0xff]  ;;  %v329_v11 = vld [vmem:[%s5958_s15 + $0x9] sm:$0xff]  ;;  %s5780_s21 = scalar_lea.vmem %s7532_s17, 16  ;;  %s5846_s28 = smov [#allocation2]  }
  0x1d   : > { %7637 = vst [vmem:[#allocation5_spill] sm:$0xff] %v5962_v10  ;;  %5419 = vmatpush3.bf16.msra.mxu0 %v5416_v5  ;;  %5541 = vmatpush3.bf16.msra.mxu1 %v5416_v5  ;;  %v5966_v12 = vld [vmem:[%s5958_s15 + $0x101] sm:$0xff]  ;;  %v330_v13 = vld [vmem:[%s5958_s15 + $0x11] sm:$0xff]  ;;  %v5973_v14 = vld [vmem:[%s5958_s15 + $0x109] sm:$0xff]  ;;  %p5781_p11 = scmp.ne.s32.totalorder %s7532_s17, %s5780_s21  ;;  %s5784_s22 = sshll.u32 %s5846_s28, 4  ;;  %s5785_s22 = int_to_ptr.vmem [resolvable:$false] %s5784_s22 }
  0x1e   : > { %7638 = vst [vmem:[#allocation6_spill] sm:$0xff] %v5966_v12  ;;  %4972 = vmatprep.mubr.msk.f32.mxu0 %vm360_vm0, %v328_v9  ;;  %5014 = vmatprep.mubr.msk.f32.mxu1 %vm360_vm0, %v5962_v10  ;;  %7639 = vst [vmem:[#allocation7_spill] sm:$0xff] %v5973_v14  ;;  %v331_v17 = vld [vmem:[%s5958_s15 + $0x19] sm:$0xff]  ;;  %v5987_v18 = vld [vmem:[%s5958_s15 + $0x111] sm:$0xff]  ;;  %s5786_s23 = scalar_lea.vmem %s5785_s22, 32  ;;  %p5787_p0 = scmp.lt.s32.totalorder %s7532_s17, %s5785_s22 }
  0x1f   : > { %5445 = vmatprep.subr.bf16.mxu1 %v5412_v3  ;;  %5421 = vmatprep.subr.bf16.mxu0 %v5420_v8  ;;  %7640 = vst [vmem:[#allocation8_spill] sm:$0xff] %v5987_v18  ;;  %v332_v19 = vld [vmem:[%s5958_s15 + $0x21] sm:$0xff]  ;;  %v333_v22 = vld [vmem:[%s5958_s15 + $0x29] sm:$0xff]  ;;  %v334_v24 = vld [vmem:[%s5958_s15 + $0x31] sm:$0xff]  ;;  %p5782_p12 = pnand %p5781_p11, %p5925_p5  ;;  %p5788_p1 = scmp.lt.s32.totalorder %s5786_s23, %s5780_s21 }
  0x20   : > { %4973 = vmatmul.mubr.msk.f32.vlgmr.msra.gmra.mrb[0].mxu0 %vm360_vm0, %v329_v11  ;;  %5015 = vmatmul.mubr.msk.f32.vlgmr.msra.gmra.mrb[0].mxu1 %vm360_vm0, %v5966_v12  ;;  %v5993_v20 = vld [vmem:[%s5958_s15 + $0x121] sm:$0xff]  ;;  %v6001_v23 = vld [vmem:[%s5958_s15 + $0x129] sm:$0xff]  ;;  %v6007_v25 = vld [vmem:[%s5958_s15 + $0x131] sm:$0xff] }
  0x21   : > { %5447 = vmatpush3.bf16.msra.mxu1 %v5412_v3  ;;  %4975 = vmatprep.mubr.msk.f32.mxu0 %vm360_vm0, %v330_v13  ;;  %7641 = vst [vmem:[#allocation9_spill] sm:$0xff] %v5993_v20  ;;  %7642 = vst [vmem:[#allocation10_spill] sm:$0xff] %v6001_v23  ;;  %v335_v28 = vld [vmem:[%s5958_s15 + $0x39] sm:$0xff]  ;;  %v6026_v30 = vld [vmem:[%s5958_s15 + $0x49] sm:$0xff]  ;;  %p5783_p13 = pneg %p5782_p12  ;;  %p5789_p2 = por %p5788_p1, %p5787_p0 }
  0x22   : > { %5017 = vmatprep.mubr.msk.f32.mxu1 %vm360_vm0, %v5973_v14  ;;  %5449 = vmatprep.subr.bf16.mxu1 %v5416_v5  ;;  %7643 = vst [vmem:[#allocation11_spill] sm:$0xff] %v6007_v25  ;;  %v6021_v29 = vld [vmem:[%s5958_s15 + $0x139] sm:$0xff]  ;;  %v6029_v31 = vld [vmem:[%s5958_s15 + $0x141] sm:$0xff]  ;;  %v6041_v33 = vld [vmem:[%s5958_s15 + $0x51] sm:$0xff] }
  0x23   : > { %5423 = vmatpush3.bf16.msra.mxu0 %v5420_v8  ;;  %7644 = vst [vmem:[#allocation12_spill] sm:$0xff] %v6021_v29  ;;  %7645 = vst [vmem:[#allocation13_spill] sm:$0xff] %v6029_v31  ;;  %v6044_v34 = vld [vmem:[%s5958_s15 + $0x149] sm:$0xff]  ;;  %v6047_v35 = vld [vmem:[%s5958_s15 + $0x59] sm:$0xff]  ;;  %p5790_p3 = pnand %p5789_p2, %p5783_p13 }
  0x24   : > { %4976 = vmatmul.mubr.msk.f32.gmra.mrb[2].mxu0 %vm360_vm0, %v331_v17  ;;  %5018 = vmatmul.mubr.msk.f32.gmra.mrb[2].mxu1 %vm360_vm0, %v5987_v18  ;;  %7646 = vst [vmem:[#allocation14_spill] sm:$0xff] %v6044_v34  ;;  %v6050_v36 = vld [vmem:[%s5958_s15 + $0x151] sm:$0xff]  ;;  %v6063_v37 = vld [vmem:[%s5958_s15 + $0x61] sm:$0xff]  ;;  %v6066_v38 = vld [vmem:[%s5958_s15 + $0x159] sm:$0xff] }
  0x25   : > { %5451 = vmatpush3.bf16.msra.mxu1 %v5416_v5  ;;  %4978 = vmatprep.mubr.msk.f32.mxu0 %vm360_vm0, %v332_v19  ;;  %7647 = vst [vmem:[#allocation15_spill] sm:$0xff] %v6050_v36  ;;  %7648 = vst [vmem:[#allocation16_spill] sm:$0xff] %v6066_v38  ;;  %v6069_v39 = vld [vmem:[%s5958_s15 + $0x69] sm:$0xff]  ;;  %v6083_v41 = vld [vmem:[%s5958_s15 + $0x71] sm:$0xff] }
  0x26   : > { %5196 = vmatprep.mubr.msk.f32.mxu1 %vm360_vm0, %v5993_v20  ;;  %5453 = vmatprep.subr.bf16.mxu1 %v5420_v8  ;;  %v6072_v40 = vld [vmem:[%s5958_s15 + $0x169] sm:$0xff]  ;;  %v6086_v42 = vld [vmem:[%s5958_s15 + $0x171] sm:$0xff]  ;;  %v6089_v43 = vld [vmem:[%s5958_s15 + $0x79] sm:$0xff] }
  0x27   : > { %5425 = vmatprep.subr.bf16.mxu0 %v5424_v21  ;;  %7649 = vst [vmem:[#allocation17_spill] sm:$0xff] %v6072_v40  ;;  %7650 = vst [vmem:[#allocation18_spill] sm:$0xff] %v6086_v42  ;;  %v6092_v44 = vld [vmem:[%s5958_s15 + $0x179] sm:$0xff]  ;;  %v6103_v45 = vld [vmem:[%s5958_s15 + $0x81] sm:$0xff] }
  0x28   : > { %4979 = vmatmul.mubr.msk.f32.gmra.mrb[4].mxu0 %vm360_vm0, %v333_v22  ;;  %5197 = vmatmul.mubr.msk.f32.vlgmr.msra.gmra.mrb[4].mxu1 %vm360_vm0, %v6001_v23  ;;  %7651 = vst [vmem:[#allocation19_spill] sm:$0xff] %v6092_v44  ;;  %v6106_v46 = vld [vmem:[%s5958_s15 + $0x181] sm:$0xff]  ;;  %v6109_v47 = vld [vmem:[%s5958_s15 + $0x91] sm:$0xff]  ;;  %v6112_v48 = vld [vmem:[%s5958_s15 + $0x189] sm:$0xff] }
  0x29   : > { %5455 = vmatpush3.bf16.msra.mxu1 %v5420_v8  ;;  %4981 = vmatprep.mubr.msk.f32.mxu0 %vm360_vm0, %v334_v24  ;;  %7652 = vst [vmem:[#allocation20_spill] sm:$0xff] %v6106_v46  ;;  %7653 = vst [vmem:[#allocation21_spill] sm:$0xff] %v6109_v47  ;;  %v6123_v49 = vld [vmem:[%s5958_s15 + $0x99] sm:$0xff]  ;;  %v6126_v50 = vld [vmem:[%s5958_s15 + $0x191] sm:$0xff] }
  0x2a   : > { %5199 = vmatprep.mubr.msk.f32.mxu1 %vm360_vm0, %v6007_v25  ;;  %5457 = vmatprep.subr.bf16.mxu1 %v5424_v21  ;;  %7654 = vst [vmem:[#allocation22_spill] sm:$0xff] %v6112_v48  ;;  %7655 = vst [vmem:[#allocation23_spill] sm:$0xff] %v6123_v49  ;;  %v6129_v51 = vld [vmem:[%s5958_s15 + $0xa1] sm:$0xff]  ;;  %v6132_v52 = vld [vmem:[%s5958_s15 + $0x199] sm:$0xff] }
  0x2b   : > { %5427 = vmatpush3.bf16.msra.mxu0 %v5424_v21  ;;  %7656 = vst [vmem:[#allocation24_spill] sm:$0xff] %v6126_v50  ;;  %7657 = vst [vmem:[#allocation25_spill] sm:$0xff] %v6129_v51  ;;  %v6143_v53 = vld [vmem:[%s5958_s15 + $0xa9] sm:$0xff]  ;;  %v6146_v54 = vld [vmem:[%s5958_s15 + $0x1a1] sm:$0xff] }
  0x2c   : > { %4982 = vmatmul.mubr.msk.f32.gmra.mrb[6].mxu0 %vm360_vm0, %v335_v28  ;;  %5200 = vmatmul.mubr.msk.f32.gmra.mrb[6].mxu1 %vm360_vm0, %v6021_v29  ;;  %7658 = vst [vmem:[#allocation26_spill] sm:$0xff] %v6132_v52  ;;  %7659 = vst [vmem:[#allocation27_spill] sm:$0xff] %v6143_v53  ;;  %v6149_v55 = vld [vmem:[%s5958_s15 + $0xb1] sm:$0xff]  ;;  %v6163_v57 = vld [vmem:[%s5958_s15 + $0xb9] sm:$0xff] }
  0x2d   : > { %4984 = vmatprep.mubr.msk.f32.mxu0 %vm360_vm0, %v6026_v30  ;;  %5202 = vmatprep.mubr.msk.f32.mxu1 %vm360_vm0, %v6029_v31  ;;  %7660 = vst [vmem:[#allocation28_spill] sm:$0xff] %v6146_v54  ;;  %7661 = vst [vmem:[#allocation29_spill] sm:$0xff] %v6149_v55  ;;  %v6152_v56 = vld [vmem:[%s5958_s15 + $0x1b1] sm:$0xff]  ;;  %v6166_v58 = vld [vmem:[%s5958_s15 + $0x1b9] sm:$0xff] }
  0x2e   : > { %5459 = vmatpush3.bf16.msra.mxu1 %v5424_v21  ;;  %5429 = vmatprep.subr.bf16.mxu0 %v6031_v32  ;;  %7662 = vst [vmem:[#allocation30_spill] sm:$0xff] %v6152_v56  ;;  %7663 = vst [vmem:[#allocation31_spill] sm:$0xff] %v6163_v57  ;;  %v6169_v59 = vld [vmem:[%s5958_s15 + $0xc1] sm:$0xff]  ;;  %v6183_v61 = vld [vmem:[%s5958_s15 + $0xc9] sm:$0xff] }
  0x2f   : > { %5461 = vmatprep.subr.bf16.mxu1 %v6031_v32  ;;  %7664 = vst [vmem:[#allocation32_spill] sm:$0xff] %v6166_v58  ;;  %7665 = vst [vmem:[#allocation33_spill] sm:$0xff] %v6169_v59  ;;  %v6172_v60 = vld [vmem:[%s5958_s15 + $0x1c1] sm:$0xff]  ;;  %v6186_v62 = vld [vmem:[%s5958_s15 + $0x1c9] sm:$0xff] }
  0x30   : > { %4985 = vmatmul.mubr.msk.f32.gmra.mrb[8].mxu0 %vm360_vm0, %v6041_v33  ;;  %5203 = vmatmul.mubr.msk.f32.gmra.mrb[8].mxu1 %vm360_vm0, %v6044_v34  ;;  %7666 = vst [vmem:[#allocation34_spill] sm:$0xff] %v6172_v60  ;;  %7667 = vst [vmem:[#allocation35_spill] sm:$0xff] %v6183_v61  ;;  %v6189_v63 = vld [vmem:[%s5958_s15 + $0xd9] sm:$0xff]  ;;  %v6192_v0 = vld [vmem:[%s5958_s15 + $0x1d1] sm:$0xff] }
  0x31   : > { %4987 = vmatprep.mubr.msk.f32.mxu0 %vm360_vm0, %v6047_v35  ;;  %5205 = vmatprep.mubr.msk.f32.mxu1 %vm360_vm0, %v6050_v36  ;;  %7668 = vst [vmem:[#allocation36_spill] sm:$0xff] %v6186_v62  ;;  %7669 = vst [vmem:[#allocation37_spill] sm:$0xff] %v6189_v63  ;;  %v6203_v1 = vld [vmem:[%s5958_s15 + $0xe1] sm:$0xff]  ;;  %v6206_v2 = vld [vmem:[%s5958_s15 + $0x1d9] sm:$0xff] }
  0x32   : > { %7670 = vst [vmem:[#allocation38_spill] sm:$0xff] %v6192_v0  ;;  %7671 = vst [vmem:[#allocation39_spill] sm:$0xff] %v6203_v1  ;;  %v6209_v3 = vld [vmem:[%s5958_s15 + $0xe9] sm:$0xff]  ;;  %v6212_v4 = vld [vmem:[%s5958_s15 + $0x1e1] sm:$0xff] }
  0x33   : > { %7672 = vst [vmem:[#allocation40_spill] sm:$0xff] %v6206_v2  ;;  %7673 = vst [vmem:[#allocation41_spill] sm:$0xff] %v6209_v3  ;;  %v6223_v5 = vld [vmem:[%s5958_s15 + $0xf1] sm:$0xff]  ;;  %v6226_v6 = vld [vmem:[%s5958_s15 + $0x1e9] sm:$0xff] }
  0x34   : > { %4988 = vmatmul.mubr.msk.f32.gmra.mrb[10].mxu0 %vm360_vm0, %v6063_v37  ;;  %5206 = vmatmul.mubr.msk.f32.gmra.mrb[10].mxu1 %vm360_vm0, %v6066_v38  ;;  %7674 = vst [vmem:[#allocation42_spill] sm:$0xff] %v6212_v4  ;;  %7675 = vst [vmem:[#allocation43_spill] sm:$0xff] %v6223_v5  ;;  %v296_v7 = vld [vmem:[%s5958_s15] sm:$0xff]  ;;  %v4197_v9 = vld [vmem:[%s7573_s1 + $0x50] sm:$0xff] }
  0x35   : > { %4990 = vmatprep.mubr.msk.f32.mxu0 %vm360_vm0, %v6069_v39  ;;  %5208 = vmatprep.mubr.msk.f32.mxu1 %vm360_vm0, %v6072_v40  ;;  %7676 = vst [vmem:[#allocation44_spill] sm:$0xff] %v6226_v6  ;;  %v6230_v8 = vld [vmem:[%s5958_s15 + $0x1f9] sm:$0xff]  ;;  %v297_v13 = vld [vmem:[%s5958_s15 + $0x8] sm:$0xff]  ;;  %v298_v16 = vld [vmem:[%s5958_s15 + $0x10] sm:$0xff] }
  0x36   : > { %7677 = vst [vmem:[#allocation45_spill] sm:$0xff] %v6230_v8  ;;  %v4198_v11 = vld [vmem:[%s7573_s1 + $0x58] sm:$0xff]  ;;  %v6247_v15 = vld [vmem:[%s5958_s15 + $0x201] sm:$0xff]  ;;  %v6251_v17 = vld [vmem:[%s5958_s15 + $0x209] sm:$0xff] }
  0x37   : > { %7678 = vst [vmem:[#allocation46_spill] sm:$0xff] %v6247_v15  ;;  %7679 = vst [vmem:[#allocation47_spill] sm:$0xff] %v6251_v17  ;;  %v5432_v19 = vpack.c.bf16 %v4198_v11, %v4197_v9  ;;  %v4199_v21 = vld [vmem:[%s7573_s1 + $0x60] sm:$0xff]  ;;  %v4200_v22 = vld [vmem:[%s7573_s1 + $0x68] sm:$0xff] }
  0x38   : > { %4991 = vmatmul.mubr.msk.f32.gmra.mrb[12].mxu0 %vm360_vm0, %v6083_v41  ;;  %5209 = vmatmul.mubr.msk.f32.gmra.mrb[12].mxu1 %vm360_vm0, %v6086_v42  ;;  %v299_v24 = vld [vmem:[%s5958_s15 + $0x18] sm:$0xff]  ;;  %v300_v27 = vld [vmem:[%s5958_s15 + $0x20] sm:$0xff]  ;;  %v301_v9 = vld [vmem:[%s5958_s15 + $0x28] sm:$0xff] }
  0x39   : > { %4993 = vmatprep.mubr.msk.f32.mxu0 %vm360_vm0, %v6089_v43  ;;  %5211 = vmatprep.mubr.msk.f32.mxu1 %vm360_vm0, %v6092_v44  ;;  %v6267_v26 = vld [vmem:[%s5958_s15 + $0x211] sm:$0xff]  ;;  %v6271_v28 = vld [vmem:[%s5958_s15 + $0x219] sm:$0xff]  ;;  %v6284_v11 = vld [vmem:[%s5958_s15 + $0x221] sm:$0xff] }
  0x3a   : > { %7680 = vst [vmem:[#allocation48_spill] sm:$0xff] %v6267_v26  ;;  %7681 = vst [vmem:[#allocation49_spill] sm:$0xff] %v6271_v28  ;;  %v6321_v38 = vld [vmem:[%s5958_s15 + $0x58] sm:$0xff]  ;;  %v6342_v36 = vld [vmem:[%s5958_s15 + $0x68] sm:$0xff] }
  0x3b   : > { %7682 = vst [vmem:[#allocation50_spill] sm:$0xff] %v6284_v11  ;;  %v6359_v34 = vld [vmem:[%s5958_s15 + $0x148] sm:$0xff]  ;;  %v6365_v31 = vld [vmem:[%s5958_s15 + $0x150] sm:$0xff]  ;;  %v6397_v25 = vld [vmem:[%s5958_s15 + $0x98] sm:$0xff] }
  0x3c   : > { %4994 = vmatmul.mubr.msk.f32.gmra.mrb[14].mxu0 %vm360_vm0, %v6103_v45  ;;  %5212 = vmatmul.mubr.msk.f32.gmra.mrb[14].mxu1 %vm360_vm0, %v6106_v46  ;;  %v6383_v29 = vld [vmem:[%s5958_s15 + $0x90] sm:$0xff]  ;;  %v6403_v23 = vld [vmem:[%s5958_s15 + $0xa0] sm:$0xff]  ;;  %v6417_v20 = vld [vmem:[%s5958_s15 + $0xa8] sm:$0xff] }
  0x3d   : > { %4996 = vmatprep.mubr.msk.f32.mxu0 %vm360_vm0, %v6109_v47  ;;  %5214 = vmatprep.mubr.msk.f32.mxu1 %vm360_vm0, %v6112_v48  ;;  %v6423_v18 = vld [vmem:[%s5958_s15 + $0xb0] sm:$0xff]  ;;  %v6437_v14 = vld [vmem:[%s5958_s15 + $0xb8] sm:$0xff]  ;;  %v6443_v12 = vld [vmem:[%s5958_s15 + $0xc0] sm:$0xff] }
  0x3e   : > { %v6457_v10 = vld [vmem:[%s5958_s15 + $0xc8] sm:$0xff]  ;;  %v6526_v48 = vld [vmem:[%s5958_s15 + $0x1e0] sm:$0xff]  ;;  %v4201_v44 = vld [vmem:[%s7573_s1 + $0x70] sm:$0xff] }
  0x3f   : > { %v6540_v46 = vld [vmem:[%s5958_s15 + $0x1e8] sm:$0xff]  ;;  %v6560_v42 = vld [vmem:[%s5958_s15 + $0x200] sm:$0xff]  ;;  %v4424_v47 = vld [vmem:[%s5958_s15 + $0x218] sm:$0xff] }
  0x40   : > { %4997 = vmatmul.mubr.msk.f32.gmra.mrb[16].mxu0 %vm360_vm0, %v6123_v49  ;;  %5215 = vmatmul.mubr.msk.f32.gmra.mrb[16].mxu1 %vm360_vm0, %v6126_v50  ;;  %v6520_v50 = vld [vmem:[%s5958_s15 + $0x1d8] sm:$0xff]  ;;  %v6563_v49 = vld [vmem:[%s5958_s15 + $0x208] sm:$0xff] }
  0x41   : > { %4999 = vmatprep.mubr.msk.f32.mxu0 %vm360_vm0, %v6129_v51  ;;  %5217 = vmatprep.mubr.msk.f32.mxu1 %vm360_vm0, %v6132_v52  ;;  %v6506_v52 = vld [vmem:[%s5958_s15 + $0x1d0] sm:$0xff]  ;;  %v4202_v51 = vld [vmem:[%s7573_s1 + $0x78] sm:$0xff] }
  0x42   : > { %v5440_v40 = vpack.c.bf16 %v4202_v51, %v4201_v44  ;;  %v4426_v44 = vld [vmem:[%s5958_s15 + $0x228] sm:$0xff]  ;;  %v4427_v51 = vld [vmem:[%s5958_s15 + $0x230] sm:$0xff] }
  0x44   : > { %5000 = vmatmul.mubr.msk.f32.gmra.mrb[18].mxu0 %vm360_vm0, %v6143_v53  ;;  %5218 = vmatmul.mubr.msk.f32.gmra.mrb[18].mxu1 %vm360_vm0, %v6146_v54  ;;  %v6500_v54 = vld [vmem:[%s5958_s15 + $0x1c8] sm:$0xff]  ;;  %v6543_v53 = vld [vmem:[%s5958_s15 + $0x1f8] sm:$0xff] }
  0x45   : > { %5002 = vmatprep.mubr.msk.f32.mxu0 %vm360_vm0, %v6149_v55  ;;  %5220 = vmatprep.mubr.msk.f32.mxu1 %vm360_vm0, %v6152_v56  ;;  %v6486_v56 = vld [vmem:[%s5958_s15 + $0x1c0] sm:$0xff]  ;;  %v6537_v55 = vld [vmem:[%s5958_s15 + $0x110] sm:$0xff] }
  0x48   : > { %5003 = vmatmul.mubr.msk.f32.gmra.mrb[20].mxu0 %vm360_vm0, %v6163_v57  ;;  %5221 = vmatmul.mubr.msk.f32.gmra.mrb[20].mxu1 %vm360_vm0, %v6166_v58  ;;  %v6480_v58 = vld [vmem:[%s5958_s15 + $0x1b8] sm:$0xff]  ;;  %v6523_v57 = vld [vmem:[%s5958_s15 + $0x108] sm:$0xff] }
  0x49   : > { %5005 = vmatprep.mubr.msk.f32.mxu0 %vm360_vm0, %v6169_v59  ;;  %5223 = vmatprep.mubr.msk.f32.mxu1 %vm360_vm0, %v6172_v60  ;;  %v6466_v60 = vld [vmem:[%s5958_s15 + $0x1b0] sm:$0xff]  ;;  %v6517_v59 = vld [vmem:[%s5958_s15 + $0x100] sm:$0xff] }
  0x4c   : > { %5006 = vmatmul.mubr.msk.f32.gmra.mrb[22].mxu0 %vm360_vm0, %v6183_v61  ;;  %5224 = vmatmul.mubr.msk.f32.gmra.mrb[22].mxu1 %vm360_vm0, %v6186_v62  ;;  %v6460_v62 = vld [vmem:[%s5958_s15 + $0x1a0] sm:$0xff]  ;;  %v6503_v61 = vld [vmem:[%s5958_s15 + $0xf8] sm:$0xff] }
  0x4d   : > { %5008 = vmatprep.mubr.msk.f32.mxu0 %vm360_vm0, %v6189_v63  ;;  %5226 = vmatprep.mubr.msk.f32.mxu1 %vm360_vm0, %v6192_v0  ;;  %v6446_v0 = vld [vmem:[%s5958_s15 + $0x198] sm:$0xff]  ;;  %v6497_v63 = vld [vmem:[%s5958_s15 + $0xf0] sm:$0xff] }
  0x50   : > { %5009 = vmatmul.mubr.msk.f32.gmra.mrb[24].mxu0 %vm360_vm0, %v6203_v1  ;;  %5227 = vmatmul.mubr.msk.f32.gmra.mrb[24].mxu1 %vm360_vm0, %v6206_v2  ;;  %v6440_v2 = vld [vmem:[%s5958_s15 + $0x190] sm:$0xff]  ;;  %v6483_v1 = vld [vmem:[%s5958_s15 + $0xe8] sm:$0xff] }
  0x51   : > { %5011 = vmatprep.mubr.msk.f32.mxu0 %vm360_vm0, %v6209_v3  ;;  %5229 = vmatprep.mubr.msk.f32.mxu1 %vm360_vm0, %v6212_v4  ;;  %v6426_v4 = vld [vmem:[%s5958_s15 + $0x188] sm:$0xff]  ;;  %v6477_v3 = vld [vmem:[%s5958_s15 + $0xe0] sm:$0xff] }
  0x54   : > { %5012 = vmatmul.mubr.msk.f32.gmra.mrb[26].mxu0 %vm360_vm0, %v6223_v5  ;;  %5230 = vmatmul.mubr.msk.f32.gmra.mrb[26].mxu1 %vm360_vm0, %v6226_v6  ;;  %v6420_v6 = vld [vmem:[%s5958_s15 + $0x180] sm:$0xff]  ;;  %v6463_v5 = vld [vmem:[%s5958_s15 + $0xd8] sm:$0xff] }
  0x55   : > { %5028 = vmatprep.mubr.msk.f32.mxu0 %vm360_vm0, %v296_v7  ;;  %5232 = vmatprep.mubr.msk.f32.mxu1 %vm360_vm0, %v6230_v8  ;;  %v6274_v7 = vpack.c.bf16 %v4200_v22, %v4199_v21  ;;  %v303_v21 = vld [vmem:[%s5958_s15 + $0x38] sm:$0xff] }
  0x56   : > { %v6299_v22 = vld [vmem:[%s5958_s15 + $0x231] sm:$0xff] }
  0x57   : > { %7684 = vst [vmem:[#allocation52_spill] sm:$0xff] %v6299_v22  ;;  %v6406_v8 = vld [vmem:[%s5958_s15 + $0x178] sm:$0xff] }
  0x58   : > { %5029 = vmatmul.mubr.msk.f32.vlgmr.msra.gmra.mrb[0].mxu0 %vm360_vm0, %v297_v13  ;;  %5233 = vmatmul.mubr.msk.f32.gmra.mrb[28].mxu1 %vm360_vm0, %v6247_v15  ;;  %v302_v13 = vld [vmem:[%s5958_s15 + $0x30] sm:$0xff] }
  0x59   : > { %5031 = vmatprep.mubr.msk.f32.mxu0 %vm360_vm0, %v298_v16  ;;  %5235 = vmatprep.mubr.msk.f32.mxu1 %vm360_vm0, %v6251_v17  ;;  %v6288_v16 = vld [vmem:[%s5958_s15 + $0x229] sm:$0xff] }
  0x5a   : > { %5431 = vmatpush3.bf16.msra.mxu0 %v6031_v32  ;;  %7683 = vst [vmem:[#allocation51_spill] sm:$0xff] %v6288_v16  ;;  %v6386_v17 = vld [vmem:[%s5958_s15 + $0x168] sm:$0xff]  ;;  %v6400_v15 = vld [vmem:[%s5958_s15 + $0x170] sm:$0xff] }
  0x5b   : > { %5433 = vmatprep.subr.bf16.mxu0 %v5432_v19 }
  0x5c   : > { %5032 = vmatmul.mubr.msk.f32.gmra.mrb[2].mxu0 %vm360_vm0, %v299_v24  ;;  %5236 = vmatmul.mubr.msk.f32.gmra.mrb[30].mxu1 %vm360_vm0, %v6267_v26  ;;  %v6302_v24 = vld [vmem:[%s5958_s15 + $0x48] sm:$0xff]  ;;  %v6377_v26 = vld [vmem:[%s5958_s15 + $0x80] sm:$0xff] }
  0x5d   : > { %5034 = vmatprep.mubr.msk.f32.mxu0 %vm360_vm0, %v300_v27  ;;  %5238 = vmatprep.mubr.msk.f32.mxu1 %vm360_vm0, %v6271_v28  ;;  %v6305_v27 = vld [vmem:[%s5958_s15 + $0x120] sm:$0xff]  ;;  %v6362_v28 = vld [vmem:[%s5958_s15 + $0x78] sm:$0xff] }
  0x5e   : > { %5435 = vmatpush3.bf16.msra.mxu0 %v5432_v19 }
  0x5f   : > { %5437 = vmatprep.subr.bf16.mxu0 %v6274_v7 }
  0x60   : > { %5035 = vmatmul.mubr.msk.f32.gmra.mrb[4].mxu0 %vm360_vm0, %v301_v9  ;;  %5239 = vmatmul.mubr.msk.f32.gmra.mrb[32].mxu1 %vm360_vm0, %v6284_v11  ;;  %v6315_v9 = vld [vmem:[%s5958_s15 + $0x50] sm:$0xff]  ;;  %v6345_v11 = vld [vmem:[%s5958_s15 + $0x140] sm:$0xff] }
  0x61   : > { %5037 = vmatprep.mubr.msk.f32.mxu0 %vm360_vm0, %v302_v13  ;;  %5241 = vmatprep.mubr.msk.f32.mxu1 %vm360_vm0, %v6288_v16  ;;  %v6318_v13 = vld [vmem:[%s5958_s15 + $0x128] sm:$0xff]  ;;  %v6324_v16 = vld [vmem:[%s5958_s15 + $0x130] sm:$0xff] }
  0x64   : > { %5038 = vmatmul.mubr.msk.f32.gmra.mrb[6].mxu0 %vm360_vm0, %v303_v21  ;;  %5242 = vmatmul.mubr.msk.f32.gmra.mrb[34].mxu1 %vm360_vm0, %v6299_v22  ;;  %v6334_v21 = vld [vmem:[%s5958_s15 + $0x60] sm:$0xff]  ;;  %v6337_v22 = vld [vmem:[%s5958_s15 + $0x138] sm:$0xff] }
  0x65   : > { %5040 = vmatprep.mubr.msk.f32.mxu0 %vm360_vm0, %v6302_v24  ;;  %5252 = vmatprep.mubr.msk.f32.mxu1 %vm360_vm0, %v6305_v27 }
  0x68   : > { %5041 = vmatmul.mubr.msk.f32.gmra.mrb[8].mxu0 %vm360_vm0, %v6315_v9  ;;  %5253 = vmatmul.mubr.msk.f32.vlgmr.msra.gmra.mrb[4].mxu1 %vm360_vm0, %v6318_v13 }
  0x69   : > { %5463 = vmatpush3.bf16.msra.mxu1 %v6031_v32  ;;  %5043 = vmatprep.mubr.msk.f32.mxu0 %vm360_vm0, %v6321_v38  ;;  %v6356_v32 = vld [vmem:[%s5958_s15 + $0x70] sm:$0xff] }
  0x6a   : > { %5255 = vmatprep.mubr.msk.f32.mxu1 %vm360_vm0, %v6324_v16  ;;  %5465 = vmatprep.subr.bf16.mxu1 %v5432_v19 }
  0x6c   : > { %5044 = vmatmul.mubr.msk.f32.gmra.mrb[10].mxu0 %vm360_vm0, %v6334_v21  ;;  %5256 = vmatmul.mubr.msk.f32.gmra.mrb[6].mxu1 %vm360_vm0, %v6337_v22 }
  0x6d   : > { %5046 = vmatprep.mubr.msk.f32.mxu0 %vm360_vm0, %v6342_v36  ;;  %5258 = vmatprep.mubr.msk.f32.mxu1 %vm360_vm0, %v6345_v11 }
  0x6e   : > { %5467 = vmatpush3.bf16.msra.mxu1 %v5432_v19  ;;  %v6380_v19 = vld [vmem:[%s5958_s15 + $0x158] sm:$0xff] }
  0x6f   : > { %5469 = vmatprep.subr.bf16.mxu1 %v6274_v7 }
  0x70   : > { %5047 = vmatmul.mubr.msk.f32.gmra.mrb[12].mxu0 %vm360_vm0, %v6356_v32  ;;  %5259 = vmatmul.mubr.msk.f32.gmra.mrb[8].mxu1 %vm360_vm0, %v6359_v34 }
  0x71   : > { %5049 = vmatprep.mubr.msk.f32.mxu0 %vm360_vm0, %v6362_v28  ;;  %5261 = vmatprep.mubr.msk.f32.mxu1 %vm360_vm0, %v6365_v31 }
  0x74   : > { %5050 = vmatmul.mubr.msk.f32.gmra.mrb[14].mxu0 %vm360_vm0, %v6377_v26  ;;  %5262 = vmatmul.mubr.msk.f32.gmra.mrb[10].mxu1 %vm360_vm0, %v6380_v19 }
  0x75   : > { %5052 = vmatprep.mubr.msk.f32.mxu0 %vm360_vm0, %v6383_v29  ;;  %5264 = vmatprep.mubr.msk.f32.mxu1 %vm360_vm0, %v6386_v17 }
  0x78   : > { %5053 = vmatmul.mubr.msk.f32.gmra.mrb[16].mxu0 %vm360_vm0, %v6397_v25  ;;  %5265 = vmatmul.mubr.msk.f32.gmra.mrb[12].mxu1 %vm360_vm0, %v6400_v15 }
  0x79   : > { %5055 = vmatprep.mubr.msk.f32.mxu0 %vm360_vm0, %v6403_v23  ;;  %5267 = vmatprep.mubr.msk.f32.mxu1 %vm360_vm0, %v6406_v8 }
  0x7c   : > { %5056 = vmatmul.mubr.msk.f32.gmra.mrb[18].mxu0 %vm360_vm0, %v6417_v20  ;;  %5268 = vmatmul.mubr.msk.f32.gmra.mrb[14].mxu1 %vm360_vm0, %v6420_v6 }
  0x7d   : > { %5058 = vmatprep.mubr.msk.f32.mxu0 %vm360_vm0, %v6423_v18  ;;  %5270 = vmatprep.mubr.msk.f32.mxu1 %vm360_vm0, %v6426_v4 }
  0x80   : > { %5059 = vmatmul.mubr.msk.f32.gmra.mrb[20].mxu0 %vm360_vm0, %v6437_v14  ;;  %5271 = vmatmul.mubr.msk.f32.gmra.mrb[16].mxu1 %vm360_vm0, %v6440_v2 }
  0x81   : > { %5061 = vmatprep.mubr.msk.f32.mxu0 %vm360_vm0, %v6443_v12  ;;  %5273 = vmatprep.mubr.msk.f32.mxu1 %vm360_vm0, %v6446_v0 }
  0x84   : > { %5062 = vmatmul.mubr.msk.f32.gmra.mrb[22].mxu0 %vm360_vm0, %v6457_v10  ;;  %5274 = vmatmul.mubr.msk.f32.gmra.mrb[18].mxu1 %vm360_vm0, %v6460_v62 }
  0x85   : > { %5064 = vmatprep.mubr.msk.f32.mxu0 %vm360_vm0, %v6463_v5  ;;  %5276 = vmatprep.mubr.msk.f32.mxu1 %vm360_vm0, %v6466_v60 }
  0x88   : > { %5065 = vmatmul.mubr.msk.f32.gmra.mrb[24].mxu0 %vm360_vm0, %v6477_v3  ;;  %5277 = vmatmul.mubr.msk.f32.gmra.mrb[20].mxu1 %vm360_vm0, %v6480_v58 }
  0x89   : > { %5067 = vmatprep.mubr.msk.f32.mxu0 %vm360_vm0, %v6483_v1  ;;  %5279 = vmatprep.mubr.msk.f32.mxu1 %vm360_vm0, %v6486_v56 }
  0x8c   : > { %5068 = vmatmul.mubr.msk.f32.gmra.mrb[26].mxu0 %vm360_vm0, %v6497_v63  ;;  %5280 = vmatmul.mubr.msk.f32.gmra.mrb[22].mxu1 %vm360_vm0, %v6500_v54 }
  0x8d   : > { %5070 = vmatprep.mubr.msk.f32.mxu0 %vm360_vm0, %v6503_v61  ;;  %5282 = vmatprep.mubr.msk.f32.mxu1 %vm360_vm0, %v6506_v52 }
  0x90   : > { %5071 = vmatmul.mubr.msk.f32.gmra.mrb[28].mxu0 %vm360_vm0, %v6517_v59  ;;  %5283 = vmatmul.mubr.msk.f32.gmra.mrb[24].mxu1 %vm360_vm0, %v6520_v50 }
  0x91   : > { %5073 = vmatprep.mubr.msk.f32.mxu0 %vm360_vm0, %v6523_v57  ;;  %5285 = vmatprep.mubr.msk.f32.mxu1 %vm360_vm0, %v6526_v48 }
  0x94   : > { %5074 = vmatmul.mubr.msk.f32.gmra.mrb[30].mxu0 %vm360_vm0, %v6537_v55  ;;  %5286 = vmatmul.mubr.msk.f32.gmra.mrb[26].mxu1 %vm360_vm0, %v6540_v46 }
  0x95   : > { %5084 = vmatprep.mubr.msk.f32.mxu0 %vm360_vm0, %v6302_v24  ;;  %5288 = vmatprep.mubr.msk.f32.mxu1 %vm360_vm0, %v6543_v53  ;;  %v4423_v24 = vld [vmem:[%s5958_s15 + $0x210] sm:$0xff] }
  0x98   : > { %5085 = vmatmul.mubr.msk.f32.vlgmr.msra.gmra.mrb[0].mxu0 %vm360_vm0, %v6315_v9  ;;  %5289 = vmatmul.mubr.msk.f32.gmra.mrb[28].mxu1 %vm360_vm0, %v6560_v42  ;;  %v7728_v9 = vld [vmem:[#allocation50_spill] sm:$0xff] }
  0x99   : > { %5087 = vmatprep.mubr.msk.f32.mxu0 %vm360_vm0, %v6321_v38  ;;  %5291 = vmatprep.mubr.msk.f32.mxu1 %vm360_vm0, %v6563_v49  ;;  %v4425_v38 = vld [vmem:[%s5958_s15 + $0x220] sm:$0xff] }
  0x9a   : > { %5439 = vmatpush3.bf16.msra.mxu0 %v6274_v7 }
  0x9b   : > { %5441 = vmatprep.subr.bf16.mxu0 %v5440_v40 }
  0x9c   : > { %5088 = vmatmul.mubr.msk.f32.gmra.mrb[2].mxu0 %vm360_vm0, %v6334_v21  ;;  %5292 = vmatmul.mubr.msk.f32.gmra.mrb[30].mxu1 %vm360_vm0, %v4423_v24  ;;  %v7730_v21 = vld [vmem:[#allocation51_spill] sm:$0xff] }
  0x9d   : > { %5090 = vmatprep.mubr.msk.f32.mxu0 %vm360_vm0, %v6342_v36  ;;  %5294 = vmatprep.mubr.msk.f32.mxu1 %vm360_vm0, %v4424_v47  ;;  %v7690_v36 = vld [vmem:[#allocation19_spill] sm:$0xff] }
  0x9e   : > { %5443 = vmatpush3.bf16.msra.mxu0 %v5440_v40 }
  0xa0   : > { %5091 = vmatmul.mubr.msk.f32.gmra.mrb[4].mxu0 %vm360_vm0, %v6356_v32  ;;  %5295 = vmatmul.mubr.msk.f32.gmra.mrb[32].mxu1 %vm360_vm0, %v4425_v38  ;;  %v4612_v32 = vld [vmem:[%s5958_s15 + $0x241] sm:$0xff] }
  0xa1   : > { %5093 = vmatprep.mubr.msk.f32.mxu0 %vm360_vm0, %v6362_v28  ;;  %5297 = vmatprep.mubr.msk.f32.mxu1 %vm360_vm0, %v4426_v44  ;;  %v7722_v28 = vld [vmem:[#allocation47_spill] sm:$0xff] }
  0xa4   : > { %5094 = vmatmul.mubr.msk.f32.gmra.mrb[6].mxu0 %vm360_vm0, %v6377_v26  ;;  %5298 = vmatmul.mubr.msk.f32.gmra.mrb[34].mxu1 %vm360_vm0, %v4427_v51  ;;  %v7721_v26 = vld [vmem:[#allocation11_spill] sm:$0xff] }
  0xa5   : > { %5096 = vmatprep.mubr.msk.f32.mxu0 %vm360_vm0, %v6383_v29  ;;  %5308 = vmatprep.mubr.msk.f32.mxu1 %vm360_vm0, %v6386_v17  ;;  %v4555_v29 = vld [vmem:[%s5958_s15 + $0x278] sm:$0xff]  ;;  %v7720_v17 = vld [vmem:[#allocation46_spill] sm:$0xff] }
  0xa8   : > { %5097 = vmatmul.mubr.msk.f32.gmra.mrb[8].mxu0 %vm360_vm0, %v6397_v25  ;;  %5309 = vmatmul.mubr.msk.f32.vlgmr.msra.gmra.mrb[4].mxu1 %vm360_vm0, %v6400_v15  ;;  %v4554_v25 = vld [vmem:[%s5958_s15 + $0x270] sm:$0xff] }
  0xa9   : > { %5471 = vmatpush3.bf16.msra.mxu1 %v6274_v7  ;;  %5099 = vmatprep.mubr.msk.f32.mxu0 %vm360_vm0, %v6403_v23  ;;  %v4553_v23 = vld [vmem:[%s5958_s15 + $0x268] sm:$0xff]  ;;  %v7723_v7 = vld [vmem:[#allocation12_spill] sm:$0xff] }
  0xaa   : > { %5311 = vmatprep.mubr.msk.f32.mxu1 %vm360_vm0, %v6406_v8  ;;  %5473 = vmatprep.subr.bf16.mxu1 %v5440_v40  ;;  %v7718_v8 = vld [vmem:[#allocation45_spill] sm:$0xff]  ;;  %v7719_v15 = vld [vmem:[#allocation10_spill] sm:$0xff] }
  0xac   : > { %5100 = vmatmul.mubr.msk.f32.gmra.mrb[10].mxu0 %vm360_vm0, %v6417_v20  ;;  %5312 = vmatmul.mubr.msk.f32.gmra.mrb[6].mxu1 %vm360_vm0, %v6420_v6  ;;  %v4552_v20 = vld [vmem:[%s5958_s15 + $0x260] sm:$0xff] }
  0xad   : > { %5102 = vmatprep.mubr.msk.f32.mxu0 %vm360_vm0, %v6423_v18  ;;  %5314 = vmatprep.mubr.msk.f32.mxu1 %vm360_vm0, %v6426_v4  ;;  %v4551_v18 = vld [vmem:[%s5958_s15 + $0x258] sm:$0xff]  ;;  %v7717_v6 = vld [vmem:[#allocation9_spill] sm:$0xff] }
  0xae   : > { %5475 = vmatpush3.bf16.msra.mxu1 %v5440_v40  ;;  %v7693_v40 = vld [vmem:[#allocation29_spill] sm:$0xff]  ;;  %v7715_v4 = vld [vmem:[#allocation8_spill] sm:$0xff] }
  0xb0   : > { %5103 = vmatmul.mubr.msk.f32.gmra.mrb[12].mxu0 %vm360_vm0, %v6437_v14  ;;  %5315 = vmatmul.mubr.msk.f32.gmra.mrb[8].mxu1 %vm360_vm0, %v6440_v2  ;;  %v4550_v14 = vld [vmem:[%s5958_s15 + $0x250] sm:$0xff] }
  0xb1   : > { %5105 = vmatprep.mubr.msk.f32.mxu0 %vm360_vm0, %v6443_v12  ;;  %5317 = vmatprep.mubr.msk.f32.mxu1 %vm360_vm0, %v6446_v0  ;;  %v4549_v12 = vld [vmem:[%s5958_s15 + $0x248] sm:$0xff]  ;;  %v7713_v2 = vld [vmem:[#allocation7_spill] sm:$0xff] }
  0xb2   : > { %v7711_v0 = vld [vmem:[#allocation6_spill] sm:$0xff] }
  0xb4   : > { %5106 = vmatmul.mubr.msk.f32.gmra.mrb[14].mxu0 %vm360_vm0, %v6457_v10  ;;  %5318 = vmatmul.mubr.msk.f32.gmra.mrb[10].mxu1 %vm360_vm0, %v6460_v62  ;;  %v4548_v10 = vld [vmem:[%s5958_s15 + $0x240] sm:$0xff] }
  0xb5   : > { %5108 = vmatprep.mubr.msk.f32.mxu0 %vm360_vm0, %v6463_v5  ;;  %5320 = vmatprep.mubr.msk.f32.mxu1 %vm360_vm0, %v6466_v60  ;;  %v7707_v60 = vld [vmem:[#allocation43_spill] sm:$0xff]  ;;  %v7709_v62 = vld [vmem:[#allocation5_spill] sm:$0xff]  ;;  %v7716_v5 = vld [vmem:[#allocation44_spill] sm:$0xff] }
  0xb8   : > { %5109 = vmatmul.mubr.msk.f32.gmra.mrb[16].mxu0 %vm360_vm0, %v6477_v3  ;;  %5321 = vmatmul.mubr.msk.f32.gmra.mrb[12].mxu1 %vm360_vm0, %v6480_v58  ;;  %v7705_v58 = vld [vmem:[#allocation41_spill] sm:$0xff]  ;;  %v7714_v3 = vld [vmem:[#allocation42_spill] sm:$0xff] }
  0xb9   : > { %5111 = vmatprep.mubr.msk.f32.mxu0 %vm360_vm0, %v6483_v1  ;;  %5323 = vmatprep.mubr.msk.f32.mxu1 %vm360_vm0, %v6486_v56  ;;  %v7703_v56 = vld [vmem:[#allocation39_spill] sm:$0xff]  ;;  %v7712_v1 = vld [vmem:[#allocation40_spill] sm:$0xff] }
  0xbc   : > { %5112 = vmatmul.mubr.msk.f32.gmra.mrb[18].mxu0 %vm360_vm0, %v6497_v63  ;;  %5324 = vmatmul.mubr.msk.f32.gmra.mrb[14].mxu1 %vm360_vm0, %v6500_v54  ;;  %v7710_v63 = vld [vmem:[#allocation38_spill] sm:$0xff] }
  0xbd   : > { %5114 = vmatprep.mubr.msk.f32.mxu0 %vm360_vm0, %v6503_v61  ;;  %5326 = vmatprep.mubr.msk.f32.mxu1 %vm360_vm0, %v6506_v52  ;;  %v7701_v52 = vld [vmem:[#allocation37_spill] sm:$0xff]  ;;  %v7708_v61 = vld [vmem:[#allocation36_spill] sm:$0xff] }
  0xc0   : > { %5115 = vmatmul.mubr.msk.f32.gmra.mrb[20].mxu0 %vm360_vm0, %v6517_v59  ;;  %5327 = vmatmul.mubr.msk.f32.gmra.mrb[16].mxu1 %vm360_vm0, %v6520_v50  ;;  %v7700_v50 = vld [vmem:[#allocation28_spill] sm:$0xff]  ;;  %v7706_v59 = vld [vmem:[#allocation34_spill] sm:$0xff] }
  0xc1   : > { %5117 = vmatprep.mubr.msk.f32.mxu0 %vm360_vm0, %v6523_v57  ;;  %5329 = vmatprep.mubr.msk.f32.mxu1 %vm360_vm0, %v6526_v48  ;;  %v7704_v57 = vld [vmem:[#allocation32_spill] sm:$0xff] }
  0xc4   : > { %5118 = vmatmul.mubr.msk.f32.gmra.mrb[22].mxu0 %vm360_vm0, %v6537_v55  ;;  %5330 = vmatmul.mubr.msk.f32.gmra.mrb[18].mxu1 %vm360_vm0, %v6540_v46  ;;  %v7698_v46 = vld [vmem:[#allocation26_spill] sm:$0xff] }
  0xc5   : > { %5120 = vmatprep.mubr.msk.f32.mxu0 %vm360_vm0, %v6305_v27  ;;  %5332 = vmatprep.mubr.msk.f32.mxu1 %vm360_vm0, %v6543_v53  ;;  %v7702_v53 = vld [vmem:[#allocation30_spill] sm:$0xff] }
  0xc6   : > { %v7727_v27 = vld [vmem:[#allocation14_spill] sm:$0xff] }
  0xc8   : > { %5121 = vmatmul.mubr.msk.f32.gmra.mrb[24].mxu0 %vm360_vm0, %v6318_v13  ;;  %5333 = vmatmul.mubr.msk.f32.gmra.mrb[20].mxu1 %vm360_vm0, %v6560_v42  ;;  %v7695_v42 = vld [vmem:[#allocation31_spill] sm:$0xff] }
  0xc9   : > { %5123 = vmatprep.mubr.msk.f32.mxu0 %vm360_vm0, %v6324_v16  ;;  %5335 = vmatprep.mubr.msk.f32.mxu1 %vm360_vm0, %v6563_v49  ;;  %v7699_v49 = vld [vmem:[#allocation35_spill] sm:$0xff]  ;;  %v7725_v16 = vld [vmem:[#allocation13_spill] sm:$0xff] }
  0xca   : > { %v7729_v13 = vld [vmem:[#allocation15_spill] sm:$0xff] }
  0xcc   : > { %5124 = vmatmul.mubr.msk.f32.gmra.mrb[26].mxu0 %vm360_vm0, %v6337_v22  ;;  %5336 = vmatmul.mubr.msk.f32.gmra.mrb[22].mxu1 %vm360_vm0, %v4423_v24  ;;  %v7726_v22 = vld [vmem:[#allocation49_spill] sm:$0xff]  ;;  %v7732_v24 = vld [vmem:[#allocation52_spill] sm:$0xff] }
  0xcd   : > { %5126 = vmatprep.mubr.msk.f32.mxu0 %vm360_vm0, %v6345_v11  ;;  %5338 = vmatprep.mubr.msk.f32.mxu1 %vm360_vm0, %v4424_v47  ;;  %v7724_v11 = vld [vmem:[#allocation48_spill] sm:$0xff] }
  0xd0   : > { %5127 = vmatmul.mubr.msk.f32.gmra.mrb[28].mxu0 %vm360_vm0, %v6359_v34  ;;  %5339 = vmatmul.mubr.msk.f32.gmra.mrb[24].mxu1 %vm360_vm0, %v4425_v38  ;;  %v7688_v34 = vld [vmem:[#allocation18_spill] sm:$0xff] }
  0xd1   : > { %5129 = vmatprep.mubr.msk.f32.mxu0 %vm360_vm0, %v6365_v31  ;;  %5341 = vmatprep.mubr.msk.f32.mxu1 %vm360_vm0, %v4426_v44  ;;  %v7686_v31 = vld [vmem:[#allocation17_spill] sm:$0xff]  ;;  %v4614_v44 = vld [vmem:[%s5958_s15 + $0x251] sm:$0xff] }
  0xd2   : > { %v4613_v38 = vld [vmem:[%s5958_s15 + $0x249] sm:$0xff] }
  0xd4   : > { %5130 = vmatmul.mubr.msk.f32.gmra.mrb[30].mxu0 %vm360_vm0, %v6380_v19  ;;  %5342 = vmatmul.mubr.msk.f32.gmra.mrb[26].mxu1 %vm360_vm0, %v4427_v51  ;;  %v7731_v19 = vld [vmem:[#allocation16_spill] sm:$0xff] }
  0xd5   : > { %5140 = vmatprep.mubr.msk.f32.mxu0 %vm360_vm0, %v6026_v30  ;;  %5344 = vmatprep.mubr.msk.f32.mxu1 %vm360_vm0, %v4548_v10  ;;  %v7685_v30 = vld [vmem:[#allocation21_spill] sm:$0xff]  ;;  %v4615_v51 = vld [vmem:[%s5958_s15 + $0x259] sm:$0xff] }
  0xd6   : > { %v4616_v10 = vld [vmem:[%s5958_s15 + $0x261] sm:$0xff] }
  0xd8   : > { %5141 = vmatmul.mubr.msk.f32.vlgmr.msra.gmra.mrb[0].mxu0 %vm360_vm0, %v6041_v33  ;;  %5345 = vmatmul.mubr.msk.f32.gmra.mrb[28].mxu1 %vm360_vm0, %v4549_v12  ;;  %v7687_v33 = vld [vmem:[#allocation23_spill] sm:$0xff]  ;;  %v4617_v12 = vld [vmem:[%s5958_s15 + $0x269] sm:$0xff] }
  0xd9   : > { %5143 = vmatprep.mubr.msk.f32.mxu0 %vm360_vm0, %v6047_v35  ;;  %5347 = vmatprep.mubr.msk.f32.mxu1 %vm360_vm0, %v4550_v14  ;;  %v7689_v35 = vld [vmem:[#allocation25_spill] sm:$0xff]  ;;  %v4618_v14 = vld [vmem:[%s5958_s15 + $0x271] sm:$0xff] }
  0xdc   : > { %5144 = vmatmul.mubr.msk.f32.gmra.mrb[2].mxu0 %vm360_vm0, %v6063_v37  ;;  %5348 = vmatmul.mubr.msk.f32.gmra.mrb[30].mxu1 %vm360_vm0, %v4551_v18  ;;  %v7691_v37 = vld [vmem:[#allocation27_spill] sm:$0xff] }
  0xdd   : > { %5146 = vmatprep.mubr.msk.f32.mxu0 %vm360_vm0, %v6069_v39  ;;  %5350 = vmatprep.mubr.msk.f32.mxu1 %vm360_vm0, %v4552_v20  ;;  %v7692_v39 = vld [vmem:[#allocation20_spill] sm:$0xff]  ;;  %v4653_v20 = vld [vmem:[%s7575_s3 + $0x88] sm:$0xff] }
  0xde   : > { %v4619_v18 = vld [vmem:[%s5958_s15 + $0x279] sm:$0xff] }
  0xe0   : > { %5147 = vmatmul.mubr.msk.f32.gmra.mrb[4].mxu0 %vm360_vm0, %v6083_v41  ;;  %5351 = vmatmul.mubr.msk.f32.gmra.mrb[32].mxu1 %vm360_vm0, %v4553_v23  ;;  %v7694_v41 = vld [vmem:[#allocation22_spill] sm:$0xff]  ;;  %v4655_v23 = vld [vmem:[%s7575_s3 + $0x98] sm:$0xff] }
  0xe1   : > { %5149 = vmatprep.mubr.msk.f32.mxu0 %vm360_vm0, %v6089_v43  ;;  %5353 = vmatprep.mubr.msk.f32.mxu1 %vm360_vm0, %v4554_v25  ;;  %v7696_v43 = vld [vmem:[#allocation24_spill] sm:$0xff] }
  0xe2   : > { %v4652_v25 = vld [vmem:[%s7575_s3 + $0x80] sm:$0xff] }
  0xe4   : > { %5150 = vmatmul.mubr.msk.f32.gmra.mrb[6].mxu0 %vm360_vm0, %v6103_v45  ;;  %5354 = vmatmul.mubr.msk.f32.gmra.mrb[34].mxu1 %vm360_vm0, %v4555_v29  ;;  %v7697_v45 = vld [vmem:[#allocation33_spill] sm:$0xff]  ;;  %v5476_v29 = vpack.c.bf16 %v4655_v23, %v4653_v20 }
  0xe5   : > { %5152 = vmatprep.mubr.msk.f32.mxu0 %vm360_vm0, %v7685_v30  ;;  %5364 = vmatprep.mubr.msk.f32.mxu1 %vm360_vm0, %v7686_v31  ;;  %v4654_v30 = vld [vmem:[%s7575_s3 + $0x90] sm:$0xff] }
  0xe6   : > { %v5478_v31 = vpack.c.bf16 %v4654_v30, %v4652_v25  ;;  %5477 = vmatprep.subr.bf16.mxu0 %v5476_v29 }
  0xe8   : > { %5153 = vmatmul.mubr.msk.f32.gmra.mrb[8].mxu0 %vm360_vm0, %v7687_v33  ;;  %5365 = vmatmul.mubr.msk.f32.vlgmr.msra.gmra.mrb[4].mxu1 %vm360_vm0, %v7688_v34  ;;  %v4657_v33 = vld [vmem:[%s7575_s3 + $0xa8] sm:$0xff]  ;;  %v4659_v34 = vld [vmem:[%s7575_s3 + $0xb8] sm:$0xff] }
  0xe9   : > { %5155 = vmatprep.mubr.msk.f32.mxu0 %vm360_vm0, %v7689_v35  ;;  %5367 = vmatprep.mubr.msk.f32.mxu1 %vm360_vm0, %v7690_v36  ;;  %v4656_v35 = vld [vmem:[%s7575_s3 + $0xa0] sm:$0xff]  ;;  %v5480_v36 = vpack.c.bf16 %v4659_v34, %v4657_v33 }
  0xea   : > { %5479 = vmatpush1.bf16.msra.mxu0 %v5478_v31 }
  0xeb   : > { %5481 = vmatprep.subr.bf16.mxu0 %v5480_v36 }
  0xec   : > { %5156 = vmatmul.mubr.msk.f32.gmra.mrb[10].mxu0 %vm360_vm0, %v7691_v37  ;;  %5368 = vmatmul.mubr.msk.f32.gmra.mrb[6].mxu1 %vm360_vm0, %v7692_v39  ;;  %v4658_v37 = vld [vmem:[%s7575_s3 + $0xb0] sm:$0xff] }
  0xed   : > { %5158 = vmatprep.mubr.msk.f32.mxu0 %vm360_vm0, %v7693_v40  ;;  %5370 = vmatprep.mubr.msk.f32.mxu1 %vm360_vm0, %v7694_v41  ;;  %v5482_v39 = vpack.c.bf16 %v4658_v37, %v4656_v35  ;;  %v4661_v40 = vld [vmem:[%s7575_s3 + $0xc8] sm:$0xff]  ;;  %v4663_v41 = vld [vmem:[%s7575_s3 + $0xd8] sm:$0xff] }
  0xef   : > { %5483 = vmatpush1.bf16.msra.mxu0 %v5482_v39 }
  0xf0   : > { %5159 = vmatmul.mubr.msk.f32.gmra.mrb[12].mxu0 %vm360_vm0, %v7695_v42  ;;  %5371 = vmatmul.mubr.msk.f32.gmra.mrb[8].mxu1 %vm360_vm0, %v7696_v43  ;;  %v5484_v42 = vpack.c.bf16 %v4663_v41, %v4661_v40  ;;  %v4660_v43 = vld [vmem:[%s7575_s3 + $0xc0] sm:$0xff] }
  0xf1   : > { %5161 = vmatprep.mubr.msk.f32.mxu0 %vm360_vm0, %v7697_v45  ;;  %5373 = vmatprep.mubr.msk.f32.mxu1 %vm360_vm0, %v7698_v46  ;;  %v4662_v45 = vld [vmem:[%s7575_s3 + $0xd0] sm:$0xff] }
  0xf2   : > { %v5486_v46 = vpack.c.bf16 %v4662_v45, %v4660_v43  ;;  %5485 = vmatprep.subr.bf16.mxu0 %v5484_v42 }
  0xf3   : > { %v6746_v47 = vpop.f32.mrb[0].mxu1 }
  0xf4   : > { %v6748_v48 = vpop.f32.mrb[1].mxu1  ;;  %5162 = vmatmul.mubr.msk.f32.gmra.mrb[14].mxu0 %vm360_vm0, %v7699_v49  ;;  %5374 = vmatmul.mubr.msk.f32.gmra.mrb[10].mxu1 %vm360_vm0, %v7700_v50 }
  0xf5   : > { %5164 = vmatprep.mubr.msk.f32.mxu0 %vm360_vm0, %v7701_v52  ;;  %5376 = vmatprep.mubr.msk.f32.mxu1 %vm360_vm0, %v7702_v53 }
  0xf6   : > { %5487 = vmatpush1.bf16.msra.mxu0 %v5486_v46 }
  0xf7   : > { %v6758_v54 = vpop.f32.mrb[2].mxu1 }
  0xf8   : > { %v6760_v55 = vpop.f32.mrb[3].mxu1  ;;  %5165 = vmatmul.mubr.msk.f32.gmra.mrb[16].mxu0 %vm360_vm0, %v7703_v56  ;;  %5377 = vmatmul.mubr.msk.f32.gmra.mrb[12].mxu1 %vm360_vm0, %v7704_v57 }
  0xf9   : > { %5167 = vmatprep.mubr.msk.f32.mxu0 %vm360_vm0, %v7705_v58  ;;  %5379 = vmatprep.mubr.msk.f32.mxu1 %vm360_vm0, %v7706_v59  ;;  %v4665_v59 = vld [vmem:[%s7575_s3 + $0xe8] sm:$0xff] }
  0xfc   : > { %5168 = vmatmul.mubr.msk.f32.gmra.mrb[18].mxu0 %vm360_vm0, %v7707_v60  ;;  %5380 = vmatmul.mubr.msk.f32.gmra.mrb[14].mxu1 %vm360_vm0, %v7708_v61  ;;  %v4667_v60 = vld [vmem:[%s7575_s3 + $0xf8] sm:$0xff] }
  0xfd   : > { %5170 = vmatprep.mubr.msk.f32.mxu0 %vm360_vm0, %v7709_v62  ;;  %5382 = vmatprep.mubr.msk.f32.mxu1 %vm360_vm0, %v7710_v63  ;;  %v5488_v62 = vpack.c.bf16 %v4667_v60, %v4665_v59  ;;  %v4664_v63 = vld [vmem:[%s7575_s3 + $0xe0] sm:$0xff] }
  0xff   : > { %5489 = vmatprep.subr.bf16.mxu0 %v5488_v62 }
 0x100   : > { %5171 = vmatmul.mubr.msk.f32.gmra.mrb[20].mxu0 %vm360_vm0, %v7711_v0  ;;  %5383 = vmatmul.mubr.msk.f32.gmra.mrb[16].mxu1 %vm360_vm0, %v7712_v1  ;;  %v4666_v0 = vld [vmem:[%s7575_s3 + $0xf0] sm:$0xff] }
 0x101   : > { %5173 = vmatprep.mubr.msk.f32.mxu0 %vm360_vm0, %v7713_v2  ;;  %5385 = vmatprep.mubr.msk.f32.mxu1 %vm360_vm0, %v7714_v3  ;;  %v5490_v1 = vpack.c.bf16 %v4666_v0, %v4664_v63 }
 0x103   : > { %5491 = vmatpush1.bf16.msra.mxu0 %v5490_v1 }
 0x104   : > { %5174 = vmatmul.mubr.msk.f32.gmra.mrb[22].mxu0 %vm360_vm0, %v7715_v4  ;;  %5386 = vmatmul.mubr.msk.f32.gmra.mrb[18].mxu1 %vm360_vm0, %v7716_v5  ;;  %v2007_v4 = vld [vmem:[%s7575_s3 + $0x8] sm:$0xff]  ;;  %v2009_v5 = vld [vmem:[%s7575_s3 + $0x18] sm:$0xff] }
 0x105   : > { %5176 = vmatprep.mubr.msk.f32.mxu0 %vm360_vm0, %v7717_v6  ;;  %5388 = vmatprep.mubr.msk.f32.mxu1 %vm360_vm0, %v7718_v8 }
 0x108   : > { %5177 = vmatmul.mubr.msk.f32.gmra.mrb[24].mxu0 %vm360_vm0, %v7719_v15  ;;  %5389 = vmatmul.mubr.msk.f32.gmra.mrb[20].mxu1 %vm360_vm0, %v7720_v17 }
 0x109   : > { %5179 = vmatprep.mubr.msk.f32.mxu0 %vm360_vm0, %v7721_v26  ;;  %5391 = vmatprep.mubr.msk.f32.mxu1 %vm360_vm0, %v7722_v28  ;;  %v5492_v26 = vpack.c.bf16 %v2009_v5, %v2007_v4  ;;  %v4023_v4 = vld [vmem:[%s7577_s5 + $0x8] sm:$0xff]  ;;  %v4024_v5 = vld [vmem:[%s7577_s5 + $0x10] sm:$0xff] }
 0x10b   : > { %5493 = vmatprep.subr.bf16.mxu0 %v5492_v26 }
 0x10c   : > { %5180 = vmatmul.mubr.msk.f32.gmra.mrb[26].mxu0 %vm360_vm0, %v7723_v7  ;;  %5392 = vmatmul.mubr.msk.f32.gmra.mrb[22].mxu1 %vm360_vm0, %v7724_v11 }
 0x10d   : > { %5182 = vmatprep.mubr.msk.f32.mxu0 %vm360_vm0, %v7725_v16  ;;  %5394 = vmatprep.mubr.msk.f32.mxu1 %vm360_vm0, %v7726_v22  ;;  %v7628_v22 = vmov 0.0  }
 0x110   : > { %5183 = vmatmul.mubr.msk.f32.gmra.mrb[28].mxu0 %vm360_vm0, %v7727_v27  ;;  %5395 = vmatmul.mubr.msk.f32.gmra.mrb[24].mxu1 %vm360_vm0, %v7728_v9 }
 0x111   : > { %5185 = vmatprep.mubr.msk.f32.mxu0 %vm360_vm0, %v7729_v13  ;;  %5397 = vmatprep.mubr.msk.f32.mxu1 %vm360_vm0, %v7730_v21 }
 0x114   : > { %5186 = vmatmul.mubr.msk.f32.gmra.mrb[30].mxu0 %vm360_vm0, %v7731_v19  ;;  %5398 = vmatmul.mubr.msk.f32.gmra.mrb[26].mxu1 %vm360_vm0, %v7732_v24 }
 0x115   : > { %5400 = vmatprep.mubr.msk.f32.mxu1 %vm360_vm0, %v4612_v32  ;;  %3860 = vmatprep.mubr.f32.mxu0 %v7628_v22 }
 0x118   : > { %5401 = vmatmul.mubr.msk.f32.gmra.mrb[28].mxu1 %vm360_vm0, %v4613_v38 }
 0x119   : > { %5403 = vmatprep.mubr.msk.f32.mxu1 %vm360_vm0, %v4614_v44 }
 0x11c   : > { %5404 = vmatmul.mubr.msk.f32.gmra.mrb[30].mxu1 %vm360_vm0, %v4615_v51 }
 0x11d   : > { %5406 = vmatprep.mubr.msk.f32.mxu1 %vm360_vm0, %v4616_v10 }
 0x120   : > { %5407 = vmatmul.mubr.msk.f32.gmra.mrb[32].mxu1 %vm360_vm0, %v4617_v12 }
 0x121   : > { %5409 = vmatprep.mubr.msk.f32.mxu1 %vm360_vm0, %v4618_v14 }
 0x124   : > { %5410 = vmatmul.mubr.msk.f32.gmra.mrb[34].mxu1 %vm360_vm0, %v4619_v18 }
 0x1ab   : > { %v5142_v49 = vpop.f32.mrb[0].mxu0 }
 0x1ac   : > { %v1583_v50 = vpop.f32.mrb[1].mxu0  ;;  %v1782_v6 = vsel %vm1774_vm1, %v5142_v49, -inf }
 0x1ad   : > { %v1775_v28 = vsel %vm1774_vm1, %v1583_v50, -inf }
 0x1af   : > { %v5145_v52 = vpop.f32.mrb[2].mxu0 }
 0x1b0   : > { %v1593_v53 = vpop.f32.mrb[3].mxu0  ;;  %v1796_v13 = vsel %vm1774_vm1, %v5145_v52, -inf }
 0x1b1   : > { %v1789_v24 = vsel %vm1774_vm1, %v1593_v53, -inf }
 0x1b3   : > { %v5148_v56 = vpop.f32.mrb[4].mxu0 }
 0x1b4   : > { %v1603_v57 = vpop.f32.mrb[5].mxu0  ;;  %v6902_v14 = vsel %vm1774_vm1, %v5148_v56, -inf }
 0x1b5   : > { %v6908_v25 = vsel %vm1774_vm1, %v1603_v57, -inf }
 0x1b7   : > { %v5151_v58 = vpop.f32.mrb[6].mxu0 }
 0x1b8   : > { %v1613_v61 = vpop.f32.mrb[7].mxu0  ;;  %v6920_v35 = vsel %vm1774_vm1, %v5151_v58, -inf }
 0x1b9   : > { %v6928_v40 = vsel %vm1774_vm1, %v1613_v61, -inf }
 0x1bb   : > { %v5154_v2 = vpop.f32.mrb[8].mxu0  ;;  %v5366_v3 = vpop.f32.mrb[4].mxu1 }
 0x1bc   : > { %v1783_v8 = vsel %vm1774_vm1, %v5154_v2, -inf  ;;  %v1623_v15 = vpop.f32.mrb[9].mxu0  ;;  %v3309_v17 = vpop.f32.mrb[5].mxu1  ;;  %v6938_v49 = vsel %vm1774_vm1, %v5366_v3, -inf  ;;  %v4022_v3 = vld [vmem:[%s7577_s5] sm:$0xff] }
 0x1bd   : > { %v1784_v7 = vmax.f32 %v1782_v6, %v1783_v8  ;;  %v1776_v11 = vsel %vm1774_vm1, %v1623_v15, -inf  ;;  %v6941_v50 = vsel %vm1774_vm1, %v3309_v17, -inf }
 0x1be   : > { %v1777_v16 = vmax.f32 %v1775_v28, %v1776_v11  ;;  %v7630_v28 = vmov 0.0|0.0   ;;  %v4025_v11 = vld [vmem:[%s7577_s5 + $0x18] sm:$0xff] }
 0x1bf   : > { %v5157_v27 = vpop.f32.mrb[10].mxu0  ;;  %v5369_v9 = vpop.f32.mrb[6].mxu1  ;;  %5508 = vmatprep.subr.bf16.mxu1 %v7630_v28 }
 0x1c0   : > { %v1797_v21 = vsel %vm1774_vm1, %v5157_v27, -inf  ;;  %v1633_v32 = vpop.f32.mrb[11].mxu0  ;;  %v3319_v19 = vpop.f32.mrb[7].mxu1  ;;  %v6956_v62 = vsel %vm1774_vm1, %v5369_v9, -inf }
 0x1c1   : > { %v1798_v38 = vmax.f32 %v1796_v13, %v1797_v21  ;;  %v1790_v44 = vsel %vm1774_vm1, %v1633_v32, -inf  ;;  %v6972_v6 = vsel %vm1774_vm1, %v3319_v19, -inf  ;;  %v5512_v19 = vpack.c.bf16 %v4025_v11, %v4024_v5  ;;  %v7081_v11 = vld [vmem:[%s7575_s3 + $0x38] sm:$0xff] }
 0x1c2   : > { %v1791_v51 = vmax.f32 %v1789_v24, %v1790_v44 }
 0x1c3   : > { %v5160_v10 = vpop.f32.mrb[12].mxu0  ;;  %v5372_v12 = vpop.f32.mrb[8].mxu1 }
 0x1c4   : > { %v6905_v18 = vsel %vm1774_vm1, %v5160_v10, -inf  ;;  %v1643_v20 = vpop.f32.mrb[13].mxu0  ;;  %v3329_v23 = vpop.f32.mrb[9].mxu1  ;;  %v4027_v10 = vld [vmem:[%s7577_s5 + $0x28] sm:$0xff] }
 0x1c5   : > { %v1812_v29 = vmax.f32 %v6902_v14, %v6905_v18  ;;  %v6913_v30 = vsel %vm1774_vm1, %v1643_v20, -inf  ;;  %v7005_v14 = vsel %vm1774_vm1, %v3329_v23, -inf }
 0x1c6   : > { %v1805_v31 = vmax.f32 %v6908_v25, %v6913_v30 }
 0x1c7   : > { %v5163_v33 = vpop.f32.mrb[14].mxu0  ;;  %v6917_v34 = vpop.f32.mrb[10].mxu1 }
 0x1c8   : > { %v6923_v36 = vsel %vm1774_vm1, %v5163_v33, -inf  ;;  %v1653_v37 = vpop.f32.mrb[15].mxu0  ;;  %v6925_v39 = vpop.f32.mrb[11].mxu1  ;;  %v7035_v25 = vsel %vm1774_vm1, %v6917_v34, -inf }
 0x1c9   : > { %v1826_v41 = vmax.f32 %v6920_v35, %v6923_v36  ;;  %v6933_v42 = vsel %vm1774_vm1, %v1653_v37, -inf  ;;  %v7039_v30 = vsel %vm1774_vm1, %v6925_v39, -inf }
 0x1ca   : > { %v1819_v43 = vmax.f32 %v6928_v40, %v6933_v42 }
 0x1cb   : > { %v5166_v45 = vpop.f32.mrb[16].mxu0  ;;  %v5378_v46 = vpop.f32.mrb[12].mxu1 }
 0x1cc   : > { %v1785_v52 = vsel %vm1774_vm1, %v5166_v45, -inf  ;;  %v6945_v53 = vsel %vm1774_vm1, %v5378_v46, -inf  ;;  %v1663_v56 = vpop.f32.mrb[17].mxu0  ;;  %v3349_v57 = vpop.f32.mrb[13].mxu1 }
 0x1cd   : > { %v6947_v58 = vmax.f32 %v1784_v7, %v1785_v52  ;;  %v3509_v59 = vmax.f32 %v6938_v49, %v6945_v53  ;;  %v1778_v60 = vsel %vm1774_vm1, %v1663_v56, -inf  ;;  %v6953_v61 = vsel %vm1774_vm1, %v3349_v57, -inf }
 0x1ce   : > { %v6958_v63 = vmax.f32 %v1777_v16, %v1778_v60  ;;  %v3502_v0 = vmax.f32 %v6941_v50, %v6953_v61  ;;  %v5509_v7 = vpack.c.bf16 %v4023_v4, %v4022_v3 }
 0x1cf   : > { %v5169_v1 = vpop.f32.mrb[18].mxu0  ;;  %v5381_v2 = vpop.f32.mrb[14].mxu1 }
 0x1d0   : > { %v1799_v8 = vsel %vm1774_vm1, %v5169_v1, -inf  ;;  %v6976_v15 = vsel %vm1774_vm1, %v5381_v2, -inf  ;;  %v1673_v17 = vpop.f32.mrb[19].mxu0  ;;  %v3359_v26 = vpop.f32.mrb[15].mxu1  ;;  %5510 = vmatpush1.bf16.msra.mxu1 %v5509_v7  ;;  %v4028_v1 = vld [vmem:[%s7577_s5 + $0x30] sm:$0xff]  ;;  %v4029_v2 = vld [vmem:[%s7577_s5 + $0x38] sm:$0xff] }
 0x1d1   : > { %v6982_v16 = vmax.f32 %v1798_v38, %v1799_v8  ;;  %v3523_v27 = vmax.f32 %v6956_v62, %v6976_v15  ;;  %v1792_v9 = vsel %vm1774_vm1, %v1673_v17, -inf  ;;  %v6988_v13 = vsel %vm1774_vm1, %v3359_v26, -inf  ;;  %5511 = vmatprep.subr.bf16.mxu1 %v7630_v28  ;;  %v4026_v38 = vld [vmem:[%s7577_s5 + $0x20] sm:$0xff]  ;;  %v7064_v7 = vld [vmem:[%s7575_s3 + $0x10] sm:$0xff] }
 0x1d2   : > { %v6990_v21 = vmax.f32 %v1791_v51, %v1792_v9  ;;  %v7002_v51 = vsel %vm1774_vm1, %v5372_v12, -inf  ;;  %v5515_v57 = vpack.c.bf16 %v4027_v10, %v4026_v38  ;;  %v7059_v26 = vld [vmem:[%s7575_s3] sm:$0xff]  ;;  %v5518_v40 = vpack.c.bf16 %v4029_v2, %v4028_v1 }
 0x1d3   : > { %v5172_v24 = vpop.f32.mrb[20].mxu0  ;;  %v5384_v44 = vpop.f32.mrb[16].mxu1  ;;  %v7086_v9 = vld [vmem:[%s7575_s3 + $0x20] sm:$0xff] }
 0x1d4   : > { %v1813_v18 = vsel %vm1774_vm1, %v5172_v24, -inf  ;;  %v7009_v20 = vsel %vm1774_vm1, %v5384_v44, -inf  ;;  %v1683_v33 = vpop.f32.mrb[21].mxu0  ;;  %v3369_v37 = vpop.f32.mrb[17].mxu1  ;;  %5513 = vmatpush1.bf16.msra.mxu1 %v5512_v19  ;;  %7734 = vst [vmem:[#allocation17_spill] sm:$0xff] %v7086_v9  ;;  %v7091_v19 = vld [vmem:[%s7575_s3 + $0x30] sm:$0xff] }
 0x1d5   : > { %v7011_v45 = vmax.f32 %v1812_v29, %v1813_v18  ;;  %v1806_v52 = vsel %vm1774_vm1, %v1683_v33, -inf  ;;  %v7017_v12 = vsel %vm1774_vm1, %v3369_v37, -inf  ;;  %5514 = vmatprep.subr.bf16.mxu1 %v7630_v28  ;;  %7735 = vst [vmem:[#allocation23_spill] sm:$0xff] %v7091_v19  ;;  %v4030_v24 = vld [vmem:[%s7577_s5 + $0x40] sm:$0xff]  ;;  %v4031_v44 = vld [vmem:[%s7577_s5 + $0x48] sm:$0xff] }
 0x1d6   : > { %v7022_v23 = vmax.f32 %v1805_v31, %v1806_v52  ;;  %v4032_v52 = vld [vmem:[%s7577_s5 + $0x50] sm:$0xff] }
 0x1d7   : > { %v5175_v29 = vpop.f32.mrb[22].mxu0  ;;  %v5387_v60 = vpop.f32.mrb[18].mxu1 }
 0x1d8   : > { %v1827_v31 = vsel %vm1774_vm1, %v5175_v29, -inf  ;;  %v7043_v3 = vsel %vm1774_vm1, %v5387_v60, -inf  ;;  %v1693_v4 = vpop.f32.mrb[23].mxu0  ;;  %v3379_v5 = vpop.f32.mrb[19].mxu1  ;;  %5516 = vmatpush1.bf16.msra.mxu1 %v5515_v57  ;;  %v4033_v57 = vld [vmem:[%s7577_s5 + $0x58] sm:$0xff] }
 0x1d9   : > { %v7048_v8 = vmax.f32 %v1826_v41, %v1827_v31  ;;  %v1820_v17 = vsel %vm1774_vm1, %v1693_v4, -inf  ;;  %v7054_v39 = vsel %vm1774_vm1, %v3379_v5, -inf  ;;  %v7076_v41 = vld [vmem:[%s7575_s3 + $0x28] sm:$0xff]  ;;  %5517 = vmatprep.subr.bf16.mxu1 %v7630_v28 }
 0x1da   : > { %v7069_v35 = vmax.f32 %v1819_v43, %v1820_v17  ;;  %7733 = vst [vmem:[#allocation21_spill] sm:$0xff] %v7076_v41 }
 0x1db   : > { %v5178_v42 = vpop.f32.mrb[24].mxu0  ;;  %v5390_v43 = vpop.f32.mrb[20].mxu1 }
 0x1dc   : > { %v1787_v38 = vsel %vm1774_vm1, %v5178_v42, -inf  ;;  %v3510_v10 = vsel %vm1774_vm1, %v5390_v43, -inf  ;;  %v1703_v18 = vpop.f32.mrb[25].mxu0  ;;  %v3389_v33 = vpop.f32.mrb[21].mxu1  ;;  %5519 = vmatpush1.bf16.msra.mxu1 %v5518_v40 }
 0x1dd   : > { %v1788_v29 = vmax.f32 %v6947_v58, %v1787_v38  ;;  %v7114_v60 = vmax.f32 %v3509_v59, %v3510_v10  ;;  %v1780_v1 = vsel %vm1774_vm1, %v1703_v18, -inf  ;;  %v3503_v2 = vsel %vm1774_vm1, %v3389_v33, -inf  ;;  %5520 = vmatprep.subr.bf16.mxu1 %v7630_v28 }
 0x1de   : > { %v1781_v31 = vmax.f32 %v6958_v63, %v1780_v1  ;;  %v7122_v4 = vmax.f32 %v3502_v0, %v3503_v2  ;;  %v5521_v58 = vpack.c.bf16 %v4031_v44, %v4030_v24  ;;  %v5524_v63 = vpack.c.bf16 %v4033_v57, %v4032_v52 }
 0x1df   : > { %v1840_v17 = vcombine.high %v1788_v29, %v1788_v29  ;;  %v1870_v49 = vsel %vm1855_vm2, %v1788_v29, -inf  ;;  %v5181_v53 = vpop.f32.mrb[26].mxu0  ;;  %v5393_v59 = vpop.f32.mrb[22].mxu1 }
 0x1e0   : > { %v1871_v43 = vrot.slane %v1870_v49, 4  ;;  %v1839_v50 = vcombine.high %v1781_v31, %v1781_v31  ;;  %v1856_v61 = vsel %vm1855_vm2, %v1781_v31, -inf  ;;  %v1801_v0 = vsel %vm1774_vm1, %v5181_v53, -inf  ;;  %v1713_v38 = vpop.f32.mrb[27].mxu0  ;;  %v7132_v40 = vpop.f32.mrb[23].mxu1  ;;  %5522 = vmatpush1.bf16.msra.mxu1 %v5521_v58 }
 0x1e1   : > { %v1877_v24 = vsel %vm1855_vm2, %v1840_v17, -inf  ;;  %v1857_v44 = vrot.slane %v1856_v61, 4  ;;  %v1802_v10 = vmax.f32 %v6982_v16, %v1801_v0  ;;  %v3524_v18 = vsel %vm1774_vm1, %v5393_v59, -inf  ;;  %5523 = vmatprep.subr.bf16.mxu1 %v7630_v28 }
 0x1e2   : > { %v1872_v33 = vmax.f32 %v1870_v49, %v1871_v43  ;;  %v1878_v29 = vrot.slane %v1877_v24, 4  ;;  %v1863_v52 = vsel %vm1855_vm2, %v1839_v50, -inf  ;;  %v7141_v57 = vmax.f32 %v3523_v27, %v3524_v18 }
 0x1e3   : > { %v1858_v1 = vmax.f32 %v1856_v61, %v1857_v44  ;;  %v1864_v2 = vrot.slane %v1863_v52, 4  ;;  %v1842_v31 = vcombine.high %v1802_v10, %v1802_v10  ;;  %v1898_v17 = vsel %vm1855_vm2, %v1802_v10, -inf  ;;  %v7144_v53 = vpop.f32.mrb[28].mxu0  ;;  %v7146_v16 = vpop.f32.mrb[24].mxu1 }
 0x1e4   : > { %v1873_v49 = vrot.slane %v1872_v33, 2  ;;  %v1879_v59 = vmax.f32 %v1877_v24, %v1878_v29  ;;  %v1899_v43 = vrot.slane %v1898_v17, 4  ;;  %v1794_v50 = vsel %vm1774_vm1, %v1713_v38, -inf  ;;  %v7150_v62 = vpop.f32.mrb[29].mxu0  ;;  %v7152_v15 = vpop.f32.mrb[25].mxu1  ;;  %5525 = vmatpush1.bf16.msra.mxu1 %v5524_v63 }
 0x1e5   : > { %v1859_v27 = vrot.slane %v1858_v1, 2  ;;  %v1865_v58 = vmax.f32 %v1863_v52, %v1864_v2  ;;  %v1905_v61 = vsel %vm1855_vm2, %v1842_v31, -inf  ;;  %v1795_v0 = vmax.f32 %v6990_v21, %v1794_v50  ;;  %5526 = vmatprep.subr.bf16.mxu1 %v7630_v28  ;;  %v7169_v63 = vld [vmem:[%s7574_s2] ss:$0 sm:$0xff] }
 0x1e6   : > { %v1874_v44 = vmax.f32 %v1872_v33, %v1873_v49  ;;  %v1880_v10 = vrot.slane %v1879_v59, 2  ;;  %v1900_v18 = vmax.f32 %v1898_v17, %v1899_v43  ;;  %v1906_v42 = vrot.slane %v1905_v61, 4 }
 0x1e7   : > { %v1860_v5 = vmax.f32 %v1858_v1, %v1859_v27  ;;  %v1866_v24 = vrot.slane %v1865_v58, 2  ;;  %v1841_v29 = vcombine.high %v1795_v0, %v1795_v0  ;;  %v1884_v38 = vsel %vm1855_vm2, %v1795_v0, -inf  ;;  %v7157_v22 = vpop.f32.mrb[30].mxu0  ;;  %v7159_v37 = vpop.f32.mrb[26].mxu1 }
 0x1e8   : > { %v1875_v52 = vrot.slane %v1874_v44, 1  ;;  %v1881_v2 = vmax.f32 %v1879_v59, %v1880_v10  ;;  %v1901_v31 = vrot.slane %v1900_v18, 2  ;;  %v1907_v21 = vmax.f32 %v1905_v61, %v1906_v42  ;;  %v7162_v33 = vpop.f32.mrb[31].mxu0  ;;  %v7164_v17 = vpop.f32.mrb[27].mxu1 }
 0x1e9   : > { %v1861_v1 = vrot.slane %v1860_v5, 1  ;;  %v1867_v49 = vmax.f32 %v1865_v58, %v1866_v24  ;;  %v1885_v43 = vrot.slane %v1884_v38, 4  ;;  %v1891_v50 = vsel %vm1855_vm2, %v1841_v29, -inf }
 0x1ea   : > { %v1876_v27 = vmax.f32 %v1874_v44, %v1875_v52  ;;  %v1882_v0 = vrot.slane %v1881_v2, 1  ;;  %v1902_v59 = vmax.f32 %v1900_v18, %v1901_v31  ;;  %v1908_v10 = vrot.slane %v1907_v21, 2  ;;  %v7180_v44 = vld [vmem:[%s7575_s3 + $0x48] sm:$0xff]  ;;  %v7196_v31 = vld [vmem:[%s7575_s3 + $0x50] sm:$0xff] }
 0x1eb   : > { %v1862_v42 = vmax.f32 %v1860_v5, %v1861_v1  ;;  %v1868_v61 = vrot.slane %v1867_v49, 1  ;;  %v1886_v28 = vmax.f32 %v1884_v38, %v1885_v43  ;;  %v1892_v36 = vrot.slane %v1891_v50, 4  ;;  %v7172_v34 = vpop.f32.mrb[28].mxu1  ;;  %v7185_v5 = vld [vmem:[%s7575_s3 + $0x58] sm:$0xff] }
 0x1ec   : > { %v1883_v56 = vmax.f32 %v1881_v2, %v1882_v0  ;;  %v1976_v46 = vadd.f32 %v7169_v63, %v1876_v27  ;;  %v1903_v32 = vrot.slane %v1902_v59, 1  ;;  %v1909_v58 = vmax.f32 %v1907_v21, %v1908_v10  ;;  %v7175_v24 = vpop.f32.mrb[29].mxu1  ;;  %v7191_v2 = vld [vmem:[%s7575_s3 + $0x40] sm:$0xff] }
 0x1ed   : > { %v1869_v18 = vmax.f32 %v1867_v49, %v1868_v61  ;;  %v1974_v29 = vadd.f32 %v7169_v63, %v1862_v42  ;;  %v1887_v38 = vrot.slane %v1886_v28, 2  ;;  %v1893_v52 = vmax.f32 %v1891_v50, %v1892_v36 }
 0x1ee   : > { %v1977_v21 = vadd.f32 %v7169_v63, %v1883_v56  ;;  %v1992_v1 = vmax.f32 %v1976_v46, 0.0  ;;  %v1904_v43 = vmax.f32 %v1902_v59, %v1903_v32  ;;  %v1910_v27 = vrot.slane %v1909_v58, 1 }
 0x1ef   : > { %v1975_v49 = vadd.f32 %v7169_v63, %v1869_v18  ;;  %v1888_v0 = vmax.f32 %v1886_v28, %v1887_v38  ;;  %v1894_v10 = vrot.slane %v1893_v52, 2  ;;  %v7200_v36 = vpop.f32.mrb[30].mxu1  ;;  %v5502_v46 = vpack.c.bf16 %v7196_v31, %v7191_v2  ;;  %v4034_v2 = vld [vmem:[%s7577_s5 + $0x60] sm:$0xff]  ;;  %v4035_v31 = vld [vmem:[%s7577_s5 + $0x68] sm:$0xff] }
 0x1f0   : > { %v1993_v42 = vmax.f32 %v1977_v21, 0.0  ;;  %v1911_v61 = vmax.f32 %v1909_v58, %v1910_v27  ;;  %v1980_v9 = vadd.f32 %v7169_v63, %v1904_v43  ;;  %v7205_v19 = vpop.f32.mrb[31].mxu1  ;;  %v3517_v28 = vsel %vm1774_vm1, %v7132_v40, -inf }
 0x1f1   : > { %v1991_v32 = vmax.f32 %v1975_v49, 0.0  ;;  %v1889_v56 = vrot.slane %v1888_v0, 1  ;;  %v1895_v59 = vmax.f32 %v1893_v52, %v1894_v10  ;;  %v3891_v18 = vrot.slane %v1992_v1, 6 }
 0x1f2   : > { %v1990_v38 = vmax.f32 %v1974_v29, 0.0  ;;  %v7212_v41 = vadd.f32 %v7169_v63, %v1911_v61  ;;  %v7736_v58 = vmax.f32 %v6972_v6, %v6988_v13  ;;  %v5542_v49 = vadd.f32 %v7144_v53, %v6746_v47 }
 0x1f3   : > { %v3889_v43 = vrot.slane %v1991_v32, 7  ;;  %v1890_v27 = vmax.f32 %v1888_v0, %v1889_v56  ;;  %v1896_v50 = vrot.slane %v1895_v59, 1  ;;  %v7221_v52 = vpop.f32.mrb[32].mxu1  ;;  %v7223_v10 = vrot.slane %v1993_v42, 5 }
 0x1f4   : > { %v7217_v21 = vmax.f32 %v7736_v58, %v3517_v28  ;;  %v1996_v40 = vmax.f32 %v1980_v9, 0.0  ;;  %v3538_v29 = vsel %vm1774_vm1, %v7146_v16, -inf  ;;  %v5543_v1 = vadd.f32 %v7150_v62, %v6748_v48  ;;  %v7229_v6 = vpop.f32.mrb[33].mxu1 }
 0x1f5   : > { %v3890_v13 = vsel %vm3758_vm3, %v3889_v43, %v1990_v38  ;;  %v1897_v0 = vmax.f32 %v1895_v59, %v1896_v50  ;;  %v7233_v61 = vadd.f32 %v7169_v63, %v1890_v27  ;;  %v1815_v47 = vsel %vm1774_vm1, %v5542_v49, -inf }
 0x1f6   : > { %v7237_v53 = vsel %vm3761_vm4, %v3891_v18, %v3890_v13  ;;  %v1816_v9 = vmax.f32 %v7011_v45, %v1815_v47  ;;  %v7737_v16 = vmax.f32 %v7002_v51, %v7009_v20  ;;  %v1808_v48 = vsel %vm1774_vm1, %v5543_v1, -inf }
 0x1f7   : > { %v1997_v62 = vmax.f32 %v7212_v41, 0.0  ;;  %v7248_v50 = vadd.f32 %v7169_v63, %v1897_v0  ;;  %v1809_v32 = vmax.f32 %v7022_v23, %v1808_v48  ;;  %v3531_v56 = vsel %vm1774_vm1, %v7152_v15, -inf  ;;  %v7253_v59 = vpop.f32.mrb[34].mxu1  ;;  %v7743_v41 = vld [vmem:[#allocation21_spill] sm:$0xff] }
 0x1f8   : > { %v7243_v42 = vmax.f32 %v7737_v16, %v3538_v29  ;;  %v1844_v45 = vcombine.high %v1816_v9, %v1816_v9  ;;  %v1926_v28 = vsel %vm1855_vm2, %v1816_v9, -inf  ;;  %v7738_v51 = vmax.f32 %v7005_v14, %v7017_v12  ;;  %v7263_v38 = vpop.f32.mrb[35].mxu1 }
 0x1f9   : > { %v5544_v18 = vadd.f32 %v7157_v22, %v6758_v54  ;;  %v7265_v58 = vrot.slane %v1996_v40, 2  ;;  %v1994_v23 = vmax.f32 %v7233_v61, 0.0  ;;  %v1927_v15 = vrot.slane %v1926_v28, 4 }
 0x1fa   : > { %v7259_v20 = vmax.f32 %v7738_v51, %v3531_v56  ;;  %v1843_v43 = vcombine.high %v1809_v32, %v1809_v32  ;;  %v1933_v27 = vsel %vm1855_vm2, %v1844_v45, -inf  ;;  %v1912_v49 = vsel %vm1855_vm2, %v1809_v32, -inf }
 0x1fb   : > { %v1829_v29 = vsel %vm1774_vm1, %v5544_v18, -inf  ;;  %v3552_v14 = vsel %vm1774_vm1, %v7159_v37, -inf  ;;  %v1995_v12 = vmax.f32 %v7248_v50, 0.0  ;;  %v1928_v54 = vmax.f32 %v1926_v28, %v1927_v15 }
 0x1fc   : > { %v1934_v22 = vrot.slane %v1933_v27, 4  ;;  %v1913_v1 = vrot.slane %v1912_v49, 4  ;;  %v1919_v40 = vsel %vm1855_vm2, %v1843_v43, -inf  ;;  %v1830_v13 = vmax.f32 %v7048_v8, %v1829_v29 }
 0x1fd   : > { %v7739_v0 = vmax.f32 %v7035_v25, %v7043_v3  ;;  %v5545_v9 = vadd.f32 %v7162_v33, %v6760_v55  ;;  %v1929_v16 = vrot.slane %v1928_v54, 2  ;;  %v1920_v32 = vrot.slane %v1919_v40, 4 }
 0x1fe   : > { %v1935_v48 = vmax.f32 %v1933_v27, %v1934_v22  ;;  %v1914_v37 = vmax.f32 %v1912_v49, %v1913_v1  ;;  %v1846_v50 = vcombine.high %v1830_v13, %v1830_v13  ;;  %v1954_v56 = vsel %vm1855_vm2, %v1830_v13, -inf }
 0x1ff   : > { %v7279_v47 = vmax.f32 %v7739_v0, %v3552_v14  ;;  %v1822_v45 = vsel %vm1774_vm1, %v5545_v9, -inf  ;;  %v3545_v8 = vsel %vm1774_vm1, %v7164_v17, -inf  ;;  %v1930_v28 = vmax.f32 %v1928_v54, %v1929_v16 }
 0x200   : > { %v1936_v51 = vrot.slane %v1935_v48, 2  ;;  %v1915_v25 = vrot.slane %v1914_v37, 2  ;;  %v1921_v3 = vmax.f32 %v1919_v40, %v1920_v32  ;;  %v1955_v18 = vrot.slane %v1954_v56, 4 }
 0x201   : > { %v1961_v15 = vsel %vm1855_vm2, %v1846_v50, -inf  ;;  %v1823_v55 = vmax.f32 %v7069_v35, %v1822_v45  ;;  %v7740_v33 = vmax.f32 %v7039_v30, %v7054_v39  ;;  %v1931_v27 = vrot.slane %v1930_v28, 1 }
 0x202   : > { %v1937_v49 = vmax.f32 %v1935_v48, %v1936_v51  ;;  %v1916_v29 = vmax.f32 %v1914_v37, %v1915_v25  ;;  %v1922_v14 = vrot.slane %v1921_v3, 2  ;;  %v1956_v22 = vmax.f32 %v1954_v56, %v1955_v18 }
 0x203   : > { %v7292_v43 = vmax.f32 %v7740_v33, %v3545_v8  ;;  %v1962_v17 = vrot.slane %v1961_v15, 4  ;;  %v1845_v54 = vcombine.high %v1823_v55, %v1823_v55  ;;  %v1940_v1 = vsel %vm1855_vm2, %v1823_v55, -inf }
 0x204   : > { %v1932_v40 = vmax.f32 %v1930_v28, %v1931_v27  ;;  %v1938_v13 = vrot.slane %v1937_v49, 1  ;;  %v1917_v0 = vrot.slane %v1916_v29, 1  ;;  %v1923_v9 = vmax.f32 %v1921_v3, %v1922_v14 }
 0x205   : > { %v1957_v16 = vrot.slane %v1956_v22, 2  ;;  %v1963_v35 = vmax.f32 %v1961_v15, %v1962_v17  ;;  %v1941_v32 = vrot.slane %v1940_v1, 4  ;;  %v1947_v30 = vsel %vm1855_vm2, %v1845_v54, -inf }
 0x206   : > { %v1939_v39 = vmax.f32 %v1937_v49, %v1938_v13  ;;  %v1984_v50 = vadd.f32 %v7169_v63, %v1932_v40  ;;  %v1918_v48 = vmax.f32 %v1916_v29, %v1917_v0  ;;  %v1924_v37 = vrot.slane %v1923_v9, 1 }
 0x207   : > { %v1958_v45 = vmax.f32 %v1956_v22, %v1957_v16  ;;  %v1964_v56 = vrot.slane %v1963_v35, 2  ;;  %v1942_v8 = vmax.f32 %v1940_v1, %v1941_v32  ;;  %v1948_v51 = vrot.slane %v1947_v30, 4 }
 0x208   : > { %v1985_v25 = vadd.f32 %v7169_v63, %v1939_v39  ;;  %v2000_v28 = vmax.f32 %v1984_v50, 0.0  ;;  %v1925_v18 = vmax.f32 %v1923_v9, %v1924_v37  ;;  %v7299_v3 = vadd.f32 %v7169_v63, %v1918_v48 }
 0x209   : > { %v1959_v15 = vrot.slane %v1958_v45, 1  ;;  %v7301_v55 = vmax.f32 %v1963_v35, %v1964_v56  ;;  %v1943_v33 = vrot.slane %v1942_v8, 2  ;;  %v1949_v27 = vmax.f32 %v1947_v30, %v1948_v51 }
 0x20a   : > { %v7305_v49 = vrot.slane %v1994_v23, 4  ;;  %v7307_v29 = vrot.slane %v1995_v12, 3  ;;  %v2001_v14 = vmax.f32 %v1985_v25, 0.0  ;;  %v1983_v22 = vadd.f32 %v7169_v63, %v1925_v18 }
 0x20b   : > { %v7310_v17 = vrot.slane %v2000_v28, 6  ;;  %v1998_v54 = vmax.f32 %v7299_v3, 0.0  ;;  %v1944_v1 = vmax.f32 %v1942_v8, %v1943_v33  ;;  %v1950_v40 = vrot.slane %v1949_v27, 2 }
 0x20c   : > { %v1999_v13 = vmax.f32 %v1983_v22, 0.0  ;;  %v7313_v0 = vmax.f32 %v1958_v45, %v1959_v15  ;;  %v3512_v9 = vsel %vm1774_vm1, %v7172_v34, -inf  ;;  %v3505_v61 = vsel %vm1774_vm1, %v7175_v24, -inf }
 0x20d   : > { %v1966_v23 = vrot.slane %v7301_v55, 1  ;;  %v1945_v12 = vrot.slane %v1944_v1, 1  ;;  %v3513_v16 = vmax.f32 %v7114_v60, %v3512_v9  ;;  %v3506_v35 = vmax.f32 %v7122_v4, %v3505_v61 }
 0x20e   : > { %v7322_v32 = vrot.slane %v2001_v14, 5  ;;  %v7324_v30 = vrot.slane %v1999_v13, 7  ;;  %v7326_v39 = vmax.f32 %v1949_v27, %v1950_v40  ;;  %v3526_v50 = vsel %vm1774_vm1, %v7200_v36, -inf }
 0x20f   : > { %v1946_v34 = vmax.f32 %v1944_v1, %v1945_v12  ;;  %v3565_v48 = vcombine.high %v3513_v16, %v3513_v16  ;;  %v3594_v24 = vsel %vm1855_vm2, %v3513_v16, -inf  ;;  %v3519_v37 = vsel %vm1774_vm1, %v7205_v19, -inf }
 0x210   : > { %v3595_v45 = vrot.slane %v3594_v24, 4  ;;  %v3564_v60 = vcombine.high %v3506_v35, %v3506_v35  ;;  %v3580_v4 = vsel %vm1855_vm2, %v3506_v35, -inf  ;;  %v3527_v56 = vmax.f32 %v7141_v57, %v3526_v50 }
 0x211   : > { %v1986_v8 = vadd.f32 %v7169_v63, %v1946_v34  ;;  %v3601_v51 = vsel %vm1855_vm2, %v3565_v48, -inf  ;;  %v3581_v25 = vrot.slane %v3580_v4, 4  ;;  %v3540_v36 = vsel %vm1774_vm1, %v7221_v52, -inf }
 0x212   : > { %v3596_v28 = vmax.f32 %v3594_v24, %v3595_v45  ;;  %v3602_v18 = vrot.slane %v3601_v51, 4  ;;  %v3587_v15 = vsel %vm1855_vm2, %v3564_v60, -inf  ;;  %v3567_v33 = vcombine.high %v3527_v56, %v3527_v56 }
 0x213   : > { %v1952_v19 = vrot.slane %v7326_v39, 1  ;;  %v3582_v27 = vmax.f32 %v3580_v4, %v3581_v25  ;;  %v3588_v14 = vrot.slane %v3587_v15, 4  ;;  %v3622_v22 = vsel %vm1855_vm2, %v3527_v56, -inf }
 0x214   : > { %v3597_v57 = vrot.slane %v3596_v28, 2  ;;  %v3603_v1 = vmax.f32 %v3601_v51, %v3602_v18  ;;  %v3623_v40 = vrot.slane %v3622_v22, 4  ;;  %v3629_v13 = vsel %vm1855_vm2, %v3567_v33, -inf }
 0x215   : > { %v2002_v9 = vmax.f32 %v1986_v8, 0.0  ;;  %v3583_v61 = vrot.slane %v3582_v27, 2  ;;  %v3589_v12 = vmax.f32 %v3587_v15, %v3588_v14  ;;  %v3630_v52 = vrot.slane %v3629_v13, 4 }
 0x216   : > { %v3598_v16 = vmax.f32 %v3596_v28, %v3597_v57  ;;  %v3604_v35 = vrot.slane %v3603_v1, 2  ;;  %v3624_v50 = vmax.f32 %v3622_v22, %v3623_v40  ;;  %v3520_v34 = vmax.f32 %v7217_v21, %v3519_v37 }
 0x217   : > { %v3584_v48 = vmax.f32 %v3582_v27, %v3583_v61  ;;  %v3590_v24 = vrot.slane %v3589_v12, 2  ;;  %v3631_v45 = vmax.f32 %v3629_v13, %v3630_v52  ;;  %v3541_v60 = vmax.f32 %v7243_v42, %v3540_v36 }
 0x218   : > { %v3599_v4 = vrot.slane %v3598_v16, 1  ;;  %v3605_v56 = vmax.f32 %v3603_v1, %v3604_v35  ;;  %v3625_v51 = vrot.slane %v3624_v50, 2  ;;  %v3566_v25 = vcombine.high %v3520_v34, %v3520_v34 }
 0x219   : > { %v3585_v18 = vrot.slane %v3584_v48, 1  ;;  %v3591_v33 = vmax.f32 %v3589_v12, %v3590_v24  ;;  %v3632_v8 = vrot.slane %v3631_v45, 2  ;;  %v3608_v15 = vsel %vm1855_vm2, %v3520_v34, -inf }
 0x21a   : > { %v3600_v14 = vmax.f32 %v3598_v16, %v3599_v4  ;;  %v3606_v28 = vrot.slane %v3605_v56, 1  ;;  %v3626_v57 = vmax.f32 %v3624_v50, %v3625_v51  ;;  %v3609_v22 = vrot.slane %v3608_v15, 4 }
 0x21b   : > { %v3586_v40 = vmax.f32 %v3584_v48, %v3585_v18  ;;  %v3592_v21 = vrot.slane %v3591_v33, 1  ;;  %v3633_v37 = vmax.f32 %v3631_v45, %v3632_v8  ;;  %v3615_v27 = vsel %vm1855_vm2, %v3566_v25, -inf }
 0x21c   : > { %v3607_v13 = vmax.f32 %v3605_v56, %v3606_v28  ;;  %v3694_v42 = vadd.f32 %v7169_v63, %v3600_v14  ;;  %v3627_v36 = vrot.slane %v3626_v57, 1  ;;  %v3610_v1 = vmax.f32 %v3608_v15, %v3609_v22 }
 0x21d   : > { %v3593_v61 = vmax.f32 %v3591_v33, %v3592_v21  ;;  %v3692_v12 = vadd.f32 %v7169_v63, %v3586_v40  ;;  %v3634_v52 = vrot.slane %v3633_v37, 1  ;;  %v3616_v35 = vrot.slane %v3615_v27, 4 }
 0x21e   : > { %v3695_v16 = vadd.f32 %v7169_v63, %v3607_v13  ;;  %v3710_v34 = vmax.f32 %v3694_v42, 0.0  ;;  %v3628_v50 = vmax.f32 %v3626_v57, %v3627_v36  ;;  %v3611_v24 = vrot.slane %v3610_v1, 2 }
 0x21f   : > { %v7351_v48 = vmax.f32 %v7326_v39, %v1952_v19  ;;  %v3693_v45 = vadd.f32 %v7169_v63, %v3593_v61  ;;  %v3635_v4 = vmax.f32 %v3633_v37, %v3634_v52  ;;  %v3617_v56 = vmax.f32 %v3615_v27, %v3616_v35 }
 0x220   : > { %v7354_v51 = vrot.slane %v2002_v9, 4  ;;  %v3711_v25 = vmax.f32 %v3695_v16, 0.0  ;;  %v3698_v18 = vadd.f32 %v7169_v63, %v3628_v50  ;;  %v3612_v33 = vmax.f32 %v3610_v1, %v3611_v24 }
 0x221   : > { %v3708_v8 = vmax.f32 %v3692_v12, 0.0  ;;  %v3709_v15 = vmax.f32 %v3693_v45, 0.0  ;;  %v3618_v14 = vrot.slane %v3617_v56, 2  ;;  %v3569_v28 = vcombine.high %v3541_v60, %v3541_v60 }
 0x222   : > { %v3760_v22 = vrot.slane %v3710_v34, 6  ;;  %v7358_v57 = vadd.f32 %v7169_v63, %v3635_v4  ;;  %v3613_v39 = vrot.slane %v3612_v33, 1  ;;  %v3650_v19 = vsel %vm1855_vm2, %v3541_v60, -inf }
 0x223   : > { %v7361_v40 = vrot.slane %v3711_v25, 5  ;;  %v3757_v21 = vrot.slane %v3709_v15, 7  ;;  %v3619_v9 = vmax.f32 %v3617_v56, %v3618_v14  ;;  %v3651_v37 = vrot.slane %v3650_v19, 4 }
 0x224   : > { %v3714_v27 = vmax.f32 %v3698_v18, 0.0  ;;  %v3614_v13 = vmax.f32 %v3612_v33, %v3613_v39  ;;  %v3657_v42 = vsel %vm1855_vm2, %v3569_v28, -inf  ;;  %v3533_v36 = vsel %vm1774_vm1, %v7229_v6, -inf }
 0x225   : > { %v3759_v1 = vsel %vm3758_vm3, %v3757_v21, %v3708_v8  ;;  %v3620_v61 = vrot.slane %v3619_v9, 1  ;;  %v3652_v12 = vmax.f32 %v3650_v19, %v3651_v37  ;;  %v3658_v52 = vrot.slane %v3657_v42, 4 }
 0x226   : > { %v7368_v35 = vsel %vm3761_vm4, %v3760_v22, %v3759_v1  ;;  %v3696_v60 = vadd.f32 %v7169_v63, %v3614_v13  ;;  %v3534_v16 = vmax.f32 %v7259_v20, %v3533_v36  ;;  %v3554_v34 = vsel %vm1774_vm1, %v7253_v59, -inf }
 0x227   : > { %v3621_v50 = vmax.f32 %v3619_v9, %v3620_v61  ;;  %v3653_v24 = vrot.slane %v3652_v12, 2  ;;  %v3659_v45 = vmax.f32 %v3657_v42, %v3658_v52  ;;  %v3555_v6 = vmax.f32 %v7279_v47, %v3554_v34 }
 0x228   : > { %v3715_v4 = vmax.f32 %v7358_v57, 0.0  ;;  %v3568_v56 = vcombine.high %v3534_v16, %v3534_v16  ;;  %v3636_v25 = vsel %vm1855_vm2, %v3534_v16, -inf  ;;  %v3547_v18 = vsel %vm1774_vm1, %v7263_v38, -inf }
 0x229   : > { %v3697_v33 = vadd.f32 %v7169_v63, %v3621_v50  ;;  %v3654_v8 = vmax.f32 %v3652_v12, %v3653_v24  ;;  %v3660_v20 = vrot.slane %v3659_v45, 2  ;;  %v3637_v15 = vrot.slane %v3636_v25, 4 }
 0x22a   : > { %v7380_v14 = vrot.slane %v3714_v27, 2  ;;  %v3643_v59 = vsel %vm1855_vm2, %v3568_v56, -inf  ;;  %v3571_v28 = vcombine.high %v3555_v6, %v3555_v6  ;;  %v3678_v47 = vsel %vm1855_vm2, %v3555_v6, -inf }
 0x22b   : > { %v3712_v22 = vmax.f32 %v3696_v60, 0.0  ;;  %v3655_v39 = vrot.slane %v3654_v8, 1  ;;  %v3661_v19 = vmax.f32 %v3659_v45, %v3660_v20  ;;  %v3638_v21 = vmax.f32 %v3636_v25, %v3637_v15 }
 0x22c   : > { %v3644_v9 = vrot.slane %v3643_v59, 4  ;;  %v3679_v37 = vrot.slane %v3678_v47, 4  ;;  %v3685_v38 = vsel %vm1855_vm2, %v3571_v28, -inf  ;;  %v3548_v13 = vmax.f32 %v7292_v43, %v3547_v18 }
 0x22d   : > { %v3713_v42 = vmax.f32 %v3697_v33, 0.0  ;;  %v3656_v36 = vmax.f32 %v3654_v8, %v3655_v39  ;;  %v3662_v27 = vrot.slane %v3661_v19, 1  ;;  %v3639_v1 = vrot.slane %v3638_v21, 2 }
 0x22e   : > { %v3645_v61 = vmax.f32 %v3643_v59, %v3644_v9  ;;  %v3680_v12 = vmax.f32 %v3678_v47, %v3679_v37  ;;  %v3686_v52 = vrot.slane %v3685_v38, 4  ;;  %v3570_v16 = vcombine.high %v3548_v13, %v3548_v13 }
 0x22f   : > { %v3663_v60 = vmax.f32 %v3661_v19, %v3662_v27  ;;  %v3702_v34 = vadd.f32 %v7169_v63, %v3656_v36  ;;  %v3640_v50 = vmax.f32 %v3638_v21, %v3639_v1  ;;  %v3664_v24 = vsel %vm1855_vm2, %v3548_v13, -inf }
 0x230   : > { %v3646_v45 = vrot.slane %v3645_v61, 2  ;;  %v3681_v6 = vrot.slane %v3680_v12, 2  ;;  %v3687_v56 = vmax.f32 %v3685_v38, %v3686_v52  ;;  %v3665_v43 = vrot.slane %v3664_v24, 4 }
 0x231   : > { %v3703_v25 = vadd.f32 %v7169_v63, %v3663_v60  ;;  %v3718_v18 = vmax.f32 %v3702_v34, 0.0  ;;  %v3641_v33 = vrot.slane %v3640_v50, 1  ;;  %v3671_v8 = vsel %vm1855_vm2, %v3570_v16, -inf }
 0x232   : > { %v3647_v20 = vmax.f32 %v3645_v61, %v3646_v45  ;;  %v3682_v15 = vmax.f32 %v3680_v12, %v3681_v6  ;;  %v3688_v59 = vrot.slane %v3687_v56, 2  ;;  %v3666_v28 = vmax.f32 %v3664_v24, %v3665_v43 }
 0x233   : > { %v3766_v47 = vrot.slane %v3712_v22, 4  ;;  %v3719_v39 = vmax.f32 %v3703_v25, 0.0  ;;  %v3642_v19 = vmax.f32 %v3640_v50, %v3641_v33  ;;  %v3672_v21 = vrot.slane %v3671_v8, 4 }
 0x234   : > { %v3648_v9 = vrot.slane %v3647_v20, 1  ;;  %v3683_v37 = vrot.slane %v3682_v15, 1  ;;  %v3689_v38 = vmax.f32 %v3687_v56, %v3688_v59  ;;  %v3667_v13 = vrot.slane %v3666_v28, 2 }
 0x235   : > { %v3769_v36 = vrot.slane %v3713_v42, 3  ;;  %v3780_v27 = vrot.slane %v3718_v18, 6  ;;  %v3673_v1 = vmax.f32 %v3671_v8, %v3672_v21  ;;  %v3765_v52 = vsel %vm3764_vm5, %v7361_v40, %v7368_v35 }
 0x236   : > { %v3649_v61 = vmax.f32 %v3647_v20, %v3648_v9  ;;  %v3684_v12 = vmax.f32 %v3682_v15, %v3683_v37  ;;  %v3690_v16 = vrot.slane %v3689_v38, 1  ;;  %v3668_v60 = vmax.f32 %v3666_v28, %v3667_v13 }
 0x237   : > { %v3782_v34 = vrot.slane %v3719_v39, 5  ;;  %v3700_v22 = vadd.f32 %v7169_v63, %v3642_v19  ;;  %v3674_v50 = vrot.slane %v3673_v1, 2  ;;  %v3768_v24 = vsel %vm3767_vm6, %v3766_v47, %v3765_v52 }
 0x238   : > { %v3701_v45 = vadd.f32 %v7169_v63, %v3649_v61  ;;  %v3691_v6 = vmax.f32 %v3689_v38, %v3690_v16  ;;  %v3669_v42 = vrot.slane %v3668_v60, 1  ;;  %v3775_v56 = vrot.slane %v3715_v4, 1  ;;  %v7745_v61 = vld [vmem:[#allocation23_spill] sm:$0xff] }
 0x239   : > { %v3706_v43 = vadd.f32 %v7169_v63, %v3684_v12  ;;  %v3675_v40 = vmax.f32 %v3673_v1, %v3674_v50  ;;  %v3771_v35 = vsel %vm3770_vm7, %v3769_v36, %v3768_v24  ;;  %v3894_v25 = vsel %vm3764_vm5, %v7223_v10, %v7237_v53  ;;  %v7746_v12 = vld [vmem:[#allocation17_spill] sm:$0xff] }
 0x23a   : > { %v3717_v18 = vmax.f32 %v3701_v45, 0.0  ;;  %v3670_v33 = vmax.f32 %v3668_v60, %v3669_v42  ;;  %v3774_v8 = vsel %vm3773_vm8, %v7380_v14, %v3771_v35  ;;  %v3707_v20 = vadd.f32 %v7169_v63, %v3691_v6 }
 0x23b   : > { %v3716_v15 = vmax.f32 %v3700_v22, 0.0  ;;  %v3676_v59 = vrot.slane %v3675_v40, 1  ;;  %v3777_v57 = vsel %vm3776_vm9, %v3775_v56, %v3774_v8  ;;  %v3896_v4 = vsel %vm3767_vm6, %v7305_v49, %v3894_v25  ;;  %v4036_v8 = vld [vmem:[%s7577_s5 + $0x70] sm:$0xff] }
 0x23c   : > { %v3778_v28 = vrot.slane %v3717_v18, 7  ;;  %v3704_v47 = vadd.f32 %v7169_v63, %v3670_v33  ;;  %4668 = vmatmul.mubr.msk.f32.vlgmr.msra.gmra.mrb[32].mxu0 %vm1774_vm1, %v3777_v57  ;;  %v3898_v10 = vsel %vm3770_vm7, %v7307_v29, %v3896_v4  ;;  %v3901_v53 = vrot.slane %v1997_v62, 1  ;;  %v4039_v57 = vld [vmem:[%s7577_s5 + $0x88] sm:$0xff] }
 0x23d   : > { %v3677_v14 = vmax.f32 %v3675_v40, %v3676_v59  ;;  %v7741_v39 = vpack.c.bf16 %v7064_v7, %v7059_v26  ;;  %v7742_v19 = vmov 0.0   ;;  %v3722_v21 = vmax.f32 %v3706_v43, 0.0  ;;  %v4038_v59 = vld [vmem:[%s7577_s5 + $0x80] sm:$0xff] }
 0x23e   : > { %3866 = vmatprep.mubr.f32.mxu0 %v7742_v19  ;;  %v3900_v49 = vsel %vm3773_vm8, %v7265_v58, %v3898_v10  ;;  %v1967_v9 = vmax.f32 %v7301_v55, %v1966_v23  ;;  %v3779_v29 = vsel %vm3758_vm3, %v3778_v28, %v3716_v15  ;;  %v3720_v37 = vmax.f32 %v3704_v47, 0.0  ;;  %v2019_v58 = vld [vmem:[%s7575_s3 + $0x68] sm:$0xff]  ;;  %v2021_v55 = vld [vmem:[%s7575_s3 + $0x78] sm:$0xff]  ;;  %v4040_v28 = vld [vmem:[%s7577_s5 + $0x90] sm:$0xff] }
 0x23f   : > { %5495 = vmatpush1.bf16.msra.mxu0 %v7741_v39  ;;  %v7744_v62 = vpack.c.bf16 %v7081_v11, %v7743_v41  ;;  %v3723_v38 = vmax.f32 %v3707_v20, 0.0  ;;  %v3902_v26 = vsel %vm3776_vm9, %v3901_v53, %v3900_v49  ;;  %v3705_v7 = vadd.f32 %v7169_v63, %v3677_v14  ;;  %v4037_v20 = vld [vmem:[%s7577_s5 + $0x78] sm:$0xff]  ;;  %v3999_v39 = vld [vmem:[%s7576_s4 + $0x8] sm:$0xff] }
 0x240   : > { %v3781_v13 = vsel %vm3761_vm4, %v3780_v27, %v3779_v29  ;;  %v1987_v23 = vadd.f32 %v7169_v63, %v7351_v48  ;;  %v1988_v11 = vadd.f32 %v7169_v63, %v7313_v0  ;;  %v3784_v36 = vrot.slane %v3720_v37, 4  ;;  %v2018_v48 = vld [vmem:[%s7575_s3 + $0x60] sm:$0xff]  ;;  %v2020_v0 = vld [vmem:[%s7575_s3 + $0x70] sm:$0xff]  ;;  %v4041_v47 = vld [vmem:[%s7577_s5 + $0x98] sm:$0xff] }
 0x241   : > { %5497 = vmatprep.subr.bf16.mxu0 %v7744_v62  ;;  %v3783_v1 = vsel %vm3764_vm5, %v3782_v34, %v3781_v13  ;;  %v1989_v52 = vadd.f32 %v7169_v63, %v1967_v9  ;;  %v3904_v27 = vsel %vm3758_vm3, %v7324_v30, %v1998_v54  ;;  %v7747_v16 = vpack.c.bf16 %v7745_v61, %v7746_v12  ;;  %v4001_v49 = vld [vmem:[%s7576_s4 + $0x18] sm:$0xff] }
 0x242   : > { %v3721_v60 = vmax.f32 %v3705_v7, 0.0  ;;  %v2003_v34 = vmax.f32 %v1987_v23, 0.0  ;;  %v2004_v63 = vmax.f32 %v1988_v11, 0.0  ;;  %v3906_v3 = vsel %vm3761_vm4, %v7310_v17, %v3904_v27 }
 0x243   : > { %5499 = vmatpush1.bf16.msra.mxu0 %v7747_v16  ;;  %v7748_v54 = vpack.c.bf16 %v7185_v5, %v7180_v44  ;;  %v3785_v30 = vsel %vm3767_vm6, %v3784_v36, %v3783_v1  ;;  %v5504_v22 = vpack.c.bf16 %v2021_v55, %v2019_v58  ;;  %v2005_v50 = vmax.f32 %v1989_v52, 0.0 }
 0x244   : > { %v3908_v24 = vsel %vm3764_vm5, %v7322_v32, %v3906_v3  ;;  %v3786_v45 = vrot.slane %v3721_v60, 3  ;;  %v3911_v42 = vrot.slane %v2003_v34, 3  ;;  %v3788_v56 = vrot.slane %v3722_v21, 2  ;;  %v4000_v21 = vld [vmem:[%s7576_s4 + $0x10] sm:$0xff] }
 0x245   : > { %5501 = vmatprep.subr.bf16.mxu0 %v7748_v54  ;;  %v3910_v6 = vsel %vm3767_vm6, %v7354_v51, %v3908_v24  ;;  %v5506_v43 = vpack.c.bf16 %v2020_v0, %v2018_v48  ;;  %v3913_v40 = vrot.slane %v2004_v63, 2  ;;  %v3790_v35 = vrot.slane %v3723_v38, 1  ;;  %v4042_v0 = vld [vmem:[%s7578_s6] sm:$0x1] }
 0x246   : > { %v3787_v17 = vsel %vm3770_vm7, %v3786_v45, %v3785_v30  ;;  %v3912_v44 = vsel %vm3770_vm7, %v3911_v42, %v3910_v6  ;;  %v3915_v5 = vrot.slane %v2005_v50, 1  ;;  %v7749_v33 = vmov 0.0|0.0  }
 0x247   : > { %5503 = vmatpush1.bf16.msra.mxu0 %v5502_v46  ;;  %v3789_v32 = vsel %vm3773_vm8, %v3788_v56, %v3787_v17  ;;  %v3914_v25 = vsel %vm3773_vm8, %v3913_v40, %v3912_v44  ;;  %v5527_v46 = vpack.c.bf16 %v4035_v31, %v4034_v2  ;;  %v5530_v15 = vpack.c.bf16 %v4037_v20, %v4036_v8 }
 0x248   : > { %5505 = vmatprep.subr.bf16.mxu0 %v5504_v22  ;;  %v3791_v51 = vsel %vm3776_vm9, %v3790_v35, %v3789_v32  ;;  %v3916_v18 = vsel %vm3776_vm9, %v3915_v5, %v3914_v25  ;;  %v5533_v4 = vpack.c.bf16 %v4039_v57, %v4038_v59  ;;  %v5536_v10 = vpack.c.bf16 %v4041_v47, %v4040_v28 }
 0x249   : > { %4669 = vmatmul.mubr.msk.f32.gmra.mrb[34].mxu0 %vm1774_vm1, %v3791_v51  ;;  %5528 = vmatpush1.bf16.msra.mxu1 %v5527_v46 }
 0x24a   : > { %3985 = vmatprep.mubr.f32.mxu0 %v7742_v19  ;;  %5529 = vmatprep.subr.bf16.mxu1 %v7749_v33 }
 0x24b   : > { %5507 = vmatpush1.bf16.msra.mxu0 %v5506_v43 }
 0x24d   : > { %5531 = vmatpush1.bf16.msra.mxu1 %v5530_v15 }
 0x24e   : > { %4670 = vmatmul.mubr.msk.f32.vlgmr.msra.gmra.mrb[32].mxu0 %vm1774_vm1, %v3902_v26  ;;  %5532 = vmatprep.subr.bf16.mxu1 %v7749_v33 }
 0x24f   : > { %3991 = vmatprep.mubr.f32.mxu0 %v7742_v19  ;;  %v3998_v19 = vld [vmem:[%s7576_s4] sm:$0xff] }
 0x251   : > { %5534 = vmatpush1.bf16.msra.mxu1 %v5533_v4 }
 0x252   : > { %4671 = vmatmul.mubr.msk.f32.gmra.mrb[34].mxu0 %vm1774_vm1, %v3916_v18  ;;  %5535 = vmatprep.subr.bf16.mxu1 %v7749_v33 }
 0x255   : > { %5537 = vmatpush1.bf16.msra.mxu1 %v5536_v10 }
 0x321   : > { %v3987_v53 = vpop.f32.mrb[32].mxu0 }
 0x322   : > { %v3989_v14 = vpop.f32.mrb[33].mxu0  ;;  %v4002_v37 = vmul.f32 %v3998_v19, %v3987_v53 }
 0x323   : > { %v4003_v9 = vmul.f32 %v3999_v39, %v3989_v14 }
 0x325   : > { %v3993_v29 = vpop.f32.mrb[34].mxu0  ;;  %v4013_v7 = vsel %vm360_vm0, %v4003_v9, 0.0 }
 0x326   : > { %v4004_v41 = vmul.f32 %v4000_v21, %v3993_v29  ;;  %v3995_v62 = vpop.f32.mrb[35].mxu0 }
 0x327   : > { %v4005_v38 = vmul.f32 %v4001_v49, %v3995_v62 }
 0x328   : > { %v4006_v26 = vadd.f32 %v4004_v41, %v4002_v37 }
 0x329   : > { %v4014_v13 = vsel %vm360_vm0, %v4005_v38, 0.0 }
 0x32a   : > { %v4007_v58 = vrot.slane %v4006_v26, 4  ;;  %v4015_v55 = vadd.f32 %v4014_v13, %v4013_v7 }
 0x32c   : > { %v4008_v23 = vadd.f32 %v4007_v58, %v4006_v26  ;;  %v4016_v11 = vrot.slane %v4015_v55, 4 }
 0x32e   : > { %v4009_v36 = vrot.slane %v4008_v23, 2  ;;  %v4017_v1 = vadd.f32 %v4016_v11, %v4015_v55 }
 0x330   : > { %v4010_v52 = vadd.f32 %v4009_v36, %v4008_v23  ;;  %v4018_v27 = vrot.slane %v4017_v1, 2 }
 0x332   : > { %v4019_v61 = vadd.f32 %v4018_v27, %v4017_v1  ;;  %v4011_v12 = vrot.slane %v4010_v52, 1 }
 0x334   : > { %v4020_v16 = vrot.slane %v4019_v61, 1  ;;  %v4012_v48 = vadd.f32 %v4011_v12, %v4010_v52 }
 0x336   : > { %v4021_v60 = vadd.f32 %v4020_v16, %v4019_v61 }
 0x338   : > { %4672 = vmatprep.mubr.msk.f32.mxu1 %vm360_vm0, %v4021_v60 }
 0x339   : > { %4111 = vmatmul.mubr.f32.vlgmr.msra.gmra.mrb[36].mxu1 %v4012_v48 }
 0x40c   : > { %v4112_v34 = vpop.f32.mrb[36].mxu1 }
 0x40d   : > { %v4113_v63 = vadd.f32 %v4112_v34, %v4042_v0  ;;  %v4114_v3 = vpop.f32.mrb[37].mxu1 }
 0x40f   : > { %4117 = vst.msk [vmem:[%s270_s16] sm:$0x1] %vm4116_vm10, %v4113_v63 }
 0x410   : > { %5793 = shalt.err (!%p5790_p3)
}
 0x411   : > { %s5794_s29 = scalar_lea.hbm %s7530_s19, 16  ;;  %s5798_s13 = scalar_lea.hbm %s7579_s7, 32 }
 0x412   : > { %p5795_p4 = scmp.ne.s32.totalorder %s7530_s19, %s5794_s29  ;;  %p5799_p9 = scmp.lt.u32.totalorder %s7530_s19, %s7579_s7 }
 0x413   : > { %p5800_p10 = scmp.lt.u32.totalorder %s5798_s13, %s5794_s29  ;;  %p5802_p12 = scmp.lt.u32.totalorder %s5794_s29, %s7530_s19 }
 0x414   : > { %p5796_p7 = pnand %p5795_p4, %p5925_p5 }
 0x415   : > { %p5801_p11 = por %p5800_p10, %p5799_p9 }
 0x416   : > { %p5797_p8 = pneg %p5796_p7 }
 0x417   : > { %p5803_p13 = por %p5802_p12, %p5801_p11 }
 0x419   : > { %p5804_p0 = pnand %p5803_p13, %p5797_p8 }
 0x41b   : > { %5807 = shalt.err (!%p5804_p0)
}
 0x41c   : > { %5739 = dma.vmem_to_hbm [thread:$0]  (%p5925_p5), %s7532_s17, 16, %s7530_s19, %s4119_s20  }
 0x41d PF: > { %p5745_p1 = scmp.ge.s32.totalorder %s5842_s27, 2  ;;  %s4143_s15 = sand.u32 1, %s5830_s24  }
 0x41e   : > { %s4144_s18 = scalar_lea.sflag [#allocation3], %s4143_s15 }
 0x41f   : > { %p5742_p2 = pnand %p5745_p1, %p5929_p6 }
 0x421   : > { %5825 = dma.done.wait (!%p5742_p2), %s4144_s18, 16  }
 0x422   : > { %5827 = vsyncadd (!%p5742_p2), %s4144_s18, 4294967280  ;;  %p17_p3 = scmp.ge.s32.totalorder %s5912_s30, 4   ;;  %s7750_s24 = smov %s5834_s25 }
 0x423   : > { %s7751_s25 = smov %s5838_s26  ;;  %s7752_s26 = smov %s5923_s10 }
 0x424   : > { %s7753_s27 = smov %s5912_s30  ;;  %19 = sbr.rel (!%p17_p3) target bundleno = 3 (0x3), region = 90 }
 0x42b   :  { %4148 = vsyncpa [#allocation3], 1 }
 0x42c   :  { %4150 = vsyncpa [#allocation3 + $0x1], 1 }

</bundles_post_ra>
